<compile_context>
chip_gen: v7x
topology: tpu7x:2x2x1
jax: 0.10.0
libtpu: 0.0.40
codegen_flags: <defaults>
</compile_context>

<pallas_src>
import math

import jax
import jax.numpy as jnp
import numpy as np
from jax import lax
from jax.experimental import pallas as pl
from jax.experimental.pallas import tpu as pltpu


# Feed the MXU bf16 operands (one MXU pass) while keeping all elementwise and
# softmax math in f32 on the VPU.  Per the perf review this removes the 3-6x
# pass blow-up of Precision.HIGHEST on v6e/v7x and is harmless on v5e (only
# the MXU ever sees bf16).  Set False to restore exact f32 matmuls (and
# tighten the tolerance in __main__ back towards 1e-4).
USE_BF16_MXU = True


def _mxu_dot(a, b):
    if USE_BF16_MXU:
        return jnp.dot(a.astype(jnp.bfloat16), b.astype(jnp.bfloat16),
                       preferred_element_type=jnp.float32)
    return jnp.dot(a, b, preferred_element_type=jnp.float32,
                   precision=jax.lax.Precision.HIGHEST)


# ----------------------------------------------------------------------------
# Pallas kernel: one T-block of the full forward pass.
# ----------------------------------------------------------------------------
def attention_kernel(x_ref, tt_ref, l1_ref, w2d_ref, b2_ref, tp_ref,
                     wproj_ref, bproj_ref, h_ref, attn_ref):
    Tb, N = x_ref.shape            # time-block rows, number of variables
    E = l1_ref.shape[1]            # embed_dim
    P = h_ref.shape[1]             # proj_dim

    # Packed first-layer parameters (static sublane slices).
    w1k, b1k = l1_ref[0:1, :], l1_ref[1:2, :]          # [1, E]
    w1v, b1v = l1_ref[2:3, :], l1_ref[3:4, :]          # [1, E]

    # ---- time embedding (shared across all N variables) --------------------
    tt = tt_ref[...]                                   # [Tb, 1]
    # Column 0 carries the linear branch (wlin/blin), columns 1..E-1 the
    # periodic branch (wper/bper); sin() is applied to the periodic columns
    # only, selected with a lane iota (keeps the Wproj matmul K=32 aligned).
    t_pre = tt * tp_ref[0:1, :] + tp_ref[1:2, :]       # [Tb, E]
    lane = lax.broadcasted_iota(jnp.int32, (Tb, E), 1)
    tcat = jnp.where(lane == 0, t_pre, jnp.sin(t_pre))
    temb = jnp.maximum(_mxu_dot(tcat, wproj_ref[...]) + bproj_ref[...], 0.0)   # [Tb, P]

    # ---- fused key/value MLP ------------------------------------------------
    # Layer 1 has fan_in == 1 -> exact f32 broadcast multiply on the VPU.
    # Broadcasts hoisted once (JAX does not CSE broadcast_in_dim).
    w1k_b = jnp.broadcast_to(w1k, (Tb, E)); b1k_b = jnp.broadcast_to(b1k, (Tb, E))
    w1v_b = jnp.broadcast_to(w1v, (Tb, E)); b1v_b = jnp.broadcast_to(b1v, (Tb, E))
    rows = []
    for n in range(N):                                 # N is small & static
        xn = x_ref[:, n:n + 1]                         # [Tb, 1] lane slice
        h1k = jnp.maximum(xn * w1k_b + b1k_b, 0.0)     # [Tb, E]
        h1v = jnp.maximum(xn * w1v_b + b1v_b, 0.0)     # [Tb, E]
        rows.append(jnp.concatenate([h1k, h1v], axis=-1))      # [Tb, 2E]
    lhs = jnp.concatenate(rows, axis=0)                # [N*Tb, 2E], n-major rows
    # Single MXU matmul against block_diag(W2k, W2v): cols 0:P = keys, P:2P = values.
    kv = jnp.maximum(_mxu_dot(lhs, w2d_ref[...]) + b2_ref[...], 0.0)   # [N*Tb, 2P]

    # ---- attention scores + softmax over the N (variable) axis --------------
    scale = 1.0 / math.sqrt(P)
    score_cols = [
        jnp.sum(kv[n * Tb:(n + 1) * Tb, :P] * temb, axis=-1, keepdims=True) * scale
        for n in range(N)
    ]                                                  # N x [Tb, 1]
    scores = jnp.concatenate(score_cols, axis=-1)      # [Tb, N]
    m = jnp.max(scores, axis=-1, keepdims=True)
    ex = jnp.exp(scores - m)
    denom = jnp.sum(ex, axis=-1, keepdims=True)
    attn_tn = ex * pl.reciprocal(denom, approx=True)   # [Tb, N]  (EUP vrcp)

    # ---- outputs -------------------------------------------------------------
    # h = sum_n attn[:, n] * v_n  (v_n = static slice of the fused kv tensor).
    h = attn_tn[:, 0:1] * kv[0:Tb, P:]
    for n in range(1, N):
        h = h + attn_tn[:, n:n + 1] * kv[n * Tb:(n + 1) * Tb, P:]
    h_ref[...] = h                                     # [Tb, P] lane-dense store
    # Lane-dense attention store: one small XLU transpose [Tb, N] -> [N, Tb].
    attn_ref[...] = jnp.transpose(attn_tn)


# ----------------------------------------------------------------------------
# Wrapper: parameter packing + pallas_call with a T-grid.
# ----------------------------------------------------------------------------
def attention_with_time_embedding_pallas(x, tt, params, embed_dim, proj_dim,
                                          block_t=None, target_blocks=2):
    T, N = x.shape
    E, P = embed_dim, proj_dim
    f32 = jnp.float32

    # block_t: default to a grid of `target_blocks` steps (2 -> shards across
    # both TensorCores on v7x / megacore parts; on 1-TC v5e/v6e the extra step
    # is ~0.35us).  Must divide T and be a multiple of 8 unless it equals T.
    if block_t is None:
        bt = T // target_blocks if (target_blocks > 0 and T % target_blocks == 0) else T
        block_t = bt if (bt >= 8 and bt % 8 == 0 and bt <= 1024) else T
    if T % block_t != 0 or (block_t % 8 != 0 and block_t != T):
        block_t = T
    grid = (T // block_t,)

    x = x.astype(f32)                                  # native [T, N] layout
    tt_t = tt.astype(f32).reshape(T, 1)

    def row(a, width):
        return jnp.asarray(a, f32).reshape(1, width)

    # Consolidated parameter packs (8 kernel inputs).
    l1 = jnp.concatenate([row(params['w1k'], E), row(params['b1k'], E),
                          row(params['w1v'], E), row(params['b1v'], E)], axis=0)   # [4, E]
    w2d = jnp.zeros((2 * E, 2 * P), f32)
    w2d = w2d.at[:E, :P].set(params['w2k'].astype(f32))
    w2d = w2d.at[E:, P:].set(params['w2v'].astype(f32))                             # block_diag
    b2 = jnp.concatenate([row(params['b2k'], P), row(params['b2v'], P)], axis=1)    # [1, 2P]
    tp = jnp.concatenate(
        [jnp.concatenate([row(params['wlin'], 1), row(params['wper'], E - 1)], axis=1),
         jnp.concatenate([row(params['blin'], 1), row(params['bper'], E - 1)], axis=1)],
        axis=0)                                                                      # [2, E]
    wproj = params['wproj'].astype(f32)                                              # [E, P]
    bproj = row(params['bproj'], P)                                                  # [1, P]

    const2 = lambda i: (0, 0)
    h, attn_nt = pl.pallas_call(
        attention_kernel,
        grid=grid,
        in_specs=[
            pl.BlockSpec((block_t, N), lambda i: (i, 0)),     # x (native [T, N])
            pl.BlockSpec((block_t, 1), lambda i: (i, 0)),     # tt
            pl.BlockSpec((4, E), const2),                     # w1k/b1k/w1v/b1v
            pl.BlockSpec((2 * E, 2 * P), const2),             # block_diag(w2k, w2v)
            pl.BlockSpec((1, 2 * P), const2),                 # [b2k | b2v]
            pl.BlockSpec((2, E), const2),                     # [wlin|wper ; blin|bper]
            pl.BlockSpec((E, P), const2),                     # wproj
            pl.BlockSpec((1, P), const2),                     # bproj
        ],
        out_specs=(
            pl.BlockSpec((block_t, P), lambda i: (i, 0)),     # h: lane-dense [T, P]
            pl.BlockSpec((N, block_t), lambda i: (0, i)),     # attn: lane-dense [N, T]
        ),
        out_shape=(
            jax.ShapeDtypeStruct((T, P), f32),
            jax.ShapeDtypeStruct((N, T), f32),
        ),
        compiler_params=pltpu.CompilerParams(
            dimension_semantics=("parallel",),
            vmem_limit_bytes=32 * 1024 * 1024,
        ),
    )(x, tt_t, l1, w2d, b2, tp, wproj, bproj)

    attn = attn_nt[:, :, None, None]                   # torch layout [N, T, 1, 1]
    return h, attn


# ----------------------------------------------------------------------------
# Pure-JAX reference (mirrors the PyTorch forward exactly).
# ----------------------------------------------------------------------------
def attention_ref(x, tt, params, proj_dim):
    T, N = x.shape

    def mlp2(u, w1, b1, w2, b2):
        h1 = jnp.maximum(u @ w1 + b1, 0.0)
        return jnp.maximum(h1 @ w2 + b2, 0.0)

    k = mlp2(x[..., None], params['w1k'], params['b1k'], params['w2k'], params['b2k'])
    v = mlp2(x[..., None], params['w1v'], params['b1v'], params['w2v'], params['b2v'])

    t1 = tt @ params['wlin'] + params['blin']
    t2 = jnp.sin(tt @ params['wper'] + params['bper'])
    tcat = jnp.concatenate([t1, t2], axis=-1)
    temb = jnp.maximum(tcat @ params['wproj'] + params['bproj'], 0.0)   # [T, P]

    kperm = jnp.transpose(k[..., None], (1, 0, 3, 2))        # [N, T, 1, P]
    temb_t = jnp.tile(temb[None], (N, 1, 1))                 # [N, T, P]
    A = jnp.matmul(kperm, temb_t[..., None]) / math.sqrt(proj_dim)   # [N, T, 1, 1]
    attn = jax.nn.softmax(A, axis=0)
    vperm = jnp.transpose(v[..., None], (1, 0, 2, 3))        # [N, T, P, 1]
    h = jnp.sum(attn * vperm, axis=0)[..., 0]                # [T, P]
    return h, attn


# ----------------------------------------------------------------------------
# Deterministic parameter init (PyTorch Linear-style uniform bounds).
# Weights stored as [in, out]; forward uses x @ W + b.
# ----------------------------------------------------------------------------
def init_linear(key, fan_in, fan_out):
    kw, kb = jax.random.split(key)
    bound = 1.0 / math.sqrt(fan_in)
    w = jax.random.uniform(kw, (fan_in, fan_out), jnp.float32, -bound, bound)
    b = jax.random.uniform(kb, (fan_out,), jnp.float32, -bound, bound)
    return w, b


if __name__ == "__main__":
    EMBED_DIM, PROJ_DIM, FINAL_DIM = 32, 32, 16   # final_dim only feeds the unused classifier
    T, N = 256, 4                                 # x: [T, N], time: [T, 1]

    key = jax.random.PRNGKey(0)
    keys = jax.random.split(key, 10)

    params = {}
    params['w1k'], params['b1k'] = init_linear(keys[0], 1, EMBED_DIM)
    params['w2k'], params['b2k'] = init_linear(keys[1], EMBED_DIM, PROJ_DIM)
    params['w1v'], params['b1v'] = init_linear(keys[2], 1, EMBED_DIM)
    params['w2v'], params['b2v'] = init_linear(keys[3], EMBED_DIM, PROJ_DIM)
    params['wlin'], params['blin'] = init_linear(keys[4], 1, 1)
    params['wper'], params['bper'] = init_linear(keys[5], 1, EMBED_DIM - 1)
    params['wproj'], params['bproj'] = init_linear(keys[6], EMBED_DIM, PROJ_DIM)

    x = jax.random.normal(keys[7], (T, N), jnp.float32)
    tt = jnp.sort(jax.random.uniform(keys[8], (T, 1), jnp.float32), axis=0)

    h, attn = attention_with_time_embedding_pallas(x, tt, params, EMBED_DIM, PROJ_DIM)
    jax.block_until_ready((h, attn))

    with jax.default_matmul_precision("highest"):
        h_gold, attn_gold = attention_ref(x, tt, params, PROJ_DIM)

    # Tolerance reflects single-pass bf16 MXU operands + approx reciprocal in
    # the kernel vs. the f32-exact reference (per the perf-review guidance).
    np.testing.assert_allclose(np.asarray(h), np.asarray(h_gold), rtol=2e-2, atol=2e-2)
    np.testing.assert_allclose(np.asarray(attn), np.asarray(attn_gold), rtol=2e-2, atol=2e-2)
    assert h.shape == (T, PROJ_DIM) and attn.shape == (N, T, 1, 1)

    # TODO(synk): the module's dropout + classifier head are never invoked by
    # AttentionWithTimeEmbedding.forward, so they are intentionally not lowered.
    print("KERNEL_OK")
</pallas_src>

<mosaic_0001>
module attributes {stable_mosaic.version = 11 : i64} {
  func.func @attention_kernel(%arg0: i32, %arg1: memref<128x4xf32, #tpu.memory_space<vmem>>, %arg2: memref<128x1xf32, #tpu.memory_space<vmem>>, %arg3: memref<4x32xf32, #tpu.memory_space<vmem>>, %arg4: memref<64x64xf32, #tpu.memory_space<vmem>>, %arg5: memref<1x64xf32, #tpu.memory_space<vmem>>, %arg6: memref<2x32xf32, #tpu.memory_space<vmem>>, %arg7: memref<32x32xf32, #tpu.memory_space<vmem>>, %arg8: memref<1x32xf32, #tpu.memory_space<vmem>>, %arg9: memref<128x32xf32, #tpu.memory_space<vmem>>, %arg10: memref<4x128xf32, #tpu.memory_space<vmem>>) attributes {dimension_semantics = [#tpu.dimension_semantics<parallel>], iteration_bounds = array<i64: 2>, scalar_prefetch = 0 : i64, scratch_operands = 0 : i64, tpu.core_type = #tpu.core_type<tc>, window_params = [{transform_indices = @transform_0, window_bounds = array<i64: 128, 4>}, {transform_indices = @transform_1, window_bounds = array<i64: 128, 1>}, {pipeline_mode = #tpu.pipeline_mode<synchronous>, transform_indices = @transform_2, window_bounds = array<i64: 4, 32>}, {pipeline_mode = #tpu.pipeline_mode<synchronous>, transform_indices = @transform_3, window_bounds = array<i64: 64, 64>}, {pipeline_mode = #tpu.pipeline_mode<synchronous>, transform_indices = @transform_4, window_bounds = array<i64: 1, 64>}, {pipeline_mode = #tpu.pipeline_mode<synchronous>, transform_indices = @transform_5, window_bounds = array<i64: 2, 32>}, {pipeline_mode = #tpu.pipeline_mode<synchronous>, transform_indices = @transform_6, window_bounds = array<i64: 32, 32>}, {pipeline_mode = #tpu.pipeline_mode<synchronous>, transform_indices = @transform_7, window_bounds = array<i64: 1, 32>}, {transform_indices = @transform_8, window_bounds = array<i64: 128, 32>}, {transform_indices = @transform_9, window_bounds = array<i64: 4, 128>}]} {
    %c0 = arith.constant 0 : index
    %c0_0 = arith.constant 0 : index
    %0 = vector.load %arg3[%c0, %c0_0] : memref<4x32xf32, #tpu.memory_space<vmem>>, vector<1x32xf32>
    %c1 = arith.constant 1 : index
    %c0_1 = arith.constant 0 : index
    %1 = vector.load %arg3[%c1, %c0_1] : memref<4x32xf32, #tpu.memory_space<vmem>>, vector<1x32xf32>
    %c2 = arith.constant 2 : index
    %c0_2 = arith.constant 0 : index
    %2 = vector.load %arg3[%c2, %c0_2] : memref<4x32xf32, #tpu.memory_space<vmem>>, vector<1x32xf32>
    %c3 = arith.constant 3 : index
    %c0_3 = arith.constant 0 : index
    %3 = vector.load %arg3[%c3, %c0_3] : memref<4x32xf32, #tpu.memory_space<vmem>>, vector<1x32xf32>
    %c0_4 = arith.constant 0 : index
    %c0_5 = arith.constant 0 : index
    %4 = vector.load %arg2[%c0_4, %c0_5] : memref<128x1xf32, #tpu.memory_space<vmem>>, vector<128x1xf32>
    %c0_6 = arith.constant 0 : index
    %c0_7 = arith.constant 0 : index
    %5 = vector.load %arg6[%c0_6, %c0_7] : memref<2x32xf32, #tpu.memory_space<vmem>>, vector<1x32xf32>
    %6 = vector.broadcast %4 : vector<128x1xf32> to vector<128x32xf32>
    %7 = vector.broadcast %5 : vector<1x32xf32> to vector<128x32xf32>
    %8 = arith.mulf %6, %7 : vector<128x32xf32>
    %c1_8 = arith.constant 1 : index
    %c0_9 = arith.constant 0 : index
    %9 = vector.load %arg6[%c1_8, %c0_9] : memref<2x32xf32, #tpu.memory_space<vmem>>, vector<1x32xf32>
    %10 = vector.broadcast %9 : vector<1x32xf32> to vector<128x32xf32>
    %11 = arith.addf %8, %10 : vector<128x32xf32>
    %12 = tpu.iota {dimensions = array<i32: 1>} : vector<128x32xi32>
    %c0_i32 = arith.constant 0 : i32
    %13 = vector.broadcast %c0_i32 : i32 to vector<128x32xi32>
    %14 = arith.cmpi eq, %12, %13 : vector<128x32xi32>
    %15 = math.sin %11 : vector<128x32xf32>
    %16 = arith.select %14, %11, %15 : vector<128x32xi1>, vector<128x32xf32>
    %c0_10 = arith.constant 0 : index
    %c0_11 = arith.constant 0 : index
    %17 = vector.load %arg7[%c0_10, %c0_11] : memref<32x32xf32, #tpu.memory_space<vmem>>, vector<32x32xf32>
    %18 = arith.truncf %16 : vector<128x32xf32> to vector<128x32xbf16>
    %19 = arith.truncf %17 : vector<32x32xf32> to vector<32x32xbf16>
    %cst = arith.constant dense<0.000000e+00> : vector<128x32xf32>
    %20 = tpu.matmul %18, %19, %cst {dimension_numbers = #tpu.dot_dimension_numbers<[1], [0], [0], [1], [0, 0, 1, 1], [], []>} : vector<128x32xbf16>, vector<32x32xbf16>, vector<128x32xf32> -> vector<128x32xf32>
    %c0_12 = arith.constant 0 : index
    %c0_13 = arith.constant 0 : index
    %21 = vector.load %arg8[%c0_12, %c0_13] : memref<1x32xf32, #tpu.memory_space<vmem>>, vector<1x32xf32>
    %22 = vector.broadcast %21 : vector<1x32xf32> to vector<128x32xf32>
    %23 = arith.addf %20, %22 : vector<128x32xf32>
    %cst_14 = arith.constant 0.000000e+00 : f32
    %24 = vector.broadcast %cst_14 : f32 to vector<128x32xf32>
    %25 = arith.maximumf %23, %24 : vector<128x32xf32>
    %26 = vector.shape_cast %0 : vector<1x32xf32> to vector<1x32xf32>
    %27 = vector.broadcast %26 : vector<1x32xf32> to vector<128x32xf32>
    %28 = vector.shape_cast %1 : vector<1x32xf32> to vector<1x32xf32>
    %29 = vector.broadcast %28 : vector<1x32xf32> to vector<128x32xf32>
    %30 = vector.shape_cast %2 : vector<1x32xf32> to vector<1x32xf32>
    %31 = vector.broadcast %30 : vector<1x32xf32> to vector<128x32xf32>
    %32 = vector.shape_cast %3 : vector<1x32xf32> to vector<1x32xf32>
    %33 = vector.broadcast %32 : vector<1x32xf32> to vector<128x32xf32>
    %c0_15 = arith.constant 0 : index
    %c0_16 = arith.constant 0 : index
    %34 = vector.load %arg1[%c0_15, %c0_16] : memref<128x4xf32, #tpu.memory_space<vmem>>, vector<128x1xf32>
    %35 = vector.broadcast %34 : vector<128x1xf32> to vector<128x32xf32>
    %36 = arith.mulf %35, %27 : vector<128x32xf32>
    %37 = arith.addf %36, %29 : vector<128x32xf32>
    %cst_17 = arith.constant 0.000000e+00 : f32
    %38 = vector.broadcast %cst_17 : f32 to vector<128x32xf32>
    %39 = arith.maximumf %37, %38 : vector<128x32xf32>
    %40 = vector.broadcast %34 : vector<128x1xf32> to vector<128x32xf32>
    %41 = arith.mulf %40, %31 : vector<128x32xf32>
    %42 = arith.addf %41, %33 : vector<128x32xf32>
    %cst_18 = arith.constant 0.000000e+00 : f32
    %43 = vector.broadcast %cst_18 : f32 to vector<128x32xf32>
    %44 = arith.maximumf %42, %43 : vector<128x32xf32>
    %45 = tpu.concatenate %39, %44 in 1 : vector<128x32xf32>, vector<128x32xf32> -> vector<128x64xf32>
    %c0_19 = arith.constant 0 : index
    %c1_20 = arith.constant 1 : index
    %46 = vector.load %arg1[%c0_19, %c1_20] : memref<128x4xf32, #tpu.memory_space<vmem>>, vector<128x1xf32>
    %47 = vector.broadcast %46 : vector<128x1xf32> to vector<128x32xf32>
    %48 = arith.mulf %47, %27 : vector<128x32xf32>
    %49 = arith.addf %48, %29 : vector<128x32xf32>
    %cst_21 = arith.constant 0.000000e+00 : f32
    %50 = vector.broadcast %cst_21 : f32 to vector<128x32xf32>
    %51 = arith.maximumf %49, %50 : vector<128x32xf32>
    %52 = vector.broadcast %46 : vector<128x1xf32> to vector<128x32xf32>
    %53 = arith.mulf %52, %31 : vector<128x32xf32>
    %54 = arith.addf %53, %33 : vector<128x32xf32>
    %cst_22 = arith.constant 0.000000e+00 : f32
    %55 = vector.broadcast %cst_22 : f32 to vector<128x32xf32>
    %56 = arith.maximumf %54, %55 : vector<128x32xf32>
    %57 = tpu.concatenate %51, %56 in 1 : vector<128x32xf32>, vector<128x32xf32> -> vector<128x64xf32>
    %c0_23 = arith.constant 0 : index
    %c2_24 = arith.constant 2 : index
    %58 = vector.load %arg1[%c0_23, %c2_24] : memref<128x4xf32, #tpu.memory_space<vmem>>, vector<128x1xf32>
    %59 = vector.broadcast %58 : vector<128x1xf32> to vector<128x32xf32>
    %60 = arith.mulf %59, %27 : vector<128x32xf32>
    %61 = arith.addf %60, %29 : vector<128x32xf32>
    %cst_25 = arith.constant 0.000000e+00 : f32
    %62 = vector.broadcast %cst_25 : f32 to vector<128x32xf32>
    %63 = arith.maximumf %61, %62 : vector<128x32xf32>
    %64 = vector.broadcast %58 : vector<128x1xf32> to vector<128x32xf32>
    %65 = arith.mulf %64, %31 : vector<128x32xf32>
    %66 = arith.addf %65, %33 : vector<128x32xf32>
    %cst_26 = arith.constant 0.000000e+00 : f32
    %67 = vector.broadcast %cst_26 : f32 to vector<128x32xf32>
    %68 = arith.maximumf %66, %67 : vector<128x32xf32>
    %69 = tpu.concatenate %63, %68 in 1 : vector<128x32xf32>, vector<128x32xf32> -> vector<128x64xf32>
    %c0_27 = arith.constant 0 : index
    %c3_28 = arith.constant 3 : index
    %70 = vector.load %arg1[%c0_27, %c3_28] : memref<128x4xf32, #tpu.memory_space<vmem>>, vector<128x1xf32>
    %71 = vector.broadcast %70 : vector<128x1xf32> to vector<128x32xf32>
    %72 = arith.mulf %71, %27 : vector<128x32xf32>
    %73 = arith.addf %72, %29 : vector<128x32xf32>
    %cst_29 = arith.constant 0.000000e+00 : f32
    %74 = vector.broadcast %cst_29 : f32 to vector<128x32xf32>
    %75 = arith.maximumf %73, %74 : vector<128x32xf32>
    %76 = vector.broadcast %70 : vector<128x1xf32> to vector<128x32xf32>
    %77 = arith.mulf %76, %31 : vector<128x32xf32>
    %78 = arith.addf %77, %33 : vector<128x32xf32>
    %cst_30 = arith.constant 0.000000e+00 : f32
    %79 = vector.broadcast %cst_30 : f32 to vector<128x32xf32>
    %80 = arith.maximumf %78, %79 : vector<128x32xf32>
    %81 = tpu.concatenate %75, %80 in 1 : vector<128x32xf32>, vector<128x32xf32> -> vector<128x64xf32>
    %82 = tpu.concatenate %45, %57, %69, %81 in 0 : vector<128x64xf32>, vector<128x64xf32>, vector<128x64xf32>, vector<128x64xf32> -> vector<512x64xf32>
    %c0_31 = arith.constant 0 : index
    %c0_32 = arith.constant 0 : index
    %83 = vector.load %arg4[%c0_31, %c0_32] : memref<64x64xf32, #tpu.memory_space<vmem>>, vector<64x64xf32>
    %84 = arith.truncf %82 : vector<512x64xf32> to vector<512x64xbf16>
    %85 = arith.truncf %83 : vector<64x64xf32> to vector<64x64xbf16>
    %cst_33 = arith.constant dense<0.000000e+00> : vector<512x64xf32>
    %86 = tpu.matmul %84, %85, %cst_33 {dimension_numbers = #tpu.dot_dimension_numbers<[1], [0], [0], [1], [0, 0, 1, 1], [], []>} : vector<512x64xbf16>, vector<64x64xbf16>, vector<512x64xf32> -> vector<512x64xf32>
    %c0_34 = arith.constant 0 : index
    %c0_35 = arith.constant 0 : index
    %87 = vector.load %arg5[%c0_34, %c0_35] : memref<1x64xf32, #tpu.memory_space<vmem>>, vector<1x64xf32>
    %88 = vector.broadcast %87 : vector<1x64xf32> to vector<512x64xf32>
    %89 = arith.addf %86, %88 : vector<512x64xf32>
    %cst_36 = arith.constant 0.000000e+00 : f32
    %90 = vector.broadcast %cst_36 : f32 to vector<512x64xf32>
    %91 = arith.maximumf %89, %90 : vector<512x64xf32>
    %92 = vector.extract_strided_slice %91 {offsets = [0, 0], sizes = [128, 32], strides = [1, 1]} : vector<512x64xf32> to vector<128x32xf32>
    %93 = arith.mulf %92, %25 : vector<128x32xf32>
    %cst_37 = arith.constant dense<0.000000e+00> : vector<128xf32>
    %94 = vector.multi_reduction <add>, %93, %cst_37 [1] : vector<128x32xf32> to vector<128xf32>
    %95 = vector.shape_cast %94 : vector<128xf32> to vector<128x1xf32>
    %cst_38 = arith.constant 0.176776692 : f32
    %96 = vector.broadcast %cst_38 : f32 to vector<128x1xf32>
    %97 = arith.mulf %95, %96 : vector<128x1xf32>
    %98 = vector.extract_strided_slice %91 {offsets = [128, 0], sizes = [128, 32], strides = [1, 1]} : vector<512x64xf32> to vector<128x32xf32>
    %99 = arith.mulf %98, %25 : vector<128x32xf32>
    %cst_39 = arith.constant dense<0.000000e+00> : vector<128xf32>
    %100 = vector.multi_reduction <add>, %99, %cst_39 [1] : vector<128x32xf32> to vector<128xf32>
    %101 = vector.shape_cast %100 : vector<128xf32> to vector<128x1xf32>
    %cst_40 = arith.constant 0.176776692 : f32
    %102 = vector.broadcast %cst_40 : f32 to vector<128x1xf32>
    %103 = arith.mulf %101, %102 : vector<128x1xf32>
    %104 = vector.extract_strided_slice %91 {offsets = [256, 0], sizes = [128, 32], strides = [1, 1]} : vector<512x64xf32> to vector<128x32xf32>
    %105 = arith.mulf %104, %25 : vector<128x32xf32>
    %cst_41 = arith.constant dense<0.000000e+00> : vector<128xf32>
    %106 = vector.multi_reduction <add>, %105, %cst_41 [1] : vector<128x32xf32> to vector<128xf32>
    %107 = vector.shape_cast %106 : vector<128xf32> to vector<128x1xf32>
    %cst_42 = arith.constant 0.176776692 : f32
    %108 = vector.broadcast %cst_42 : f32 to vector<128x1xf32>
    %109 = arith.mulf %107, %108 : vector<128x1xf32>
    %110 = vector.extract_strided_slice %91 {offsets = [384, 0], sizes = [128, 32], strides = [1, 1]} : vector<512x64xf32> to vector<128x32xf32>
    %111 = arith.mulf %110, %25 : vector<128x32xf32>
    %cst_43 = arith.constant dense<0.000000e+00> : vector<128xf32>
    %112 = vector.multi_reduction <add>, %111, %cst_43 [1] : vector<128x32xf32> to vector<128xf32>
    %113 = vector.shape_cast %112 : vector<128xf32> to vector<128x1xf32>
    %cst_44 = arith.constant 0.176776692 : f32
    %114 = vector.broadcast %cst_44 : f32 to vector<128x1xf32>
    %115 = arith.mulf %113, %114 : vector<128x1xf32>
    %116 = tpu.concatenate %97, %103, %109, %115 in 1 : vector<128x1xf32>, vector<128x1xf32>, vector<128x1xf32>, vector<128x1xf32> -> vector<128x4xf32>
    %cst_45 = arith.constant dense<0xFF800000> : vector<128xf32>
    %117 = vector.multi_reduction <maximumf>, %116, %cst_45 [1] : vector<128x4xf32> to vector<128xf32>
    %118 = vector.shape_cast %117 : vector<128xf32> to vector<128x1xf32>
    %119 = vector.broadcast %118 : vector<128x1xf32> to vector<128x4xf32>
    %120 = arith.subf %116, %119 : vector<128x4xf32>
    %121 = math.exp %120 : vector<128x4xf32>
    %cst_46 = arith.constant dense<0.000000e+00> : vector<128xf32>
    %122 = vector.multi_reduction <add>, %121, %cst_46 [1] : vector<128x4xf32> to vector<128xf32>
    %123 = vector.shape_cast %122 : vector<128xf32> to vector<128x1xf32>
    %124 = tpu.reciprocal %123 {approx = true} : vector<128x1xf32> -> vector<128x1xf32>
    %125 = vector.broadcast %124 : vector<128x1xf32> to vector<128x4xf32>
    %126 = arith.mulf %121, %125 : vector<128x4xf32>
    %127 = vector.extract_strided_slice %126 {offsets = [0, 0], sizes = [128, 1], strides = [1, 1]} : vector<128x4xf32> to vector<128x1xf32>
    %128 = vector.extract_strided_slice %91 {offsets = [0, 32], sizes = [128, 32], strides = [1, 1]} : vector<512x64xf32> to vector<128x32xf32>
    %129 = vector.broadcast %127 : vector<128x1xf32> to vector<128x32xf32>
    %130 = arith.mulf %129, %128 : vector<128x32xf32>
    %131 = vector.extract_strided_slice %126 {offsets = [0, 1], sizes = [128, 1], strides = [1, 1]} : vector<128x4xf32> to vector<128x1xf32>
    %132 = vector.extract_strided_slice %91 {offsets = [128, 32], sizes = [128, 32], strides = [1, 1]} : vector<512x64xf32> to vector<128x32xf32>
    %133 = vector.broadcast %131 : vector<128x1xf32> to vector<128x32xf32>
    %134 = arith.mulf %133, %132 : vector<128x32xf32>
    %135 = arith.addf %130, %134 : vector<128x32xf32>
    %136 = vector.extract_strided_slice %126 {offsets = [0, 2], sizes = [128, 1], strides = [1, 1]} : vector<128x4xf32> to vector<128x1xf32>
    %137 = vector.extract_strided_slice %91 {offsets = [256, 32], sizes = [128, 32], strides = [1, 1]} : vector<512x64xf32> to vector<128x32xf32>
    %138 = vector.broadcast %136 : vector<128x1xf32> to vector<128x32xf32>
    %139 = arith.mulf %138, %137 : vector<128x32xf32>
    %140 = arith.addf %135, %139 : vector<128x32xf32>
    %141 = vector.extract_strided_slice %126 {offsets = [0, 3], sizes = [128, 1], strides = [1, 1]} : vector<128x4xf32> to vector<128x1xf32>
    %142 = vector.extract_strided_slice %91 {offsets = [384, 32], sizes = [128, 32], strides = [1, 1]} : vector<512x64xf32> to vector<128x32xf32>
    %143 = vector.broadcast %141 : vector<128x1xf32> to vector<128x32xf32>
    %144 = arith.mulf %143, %142 : vector<128x32xf32>
    %145 = arith.addf %140, %144 : vector<128x32xf32>
    %c0_47 = arith.constant 0 : index
    %c0_48 = arith.constant 0 : index
    %146 = vector.load %arg9[%c0_47, %c0_48] : memref<128x32xf32, #tpu.memory_space<vmem>>, vector<128x32xf32>
    tpu.vector_store %arg9[%c0_47, %c0_48], %145 {strides = array<i32>} : memref<128x32xf32, #tpu.memory_space<vmem>>, vector<128x32xf32>,
    %147 = tpu.transpose %126, [1, 0] : vector<128x4xf32> -> vector<4x128xf32>
    %c0_49 = arith.constant 0 : index
    %c0_50 = arith.constant 0 : index
    %148 = vector.load %arg10[%c0_49, %c0_50] : memref<4x128xf32, #tpu.memory_space<vmem>>, vector<4x128xf32>
    tpu.vector_store %arg10[%c0_49, %c0_50], %147 {strides = array<i32>} : memref<4x128xf32, #tpu.memory_space<vmem>>, vector<4x128xf32>,
    return
  }
  func.func @transform_0(%arg0: i32) -> (i32, i32) {
    %c0_i32 = arith.constant 0 : i32
    %c0_i32_0 = arith.constant 0 : i32
    return %arg0, %c0_i32 : i32, i32
  }
  func.func @transform_1(%arg0: i32) -> (i32, i32) {
    %c0_i32 = arith.constant 0 : i32
    %c0_i32_0 = arith.constant 0 : i32
    return %arg0, %c0_i32 : i32, i32
  }
  func.func @transform_2(%arg0: i32) -> (i32, i32) {
    %c0_i32 = arith.constant 0 : i32
    %c0_i32_0 = arith.constant 0 : i32
    %c0_i32_1 = arith.constant 0 : i32
    return %c0_i32, %c0_i32_0 : i32, i32
  }
  func.func @transform_3(%arg0: i32) -> (i32, i32) {
    %c0_i32 = arith.constant 0 : i32
    %c0_i32_0 = arith.constant 0 : i32
    %c0_i32_1 = arith.constant 0 : i32
    return %c0_i32, %c0_i32_0 : i32, i32
  }
  func.func @transform_4(%arg0: i32) -> (i32, i32) {
    %c0_i32 = arith.constant 0 : i32
    %c0_i32_0 = arith.constant 0 : i32
    %c0_i32_1 = arith.constant 0 : i32
    return %c0_i32, %c0_i32_0 : i32, i32
  }
  func.func @transform_5(%arg0: i32) -> (i32, i32) {
    %c0_i32 = arith.constant 0 : i32
    %c0_i32_0 = arith.constant 0 : i32
    %c0_i32_1 = arith.constant 0 : i32
    return %c0_i32, %c0_i32_0 : i32, i32
  }
  func.func @transform_6(%arg0: i32) -> (i32, i32) {
    %c0_i32 = arith.constant 0 : i32
    %c0_i32_0 = arith.constant 0 : i32
    %c0_i32_1 = arith.constant 0 : i32
    return %c0_i32, %c0_i32_0 : i32, i32
  }
  func.func @transform_7(%arg0: i32) -> (i32, i32) {
    %c0_i32 = arith.constant 0 : i32
    %c0_i32_0 = arith.constant 0 : i32
    %c0_i32_1 = arith.constant 0 : i32
    return %c0_i32, %c0_i32_0 : i32, i32
  }
  func.func @transform_8(%arg0: i32) -> (i32, i32) {
    %c0_i32 = arith.constant 0 : i32
    %c0_i32_0 = arith.constant 0 : i32
    return %arg0, %c0_i32 : i32, i32
  }
  func.func @transform_9(%arg0: i32) -> (i32, i32) {
    %c0_i32 = arith.constant 0 : i32
    %c0_i32_0 = arith.constant 0 : i32
    return %c0_i32, %arg0 : i32, i32
  }
}

</mosaic_0001>

<bundles_post_ra>
// kernel: tpu_custom_call.1
= control target key start
LH: loop header
LB: loop body
LE: loop exit
PB: predicated region body
PF: predicated region fallthrough
CT: control target
= control target key end

     0   :  { %15 = vsyncpa [#allocation3], 0  ;;  %s10531_s0 = inlined_call_operand.vmem [shape: f32[256,4], index: 0, kind: input, shape index: {}]   ;;  %s10532_s1 = inlined_call_operand.vmem [shape: f32[256,1], index: 1, kind: input, shape index: {}]   ;;  %s10533_s2 = inlined_call_operand.vmem [shape: f32[4,32], index: 2, kind: input, shape index: {}]   ;;  %s10534_s3 = inlined_call_operand.vmem [shape: f32[64,64], index: 3, kind: input, shape index: {}]   ;;  %s10535_s4 = inlined_call_operand.vmem [shape: f32[1,64], index: 4, kind: input, shape index: {}]   ;;  %s10536_s5 = inlined_call_operand.vmem [shape: f32[2,32], index: 5, kind: input, shape index: {}]   ;;  %s10537_s6 = inlined_call_operand.vmem [shape: f32[32,32], index: 6, kind: input, shape index: {}]   ;;  %s10538_s7 = inlined_call_operand.vmem [shape: f32[1,32], index: 7, kind: input, shape index: {}]   ;;  %s10539_s8 = inlined_call_operand.vmem [shape: f32[256,32], index: 8, kind: output, shape index: {0}]   ;;  %s10540_s9 = inlined_call_operand.hbm [shape: f32[4,256], index: 9, kind: output, shape index: {1}]  }
   0x1   :  { %17 = vsyncpa [#allocation3 + $0x1], 0  ;;  %s5923_s30 = smov 0   ;;  %s5925_s10 = smov 0  }
   0x2   :  { %s5927_s11 = smov 0   ;;  %s5929_s12 = smov 0  }
   0x3 LB: > { %s5944_s13 = sadd.s32 4294967295, %s5858_s12   ;;  %s5027_s14 = sadd.s32 4294967294, %s5858_s12   ;;  %s5858_s12 = sphi %s5929_s12, %s11242_s12   ;;  %s5854_s11 = sphi %s5927_s11, %s11241_s11   ;;  %s5850_s10 = sphi %s5925_s10, %s11240_s10   ;;  %s5846_s30 = sphi %s5923_s30, %s11239_s30  }
   0x4   : > { %s5948_s15 = sadd.s32 1, %s5858_s12   ;;  %s234_s16 = sadd.s32 1, %s5854_s11 }
   0x5   : > { %s231_s17 = ssub.s32 %s5858_s12, %s5948_s15  ;;  %p244_p0 = scmp.ne.s32.totalorder %s5854_s11, %s5850_s10 }
   0x6   : > { %p232_p1 = scmp.eq.s32.totalorder %s231_s17, 0  ;;  %p245_p2 = scmp.eq.s32.totalorder %s5944_s13, 1 }
   0x7   : > { %p250_p3 = scmp.ne.s32.totalorder %s5850_s10, %s5846_s30  ;;  %p251_p4 = scmp.eq.s32.totalorder %s5027_s14, 1 }
   0x8   : > { %s5959_s18 = scalar_select %p232_p1, %s5854_s11, %s234_s16  }
   0x9   : > { %p5961_p5 = por %p245_p2, %p244_p0  ;;  %p5965_p6 = por %p251_p4, %p250_p3 }
   0xa   : > { %p5030_p7 = scmp.ge.s32.totalorder %s5858_s12, 1  ;;  %p305_p8 = scmp.lt.s32.totalorder %s5858_s12, 3 }
   0xc   : > { %p306_p9 = pnand %p5030_p7, %p305_p8 }
   0xe   : > { %309 = sbr.rel (%p306_p9) target bundleno = 1955 (0x7a3), region = 52 }
  0x15   : > { %s5032_s21 = sshll.u32 %s5944_s13, 4  ;;  %v10545_v0 = vmov 0   ;;  %v10543_v33 = vmov 1   ;;  %v10541_v34 = vmov 2   ;;  %v6009_v35 = vld [vmem:[%s10536_s5] ss:$0 sm:$0xff] }
  0x16   : > { %5416 = vset.pattern.permute.xlu1 %v10545_v0  ;;  %5415 = vset.pattern.permute.xlu0 %v10545_v0  ;;  %p352_p10 = scmp.lt.s32.totalorder %s5032_s21, 31  ;;  %v6015_v38 = vld [vmem:[%s10536_s5 + $0x1] ss:$0 sm:$0xff]  ;;  %v10563_v59 = vmov 1326507024   ;;  %s5869_s16 = smov 32  }
  0x17   : > { %v10559_v62 = vmov 920167782   ;;  %s5871_s24 = smov 96   ;;  %s5151_s17 = sshll.u32 %s5944_s13, 6 }
  0x18   : > { %s11244_s21 = smov (!%p352_p10, %s5032_s21), 31  ;;  %s5872_s26 = smov [#allocation2]  }
  0x19   : > { %s5974_s22 = sshll.u32 %s11244_s21, 3  ;;  %s5800_s13 = sshll.u32 %s5872_s26, 4  ;;  %s5801_s13 = int_to_ptr.vmem [resolvable:$false] %s5800_s13 }
  0x1a   : > { %s361_s25 = scalar_lea.vmem %s10532_s1, %s5974_s22  ;;  %s5984_s28 = scalar_lea.vmem %s10531_s0, %s5974_s22 }
  0x1b   : > { %v376_v1 = vld [vmem:[%s361_s25 + $0x10] sm:$0xff]  ;;  %v374_v2 = vld [vmem:[%s361_s25] sm:$0xff]  ;;  %v377_v3 = vld [vmem:[%s361_s25 + $0x18] sm:$0xff] }
  0x1c   : > { %403 = vperm.xlu1 %5416, %v376_v1   ;;  %393 = vperm.xlu0 %5415, %v374_v2   ;;  %v375_v4 = vld [vmem:[%s361_s25 + $0x8] sm:$0xff]  ;;  %v378_v6 = vld [vmem:[%s361_s25 + $0x20] sm:$0xff]  ;;  %v381_v7 = vld [vmem:[%s361_s25 + $0x38] sm:$0xff] }
  0x1d   : > { %v379_v5 = vld [vmem:[%s361_s25 + $0x28] sm:$0xff]  ;;  %v380_v8 = vld [vmem:[%s361_s25 + $0x30] sm:$0xff]  ;;  %v382_v10 = vld [vmem:[%s361_s25 + $0x40] sm:$0xff] }
  0x1e   : > { %v383_v9 = vld [vmem:[%s361_s25 + $0x48] sm:$0xff]  ;;  %v385_v11 = vld [vmem:[%s361_s25 + $0x58] sm:$0xff]  ;;  %v384_v12 = vld [vmem:[%s361_s25 + $0x50] sm:$0xff] }
  0x1f   : > { %v387_v13 = vld [vmem:[%s361_s25 + $0x68] sm:$0xff]  ;;  %v386_v14 = vld [vmem:[%s361_s25 + $0x60] sm:$0xff]  ;;  %v389_v15 = vld [vmem:[%s361_s25 + $0x78] sm:$0xff] }
  0x20   : > { %408 = vperm.xlu1 %5416, %v377_v3   ;;  %398 = vperm.xlu0 %5415, %v375_v4   ;;  %v388_v16 = vld [vmem:[%s361_s25 + $0x70] sm:$0xff]  ;;  %v2371_v17 = vld [vmem:[%s5984_s28 + $0x8] sm:$0xff]  ;;  %v2370_v18 = vld [vmem:[%s5984_s28] sm:$0xff] }
  0x21   : > { %v2373_v19 = vld [vmem:[%s5984_s28 + $0x18] sm:$0xff]  ;;  %v2372_v20 = vld [vmem:[%s5984_s28 + $0x10] sm:$0xff]  ;;  %v2375_v21 = vld [vmem:[%s5984_s28 + $0x28] sm:$0xff] }
  0x22   : > { %v2374_v22 = vld [vmem:[%s5984_s28 + $0x20] sm:$0xff]  ;;  %v2377_v23 = vld [vmem:[%s5984_s28 + $0x38] sm:$0xff]  ;;  %v2376_v24 = vld [vmem:[%s5984_s28 + $0x30] sm:$0xff] }
  0x23   : > { %v2379_v25 = vld [vmem:[%s5984_s28 + $0x48] sm:$0xff]  ;;  %v2378_v26 = vld [vmem:[%s5984_s28 + $0x40] sm:$0xff]  ;;  %v2381_v27 = vld [vmem:[%s5984_s28 + $0x58] sm:$0xff] }
  0x24   : > { %418 = vperm.xlu1 %5416, %v379_v5   ;;  %413 = vperm.xlu0 %5415, %v378_v6   ;;  %v2380_v28 = vld [vmem:[%s5984_s28 + $0x50] sm:$0xff]  ;;  %v2383_v29 = vld [vmem:[%s5984_s28 + $0x68] sm:$0xff]  ;;  %v2382_v30 = vld [vmem:[%s5984_s28 + $0x60] sm:$0xff]  ;;  %v10552_v5 = vmov 2131351028  }
  0x25   : > { %v2385_v31 = vld [vmem:[%s5984_s28 + $0x78] sm:$0xff]  ;;  %v2384_v32 = vld [vmem:[%s5984_s28 + $0x70] sm:$0xff] }
  0x28   : > { %428 = vperm.xlu1 %5416, %v381_v7   ;;  %423 = vperm.xlu0 %5415, %v380_v8   ;;  %v10557_v7 = vmov 2102212464  }
  0x2c   : > { %438 = vperm.xlu1 %5416, %v383_v9   ;;  %433 = vperm.xlu0 %5415, %v382_v10   ;;  %v10554_v10 = vmov 2475754826  }
  0x30   : > { %448 = vperm.xlu1 %5416, %v385_v11   ;;  %443 = vperm.xlu0 %5415, %v384_v12  }
  0x34   : > { %458 = vperm.xlu1 %5416, %v387_v13   ;;  %453 = vperm.xlu0 %5415, %v386_v14  }
  0x38   : > { %468 = vperm.xlu1 %5416, %v389_v15   ;;  %463 = vperm.xlu0 %5415, %v388_v16  }
  0x3c   : > { %2393 = vperm.xlu1 %5416, %v2371_v17   ;;  %2388 = vperm.xlu0 %5415, %v2370_v18  }
  0x40   : > { %2403 = vperm.xlu1 %5416, %v2373_v19   ;;  %2398 = vperm.xlu0 %5415, %v2372_v20  }
  0x44   : > { %2413 = vperm.xlu1 %5416, %v2375_v21   ;;  %2408 = vperm.xlu0 %5415, %v2374_v22  }
  0x48   : > { %2423 = vperm.xlu1 %5416, %v2377_v23   ;;  %2418 = vperm.xlu0 %5415, %v2376_v24  }
  0x4c   : > { %2433 = vperm.xlu1 %5416, %v2379_v25   ;;  %2428 = vperm.xlu0 %5415, %v2378_v26  }
  0x50   : > { %2443 = vperm.xlu1 %5416, %v2381_v27   ;;  %2438 = vperm.xlu0 %5415, %v2380_v28  }
  0x54   : > { %2453 = vperm.xlu1 %5416, %v2383_v29   ;;  %2448 = vperm.xlu0 %5415, %v2382_v30  }
  0x58   : > { %2463 = vperm.xlu1 %5416, %v2385_v31   ;;  %2458 = vperm.xlu0 %5415, %v2384_v32  }
  0x5c   : > { %5418 = vset.pattern.permute.xlu1 %v10543_v33  ;;  %5417 = vset.pattern.permute.xlu0 %v10543_v33 }
  0x5d   : > { %2647 = vperm.xlu1 %5418, %v2371_v17   ;;  %2643 = vperm.xlu0 %5417, %v2370_v18  }
  0x61   : > { %2651 = vperm.xlu1 %5418, %v2372_v20   ;;  %2655 = vperm.xlu0 %5417, %v2373_v19  }
  0x65   : > { %2659 = vperm.xlu1 %5418, %v2374_v22   ;;  %2663 = vperm.xlu0 %5417, %v2375_v21  }
  0x69   : > { %2667 = vperm.xlu1 %5418, %v2376_v24   ;;  %2671 = vperm.xlu0 %5417, %v2377_v23  }
  0x6d   : > { %2675 = vperm.xlu1 %5418, %v2378_v26   ;;  %2679 = vperm.xlu0 %5417, %v2379_v25  }
  0x71   : > { %2683 = vperm.xlu1 %5418, %v2380_v28   ;;  %2687 = vperm.xlu0 %5417, %v2381_v27  }
  0x75   : > { %2691 = vperm.xlu1 %5418, %v2382_v30   ;;  %2695 = vperm.xlu0 %5417, %v2383_v29  }
  0x79   : > { %2699 = vperm.xlu1 %5418, %v2384_v32   ;;  %2703 = vperm.xlu0 %5417, %v2385_v31  }
  0x7d   : > { %5419 = vset.pattern.permute.xlu1 %v10541_v34  ;;  %5420 = vset.pattern.permute.xlu0 %v10541_v34 }
  0x7e   : > { %2883 = vperm.xlu1 %5419, %v2370_v18   ;;  %2887 = vperm.xlu0 %5420, %v2371_v17   ;;  %v10561_v17 = vmov 683565275  }
  0x82   : > { %2891 = vperm.xlu1 %5419, %v2372_v20   ;;  %2899 = vperm.xlu0 %5420, %v2374_v22  }
  0x86   : > { %2895 = vperm.xlu1 %5419, %v2373_v19   ;;  %2907 = vperm.xlu0 %5420, %v2376_v24  }
  0x8a   : > { %2903 = vperm.xlu1 %5419, %v2375_v21   ;;  %2915 = vperm.xlu0 %5420, %v2378_v26  }
  0x8e   : > { %2911 = vperm.xlu1 %5419, %v2377_v23   ;;  %2923 = vperm.xlu0 %5420, %v2380_v28  }
  0x92   : > { %2919 = vperm.xlu1 %5419, %v2379_v25   ;;  %2931 = vperm.xlu0 %5420, %v2382_v30  }
  0x96   : > { %2927 = vperm.xlu1 %5419, %v2381_v27  }
  0x9a   : > { %2935 = vperm.xlu1 %5419, %v2383_v29  }
  0x9b   : > { %v404_v36 = vpop.permute.xlu1 %403  ;;  %v6027_v53 = vpop.permute.xlu0 %393 }
  0x9c   : > { %v477_v37 = vmul.f32 %v6009_v35, %v404_v36 }
  0x9e   : > { %v6018_v39 = vadd.f32 %v6015_v38, %v477_v37 }
  0x9f   : > { %v409_v42 = vpop.permute.xlu1 %408  ;;  %v6034_v61 = vpop.permute.xlu0 %398 }
  0xa0   : > { %10796 = vst [vmem:[#allocation5_spill] sm:$0xff] %v6018_v39  ;;  %v726_v40 = vand.u32 2139095040, %v6018_v39  ;;  %v478_v44 = vmul.f32 %v6009_v35, %v409_v42  ;;  %v10551_v1 = vand.u32 2147483647, %v6018_v39 }
  0xa2   : > { %v727_v41 = vshrl.u32 %v726_v40, 23  ;;  %v6023_v46 = vadd.f32 %v6015_v38, %v478_v44  ;;  %v730_v21 = vand.u32 8388607, %v10551_v1 }
  0xa3   : > { %v419_v48 = vpop.permute.xlu1 %418  ;;  %v414_v20 = vpop.permute.xlu0 %413 }
  0xa4   : > { %v5048_v43 = vadd.s32 4294967169, %v727_v41  ;;  %10797 = vst [vmem:[#allocation6_spill] sm:$0xff] %v6023_v46  ;;  %v830_v47 = vand.u32 2139095040, %v6023_v46  ;;  %v480_v51 = vmul.f32 %v6009_v35, %v419_v48  ;;  %v479_v28 = vmul.f32 %v6009_v35, %v414_v20 }
  0xa5   : > { %v731_v30 = vor.u32 8388608, %v730_v21  ;;  %v10550_v40 = vand.u32 2147483647, %v6023_v46 }
  0xa6   : > { %v733_v45 = vadd.s32 1, %v5048_v43  ;;  %v831_v50 = vshrl.u32 %v830_v47, 23  ;;  %v6030_v55 = vadd.f32 %v6015_v38, %v480_v51  ;;  %v6071_v42 = vadd.f32 %v6015_v38, %v479_v28 }
  0xa8   : > { %vm734_vm0 = vcmp.gt.s32.totalorder %v733_v45, 0  ;;  %v5052_v54 = vadd.s32 4294967169, %v831_v50  ;;  %10798 = vst [vmem:[#allocation7_spill] sm:$0xff] %v6030_v55  ;;  %v1038_v58 = vand.u32 2139095040, %v6030_v55 }
  0xa9   : > { %v735_v49 = vsel %vm734_vm0, %v733_v45, 0  ;;  %v6077_v45 = vshll.u32 %v731_v30, 8 }
  0xaa   : > { %v737_v52 = vand.u32 31, %v735_v49  ;;  %v837_v57 = vadd.s32 1, %v5052_v54  ;;  %v1039_v3 = vshrl.u32 %v1038_v58, 23  ;;  %v6039_v4 = vshrl.u32 %v735_v49, 5  ;;  %v429_v58 = vpop.permute.xlu1 %428 }
  0xab   : > { %v834_v49 = vand.u32 8388607, %v10550_v40 }
  0xac   : > { %v738_v56 = vsub.s32 32, %v737_v52  ;;  %v752_v2 = vshll.u32 %v10559_v62, %v737_v52  ;;  %vm838_vm1 = vcmp.gt.s32.totalorder %v837_v57, 0  ;;  %v749_v9 = vshll.u32 %v10557_v7, %v737_v52 }
  0xad   : > { %v743_v13 = vshll.u32 %v10554_v10, %v737_v52  ;;  %v746_v14 = vshll.u32 %v10552_v5, %v737_v52  ;;  %v839_v16 = vsel %vm838_vm1, %v837_v57, 0  ;;  %v740_v18 = vshll.u32 %v10561_v17, %v737_v52 }
  0xae   : > { %v753_v60 = vshrl.u32 %v10563_v59, %v738_v56  ;;  %v750_v63 = vshrl.u32 %v10559_v62, %v738_v56  ;;  %v744_v6 = vshrl.u32 %v10552_v5, %v738_v56  ;;  %v747_v8 = vshrl.u32 %v10557_v7, %v738_v56 }
  0xaf   : > { %v741_v11 = vshrl.u32 %v10554_v10, %v738_v56  ;;  %v5060_v19 = vadd.s32 4294967169, %v1039_v3  ;;  %vm758_vm2 = vcmp.lt.s32.totalorder %v6039_v4, 4  ;;  %v841_v26 = vand.u32 31, %v839_v16 }
  0xb0   : > { %v754_v12 = vor.u32 %v753_v60, %v752_v2  ;;  %v751_v15 = vor.u32 %v750_v63, %v749_v9  ;;  %v745_v22 = vor.u32 %v744_v6, %v743_v13  ;;  %v748_v23 = vor.u32 %v747_v8, %v746_v14 }
  0xb1   : > { %v742_v24 = vor.u32 %v741_v11, %v740_v18  ;;  %vm755_vm3 = vcmp.lt.s32.totalorder %v6039_v4, 1  ;;  %vm757_vm4 = vcmp.lt.s32.totalorder %v6039_v4, 3  ;;  %v1045_v29 = vadd.s32 1, %v5060_v19 }
  0xb2   : > { %v768_v25 = vsel %vm758_vm2, %v754_v12, 1326507024  ;;  %v764_v27 = vsel %vm758_vm2, %v751_v15, 920167782  ;;  %v767_v31 = vsel %vm755_vm3, %v745_v22, %v748_v23  ;;  %v6067_v41 = vsub.s32 32, %v841_v26 }
  0xb3   : > { %v769_v32 = vsel %vm757_vm4, %v751_v15, %v768_v25  ;;  %v763_v36 = vsel %vm755_vm3, %v742_v24, %v745_v22  ;;  %v765_v37 = vsel %vm757_vm4, %v748_v23, %v764_v27  ;;  %vm756_vm5 = vcmp.lt.s32.totalorder %v6039_v4, 2 }
  0xb4   : > { %v770_v43 = vsel %vm756_vm5, %v767_v31, %v769_v32  ;;  %vm1046_vm6 = vcmp.gt.s32.totalorder %v1045_v29, 0  ;;  %v766_v44 = vsel %vm756_vm5, %v763_v36, %v765_v37  ;;  %v739_v47 = vshrl.u32 %v10561_v17, %v738_v56 }
  0xb5   : > { %v760_v48 = vsel %vm758_vm2, %v748_v23, 2102212464  ;;  %v854_v50 = vshrl.u32 %v10559_v62, %v6067_v41  ;;  %v6087_v51 = vmul.u32.u64.low %v6077_v45, %v770_v43  ;;  %v6088_v52 = vmul.u32.u64.high %v6077_v45, %v770_v43, %v6087_v51 }
  0xb6   : > { %v1047_v54 = vsel %vm1046_vm6, %v1045_v29, 0  ;;  %v934_v57 = vand.u32 2139095040, %v6071_v42  ;;  %v6092_v60 = vmul.u32.u64.low %v6077_v45, %v766_v44  ;;  %v6093_v56 = vmul.u32.u64.high %v6077_v45, %v766_v44, %v6092_v60 }
  0xb7   : > { %v853_v63 = vshll.u32 %v10557_v7, %v841_v26  ;;  %v857_v2 = vshrl.u32 %v10563_v59, %v6067_v41  ;;  %v6099_v3 = vshrl.u32 %v839_v16, 5  ;;  %v845_v6 = vshrl.u32 %v10554_v10, %v6067_v41 }
  0xb8   : > { %v848_v8 = vshrl.u32 %v10552_v5, %v6067_v41  ;;  %v851_v9 = vshrl.u32 %v10557_v7, %v6067_v41  ;;  %v856_v12 = vshll.u32 %v10559_v62, %v841_v26  ;;  %v1049_v13 = vand.u32 31, %v1047_v54 }
  0xb9   : > { %v855_v11 = vor.u32 %v854_v50, %v853_v63  ;;  %v482_v14 = vmul.f32 %v6009_v35, %v429_v58  ;;  %v844_v15 = vshll.u32 %v10561_v17, %v841_v26  ;;  %v847_v16 = vshll.u32 %v10554_v10, %v841_v26 }
  0xba   : > { %v850_v18 = vshll.u32 %v10552_v5, %v841_v26  ;;  %v935_v19 = vshrl.u32 %v934_v57, 23  ;;  %v759_v20 = vsel %vm755_vm3, %v739_v47, %v742_v24  ;;  %v761_v21 = vsel %vm757_vm4, %v745_v22, %v760_v48 }
  0xbb   : > { %v858_v23 = vor.u32 %v857_v2, %v856_v12  ;;  %v6116_v25 = vor.u32 %v845_v6, %v844_v15  ;;  %v6118_v27 = vor.u32 %v848_v8, %v847_v16  ;;  %vm862_vm7 = vcmp.lt.s32.totalorder %v6099_v3, 4 }
  0xbc   : > { %v852_v28 = vor.u32 %v851_v9, %v850_v18  ;;  %v835_v29 = vor.u32 8388608, %v834_v49  ;;  %v868_v30 = vsel %vm862_vm7, %v855_v11, 920167782  ;;  %v6123_v26 = vsub.s32 32, %v1049_v13 }
  0xbd   : > { %v6126_v31 = vadd.f32 %v6015_v38, %v482_v14  ;;  %v762_v22 = vsel %vm756_vm5, %v759_v20, %v761_v21  ;;  %v5056_v24 = vadd.s32 4294967169, %v935_v19  ;;  %v781_v32 = vadd.s32 1, %v6093_v56 }
  0xbe   : > { %vm859_vm8 = vcmp.lt.s32.totalorder %v6099_v3, 1  ;;  %vm861_vm9 = vcmp.lt.s32.totalorder %v6099_v3, 3  ;;  %v872_v36 = vsel %vm862_vm7, %v858_v23, 1326507024  ;;  %vm780_vm10 = vc.u32 %v6088_v52, %v6092_v60 }
  0xbf   : > { %10799 = vst [vmem:[#allocation8_spill] sm:$0xff] %v6126_v31  ;;  %v867_v37 = vsel %vm859_vm8, %v6116_v25, %v6118_v27  ;;  %v869_v4 = vsel %vm861_vm9, %v852_v28, %v868_v30  ;;  %v10548_v43 = vand.u32 2147483647, %v6030_v55  ;;  %v778_v44 = vmul.u32 %v6077_v45, %v762_v22 }
  0xc0   : > { %v6145_v47 = vshll.u32 %v835_v29, 8  ;;  %v1062_v48 = vshrl.u32 %v10559_v62, %v6123_v26  ;;  %v1246_v49 = vand.u32 2139095040, %v6126_v31  ;;  %vm860_vm11 = vcmp.lt.s32.totalorder %v6099_v3, 2 }
  0xc1   : > { %v871_v50 = vsel %vm859_vm8, %v6118_v27, %v852_v28  ;;  %v873_v51 = vsel %vm861_vm9, %v855_v11, %v872_v36  ;;  %v941_v57 = vadd.s32 1, %v5056_v24  ;;  %v782_v58 = vsel %vm780_vm10, %v781_v32, %v6093_v56 }
  0xc2   : > { %v870_v45 = vsel %vm860_vm11, %v867_v37, %v869_v4  ;;  %v1061_v63 = vshll.u32 %v10557_v7, %v1049_v13  ;;  %v1065_v2 = vshrl.u32 %v10563_v59, %v6123_v26  ;;  %v6162_v6 = vshrl.u32 %v1047_v54, 5 }
  0xc3   : > { %v1053_v8 = vshrl.u32 %v10554_v10, %v6123_v26  ;;  %v1056_v9 = vshrl.u32 %v10552_v5, %v6123_v26  ;;  %v1059_v11 = vshrl.u32 %v10557_v7, %v6123_v26  ;;  %v874_v56 = vsel %vm860_vm11, %v871_v50, %v873_v51 }
  0xc4   : > { %v1063_v12 = vor.u32 %v1062_v48, %v1061_v63  ;;  %v1064_v14 = vshll.u32 %v10559_v62, %v1049_v13  ;;  %v1247_v15 = vshrl.u32 %v1246_v49, 23  ;;  %v1052_v16 = vshll.u32 %v10561_v17, %v1049_v13 }
  0xc5   : > { %v1055_v54 = vshll.u32 %v10554_v10, %v1049_v13  ;;  %v1058_v18 = vshll.u32 %v10552_v5, %v1049_v13  ;;  %vm942_vm12 = vcmp.gt.s32.totalorder %v941_v57, 0  ;;  %v1042_v21 = vand.u32 8388607, %v10548_v43 }
  0xc6   : > { %v6177_v19 = vmul.u32.u64.low %v6145_v47, %v870_v45  ;;  %v6178_v20 = vmul.u32.u64.high %v6145_v47, %v870_v45, %v6177_v19  ;;  %v1066_v23 = vor.u32 %v1065_v2, %v1064_v14  ;;  %v1054_v29 = vor.u32 %v1053_v8, %v1052_v16 }
  0xc7   : > { %v1057_v30 = vor.u32 %v1056_v9, %v1055_v54  ;;  %v1060_v22 = vor.u32 %v1059_v11, %v1058_v18  ;;  %vm1070_vm13 = vcmp.lt.s32.totalorder %v6162_v6, 4  ;;  %v6184_v24 = vadd.s32 %v782_v58, %v778_v44 }
  0xc8   : > { %v1076_v13 = vsel %vm1070_vm13, %v1063_v12, 920167782  ;;  %v943_v32 = vsel %vm942_vm12, %v941_v57, 0  ;;  %v5068_v36 = vadd.s32 4294967169, %v1247_v15  ;;  %v864_v48 = vsel %vm862_vm7, %v852_v28, 2102212464 }
  0xc9   : > { %v6189_v37 = vmul.u32.u64.low %v6145_v47, %v874_v56  ;;  %v6190_v4 = vmul.u32.u64.high %v6145_v47, %v874_v56, %v6189_v37  ;;  %vm1067_vm14 = vcmp.lt.s32.totalorder %v6162_v6, 1  ;;  %vm1069_vm15 = vcmp.lt.s32.totalorder %v6162_v6, 3 }
  0xca   : > { %v1080_v44 = vsel %vm1070_vm13, %v1066_v23, 1326507024  ;;  %v1043_v49 = vor.u32 8388608, %v1042_v21  ;;  %v1075_v50 = vsel %vm1067_vm14, %v1054_v29, %v1057_v30  ;;  %v1077_v51 = vsel %vm1069_vm15, %v1060_v22, %v1076_v13 }
  0xcb   : > { %v945_v57 = vand.u32 31, %v943_v32  ;;  %v784_v58 = vadd.s32 536870912, %v6184_v24  ;;  %v843_v28 = vshrl.u32 %v10561_v17, %v6067_v41  ;;  %v1253_v45 = vadd.s32 1, %v5068_v36 }
  0xcc   : > { %vm1068_vm0 = vcmp.lt.s32.totalorder %v6162_v6, 2  ;;  %v1079_v63 = vsel %vm1067_vm14, %v1057_v30, %v1060_v22  ;;  %v1081_v2 = vsel %vm1069_vm15, %v1063_v12, %v1080_v44  ;;  %v475_v8 = vmul.f32 %v6009_v35, %v6027_v53  ;;  %v424_v12 = vpop.permute.xlu0 %423 }
  0xcd   : > { %v863_v9 = vsel %vm859_vm8, %v843_v28, %v6116_v25  ;;  %v865_v41 = vsel %vm861_vm9, %v6118_v27, %v864_v48  ;;  %v1078_v11 = vsel %vm1068_vm0, %v1075_v50, %v1077_v51  ;;  %v6220_v56 = vshll.u32 %v1043_v49, 8 }
  0xce   : > { %v6222_v14 = vsub.s32 32, %v945_v57  ;;  %vm1254_vm1 = vcmp.gt.s32.totalorder %v1253_v45, 0  ;;  %v6224_v15 = vshrl.u32 %v784_v58, 30  ;;  %v885_v53 = vadd.s32 1, %v6178_v20 }
  0xcf   : > { %v1082_v25 = vsel %vm1068_vm0, %v1079_v63, %v1081_v2  ;;  %v10549_v16 = vand.u32 2147483647, %v6071_v42  ;;  %v866_v27 = vsel %vm860_vm11, %v863_v9, %v865_v41  ;;  %vm884_vm2 = vc.u32 %v6190_v4, %v6177_v19 }
  0xd0   : > { %10800 = vst [vmem:[#allocation9_spill] sm:$0xff] %v6224_v15  ;;  %v6235_v54 = vmul.u32.u64.low %v6220_v56, %v1078_v11  ;;  %v6236_v18 = vmul.u32.u64.high %v6220_v56, %v1078_v11, %v6235_v54  ;;  %v6240_v21 = vadd.f32 %v6015_v38, %v475_v8  ;;  %v1072_v23 = vsel %vm1070_vm13, %v1060_v22, 2102212464 }
  0xd1   : > { %v1255_v13 = vsel %vm1254_vm1, %v1253_v45, 0  ;;  %v481_v36 = vmul.f32 %v6009_v35, %v424_v12  ;;  %v1051_v3 = vshrl.u32 %v10561_v17, %v6123_v26  ;;  %v958_v44 = vshrl.u32 %v10559_v62, %v6222_v14 }
  0xd2   : > { %10801 = vst [vmem:[#allocation10_spill] sm:$0xff] %v6240_v21  ;;  %v6248_v37 = vmul.u32.u64.low %v6220_v56, %v1082_v25  ;;  %v6249_v48 = vmul.u32.u64.high %v6220_v56, %v1082_v25, %v6248_v37  ;;  %v786_v49 = vshll.u32 %v6224_v15, 30  ;;  %v882_v50 = vmul.u32 %v6145_v47, %v866_v27 }
  0xd3   : > { %v886_v51 = vsel %vm884_vm2, %v885_v53, %v6178_v20  ;;  %v938_v22 = vand.u32 8388607, %v10549_v16  ;;  %v1071_v58 = vsel %vm1067_vm14, %v1051_v3, %v1054_v29  ;;  %v1073_v26 = vsel %vm1069_vm15, %v1057_v30, %v1072_v23 }
  0xd4   : > { %v957_v28 = vshll.u32 %v10557_v7, %v945_v57  ;;  %v1257_v45 = vand.u32 31, %v1255_v13  ;;  %v6263_v63 = vshrl.u32 %v943_v32, 5  ;;  %v949_v2 = vshrl.u32 %v10554_v10, %v6222_v14 }
  0xd5   : > { %v952_v47 = vshrl.u32 %v10552_v5, %v6222_v14  ;;  %v955_v20 = vshrl.u32 %v10557_v7, %v6222_v14  ;;  %v6271_v8 = vadd.s32 %v886_v51, %v882_v50  ;;  %v961_v30 = vshrl.u32 %v10563_v59, %v6222_v14 }
  0xd6   : > { %v959_v29 = vor.u32 %v958_v44, %v957_v28  ;;  %v6276_v9 = vadd.f32 %v6015_v38, %v481_v36  ;;  %v939_v32 = vor.u32 8388608, %v938_v22  ;;  %v948_v41 = vshll.u32 %v10561_v17, %v945_v57 }
  0xd7   : > { %v951_v11 = vshll.u32 %v10554_v10, %v945_v57  ;;  %v954_v12 = vshll.u32 %v10552_v5, %v945_v57  ;;  %v1074_v53 = vsel %vm1068_vm0, %v1071_v58, %v1073_v26  ;;  %v1093_v25 = vadd.s32 1, %v6236_v18 }
  0xd8   : > { %10802 = vst [vmem:[#allocation11_spill] sm:$0xff] %v6276_v9  ;;  %v960_v27 = vshll.u32 %v10559_v62, %v945_v57  ;;  %v6285_v23 = vsub.s32 32, %v1257_v45  ;;  %v6287_v3 = vor.u32 %v949_v2, %v948_v41  ;;  %vm966_vm3 = vcmp.lt.s32.totalorder %v6263_v63, 4 }
  0xd9   : > { %v6289_v36 = vor.u32 %v952_v47, %v951_v11  ;;  %v6291_v37 = vor.u32 %v955_v20, %v954_v12  ;;  %vm1092_vm4 = vc.u32 %v6249_v48, %v6235_v54  ;;  %v972_v6 = vsel %vm966_vm3, %v959_v29, 920167782 }
  0xda   : > { %v962_v44 = vor.u32 %v961_v30, %v960_v27  ;;  %v1142_v50 = vand.u32 2139095040, %v6276_v9  ;;  %v6300_v57 = vsub.s32 %v6184_v24, %v786_v49  ;;  %v888_v51 = vadd.s32 536870912, %v6271_v8 }
  0xdb   : > { %v1090_v22 = vmul.u32 %v6220_v56, %v1074_v53  ;;  %v10547_v58 = vand.u32 2147483647, %v6126_v31  ;;  %vm963_vm5 = vcmp.lt.s32.totalorder %v6263_v63, 1  ;;  %vm965_vm6 = vcmp.lt.s32.totalorder %v6263_v63, 3 }
  0xdc   : > { %v6307_v26 = vshll.u32 %v939_v32, 8  ;;  %v1270_v28 = vshrl.u32 %v10559_v62, %v6285_v23  ;;  %v1094_v2 = vsel %vm1092_vm4, %v1093_v25, %v6236_v18  ;;  %v971_v24 = vsel %vm963_vm5, %v6287_v3, %v6289_v36 }
  0xdd   : > { %v973_v56 = vsel %vm965_vm6, %v6291_v37, %v972_v6  ;;  %v1273_v49 = vshrl.u32 %v10563_v59, %v6285_v23  ;;  %v976_v47 = vsel %vm966_vm3, %v962_v44, 1326507024  ;;  %v6323_v20 = vshrl.u32 %v1255_v13, 5 }
  0xde   : > { %v1269_v30 = vshll.u32 %v10557_v7, %v1257_v45  ;;  %v1143_v18 = vshrl.u32 %v1142_v50, 23  ;;  %v1261_v32 = vshrl.u32 %v10554_v10, %v6285_v23  ;;  %v1264_v41 = vshrl.u32 %v10552_v5, %v6285_v23 }
  0xdf   : > { %v1267_v11 = vshrl.u32 %v10557_v7, %v6285_v23  ;;  %v1272_v12 = vshll.u32 %v10559_v62, %v1257_v45  ;;  %v6333_v53 = vadd.s32 %v1094_v2, %v1090_v22  ;;  %vm964_vm7 = vcmp.lt.s32.totalorder %v6263_v63, 2 }
  0xe0   : > { %v1250_v13 = vand.u32 8388607, %v10547_v58  ;;  %v1271_v25 = vor.u32 %v1270_v28, %v1269_v30  ;;  %v1260_v27 = vshll.u32 %v10561_v17, %v1257_v45  ;;  %v1263_v44 = vshll.u32 %v10554_v10, %v1257_v45 }
  0xe1   : > { %v1266_v6 = vshll.u32 %v10552_v5, %v1257_v45  ;;  %v1274_v50 = vor.u32 %v1273_v49, %v1272_v12  ;;  %v974_v34 = vsel %vm964_vm7, %v971_v24, %v973_v56  ;;  %v975_v22 = vsel %vm963_vm5, %v6289_v36, %v6291_v37  ;;  %v439_v12 = vpop.permute.xlu1 %438 }
  0xe2   : > { %v977_v2 = vsel %vm965_vm6, %v959_v29, %v976_v47  ;;  %v5064_v33 = vadd.s32 4294967169, %v1143_v18  ;;  %v6349_v28 = vor.u32 %v1261_v32, %v1260_v27  ;;  %v6351_v30 = vor.u32 %v1264_v41, %v1263_v44 }
  0xe3   : > { %v1268_v0 = vor.u32 %v1267_v11, %v1266_v6  ;;  %vm1278_vm8 = vcmp.lt.s32.totalorder %v6323_v20, 4  ;;  %v789_v45 = vsub.s32 0, %v6300_v57  ;;  %v6355_v49 = vshrl.u32 %v888_v51, 30 }
  0xe4   : > { %v476_v24 = vmul.f32 %v6009_v35, %v6034_v61  ;;  %v1284_v56 = vsel %vm1278_vm8, %v1271_v25, 920167782  ;;  %v978_v29 = vsel %vm964_vm7, %v975_v22, %v977_v2  ;;  %v1288_v32 = vsel %vm1278_vm8, %v1274_v50, 1326507024 }
  0xe5   : > { %10803 = vst [vmem:[#allocation12_spill] sm:$0xff] %v6355_v49  ;;  %v6364_v47 = vmul.u32.u64.low %v6307_v26, %v974_v34  ;;  %v6365_v18 = vmul.u32.u64.high %v6307_v26, %v974_v34, %v6364_v47  ;;  %v1096_v51 = vadd.s32 536870912, %v6333_v53  ;;  %vm1275_vm9 = vcmp.lt.s32.totalorder %v6323_v20, 1 }
  0xe6   : > { %vm1277_vm10 = vcmp.lt.s32.totalorder %v6323_v20, 3  ;;  %v1149_v61 = vadd.s32 1, %v5064_v33  ;;  %v1251_v41 = vor.u32 8388608, %v1250_v13  ;;  %v1283_v11 = vsel %vm1275_vm9, %v6349_v28, %v6351_v30 }
  0xe7   : > { %v1285_v34 = vsel %vm1277_vm10, %v1268_v0, %v1284_v56  ;;  %v484_v27 = vmul.f32 %v6009_v35, %v439_v12  ;;  %v6381_v44 = vmul.u32.u64.low %v6307_v26, %v978_v29  ;;  %v6382_v6 = vmul.u32.u64.high %v6307_v26, %v978_v29, %v6381_v44 }
  0xe8   : > { %v1287_v50 = vsel %vm1275_vm9, %v6351_v30, %v1268_v0  ;;  %v1289_v33 = vsel %vm1277_vm10, %v1271_v25, %v1288_v32  ;;  %v890_v13 = vshll.u32 %v6355_v49, 30  ;;  %vm1276_vm11 = vcmp.lt.s32.totalorder %v6323_v20, 2 }
  0xe9   : > { %v5049_v22 = vmin.u32 %v789_v45, %v6300_v57  ;;  %v6392_v2 = vshrl.u32 %v1096_v51, 30  ;;  %v1286_v56 = vsel %vm1276_vm11, %v1283_v11, %v1285_v34  ;;  %vm1150_vm12 = vcmp.gt.s32.totalorder %v1149_v61, 0 }
  0xea   : > { %v968_v12 = vsel %vm966_vm3, %v6291_v37, 2102212464  ;;  %v1290_v29 = vsel %vm1276_vm11, %v1287_v50, %v1289_v33  ;;  %v1291_v25 = vshll.u32 %v1251_v41, 8  ;;  %v6402_v32 = vadd.f32 %v6015_v38, %v484_v27 }
  0xeb   : > { %10804 = vst [vmem:[#allocation13_spill] sm:$0xff] %v6392_v2  ;;  %v518_v44 = vand.u32 2139095040, %v6240_v21  ;;  %v6406_v45 = vadd.f32 %v6015_v38, %v476_v24  ;;  %v947_v51 = vshrl.u32 %v10561_v17, %v6222_v14  ;;  %v6411_v11 = vsub.s32 %v6271_v8, %v890_v13 }
  0xec   : > { %v6413_v34 = vmul.u32.u64.low %v1291_v25, %v1286_v56  ;;  %v6414_v37 = vmul.u32.u64.high %v1291_v25, %v1286_v56, %v6413_v34  ;;  %v1151_v50 = vsel %vm1150_vm12, %v1149_v61, 0  ;;  %v969_v24 = vsel %vm965_vm6, %v6289_v36, %v968_v12 }
  0xed   : > { %10805 = vst [vmem:[#allocation14_spill] sm:$0xff] %v6406_v45  ;;  %v967_v41 = vsel %vm963_vm5, %v947_v51, %v6287_v3  ;;  %v6423_v27 = vmul.u32.u64.low %v1291_v25, %v1290_v29  ;;  %v6424_v33 = vmul.u32.u64.high %v1291_v25, %v1290_v29, %v6423_v27  ;;  %v791_v14 = vclz %v5049_v22 }
  0xee   : > { %v1098_v8 = vshll.u32 %v6392_v2, 30  ;;  %v989_v13 = vadd.s32 1, %v6365_v18  ;;  %v1454_v56 = vand.u32 2139095040, %v6402_v32  ;;  %vm988_vm13 = vc.u32 %v6382_v6, %v6364_v47 }
  0xef   : > { %v1153_v61 = vand.u32 31, %v1151_v50  ;;  %v893_v3 = vsub.s32 0, %v6411_v11  ;;  %v970_v51 = vsel %vm964_vm7, %v967_v41, %v969_v24  ;;  %v1280_v36 = vsel %vm1278_vm8, %v1268_v0, 2102212464 }
  0xf0   : > { %v519_v12 = vshrl.u32 %v518_v44, 23  ;;  %v622_v22 = vand.u32 2139095040, %v6406_v45  ;;  %v1259_v29 = vshrl.u32 %v10561_v17, %v6285_v23  ;;  %v5050_v27 = vadd.s32 4294967294, %v791_v14 }
  0xf1   : > { %v6440_v58 = vsub.s32 %v6333_v53, %v1098_v8  ;;  %v990_v43 = vsel %vm988_vm13, %v989_v13, %v6365_v18  ;;  %v1455_v16 = vshrl.u32 %v1454_v56, 23  ;;  %v986_v40 = vmul.u32 %v6307_v26, %v970_v51 }
  0xf2   : > { %v1279_v63 = vsel %vm1275_vm9, %v1259_v29, %v6349_v28  ;;  %v1281_v0 = vsel %vm1277_vm10, %v6351_v30, %v1280_v36  ;;  %v6450_v44 = vsub.s32 32, %v1153_v61  ;;  %v5053_v23 = vmin.u32 %v893_v3, %v6411_v11 }
  0xf3   : > { %v1301_v53 = vadd.s32 1, %v6414_v37  ;;  %v991_v41 = vadd.s32 %v990_v43, %v986_v40  ;;  %vm1300_vm14 = vc.u32 %v6424_v33, %v6413_v34  ;;  %v5076_v18 = vadd.s32 4294967169, %v1455_v16 }
  0xf4   : > { %v5040_v26 = vadd.s32 4294967169, %v519_v12  ;;  %v1282_v24 = vsel %vm1276_vm11, %v1279_v63, %v1281_v0  ;;  %vm5051_vm15 = vcmp.lt.s32.totalorder %v5050_v27, 0  ;;  %v623_v28 = vshrl.u32 %v622_v22, 23 }
  0xf5   : > { %v1101_v14 = vsub.s32 0, %v6440_v58  ;;  %v1166_v30 = vshrl.u32 %v10559_v62, %v6450_v44  ;;  %v895_v8 = vclz %v5053_v23  ;;  %v1302_v13 = vsel %vm1300_vm14, %v1301_v53, %v6414_v37 }
  0xf6   : > { %v10556_v40 = vand.u32 2147483647, %v6276_v9  ;;  %v1461_v43 = vadd.s32 1, %v5076_v18  ;;  %v992_v56 = vadd.s32 536870912, %v991_v41  ;;  %v1298_v3 = vmul.u32 %v1291_v25, %v1282_v24 }
  0xf7   : > { %v1165_v16 = vshll.u32 %v10557_v7, %v1153_v61  ;;  %v1169_v20 = vshrl.u32 %v10563_v59, %v6450_v44  ;;  %v6466_v51 = vshrl.u32 %v1151_v50, 5  ;;  %v1157_v36 = vshrl.u32 %v10554_v10, %v6450_v44 }
  0xf8   : > { %v1160_v12 = vshrl.u32 %v10552_v5, %v6450_v44  ;;  %v1163_v37 = vshrl.u32 %v10557_v7, %v6450_v44  ;;  %v5061_v22 = vmin.u32 %v1101_v14, %v6440_v58  ;;  %v6475_v29 = vadd.s32 %v1302_v13, %v1298_v3 }
  0xf9   : > { %v1167_v25 = vor.u32 %v1166_v30, %v1165_v16  ;;  %v1168_v63 = vshll.u32 %v10559_v62, %v1153_v61  ;;  %v1156_v0 = vshll.u32 %v10561_v17, %v1153_v61  ;;  %v1159_v50 = vshll.u32 %v10554_v10, %v1153_v61 }
  0xfa   : > { %v1162_v23 = vshll.u32 %v10552_v5, %v1153_v61  ;;  %vm1462_vm0 = vcmp.gt.s32.totalorder %v1461_v43, 0  ;;  %v6482_v53 = vsel %vm5051_vm15, 0, %v5050_v27  ;;  %v6484_v18 = vshrl.u32 %v992_v56, 30 }
  0xfb   : > { %v1146_v24 = vand.u32 8388607, %v10556_v40  ;;  %v1170_v14 = vor.u32 %v1169_v20, %v1168_v63  ;;  %v6488_v13 = vor.u32 %v1157_v36, %v1156_v0  ;;  %v6490_v30 = vor.u32 %v1160_v12, %v1159_v50 }
  0xfc   : > { %10806 = vst [vmem:[#allocation15_spill] sm:$0xff] %v6484_v18  ;;  %v1164_v3 = vor.u32 %v1163_v37, %v1162_v23  ;;  %vm1174_vm1 = vcmp.lt.s32.totalorder %v6466_v51, 4  ;;  %v5054_v16 = vadd.s32 4294967294, %v895_v8  ;;  %v1103_v1 = vclz %v5061_v22  ;;  %v434_v23 = vpop.permute.xlu0 %433 }
  0xfd   : > { %v1180_v61 = vsel %vm1174_vm1, %v1167_v25, 920167782  ;;  %v1463_v27 = vsel %vm1462_vm0, %v1461_v43, 0  ;;  %v799_v56 = vsub.s32 4294967266, %v6482_v53  ;;  %v5044_v5 = vadd.s32 4294967169, %v623_v28 }
  0xfe   : > { %v1304_v10 = vadd.s32 536870912, %v6475_v29  ;;  %v994_v20 = vshll.u32 %v6484_v18, 30  ;;  %vm1171_vm2 = vcmp.lt.s32.totalorder %v6466_v51, 1  ;;  %vm1173_vm3 = vcmp.lt.s32.totalorder %v6466_v51, 3 }
  0xff   : > { %v1184_v36 = vsel %vm1174_vm1, %v1170_v14, 1326507024  ;;  %v1147_v8 = vor.u32 8388608, %v1146_v24  ;;  %v1179_v43 = vsel %vm1171_vm2, %v6488_v13, %v6490_v30  ;;  %v1181_v28 = vsel %vm1173_vm3, %v1164_v3, %v1180_v61 }
 0x100   : > { %v1465_v12 = vand.u32 31, %v1463_v27  ;;  %v6508_v37 = vadd.s32 1, %v5040_v26  ;;  %vm5055_vm4 = vcmp.lt.s32.totalorder %v5054_v16, 0  ;;  %v5062_v22 = vadd.s32 4294967294, %v1103_v1 }
 0x101   : > { %v6510_v63 = vshrl.u32 %v1304_v10, 30  ;;  %vm1172_vm5 = vcmp.lt.s32.totalorder %v6466_v51, 2  ;;  %v1183_v0 = vsel %vm1171_vm2, %v6490_v30, %v1164_v3  ;;  %v1185_v50 = vsel %vm1173_vm3, %v1167_v25, %v1184_v36 }
 0x102   : > { %v6518_v24 = vadd.s32 127, %v799_v56  ;;  %v6520_v14 = vadd.s32 1, %v5044_v5  ;;  %v6522_v26 = vsub.s32 %v991_v41, %v994_v20  ;;  %v1182_v1 = vsel %vm1172_vm5, %v1179_v43, %v1181_v28 }
 0x103   : > { %10807 = vst [vmem:[#allocation16_spill] sm:$0xff] %v6510_v63  ;;  %v6528_v10 = vadd.s32 %v6092_v60, %v6088_v52  ;;  %v6530_v61 = vsel %vm5055_vm4, 0, %v5054_v16  ;;  %v6532_v40 = vshll.u32 %v1147_v8, 8  ;;  %v6534_v7 = vsub.s32 32, %v1465_v12 }
 0x104   : > { %v6539_v5 = vadd.s32 %v6177_v19, %v6190_v4  ;;  %v1186_v41 = vsel %vm1172_vm5, %v1183_v0, %v1185_v50  ;;  %v483_v56 = vmul.f32 %v6009_v35, %v434_v23  ;;  %vm5063_vm6 = vcmp.lt.s32.totalorder %v5062_v22, 0 }
 0x105   : > { %v1306_v52 = vshll.u32 %v6510_v63, 30  ;;  %v6546_v60 = vmul.u32.u64.low %v6532_v40, %v1182_v1  ;;  %v6547_v16 = vmul.u32.u64.high %v6532_v40, %v1182_v1, %v6546_v60  ;;  %v801_v36 = vshll.u32 %v6518_v24, 23 }
 0x106   : > { %v903_v19 = vsub.s32 4294967266, %v6530_v61  ;;  %v997_v4 = vsub.s32 0, %v6522_v26  ;;  %v6556_v8 = vmul.u32.u64.low %v6532_v40, %v1186_v41  ;;  %v6557_v43 = vmul.u32.u64.high %v6532_v40, %v1186_v41, %v6556_v8 }
 0x107   : > { %v1478_v0 = vshrl.u32 %v10559_v62, %v6534_v7  ;;  %v6562_v50 = vsel %vm5063_vm6, 0, %v5062_v22  ;;  %v1155_v23 = vshrl.u32 %v10561_v17, %v6450_v44  ;;  %v1481_v24 = vshrl.u32 %v10563_v59, %v6534_v7 }
 0x108   : > { %v6569_v1 = vadd.f32 %v6015_v38, %v483_v56  ;;  %v6572_v20 = vsub.s32 %v6475_v29, %v1306_v52  ;;  %v1176_v41 = vsel %vm1174_vm1, %v1164_v3, 2102212464  ;;  %v6576_v8 = vshrl.u32 %v1463_v27, 5 }
 0x109   : > { %v10809_v25 = vmov 2102212464   ;;  %v10810_v28 = vmov 2475754826   ;;  %v10811_v44 = vmov 2131351028   ;;  %v5057_v29 = vmin.u32 %v997_v4, %v6522_v26 }
 0x10a   : > { %10808 = vst [vmem:[#allocation17_spill] sm:$0xff] %v6569_v1  ;;  %v1477_v22 = vshll.u32 %v10809_v25, %v1465_v12  ;;  %v1469_v62 = vshrl.u32 %v10810_v28, %v6534_v7  ;;  %v1472_v17 = vshrl.u32 %v10811_v44, %v6534_v7  ;;  %v1475_v56 = vshrl.u32 %v10809_v25, %v6534_v7 }
 0x10b   : > { %v10812_v59 = vmov 920167782   ;;  %v1175_v3 = vsel %vm1171_vm2, %v1155_v23, %v6488_v13  ;;  %v10813_v27 = vand.u32 2147483647, %v6402_v32  ;;  %v10814_v18 = vmov 683565275  }
 0x10c   : > { %v1480_v63 = vshll.u32 %v10812_v59, %v1465_v12  ;;  %v1479_v2 = vor.u32 %v1478_v0, %v1477_v22  ;;  %v1468_v49 = vshll.u32 %v10814_v18, %v1465_v12  ;;  %v1471_v15 = vshll.u32 %v10810_v28, %v1465_v12 }
 0x10d   : > { %v1458_v52 = vand.u32 8388607, %v10813_v27  ;;  %v1474_v45 = vshll.u32 %v10811_v44, %v1465_v12  ;;  %v1309_v9 = vsub.s32 0, %v6572_v20  ;;  %v1177_v4 = vsel %vm1173_vm3, %v6490_v30, %v1176_v41 }
 0x10e   : > { %v1482_v21 = vor.u32 %v1481_v24, %v1480_v63  ;;  %v1197_v31 = vadd.s32 1, %v6547_v16  ;;  %v1350_v13 = vand.u32 2139095040, %v6569_v1  ;;  %v6601_v23 = vor.u32 %v1469_v62, %v1468_v49 }
 0x10f   : > { %v6603_v0 = vor.u32 %v1472_v17, %v1471_v15  ;;  %v1476_v22 = vor.u32 %v1475_v56, %v1474_v45  ;;  %vm1486_vm7 = vcmp.lt.s32.totalorder %v6576_v8, 4  ;;  %v899_v12 = vsub.s32 32, %v6530_v61 }
 0x110   : > { %v904_v63 = vadd.s32 127, %v903_v19  ;;  %vm1196_vm8 = vc.u32 %v6557_v43, %v6546_v60  ;;  %v1492_v30 = vsel %vm1486_vm7, %v1479_v2, 920167782  ;;  %vm526_vm9 = vcmp.gt.s32.totalorder %v6508_v37, 0 }
 0x111   : > { %v1111_v24 = vsub.s32 4294967266, %v6562_v50  ;;  %v999_v62 = vclz %v5057_v29  ;;  %v1178_v17 = vsel %vm1172_vm5, %v1175_v3, %v1177_v4  ;;  %v1496_v15 = vsel %vm1486_vm7, %v1482_v21, 1326507024 }
 0x112   : > { %v5069_v49 = vmin.u32 %v1309_v9, %v6572_v20  ;;  %vm1483_vm10 = vcmp.lt.s32.totalorder %v6576_v8, 1  ;;  %vm1485_vm11 = vcmp.lt.s32.totalorder %v6576_v8, 3  ;;  %v1351_v45 = vshrl.u32 %v1350_v13, 23 }
 0x113   : > { %v1198_v19 = vsel %vm1196_vm8, %v1197_v31, %v6547_v16  ;;  %v1459_v41 = vor.u32 8388608, %v1458_v52  ;;  %v1491_v56 = vsel %vm1483_vm10, %v6601_v23, %v6603_v0  ;;  %v1493_v51 = vsel %vm1485_vm11, %v1476_v22, %v1492_v30 }
 0x114   : > { %v905_v29 = vshll.u32 %v904_v63, 23  ;;  %v1194_v21 = vmul.u32 %v6532_v40, %v1178_v17  ;;  %v1495_v9 = vsel %vm1483_vm10, %v6603_v0, %v1476_v22  ;;  %v1497_v3 = vsel %vm1485_vm11, %v1479_v2, %v1496_v15 }
 0x115   : > { %v10815_v31 = vsub.s32 32, %v6482_v53  ;;  %v1112_v27 = vadd.s32 127, %v1111_v24  ;;  %v5058_v52 = vadd.s32 4294967294, %v999_v62  ;;  %vm1484_vm12 = vcmp.lt.s32.totalorder %v6576_v8, 2 }
 0x116   : > { %v802_v4 = vor.u32 4788187, %v801_v36  ;;  %v6637_v13 = vadd.s32 %v1198_v19, %v1194_v21  ;;  %v1494_v40 = vsel %vm1484_vm12, %v1491_v56, %v1493_v51  ;;  %v5072_v63 = vadd.s32 4294967169, %v1351_v45  ;;  %v449_v19 = vpop.permute.xlu1 %448 }
 0x117   : > { %v797_v16 = vshrl.u32 %v6528_v10, %v10815_v31  ;;  %v901_v30 = vshrl.u32 %v6539_v5, %v899_v12  ;;  %v1311_v17 = vclz %v5069_v49  ;;  %v1498_v2 = vsel %vm1484_vm12, %v1495_v9, %v1497_v3 }
 0x118   : > { %v6644_v15 = vshll.u32 %v1459_v41, 8  ;;  %v900_v10 = vshll.u32 %v6411_v11, %v6530_v61  ;;  %v906_v24 = vor.u32 4788187, %v905_v29  ;;  %v1091_v36 = vadd.s32 %v6235_v54, %v6249_v48 }
 0x119   : > { %v1107_v62 = vsub.s32 32, %v6562_v50  ;;  %v1113_v56 = vshll.u32 %v1112_v27, 23  ;;  %vm5059_vm13 = vcmp.lt.s32.totalorder %v5058_v52, 0  ;;  %v1200_v49 = vadd.s32 536870912, %v6637_v13 }
 0x11a   : > { %v6652_v5 = vmul.u32.u64.low %v6644_v15, %v1494_v40  ;;  %v6653_v12 = vmul.u32.u64.high %v6644_v15, %v1494_v40, %v6652_v5  ;;  %v6658_v45 = vmul.u32.u64.low %v6644_v15, %v1498_v2  ;;  %v6659_v41 = vmul.u32.u64.high %v6644_v15, %v1498_v2, %v6658_v45 }
 0x11b   : > { %v1357_v11 = vadd.s32 1, %v5072_v63  ;;  %v10816_v54 = vshll.u32 %v6300_v57, %v6482_v53  ;;  %v902_v61 = vor.u32 %v901_v30, %v900_v10  ;;  %v5070_v51 = vadd.s32 4294967294, %v1311_v17 }
 0x11c   : > { %v486_v29 = vmul.f32 %v6009_v35, %v449_v19  ;;  %v803_v21 = vand.u32 2147483647, %v802_v4  ;;  %v527_v9 = vsel %vm526_vm9, %v6508_v37, 0  ;;  %vm630_vm14 = vcmp.gt.s32.totalorder %v6520_v14, 0 }
 0x11d   : > { %v798_v48 = vor.u32 %v797_v16, %v10816_v54  ;;  %v1109_v3 = vshrl.u32 %v1091_v36, %v1107_v62  ;;  %v907_v31 = vand.u32 2147483647, %v906_v24  ;;  %v1108_v27 = vshll.u32 %v6440_v58, %v6562_v50 }
 0x11e   : > { %v6671_v40 = vsel %vm5059_vm13, 0, %v5058_v52  ;;  %v1488_v57 = vsel %vm1486_vm7, %v1476_v22, 2102212464  ;;  %v1114_v53 = vor.u32 4788187, %v1113_v56  ;;  %v6675_v16 = vshrl.u32 %v1200_v49, 30 }
 0x11f   : > { %v1467_v35 = vshrl.u32 %v10814_v18, %v6534_v7  ;;  %vm1358_vm15 = vcmp.gt.s32.totalorder %v1357_v11, 0  ;;  %v805_v37 = vcvt.s32.f32 %v798_v48  ;;  %v909_v4 = vcvt.s32.f32 %v902_v61 }
 0x120   : > { %10817 = vst [vmem:[#allocation18_spill] sm:$0xff] %v6675_v16  ;;  %vm5071_vm0 = vcmp.lt.s32.totalorder %v5070_v51, 0  ;;  %v6680_v63 = vadd.f32 %v6015_v38, %v486_v29  ;;  %v1110_v30 = vor.u32 %v1109_v3, %v1108_v27  ;;  %v1007_v58 = vsub.s32 4294967266, %v6671_v40 }
 0x121   : > { %v1487_v50 = vsel %vm1483_vm10, %v1467_v35, %v6601_v23  ;;  %v1489_v22 = vsel %vm1485_vm11, %v6603_v0, %v1488_v57  ;;  %vm725_vm1 = vcmp.lt.s32.totalorder %v6018_v39, 0  ;;  %v806_v7 = vmul.f32 %v805_v37, %v803_v21  ;;  %v444_v23 = vpop.permute.xlu0 %443 }
 0x122   : > { %10818 = vst [vmem:[#allocation19_spill] sm:$0xff] %v6680_v63  ;;  %vm829_vm2 = vcmp.lt.s32.totalorder %v6023_v46, 0  ;;  %v910_v52 = vmul.f32 %v909_v4, %v907_v31  ;;  %v1509_v38 = vadd.s32 1, %v6653_v12  ;;  %v1359_v17 = vsel %vm1358_vm15, %v1357_v11, 0 }
 0x123   : > { %v1115_v2 = vand.u32 2147483647, %v1114_v53  ;;  %v6692_v10 = vsel %vm5071_vm0, 0, %v5070_v51  ;;  %v1202_v24 = vshll.u32 %v6675_v16, 30  ;;  %vm1508_vm3 = vc.u32 %v6659_v41, %v6652_v5  ;;  %v6712_v51 = vld [vmem:[%s10536_s5] ss:$0 sm:$0xff] }
 0x124   : > { %v6697_v36 = vshrl.u32 %v527_v9, 5  ;;  %v6699_v0 = vand.u32 31, %v527_v9  ;;  %v1490_v62 = vsel %vm1484_vm12, %v1487_v50, %v1489_v22  ;;  %v1662_v19 = vand.u32 2139095040, %v6680_v63 }
 0x125   : > { %v631_v56 = vsel %vm630_vm14, %v6520_v14, 0  ;;  %v1117_v49 = vcvt.s32.f32 %v1110_v30  ;;  %v1008_v45 = vadd.s32 127, %v1007_v58  ;;  %v1361_v11 = vand.u32 31, %v1359_v17  ;;  %v6739_v30 = vld [vmem:[%s10536_s5 + $0x1] ss:$0 sm:$0xff] }
 0x126   : > { %10819 = vst [vmem:[#allocation20_spill] sm:$0xff] %v6697_v36  ;;  %10820 = vst [vmem:[#allocation21_spill] sm:$0xff] %v6699_v0  ;;  %v807_v54 = vxor.u32 2147483648, %v806_v7  ;;  %v1319_v48 = vsub.s32 4294967266, %v6692_v10  ;;  %v1510_v61 = vsel %vm1508_vm3, %v1509_v38, %v6653_v12  ;;  %v485_v8 = vmul.f32 %v6712_v51, %v444_v23 }
 0x127   : > { %v911_v29 = vxor.u32 2147483648, %v910_v52  ;;  %v6715_v21 = vmul.f32 %v1117_v49, %v1115_v2  ;;  %v6718_v14 = vsub.s32 %v6637_v13, %v1202_v24  ;;  %v1506_v9 = vmul.u32 %v6644_v15, %v1490_v62 }
 0x128   : > { %v6722_v3 = vsub.s32 32, %v6699_v0  ;;  %v6724_v31 = vshrl.u32 %v631_v56, 5  ;;  %v1003_v12 = vsub.s32 32, %v6671_v40  ;;  %v1663_v27 = vshrl.u32 %v1662_v19, 23 }
 0x129   : > { %v6727_v57 = vand.u32 31, %v631_v56  ;;  %v1009_v53 = vshll.u32 %v1008_v45, 23  ;;  %v6729_v35 = vadd.s32 %v1510_v61, %v1506_v9  ;;  %v6731_v37 = vsub.s32 32, %v1361_v11 }
 0x12a   : > { %10821 = vst [vmem:[#allocation22_spill] sm:$0xff] %v6722_v3  ;;  %10822 = vst [vmem:[#allocation23_spill] sm:$0xff] %v6724_v31  ;;  %v987_v13 = vadd.s32 %v6364_v47, %v6382_v6  ;;  %v1315_v15 = vsub.s32 32, %v6692_v10  ;;  %v1320_v4 = vadd.s32 127, %v1319_v48  ;;  %v6742_v58 = vadd.f32 %v6739_v30, %v485_v8 }
 0x12b   : > { %10823 = vst [vmem:[#allocation24_spill] sm:$0xff] %v6727_v57  ;;  %v6746_v50 = vsel %vm725_vm1, %v807_v54, %v806_v7  ;;  %v6750_v22 = vsel %vm829_vm2, %v911_v29, %v910_v52  ;;  %v1205_v6 = vsub.s32 0, %v6718_v14  ;;  %v1004_v38 = vshll.u32 %v6522_v26, %v6671_v40 }
 0x12c   : > { %10824 = vst [vmem:[#allocation25_spill] sm:$0xff] %v6742_v58  ;;  %10825 = vst [vmem:[#allocation26_spill] sm:$0xff] %v6746_v50  ;;  %v1005_v2 = vshrl.u32 %v987_v13, %v1003_v12  ;;  %v1299_v24 = vadd.s32 %v6413_v34, %v6424_v33  ;;  %v5084_v23 = vadd.s32 4294967169, %v1663_v27  ;;  %v1010_v62 = vor.u32 4788187, %v1009_v53 }
 0x12d   : > { %10826 = vst [vmem:[#allocation27_spill] sm:$0xff] %v6750_v22  ;;  %v1512_v7 = vadd.s32 536870912, %v6729_v35  ;;  %v10585_v19 = vand.u32 2147483647, %v6569_v1  ;;  %v1374_v52 = vshrl.u32 %v10812_v59, %v6731_v37  ;;  %v1316_v56 = vshll.u32 %v6572_v20, %v6692_v10 }
 0x12e   : > { %v1317_v49 = vshrl.u32 %v1299_v24, %v1315_v15  ;;  %v1321_v45 = vshll.u32 %v1320_v4, 23  ;;  %v1558_v26 = vand.u32 2139095040, %v6742_v58  ;;  %v5065_v40 = vmin.u32 %v1205_v6, %v6718_v14 }
 0x12f   : > { %v1365_v34 = vshrl.u32 %v10810_v28, %v6731_v37  ;;  %v1373_v33 = vshll.u32 %v10809_v25, %v1361_v11  ;;  %v10827_v54 = vmov 1326507024   ;;  %v6771_v61 = vshrl.u32 %v1359_v17, 5 }
 0x130   : > { %v1377_v48 = vshrl.u32 %v10827_v54, %v6731_v37  ;;  %v1368_v8 = vshrl.u32 %v10811_v44, %v6731_v37  ;;  %v1371_v20 = vshrl.u32 %v10809_v25, %v6731_v37  ;;  %v1669_v10 = vadd.s32 1, %v5084_v23 }
 0x131   : > { %v6777_v29 = vshrl.u32 %v1512_v7, 30  ;;  %v1364_v9 = vshll.u32 %v10814_v18, %v1361_v11  ;;  %v1375_v12 = vor.u32 %v1374_v52, %v1373_v33  ;;  %v1376_v27 = vshll.u32 %v10812_v59, %v1361_v11  ;;  %v459_v7 = vpop.permute.xlu1 %458 }
 0x132   : > { %v1354_v53 = vand.u32 8388607, %v10585_v19  ;;  %v1367_v17 = vshll.u32 %v10810_v28, %v1361_v11  ;;  %v1370_v13 = vshll.u32 %v10811_v44, %v1361_v11  ;;  %v1559_v15 = vshrl.u32 %v1558_v26, 23 }
 0x133   : > { %10828 = vst [vmem:[#allocation28_spill] sm:$0xff] %v6777_v29  ;;  %vm1037_vm4 = vcmp.lt.s32.totalorder %v6030_v55, 0  ;;  %v1322_v4 = vor.u32 4788187, %v1321_v45  ;;  %v1207_v6 = vclz %v5065_v40  ;;  %v1366_v24 = vor.u32 %v1365_v34, %v1364_v9 }
 0x134   : > { %v1378_v23 = vor.u32 %v1377_v48, %v1376_v27  ;;  %v1369_v47 = vor.u32 %v1368_v8, %v1367_v17  ;;  %v1372_v16 = vor.u32 %v1371_v20, %v1370_v13  ;;  %vm1382_vm5 = vcmp.lt.s32.totalorder %v6771_v61, 4 }
 0x135   : > { %vm1670_vm6 = vcmp.gt.s32.totalorder %v1669_v10, 0  ;;  %v1006_v52 = vor.u32 %v1005_v2, %v1004_v38  ;;  %v1318_v33 = vor.u32 %v1317_v49, %v1316_v56  ;;  %v1514_v19 = vshll.u32 %v6777_v29, 30 }
 0x136   : > { %v1388_v11 = vsel %vm1382_vm5, %v1375_v12, 920167782  ;;  %v1011_v26 = vand.u32 2147483647, %v1010_v62  ;;  %v1355_v22 = vor.u32 8388608, %v1354_v53  ;;  %v5080_v46 = vadd.s32 4294967169, %v1559_v15 }
 0x137   : > { %v488_v45 = vmul.f32 %v6712_v51, %v459_v7  ;;  %vm1379_vm7 = vcmp.lt.s32.totalorder %v6771_v61, 1  ;;  %vm1381_vm8 = vcmp.lt.s32.totalorder %v6771_v61, 3  ;;  %v1392_v40 = vsel %vm1382_vm5, %v1378_v23, 1326507024 }
 0x138   : > { %v1671_v34 = vsel %vm1670_vm6, %v1669_v10, 0  ;;  %v1323_v38 = vand.u32 2147483647, %v1322_v4  ;;  %v5066_v2 = vadd.s32 4294967294, %v1207_v6  ;;  %v1387_v56 = vsel %vm1379_vm7, %v1366_v24, %v1369_v47 }
 0x139   : > { %v1389_v62 = vsel %vm1381_vm8, %v1372_v16, %v1388_v11  ;;  %v1013_v49 = vcvt.s32.f32 %v1006_v52  ;;  %v1325_v48 = vcvt.s32.f32 %v1318_v33  ;;  %v6800_v8 = vsub.s32 %v6729_v35, %v1514_v19 }
 0x13a   : > { %vm1380_vm9 = vcmp.lt.s32.totalorder %v6771_v61, 2  ;;  %v1391_v20 = vsel %vm1379_vm7, %v1369_v47, %v1372_v16  ;;  %v1393_v10 = vsel %vm1381_vm8, %v1375_v12, %v1392_v40  ;;  %v1673_v9 = vand.u32 31, %v1671_v34 }
 0x13b   : > { %v1565_v27 = vadd.s32 1, %v5080_v46  ;;  %v6807_v53 = vmul.f32 %v1013_v49, %v1011_v26  ;;  %v1390_v17 = vsel %vm1380_vm9, %v1387_v56, %v1389_v62  ;;  %v10588_v13 = vand.u32 2147483647, %v6680_v63 }
 0x13c   : > { %v6813_v35 = vadd.f32 %v6739_v30, %v488_v45  ;;  %v10830_v19 = vxor.u32 2147483648, %v6715_v21  ;;  %v6822_v12 = vmul.f32 %v1325_v48, %v1323_v38  ;;  %vm5067_vm10 = vcmp.lt.s32.totalorder %v5066_v2, 0 }
 0x13d   : > { %v6824_v46 = vshll.u32 %v1355_v22, 8  ;;  %v1517_v4 = vsub.s32 0, %v6800_v8  ;;  %v1363_v6 = vshrl.u32 %v10814_v18, %v6731_v37  ;;  %v1384_v23 = vsel %vm1382_vm5, %v1372_v16, 2102212464 }
 0x13e   : > { %10829 = vst [vmem:[#allocation29_spill] sm:$0xff] %v6813_v35  ;;  %v6820_v15 = vsel %vm1037_vm4, %v10830_v19, %v6715_v21  ;;  %10832 = vst [vmem:[#allocation31_spill] sm:$0xff] %v6822_v12  ;;  %v1394_v7 = vsel %vm1380_vm9, %v1391_v20, %v1393_v10  ;;  %v6838_v33 = vsub.s32 32, %v1673_v9  ;;  %vm1566_vm11 = vcmp.gt.s32.totalorder %v1565_v27, 0 }
 0x13f   : > { %10831 = vst [vmem:[#allocation30_spill] sm:$0xff] %v6820_v15  ;;  %v6834_v52 = vmul.u32.u64.low %v6824_v46, %v1390_v17  ;;  %v6835_v21 = vmul.u32.u64.high %v6824_v46, %v1390_v17, %v6834_v52  ;;  %v6841_v11 = vsel %vm5067_vm10, 0, %v5066_v2  ;;  %v1666_v37 = vand.u32 8388607, %v10588_v13 }
 0x140   : > { %v1870_v16 = vand.u32 2139095040, %v6813_v35  ;;  %v1383_v26 = vsel %vm1379_vm7, %v1363_v6, %v1366_v24  ;;  %v1385_v45 = vsel %vm1381_vm8, %v1369_v47, %v1384_v23  ;;  %v6857_v2 = vadd.s32 %v6546_v60, %v6557_v43 }
 0x141   : > { %v6851_v40 = vmul.u32.u64.low %v6824_v46, %v1394_v7  ;;  %v6852_v38 = vmul.u32.u64.high %v6824_v46, %v1394_v7, %v6851_v40  ;;  %v1567_v49 = vsel %vm1566_vm11, %v1565_v27, 0  ;;  %v6863_v24 = vadd.s32 %v6652_v5, %v6659_v41  ;;  %v454_v7 = vpop.permute.xlu0 %453 }
 0x142   : > { %v5077_v47 = vmin.u32 %v1517_v4, %v6800_v8  ;;  %v1686_v20 = vshrl.u32 %v10812_v59, %v6838_v33  ;;  %v1215_v10 = vsub.s32 4294967266, %v6841_v11  ;;  %v1386_v60 = vsel %vm1380_vm9, %v1383_v26, %v1385_v45 }
 0x143   : > { %v1689_v43 = vshrl.u32 %v10827_v54, %v6838_v33  ;;  %v1871_v27 = vshrl.u32 %v1870_v16, 23  ;;  %v1667_v17 = vor.u32 8388608, %v1666_v37  ;;  %v6873_v19 = vshrl.u32 %v1671_v34, 5 }
 0x144   : > { %v1685_v5 = vshll.u32 %v10809_v25, %v1673_v9  ;;  %v1569_v41 = vand.u32 31, %v1567_v49  ;;  %v1677_v4 = vshrl.u32 %v10810_v28, %v6838_v33  ;;  %v1680_v6 = vshrl.u32 %v10811_v44, %v6838_v33 }
 0x145   : > { %v1683_v61 = vshrl.u32 %v10809_v25, %v6838_v33  ;;  %v1688_v23 = vshll.u32 %v10812_v59, %v1673_v9  ;;  %v1519_v26 = vclz %v5077_v47  ;;  %v1405_v37 = vadd.s32 1, %v6835_v21 }
 0x146   : > { %v1676_v34 = vshll.u32 %v10814_v18, %v1673_v9  ;;  %v1687_v16 = vor.u32 %v1686_v20, %v1685_v5  ;;  %v1679_v45 = vshll.u32 %v10810_v28, %v1673_v9  ;;  %v1682_v40 = vshll.u32 %v10811_v44, %v1673_v9 }
 0x147   : > { %v1690_v13 = vor.u32 %v1689_v43, %v1688_v23  ;;  %v5092_v56 = vadd.s32 4294967169, %v1871_v27  ;;  %v6887_v22 = vadd.s32 127, %v1215_v10  ;;  %vm1404_vm12 = vc.u32 %v6852_v38, %v6834_v52 }
 0x148   : > { %v6891_v48 = vsub.s32 32, %v1569_v41  ;;  %v487_v47 = vmul.f32 %v6712_v51, %v454_v7  ;;  %v6894_v62 = vor.u32 %v1677_v4, %v1676_v34  ;;  %v6896_v29 = vor.u32 %v1680_v6, %v1679_v45 }
 0x149   : > { %v1684_v20 = vor.u32 %v1683_v61, %v1682_v40  ;;  %vm1694_vm13 = vcmp.lt.s32.totalorder %v6873_v19, 4  ;;  %v1402_v9 = vmul.u32 %v6824_v46, %v1386_v60  ;;  %v6902_v43 = vshll.u32 %v1667_v17, 8 }
 0x14a   : > { %v1700_v10 = vsel %vm1694_vm13, %v1687_v16, 920167782  ;;  %v10833_v27 = vand.u32 2147483647, %v6742_v58  ;;  %v6908_v23 = vadd.s32 4294967294, %v1519_v26  ;;  %v1406_v4 = vsel %vm1404_vm12, %v1405_v37, %v6835_v21 }
 0x14b   : > { %v1704_v6 = vsel %vm1694_vm13, %v1690_v13, 1326507024  ;;  %v1877_v61 = vadd.s32 1, %v5092_v56  ;;  %vm1691_vm14 = vcmp.lt.s32.totalorder %v6873_v19, 1  ;;  %vm1693_vm15 = vcmp.lt.s32.totalorder %v6873_v19, 3 }
 0x14c   : > { %v6906_v5 = vand.u32 8388607, %v10833_v27  ;;  %v1582_v46 = vshrl.u32 %v10812_v59, %v6891_v48  ;;  %v6918_v60 = vadd.f32 %v6739_v30, %v487_v47  ;;  %v1699_v17 = vsel %vm1691_vm14, %v6894_v62, %v6896_v29 }
 0x14d   : > { %v1701_v21 = vsel %vm1693_vm15, %v1684_v20, %v1700_v10  ;;  %v1703_v13 = vsel %vm1691_vm14, %v6896_v29, %v1684_v20  ;;  %v1585_v56 = vshrl.u32 %v10827_v54, %v6891_v48  ;;  %v1705_v7 = vsel %vm1693_vm15, %v1687_v16, %v1704_v6 }
 0x14e   : > { %10834 = vst [vmem:[#allocation32_spill] sm:$0xff] %v6918_v60  ;;  %v6933_v26 = vshrl.u32 %v1567_v49, 5  ;;  %v1573_v37 = vshrl.u32 %v10810_v28, %v6891_v48  ;;  %v1581_v34 = vshll.u32 %v10809_v25, %v1569_v41  ;;  %v1576_v45 = vshrl.u32 %v10811_v44, %v6891_v48 }
 0x14f   : > { %v1579_v40 = vshrl.u32 %v10809_v25, %v6891_v48  ;;  %v1584_v47 = vshll.u32 %v10812_v59, %v1569_v41  ;;  %vm1878_vm0 = vcmp.gt.s32.totalorder %v1877_v61, 0  ;;  %v6943_v10 = vadd.s32 %v1406_v4, %v1402_v9 }
 0x150   : > { %vm1692_vm3 = vcmp.lt.s32.totalorder %v6873_v19, 2  ;;  %v1583_v49 = vor.u32 %v1582_v46, %v1581_v34  ;;  %v1766_v16 = vand.u32 2139095040, %v6918_v60  ;;  %v1572_v27 = vshll.u32 %v10814_v18, %v1569_v41 }
 0x151   : > { %v1575_v6 = vshll.u32 %v10810_v28, %v1569_v41  ;;  %v1578_v15 = vshll.u32 %v10811_v44, %v1569_v41  ;;  %v1586_v55 = vor.u32 %v1585_v56, %v1584_v47  ;;  %v1702_v50 = vsel %vm1692_vm3, %v1699_v17, %v1701_v21  ;;  %v469_v47 = vpop.permute.xlu1 %468 }
 0x152   : > { %v1706_v39 = vsel %vm1692_vm3, %v1703_v13, %v1705_v7  ;;  %v1563_v9 = vor.u32 8388608, %v6906_v5  ;;  %v1879_v4 = vsel %vm1878_vm0, %v1877_v61, 0  ;;  %v6955_v31 = vor.u32 %v1573_v37, %v1572_v27 }
 0x153   : > { %v6957_v46 = vor.u32 %v1576_v45, %v1575_v6  ;;  %v1580_v34 = vor.u32 %v1579_v40, %v1578_v15  ;;  %vm1590_vm5 = vcmp.lt.s32.totalorder %v6933_v26, 4  ;;  %v1408_v36 = vadd.s32 536870912, %v6943_v10 }
 0x154   : > { %v1696_v41 = vsel %vm1694_vm13, %v1684_v20, 2102212464  ;;  %v1596_v17 = vsel %vm1590_vm5, %v1583_v49, 920167782  ;;  %v1767_v21 = vshrl.u32 %v1766_v16, 23  ;;  %v1881_v15 = vand.u32 31, %v1879_v4 }
 0x155   : > { %v6966_v13 = vmul.u32.u64.low %v6902_v43, %v1702_v50  ;;  %v6967_v5 = vmul.u32.u64.high %v6902_v43, %v1702_v50, %v6966_v13  ;;  %v1600_v61 = vsel %vm1590_vm5, %v1586_v55, 1326507024  ;;  %vm1587_vm6 = vcmp.lt.s32.totalorder %v6933_v26, 1 }
 0x156   : > { %v6973_v56 = vmul.u32.u64.low %v6902_v43, %v1706_v39  ;;  %v6974_v7 = vmul.u32.u64.high %v6902_v43, %v1706_v39, %v6973_v56  ;;  %vm1589_vm7 = vcmp.lt.s32.totalorder %v6933_v26, 3  ;;  %vm5079_vm8 = vcmp.lt.s32.totalorder %v6908_v23, 0 }
 0x157   : > { %v1675_v20 = vshrl.u32 %v10814_v18, %v6838_v33  ;;  %v1595_v50 = vsel %vm1587_vm6, %v6955_v31, %v6957_v46  ;;  %v1597_v55 = vsel %vm1589_vm7, %v1580_v34, %v1596_v17  ;;  %v6987_v37 = vshrl.u32 %v1408_v36, 30 }
 0x158   : > { %v1599_v39 = vsel %vm1587_vm6, %v6957_v46, %v1580_v34  ;;  %v1601_v45 = vsel %vm1589_vm7, %v1583_v49, %v1600_v61  ;;  %v5088_v40 = vadd.s32 4294967169, %v1767_v21  ;;  %v1697_v16 = vsel %vm1693_vm15, %v6896_v29, %v1696_v41 }
 0x159   : > { %10835 = vst [vmem:[#allocation33_spill] sm:$0xff] %v6987_v37  ;;  %v1695_v33 = vsel %vm1691_vm14, %v1675_v20, %v6894_v62  ;;  %vm1588_vm9 = vcmp.lt.s32.totalorder %v6933_v26, 2  ;;  %v7001_v36 = vsub.s32 32, %v1881_v15  ;;  %v10836_v6 = vsub.s32 32, %v6841_v11 }
 0x15a   : > { %v1598_v62 = vsel %vm1588_vm9, %v1595_v50, %v1597_v55  ;;  %v1602_v29 = vsel %vm1588_vm9, %v1599_v39, %v1601_v45  ;;  %v7015_v41 = vshll.u32 %v1563_v9, 8  ;;  %v490_v61 = vmul.f32 %v6712_v51, %v469_v47 }
 0x15b   : > { %v7008_v49 = vshrl.u32 %v6857_v2, %v10836_v6  ;;  %v7022_v56 = vsel %vm5079_vm8, 0, %v6908_v23  ;;  %v1410_v2 = vshll.u32 %v6987_v37, 30  ;;  %v1698_v20 = vsel %vm1692_vm3, %v1695_v33, %v1697_v16 }
 0x15c   : > { %v1773_v50 = vadd.s32 1, %v5088_v40  ;;  %v1717_v55 = vadd.s32 1, %v6967_v5  ;;  %v7029_v9 = vmul.u32.u64.low %v7015_v41, %v1598_v62  ;;  %v7030_v39 = vmul.u32.u64.high %v7015_v41, %v1598_v62, %v7029_v9 }
 0x15d   : > { %v1894_v45 = vshrl.u32 %v10812_v59, %v7001_v36  ;;  %vm1716_vm10 = vc.u32 %v6974_v7, %v6966_v13  ;;  %v7038_v23 = vmul.u32.u64.low %v7015_v41, %v1602_v29  ;;  %v7039_v47 = vmul.u32.u64.high %v7015_v41, %v1602_v29, %v7038_v23 }
 0x15e   : > { %v1897_v19 = vshrl.u32 %v10827_v54, %v7001_v36  ;;  %v7043_v40 = vshrl.u32 %v1879_v4, 5  ;;  %v1885_v33 = vshrl.u32 %v10810_v28, %v7001_v36  ;;  %v1893_v16 = vshll.u32 %v10809_v25, %v1881_v15 }
 0x15f   : > { %v7049_v6 = vadd.f32 %v6739_v30, %v490_v61  ;;  %v1888_v62 = vshrl.u32 %v10811_v44, %v7001_v36  ;;  %v1891_v29 = vshrl.u32 %v10809_v25, %v7001_v36  ;;  %v1896_v23 = vshll.u32 %v10812_v59, %v1881_v15 }
 0x160   : > { %vm1774_vm11 = vcmp.gt.s32.totalorder %v1773_v50, 0  ;;  %v1714_v4 = vmul.u32 %v6902_v43, %v1698_v20  ;;  %v1718_v17 = vsel %vm1716_vm10, %v1717_v55, %v6967_v5  ;;  %v1884_v27 = vshll.u32 %v10814_v18, %v1881_v15 }
 0x161   : > { %10837 = vst [vmem:[#allocation34_spill] sm:$0xff] %v7049_v6  ;;  %v1895_v21 = vor.u32 %v1894_v45, %v1893_v16  ;;  %v1592_v61 = vsel %vm1590_vm5, %v1580_v34, 2102212464  ;;  %v1887_v37 = vshll.u32 %v10810_v28, %v1881_v15  ;;  %v1890_v3 = vshll.u32 %v10811_v44, %v1881_v15 }
 0x162   : > { %v1898_v0 = vor.u32 %v1897_v19, %v1896_v23  ;;  %v1571_v57 = vshrl.u32 %v10814_v18, %v6891_v48  ;;  %v10838_v58 = vand.u32 2147483647, %v6813_v35  ;;  %v7067_v43 = vor.u32 %v1885_v33, %v1884_v27 }
 0x163   : > { %v1775_v5 = vsel %vm1774_vm11, %v1773_v50, 0  ;;  %v7069_v20 = vor.u32 %v1888_v62, %v1887_v37  ;;  %v7071_v55 = vor.u32 %v1891_v29, %v1890_v3  ;;  %vm1902_vm12 = vcmp.lt.s32.totalorder %v7043_v40, 4 }
 0x164   : > { %v1874_v63 = vand.u32 8388607, %v10838_v58  ;;  %v2078_v34 = vand.u32 2139095040, %v7049_v6  ;;  %v7075_v45 = vadd.s32 %v1718_v17, %v1714_v4  ;;  %v1591_v48 = vsel %vm1587_vm6, %v1571_v57, %v6955_v31 }
 0x165   : > { %v1593_v58 = vsel %vm1589_vm7, %v6957_v46, %v1592_v61  ;;  %v1908_v15 = vsel %vm1902_vm12, %v1895_v21, 920167782  ;;  %v7086_v3 = vsub.s32 %v6943_v10, %v1410_v2  ;;  %v1613_v37 = vadd.s32 1, %v7030_v39 }
 0x166   : > { %v1912_v27 = vsel %vm1902_vm12, %v1898_v0, 1326507024  ;;  %v1777_v17 = vand.u32 31, %v1775_v5  ;;  %vm1612_vm13 = vc.u32 %v7039_v47, %v7029_v9  ;;  %v1875_v31 = vor.u32 8388608, %v1874_v63 }
 0x167   : > { %vm1899_vm14 = vcmp.lt.s32.totalorder %v7043_v40, 1  ;;  %vm1901_vm15 = vcmp.lt.s32.totalorder %v7043_v40, 3  ;;  %v1594_v57 = vsel %vm1588_vm9, %v1591_v48, %v1593_v58  ;;  %v2079_v46 = vshrl.u32 %v2078_v34, 23  ;;  %v464_v58 = vpop.permute.xlu0 %463 }
 0x168   : > { %v1907_v10 = vsel %vm1899_vm14, %v7067_v43, %v7069_v20  ;;  %v1909_v0 = vsel %vm1901_vm15, %v7071_v55, %v1908_v15  ;;  %v1523_v2 = vsub.s32 32, %v7022_v56  ;;  %v1720_v63 = vadd.s32 536870912, %v7075_v45 }
 0x169   : > { %v1911_v26 = vsel %vm1899_vm14, %v7069_v20, %v7071_v55  ;;  %v1913_v50 = vsel %vm1901_vm15, %v1895_v21, %v1912_v27  ;;  %v10839_v19 = vshll.u32 %v6718_v14, %v6841_v11  ;;  %v1614_v16 = vsel %vm1612_vm13, %v1613_v37, %v7030_v39 }
 0x16a   : > { %vm1900_vm0 = vcmp.lt.s32.totalorder %v7043_v40, 2  ;;  %v7120_v62 = vsub.s32 32, %v1777_v17  ;;  %v10840_v29 = vshll.u32 %v6887_v22, 23  ;;  %v1413_v4 = vsub.s32 0, %v7086_v3 }
 0x16b   : > { %v7116_v33 = vor.u32 %v7008_v49, %v10839_v19  ;;  %v1610_v21 = vmul.u32 %v7015_v41, %v1594_v57  ;;  %v1910_v14 = vsel %vm1900_vm0, %v1907_v10, %v1909_v0  ;;  %v1914_v49 = vsel %vm1900_vm0, %v1911_v26, %v1913_v50 }
 0x16c   : > { %v7124_v23 = vor.u32 4788187, %v10840_v29  ;;  %v7133_v39 = vshll.u32 %v1875_v31, 8  ;;  %v5100_v61 = vadd.s32 4294967169, %v2079_v46  ;;  %v7136_v34 = vshrl.u32 %v6863_v24, %v1523_v2 }
 0x16d   : > { %v7138_v22 = vshrl.u32 %v1720_v63, 30  ;;  %v7140_v48 = vadd.s32 %v1614_v16, %v1610_v21  ;;  %v10609_v41 = vand.u32 2147483647, %v6918_v60  ;;  %v1790_v27 = vshrl.u32 %v10812_v59, %v7120_v62 }
 0x16e   : > { %v7144_v15 = vmul.u32.u64.low %v7133_v39, %v1910_v14  ;;  %v7145_v37 = vmul.u32.u64.high %v7133_v39, %v1910_v14, %v7144_v15  ;;  %v2085_v31 = vadd.s32 1, %v5100_v61  ;;  %v5073_v57 = vmin.u32 %v1413_v4, %v7086_v3 }
 0x16f   : > { %10841 = vst [vmem:[#allocation35_spill] sm:$0xff] %v7138_v22  ;;  %v7152_v24 = vmul.u32.u64.low %v7133_v39, %v1914_v49  ;;  %v7153_v10 = vmul.u32.u64.high %v7133_v39, %v1914_v49, %v7152_v24  ;;  %v1793_v0 = vshrl.u32 %v10827_v54, %v7120_v62  ;;  %v7157_v46 = vshrl.u32 %v1775_v5, 5 }
 0x170   : > { %v1781_v2 = vshrl.u32 %v10810_v28, %v7120_v62  ;;  %v1789_v63 = vshll.u32 %v10809_v25, %v1777_v17  ;;  %v489_v26 = vmul.f32 %v6712_v51, %v464_v58  ;;  %v1784_v50 = vshrl.u32 %v10811_v44, %v7120_v62 }
 0x171   : > { %v1787_v19 = vshrl.u32 %v10809_v25, %v7120_v62  ;;  %v1792_v16 = vshll.u32 %v10812_v59, %v1777_v17  ;;  %vm2086_vm3 = vcmp.gt.s32.totalorder %v2085_v31, 0  ;;  %v1722_v29 = vshll.u32 %v7138_v22, 30 }
 0x172   : > { %v1616_v5 = vadd.s32 536870912, %v7140_v48  ;;  %v1770_v4 = vand.u32 8388607, %v10609_v41  ;;  %v1791_v21 = vor.u32 %v1790_v27, %v1789_v63  ;;  %v1780_v14 = vshll.u32 %v10814_v18, %v1777_v17 }
 0x173   : > { %v1783_v51 = vshll.u32 %v10810_v28, %v1777_v17  ;;  %v1786_v49 = vshll.u32 %v10811_v44, %v1777_v17  ;;  %v1794_v61 = vor.u32 %v1793_v0, %v1792_v16  ;;  %v1883_v58 = vshrl.u32 %v10814_v18, %v7001_v36 }
 0x174   : > { %v1904_v24 = vsel %vm1902_vm12, %v7071_v55, 2102212464  ;;  %v2087_v11 = vsel %vm2086_vm3, %v2085_v31, 0  ;;  %v7181_v22 = vadd.f32 %v6739_v30, %v489_v26  ;;  %v1782_v41 = vor.u32 %v1781_v2, %v1780_v14 }
 0x175   : > { %v7183_v27 = vor.u32 %v1784_v50, %v1783_v51  ;;  %v1788_v63 = vor.u32 %v1787_v19, %v1786_v49  ;;  %vm1798_vm5 = vcmp.lt.s32.totalorder %v7157_v46, 4  ;;  %v1415_v60 = vclz %v5073_v57 }
 0x176   : > { %10842 = vst [vmem:[#allocation36_spill] sm:$0xff] %v7181_v22  ;;  %v7187_v17 = vsub.s32 %v7075_v45, %v1722_v29  ;;  %v1771_v0 = vor.u32 8388608, %v1770_v4  ;;  %v1804_v36 = vsel %vm1798_vm5, %v1791_v21, 920167782  ;;  %v1903_v55 = vsel %vm1899_vm14, %v1883_v58, %v7067_v43 }
 0x177   : > { %v1905_v30 = vsel %vm1901_vm15, %v7069_v20, %v1904_v24  ;;  %v1808_v31 = vsel %vm1798_vm5, %v1794_v61, 1326507024  ;;  %v2089_v2 = vand.u32 31, %v2087_v11  ;;  %v1925_v57 = vadd.s32 1, %v7145_v37 }
 0x178   : > { %vm1795_vm6 = vcmp.lt.s32.totalorder %v7157_v46, 1  ;;  %vm1797_vm7 = vcmp.lt.s32.totalorder %v7157_v46, 3  ;;  %v1974_v45 = vand.u32 2139095040, %v7181_v22  ;;  %v7203_v26 = vshrl.u32 %v1616_v5, 30 }
 0x179   : > { %vm1924_vm8 = vc.u32 %v7153_v10, %v7144_v15  ;;  %v1803_v43 = vsel %vm1795_vm6, %v1782_v41, %v7183_v27  ;;  %v1805_v20 = vsel %vm1797_vm7, %v1788_v63, %v1804_v36  ;;  %v1906_v50 = vsel %vm1900_vm0, %v1903_v55, %v1905_v30 }
 0x17a   : > { %10843 = vst [vmem:[#allocation37_spill] sm:$0xff] %v7203_v26  ;;  %v1807_v19 = vsel %vm1795_vm6, %v7183_v27, %v1788_v63  ;;  %v1809_v16 = vsel %vm1797_vm7, %v1791_v21, %v1808_v31  ;;  %v10612_v29 = vand.u32 2147483647, %v7049_v6  ;;  %v1524_v5 = vshll.u32 %v6800_v8, %v7022_v56 }
 0x17b   : > { %v7224_v4 = vadd.s32 %v6834_v52, %v6852_v38  ;;  %vm1796_vm9 = vcmp.lt.s32.totalorder %v7157_v46, 2  ;;  %v7227_v40 = vsub.s32 32, %v2089_v2  ;;  %v10844_v14 = vsub.s32 4294967266, %v7022_v56 }
 0x17c   : > { %v1926_v49 = vsel %vm1924_vm8, %v1925_v57, %v7145_v37  ;;  %v1806_v21 = vsel %vm1796_vm9, %v1803_v43, %v1805_v20  ;;  %v1975_v61 = vshrl.u32 %v1974_v45, 23  ;;  %v7237_v8 = vor.u32 %v7136_v34, %v1524_v5 }
 0x17d   : > { %v7231_v51 = vadd.s32 127, %v10844_v14  ;;  %v1922_v52 = vmul.u32 %v7133_v39, %v1906_v50  ;;  %v1810_v38 = vsel %vm1796_vm9, %v1807_v19, %v1809_v16  ;;  %v7242_v58 = vshll.u32 %v1771_v0, 8 }
 0x17e   : > { %v7244_v24 = vadd.s32 4294967294, %v1415_v60  ;;  %v1725_v56 = vsub.s32 0, %v7187_v17  ;;  %v1618_v37 = vshll.u32 %v7203_v26, 30  ;;  %v7250_v36 = vand.u32 8388607, %v10612_v29 }
 0x17f   : > { %v7252_v55 = vadd.s32 %v1926_v49, %v1922_v52  ;;  %v7255_v34 = vmul.u32.u64.low %v7242_v58, %v1806_v21  ;;  %v7256_v39 = vmul.u32.u64.high %v7242_v58, %v1806_v21, %v7255_v34  ;;  %v2102_v0 = vshrl.u32 %v10812_v59, %v7227_v40 }
 0x180   : > { %v1779_v60 = vshrl.u32 %v10814_v18, %v7120_v62  ;;  %v7264_v30 = vmul.u32.u64.low %v7242_v58, %v1810_v38  ;;  %v7265_v31 = vmul.u32.u64.high %v7242_v58, %v1810_v38, %v7264_v30  ;;  %v5096_v57 = vadd.s32 4294967169, %v1975_v61  ;;  %v7287_v38 = vpop.permute.xlu1 %2393 }
 0x181   : > { %v1800_v45 = vsel %vm1798_vm5, %v1788_v63, 2102212464  ;;  %v2093_v43 = vshrl.u32 %v10810_v28, %v7227_v40  ;;  %v2101_v20 = vshll.u32 %v10809_v25, %v2089_v2  ;;  %v2105_v50 = vshrl.u32 %v10827_v54, %v7227_v40 }
 0x182   : > { %v7274_v19 = vshrl.u32 %v2087_v11, 5  ;;  %v2096_v62 = vshrl.u32 %v10811_v44, %v7227_v40  ;;  %v2099_v16 = vshrl.u32 %v10809_v25, %v7227_v40  ;;  %v1981_v5 = vadd.s32 1, %v5096_v57 }
 0x183   : > { %v1928_v14 = vadd.s32 536870912, %v7252_v55  ;;  %v2092_v63 = vshll.u32 %v10814_v18, %v2089_v2  ;;  %v2103_v49 = vor.u32 %v2102_v0, %v2101_v20  ;;  %v2104_v21 = vshll.u32 %v10812_v59, %v2089_v2  ;;  %v7294_v20 = vpop.permute.xlu0 %2388 }
 0x184   : > { %v1799_v61 = vsel %vm1795_vm6, %v1779_v60, %v1782_v41  ;;  %v2095_v11 = vshll.u32 %v10810_v28, %v2089_v2  ;;  %v2098_v52 = vshll.u32 %v10811_v44, %v2089_v2  ;;  %vm1982_vm10 = vcmp.gt.s32.totalorder %v1981_v5, 0  ;;  %10845 = vst [vmem:[#allocation38_spill] sm:$0xff] %v7294_v20 }
 0x185   : > { %v1801_v30 = vsel %vm1797_vm7, %v7183_v27, %v1800_v45  ;;  %v7292_v57 = vor.u32 %v2093_v43, %v2092_v63  ;;  %v2106_v29 = vor.u32 %v2105_v50, %v2104_v21  ;;  %v1983_v0 = vsel %vm1982_vm10, %v1981_v5, 0 }
 0x186   : > { %v7296_v6 = vor.u32 %v2096_v62, %v2095_v11  ;;  %v2100_v41 = vor.u32 %v2099_v16, %v2098_v52  ;;  %vm2110_vm11 = vcmp.lt.s32.totalorder %v7274_v19, 4  ;;  %v1985_v60 = vand.u32 31, %v1983_v0 }
 0x187   : > { %v7300_v2 = vmin.u32 %v1725_v56, %v7187_v17  ;;  %v7303_v35 = vsub.s32 %v7140_v48, %v1618_v37  ;;  %v7305_v26 = vshrl.u32 %v1928_v14, 30  ;;  %v2116_v27 = vsel %vm2110_vm11, %v2103_v49, 920167782  ;;  %v7339_v63 = vpop.permute.xlu0 %2398 }
 0x188   : > { %v1802_v45 = vsel %vm1796_vm9, %v1799_v61, %v1801_v30  ;;  %v2083_v43 = vor.u32 8388608, %v7250_v36  ;;  %v7313_v62 = vsub.s32 32, %v1985_v60  ;;  %v1821_v56 = vadd.s32 1, %v7256_v39  ;;  %v7329_v36 = vpop.permute.xlu1 %2403  ;;  %10848 = vst [vmem:[#allocation41_spill] sm:$0xff] %v7339_v63 }
 0x189   : > { %10846 = vst [vmem:[#allocation39_spill] sm:$0xff] %v7305_v26  ;;  %vm2107_vm12 = vcmp.lt.s32.totalorder %v7274_v19, 1  ;;  %vm2109_vm13 = vcmp.lt.s32.totalorder %v7274_v19, 3  ;;  %v2120_v48 = vsel %vm2110_vm11, %v2106_v29, 1326507024  ;;  %vm1820_vm14 = vc.u32 %v7265_v31, %v7255_v34  ;;  %10847 = vst [vmem:[#allocation40_spill] sm:$0xff] %v7329_v36 }
 0x18a   : > { %vm2108_vm15 = vcmp.lt.s32.totalorder %v7274_v19, 2  ;;  %v2115_v46 = vsel %vm2107_vm12, %v7292_v57, %v7296_v6  ;;  %v2117_v37 = vsel %vm2109_vm13, %v2100_v41, %v2116_v27  ;;  %v2119_v16 = vsel %vm2107_vm12, %v7296_v6, %v2100_v41 }
 0x18b   : > { %v1989_v29 = vshrl.u32 %v10810_v28, %v7313_v62  ;;  %v1997_v5 = vshll.u32 %v10809_v25, %v1985_v60  ;;  %v1998_v14 = vshrl.u32 %v10812_v59, %v7313_v62  ;;  %v2121_v21 = vsel %vm2109_vm13, %v2103_v49, %v2120_v48 }
 0x18c   : > { %v7343_v61 = vshrl.u32 %v1983_v0, 5  ;;  %v1992_v11 = vshrl.u32 %v10811_v44, %v7313_v62  ;;  %v1995_v52 = vshrl.u32 %v10809_v25, %v7313_v62  ;;  %v2118_v30 = vsel %vm2108_vm15, %v2115_v46, %v2117_v37 }
 0x18d   : > { %v7351_v27 = vshll.u32 %v2083_v43, 8  ;;  %v1988_v50 = vshll.u32 %v10814_v18, %v1985_v60  ;;  %v1999_v12 = vor.u32 %v1998_v14, %v1997_v5  ;;  %v1991_v1 = vshll.u32 %v10810_v28, %v1985_v60 }
 0x18e   : > { %v1994_v49 = vshll.u32 %v10811_v44, %v1985_v60  ;;  %v2000_v0 = vshll.u32 %v10812_v59, %v1985_v60  ;;  %v2001_v48 = vshrl.u32 %v10827_v54, %v7313_v62  ;;  %v1822_v25 = vsel %vm1820_vm14, %v1821_v56, %v7256_v39  ;;  %v7372_v54 = vpop.permute.xlu1 %2413 }
 0x18f   : > { %v2122_v43 = vsel %vm2108_vm15, %v2119_v16, %v2121_v21  ;;  %v10849_v46 = vand.u32 2147483647, %v7181_v22  ;;  %v7367_v5 = vor.u32 %v1989_v29, %v1988_v50  ;;  %v7369_v14 = vor.u32 %v1992_v11, %v1991_v1  ;;  %10850 = vst [vmem:[#allocation42_spill] sm:$0xff] %v7372_v54  ;;  %v7382_v50 = vpop.permute.xlu0 %2408 }
 0x190   : > { %v1996_v44 = vor.u32 %v1995_v52, %v1994_v49  ;;  %v2002_v60 = vor.u32 %v2001_v48, %v2000_v0  ;;  %vm2006_vm0 = vcmp.lt.s32.totalorder %v7343_v61, 4  ;;  %v1818_v59 = vmul.u32 %v7242_v58, %v1802_v45  ;;  %10851 = vst [vmem:[#allocation43_spill] sm:$0xff] %v7382_v50  ;;  %v7394_v58 = vld [vmem:[%s10533_s2 + $0x2] ss:$0 sm:$0xff] }
 0x191   : > { %v1978_v37 = vand.u32 8388607, %v10849_v46  ;;  %v7376_v39 = vmul.u32.u64.low %v7351_v27, %v2118_v30  ;;  %v7377_v56 = vmul.u32.u64.high %v7351_v27, %v2118_v30, %v7376_v39  ;;  %v2012_v16 = vsel %vm2006_vm0, %v1999_v12, 920167782 }
 0x192   : > { %v1930_v1 = vshll.u32 %v7305_v26, 30  ;;  %v7386_v29 = vmul.u32.u64.low %v7351_v27, %v2122_v43  ;;  %v7387_v21 = vmul.u32.u64.high %v7351_v27, %v2122_v43, %v7386_v29  ;;  %v2016_v11 = vsel %vm2006_vm0, %v2002_v60, 1326507024  ;;  %v7432_v60 = vpop.permute.xlu1 %2423 }
 0x193   : > { %v7396_v45 = vadd.s32 %v1822_v25, %v1818_v59  ;;  %v2112_v52 = vsel %vm2110_vm11, %v2100_v41, 2102212464  ;;  %vm2003_vm3 = vcmp.lt.s32.totalorder %v7343_v61, 1  ;;  %vm2005_vm5 = vcmp.lt.s32.totalorder %v7343_v61, 3  ;;  %10852 = vst [vmem:[#allocation44_spill] sm:$0xff] %v7432_v60 }
 0x194   : > { %v2091_v30 = vshrl.u32 %v10814_v18, %v7227_v40  ;;  %v1979_v49 = vor.u32 8388608, %v1978_v37  ;;  %v2011_v0 = vsel %vm2003_vm3, %v7367_v5, %v7369_v14  ;;  %v2013_v59 = vsel %vm2005_vm5, %v1996_v44, %v2012_v16 }
 0x195   : > { %v2015_v25 = vsel %vm2003_vm3, %v7369_v14, %v1996_v44  ;;  %v2017_v41 = vsel %vm2005_vm5, %v1999_v12, %v2016_v11  ;;  %v2515_v48 = vmul.f32 %v7394_v58, %v7287_v38  ;;  %v2514_v40 = vmul.f32 %v7394_v58, %v7294_v20  ;;  %v7430_v12 = vld [vmem:[%s10533_s2 + $0x3] ss:$0 sm:$0xff]  ;;  %v7439_v11 = vpop.permute.xlu0 %2418 }
 0x196   : > { %v2111_v46 = vsel %vm2107_vm12, %v2091_v30, %v7292_v57  ;;  %v2113_v37 = vsel %vm2109_vm13, %v7296_v6, %v2112_v52  ;;  %vm2004_vm6 = vcmp.lt.s32.totalorder %v7343_v61, 2  ;;  %vm5075_vm7 = vcmp.lt.s32.totalorder %v7244_v24, 0  ;;  %10853 = vst [vmem:[#allocation45_spill] sm:$0xff] %v7439_v11 }
 0x197   : > { %v1727_v16 = vclz %v7300_v2  ;;  %v1621_v29 = vsub.s32 0, %v7303_v35  ;;  %v2014_v57 = vsel %vm2004_vm6, %v2011_v0, %v2013_v59  ;;  %v7442_v6 = vsub.s32 %v7252_v55, %v1930_v1 }
 0x198   : > { %v1824_v52 = vadd.s32 536870912, %v7396_v45  ;;  %v2018_v30 = vsel %vm2004_vm6, %v2015_v25, %v2017_v41  ;;  %v7447_v43 = vshll.u32 %v1979_v49, 8  ;;  %v2114_v2 = vsel %vm2108_vm15, %v2111_v46, %v2113_v37 }
 0x199   : > { %v2133_v26 = vadd.s32 1, %v7377_v56  ;;  %v2531_v22 = vadd.f32 %v7430_v12, %v2515_v48  ;;  %v2530_v0 = vadd.f32 %v7430_v12, %v2514_v40  ;;  %vm2132_vm8 = vc.u32 %v7387_v21, %v7376_v39  ;;  %v7486_v20 = vpop.permute.xlu0 %2428 }
 0x19a   : > { %v7457_v55 = vmul.u32.u64.low %v7447_v43, %v2014_v57  ;;  %v7458_v1 = vmul.u32.u64.high %v7447_v43, %v2014_v57, %v7457_v55  ;;  %v2516_v49 = vmul.f32 %v7394_v58, %v7339_v63  ;;  %v7466_v19 = vsel %vm5075_vm7, 0, %v7244_v24  ;;  %v7481_v57 = vpop.permute.xlu1 %2433  ;;  %10856 = vst [vmem:[#allocation48_spill] sm:$0xff] %v7486_v20 }
 0x19b   : > { %v7469_v59 = vmul.u32.u64.low %v7447_v43, %v2018_v30  ;;  %v7470_v25 = vmul.u32.u64.high %v7447_v43, %v2018_v30, %v7469_v59  ;;  %v2517_v41 = vmul.f32 %v7394_v58, %v7329_v36  ;;  %v7476_v48 = vadd.s32 %v6966_v13, %v6974_v7  ;;  %10855 = vst [vmem:[#allocation47_spill] sm:$0xff] %v7481_v57 }
 0x19c   : > { %v5086_v40 = vadd.s32 4294967294, %v1727_v16  ;;  %v5081_v46 = vmin.u32 %v1621_v29, %v7303_v35  ;;  %v7479_v37 = vshrl.u32 %v1824_v52, 30  ;;  %v1933_v24 = vsub.s32 0, %v7442_v6 }
 0x19d   : > { %v2130_v63 = vmul.u32 %v7351_v27, %v2114_v2  ;;  %v2134_v30 = vsel %vm2132_vm8, %v2133_v26, %v7377_v56  ;;  %v2546_v59 = vmax.f32 %v2530_v0, 0.0  ;;  %v2008_v13 = vsel %vm2006_vm0, %v1996_v44, 2102212464 }
 0x19e   : > { %10854 = vst [vmem:[#allocation46_spill] sm:$0xff] %v7479_v37  ;;  %v2532_v7 = vadd.f32 %v7430_v12, %v2516_v49  ;;  %v2518_v16 = vmul.f32 %v7394_v58, %v7382_v50  ;;  %v2547_v29 = vmax.f32 %v2531_v22, 0.0  ;;  %v1423_v52 = vsub.s32 4294967266, %v7466_v19 }
 0x19f   : > { %v1987_v36 = vshrl.u32 %v10814_v18, %v7313_v62  ;;  %v2533_v27 = vadd.f32 %v7430_v12, %v2517_v41  ;;  %v2519_v26 = vmul.f32 %v7394_v58, %v7372_v54  ;;  %v1623_v56 = vclz %v5081_v46  ;;  %v5787_v54 = vld [vmem:[%s5984_s28 + $0x50] sm:$0xff] }
 0x1a0   : > { %v1826_v2 = vshll.u32 %v7479_v37, 30  ;;  %v7500_v44 = vadd.s32 %v2134_v30, %v2130_v63  ;;  %v5421_v0 = vpack.i.bf16 %v2547_v29, %v2546_v59  ;;  %vm5087_vm9 = vcmp.lt.s32.totalorder %v5086_v40, 0  ;;  %v7521_v59 = vpop.permute.xlu0 %2438 }
 0x1a1   : > { %v5093_v49 = vmin.u32 %v1933_v24, %v7442_v6  ;;  %v2007_v22 = vsel %vm2003_vm3, %v1987_v36, %v7367_v5  ;;  %v2009_v62 = vsel %vm2005_vm5, %v7369_v14, %v2008_v13  ;;  %v2029_v41 = vadd.s32 1, %v7458_v1  ;;  %v7514_v24 = vpop.permute.xlu1 %2443  ;;  %10858 = vst [vmem:[#allocation50_spill] sm:$0xff] %v7521_v59 }
 0x1a2   : > { %v2534_v46 = vadd.f32 %v7430_v12, %v2518_v16  ;;  %5422 = vrot.lane.b32.xlu0 %v5421_v0, %s5869_s16  ;;  %v2520_v63 = vmul.f32 %v7394_v58, %v7439_v11  ;;  %v2548_v30 = vmax.f32 %v2532_v7, 0.0  ;;  %10857 = vst [vmem:[#allocation49_spill] sm:$0xff] %v7514_v24  ;;  %vm2028_vm10 = vc.u32 %v7470_v25, %v7457_v55 }
 0x1a3   : > { %v2535_v36 = vadd.f32 %v7430_v12, %v2519_v26  ;;  %v2521_v5 = vmul.f32 %v7394_v58, %v7432_v60  ;;  %v2549_v14 = vmax.f32 %v2533_v27, 0.0  ;;  %v5082_v13 = vadd.s32 4294967294, %v1623_v56 }
 0x1a4   : > { %v7524_v16 = vsub.s32 %v7396_v45, %v1826_v2  ;;  %v2136_v29 = vadd.s32 536870912, %v7500_v44  ;;  %v2010_v7 = vsel %vm2004_vm6, %v2007_v22, %v2009_v62  ;;  %v1419_v0 = vsub.s32 32, %v7466_v19 }
 0x1a5   : > { %v7530_v11 = vadd.s32 127, %v1423_v52  ;;  %v7533_v26 = vsel %vm5087_vm9, 0, %v5086_v40  ;;  %v5426_v60 = vpack.i.bf16 %v2549_v14, %v2548_v30  ;;  %v2030_v27 = vsel %vm2028_vm10, %v2029_v41, %v7458_v1  ;;  %v7547_v41 = vpop.permute.xlu1 %2453 }
 0x1a6   : > { %v2536_v56 = vadd.f32 %v7430_v12, %v2520_v63  ;;  %v2522_v45 = vmul.f32 %v7394_v58, %v7486_v20  ;;  %v2550_v2 = vmax.f32 %v2534_v46, 0.0  ;;  %v1935_v37 = vclz %v5093_v49  ;;  %10860 = vst [vmem:[#allocation52_spill] sm:$0xff] %v7547_v41  ;;  %v7556_v63 = vpop.permute.xlu0 %2448 }
 0x1a7   : > { %v2026_v61 = vmul.u32 %v7447_v43, %v2010_v7  ;;  %v2537_v22 = vadd.f32 %v7430_v12, %v2521_v5  ;;  %5427 = vrot.lane.b32.xlu1 %v5426_v60, %s5869_s16  ;;  %v2551_v52 = vmax.f32 %v2535_v36, 0.0  ;;  %vm5083_vm11 = vcmp.lt.s32.totalorder %v5082_v13, 0  ;;  %10861 = vst [vmem:[#allocation53_spill] sm:$0xff] %v7556_v63 }
 0x1a8   : > { %v1829_v40 = vsub.s32 0, %v7524_v16  ;;  %v7543_v62 = vshrl.u32 %v2136_v29, 30  ;;  %v2523_v1 = vmul.f32 %v7394_v58, %v7481_v57  ;;  %v7552_v43 = vshrl.u32 %v7224_v4, %v1419_v0 }
 0x1a9   : > { %v7554_v46 = vadd.s32 %v2030_v27, %v2026_v61  ;;  %v5431_v60 = vpack.i.bf16 %v2551_v52, %v2550_v2  ;;  %v1425_v30 = vshll.u32 %v7530_v11, 23  ;;  %v2538_v36 = vadd.f32 %v7430_v12, %v2522_v45 }
 0x1aa   : > { %10859 = vst [vmem:[#allocation51_spill] sm:$0xff] %v7543_v62  ;;  %v2524_v5 = vmul.f32 %v7394_v58, %v7521_v59  ;;  %v2552_v14 = vmax.f32 %v2536_v56, 0.0  ;;  %v1735_v29 = vsub.s32 4294967266, %v7533_v26  ;;  %v7563_v7 = vsel %vm5083_vm11, 0, %v5082_v13 }
 0x1ab   : > { %v5094_v49 = vadd.s32 4294967294, %v1935_v37  ;;  %5432 = vrot.lane.b32.xlu0 %v5431_v60, %s5869_s16  ;;  %v2553_v4 = vmax.f32 %v2537_v22, 0.0  ;;  %v5089_v0 = vmin.u32 %v1829_v40, %v7524_v16  ;;  %v2138_v27 = vshll.u32 %v7543_v62, 30 }
 0x1ac   : > { %v2539_v11 = vadd.f32 %v7430_v12, %v2523_v1  ;;  %v2525_v45 = vmul.f32 %v7394_v58, %v7514_v24  ;;  %v2032_v2 = vadd.s32 536870912, %v7554_v46  ;;  %v2527_v13 = vmul.f32 %v7394_v58, %v7547_v41  ;;  %v7580_v1 = vpop.permute.xlu1 %2463 }
 0x1ad   : > { %v5436_v56 = vpack.i.bf16 %v2553_v4, %v2552_v14  ;;  %v2526_v37 = vmul.f32 %v7394_v58, %v7556_v63  ;;  %v1611_v61 = vadd.s32 %v7029_v9, %v7039_v47  ;;  %v1631_v22 = vsub.s32 4294967266, %v7563_v7  ;;  %10862 = vst [vmem:[#allocation54_spill] sm:$0xff] %v7580_v1  ;;  %v7586_v63 = vpop.permute.xlu0 %2458 }
 0x1ae   : > { %v2540_v52 = vadd.f32 %v7430_v12, %v2524_v5  ;;  %v2554_v40 = vmax.f32 %v2538_v36, 0.0  ;;  %v1731_v60 = vsub.s32 32, %v7533_v26  ;;  %v1732_v14 = vshll.u32 %v7187_v17, %v7533_v26  ;;  %10863 = vst [vmem:[#allocation55_spill] sm:$0xff] %v7586_v63 }
 0x1af   : > { %v1736_v4 = vadd.s32 127, %v1735_v29  ;;  %vm5095_vm12 = vcmp.lt.s32.totalorder %v5094_v49, 0  ;;  %5437 = vrot.lane.b32.xlu1 %v5436_v56, %s5869_s16  ;;  %v1831_v41 = vclz %v5089_v0  ;;  %v2541_v9 = vadd.f32 %v7430_v12, %v2525_v45 }
 0x1b0   : > { %v2542_v47 = vadd.f32 %v7430_v12, %v2526_v37  ;;  %v2555_v5 = vmax.f32 %v2539_v11, 0.0  ;;  %v7591_v36 = vsub.s32 %v7500_v44, %v2138_v27  ;;  %v7593_v59 = vshrl.u32 %v2032_v2, 30 }
 0x1b1   : > { %v2543_v24 = vadd.f32 %v7430_v12, %v2527_v13  ;;  %v2529_v17 = vmul.f32 %v7394_v58, %v7580_v1  ;;  %v1632_v26 = vadd.s32 127, %v1631_v22  ;;  %v2528_v0 = vmul.f32 %v7394_v58, %v7586_v63 }
 0x1b2   : > { %10864 = vst [vmem:[#allocation56_spill] sm:$0xff] %v7593_v59  ;;  %v5441_v29 = vpack.i.bf16 %v2555_v5, %v2554_v40  ;;  %v2556_v56 = vmax.f32 %v2540_v52, 0.0  ;;  %v1733_v45 = vshrl.u32 %v7476_v48, %v1731_v60  ;;  %v1737_v37 = vshll.u32 %v1736_v4, 23 }
 0x1b3   : > { %v7602_v11 = vsel %vm5095_vm12, 0, %v5094_v49  ;;  %v2545_v44 = vadd.f32 %v7430_v12, %v2529_v17  ;;  %v1627_v27 = vsub.s32 32, %v7563_v7  ;;  %v2544_v2 = vadd.f32 %v7430_v12, %v2528_v0  ;;  %v10867_v0 = vld [vmem:[#allocation8_spill] sm:$0xff] }
 0x1b4   : > { %5442 = vrot.lane.b32.xlu0 %v5441_v29, %s5869_s16  ;;  %v2557_v13 = vmax.f32 %v2541_v9, 0.0  ;;  %v2558_v22 = vmax.f32 %v2542_v47, 0.0  ;;  %v5090_v40 = vadd.s32 4294967294, %v1831_v41  ;;  %v2141_v5 = vsub.s32 0, %v7591_v36 }
 0x1b5   : > { %v2034_v52 = vshll.u32 %v7593_v59, 30  ;;  %v2559_v48 = vmax.f32 %v2543_v24, 0.0  ;;  %v1633_v60 = vshll.u32 %v1632_v26, 23  ;;  %v1943_v49 = vsub.s32 4294967266, %v7602_v11  ;;  %v7773_v59 = vpop.permute.xlu0 %2643 }
 0x1b6   : > { %v5446_v4 = vpack.i.bf16 %v2557_v13, %v2556_v56  ;;  %v2560_v63 = vmax.f32 %v2544_v2, 0.0  ;;  %v10865_v17 = vshll.u32 %v7231_v51, 23  ;;  %v1426_v20 = vor.u32 4788187, %v1425_v30 }
 0x1b7   : > { %v5451_v29 = vpack.i.bf16 %v2559_v48, %v2558_v22  ;;  %v2561_v57 = vmax.f32 %v2545_v44, 0.0  ;;  %vm933_vm13 = vcmp.lt.s32.totalorder %v6071_v42, 0  ;;  %v10866_v41 = vshll.u32 %v7086_v3, %v7466_v19 }
 0x1b8   : > { %v1530_v1 = vor.u32 4788187, %v10865_v17  ;;  %v1734_v47 = vor.u32 %v1733_v45, %v1732_v14  ;;  %v1738_v24 = vor.u32 4788187, %v1737_v37  ;;  %v1629_v26 = vshrl.u32 %v1611_v61, %v1627_v27  ;;  %5447 = vrot.lane.b32.xlu1 %v5446_v4, %s5869_s16  ;;  %v7646_v4 = vld [vmem:[%s5984_s28 + $0x78] sm:$0xff] }
 0x1b9   : > { %v1422_v9 = vor.u32 %v7552_v43, %v10866_v41  ;;  %vm1245_vm14 = vcmp.lt.s32.totalorder %v10867_v0, 0  ;;  %vm5091_vm15 = vcmp.lt.s32.totalorder %v5090_v40, 0  ;;  %v5101_v51 = vmin.u32 %v2141_v5, %v7591_v36  ;;  %5452 = vrot.lane.b32.xlu0 %v5451_v29, %s5869_s16  ;;  %v10870_v41 = vld [vmem:[#allocation17_spill] sm:$0xff] }
 0x1ba   : > { %v7622_v30 = vsub.s32 %v7554_v46, %v2034_v52  ;;  %v5456_v56 = vpack.i.bf16 %v2561_v57, %v2560_v63  ;;  %v1221_v3 = vcvt.s32.f32 %v7116_v33  ;;  %v1628_v19 = vshll.u32 %v7303_v35, %v7563_v7  ;;  %10885 = vst [vmem:[#allocation17_spill] sm:$0xff] %v7773_v59 }
 0x1bb   : > { %v1634_v43 = vor.u32 4788187, %v1633_v60  ;;  %v1944_v61 = vadd.s32 127, %v1943_v49  ;;  %v1219_v14 = vand.u32 2147483647, %v7124_v23  ;;  %v1533_v37 = vcvt.s32.f32 %v7237_v8  ;;  %v7637_v23 = vld [vmem:[%s5984_s28 + $0x70] sm:$0xff] }
 0x1bc   : > { %v1531_v45 = vand.u32 2147483647, %v1530_v1  ;;  %v1427_v44 = vand.u32 2147483647, %v1426_v20  ;;  %v1739_v27 = vand.u32 2147483647, %v1738_v24  ;;  %v1630_v46 = vor.u32 %v1629_v26, %v1628_v19  ;;  %5457 = vrot.lane.b32.xlu1 %v5456_v56, %s5869_s16 }
 0x1bd   : > { %v1939_v2 = vsub.s32 32, %v7602_v11  ;;  %v7632_v57 = vsel %vm5091_vm15, 0, %v5090_v40  ;;  %v1429_v33 = vcvt.s32.f32 %v1422_v9  ;;  %v1741_v35 = vcvt.s32.f32 %v1734_v47  ;;  %2939 = vperm.xlu0 %5420, %v7637_v23   ;;  %v10868_v8 = vld [vmem:[#allocation11_spill] sm:$0xff] }
 0x1be   : > { %v2143_v63 = vclz %v5101_v51  ;;  %v2037_v7 = vsub.s32 0, %v7622_v30  ;;  %vm1141_vm0 = vcmp.lt.s32.totalorder %v10868_v8, 0  ;;  %v1635_v20 = vand.u32 2147483647, %v1634_v43  ;;  %v10871_v26 = vld [vmem:[#allocation31_spill] sm:$0xff]  ;;  %v5776_v43 = vld [vmem:[%s5984_s28] sm:$0xff] }
 0x1bf   : > { %v1923_v1 = vadd.s32 %v7144_v15, %v7153_v10  ;;  %v1945_v13 = vshll.u32 %v1944_v61, 23  ;;  %v1222_v22 = vmul.f32 %v1221_v3, %v1219_v14  ;;  %vm10670_vm3 = vcmp.lt.s32.totalorder %v6402_v32, 0  ;;  %v2195_v15 = vld [vmem:[%s10537_s6] sm:$0xff]  ;;  %v2196_v10 = vld [vmem:[%s10537_s6 + $0x8] sm:$0xff]  ;;  %v2197_v61 = vld [vmem:[%s10537_s6 + $0x10] sm:$0xff] }
 0x1c0   : > { %v1534_v40 = vmul.f32 %v1533_v37, %v1531_v45  ;;  %v1839_v5 = vsub.s32 4294967266, %v7632_v57  ;;  %v1430_v52 = vmul.f32 %v1429_v33, %v1427_v44  ;;  %v1742_v48 = vmul.f32 %v1741_v35, %v1739_v27  ;;  %2943 = vperm.xlu1 %5419, %v7646_v4   ;;  %v2198_v14 = vld [vmem:[%s10537_s6 + $0x18] sm:$0xff] }
 0x1c1   : > { %v1637_v60 = vcvt.s32.f32 %v1630_v46  ;;  %v1941_v49 = vshrl.u32 %v1923_v1, %v1939_v2  ;;  %v10869_v17 = vxor.u32 2147483648, %v6807_v53  ;;  %vm1349_vm5 = vcmp.lt.s32.totalorder %v10870_v41, 0  ;;  %v10873_v1 = vld [vmem:[#allocation19_spill] sm:$0xff] }
 0x1c2   : > { %v5102_v9 = vadd.s32 4294967294, %v2143_v63  ;;  %v5097_v47 = vmin.u32 %v2037_v7, %v7622_v30  ;;  %v10646_v24 = vmov 3   ;;  %v10872_v51 = vxor.u32 2147483648, %v10871_v26  ;;  %v5777_v7 = vld [vmem:[%s5984_s28 + $0x8] sm:$0xff] }
 0x1c3   : > { %v7660_v29 = vsel %vm933_vm13, %v10869_v17, %v6807_v53  ;;  %5461 = vset.pattern.permute.xlu0 %v10646_v24  ;;  %v1638_v3 = vmul.f32 %v1637_v60, %v1635_v20  ;;  %v1940_v53 = vshll.u32 %v7442_v6, %v7602_v11  ;;  %v1946_v19 = vor.u32 4788187, %v1945_v13  ;;  %v7685_v6 = vld [vmem:[%s10533_s2] ss:$0 sm:$0xff]  ;;  %v7703_v17 = vld [vmem:[%s10533_s2 + $0x1] ss:$0 sm:$0xff] }
 0x1c4   : > { %v7670_v56 = vsel %vm1245_vm14, %v10872_v51, %v10871_v26  ;;  %3123 = vperm.xlu0 %5461, %v5776_v43   ;;  %v1223_v45 = vxor.u32 2147483648, %v1222_v22  ;;  %v1835_v37 = vsub.s32 32, %v7632_v57  ;;  %v1840_v44 = vadd.s32 127, %v1839_v5  ;;  %5462 = vset.pattern.permute.xlu1 %v10646_v24  ;;  %v5779_v43 = vld [vmem:[%s5984_s28 + $0x10] sm:$0xff] }
 0x1c5   : > { %v2207_v11 = vpack.c.bf16 %v2196_v10, %v2195_v15  ;;  %v1535_v27 = vxor.u32 2147483648, %v1534_v40  ;;  %v1431_v46 = vxor.u32 2147483648, %v1430_v52  ;;  %v1743_v2 = vxor.u32 2147483648, %v1742_v48  ;;  %3127 = vperm.xlu1 %5462, %v5777_v7   ;;  %v5778_v15 = vld [vmem:[%s5984_s28 + $0x18] sm:$0xff]  ;;  %v7755_v7 = vpop.permute.xlu1 %2647 }
 0x1c6   : > { %v1942_v33 = vor.u32 %v1941_v49, %v1940_v53  ;;  %v1819_v35 = vadd.s32 %v7255_v34, %v7265_v31  ;;  %vm5103_vm6 = vcmp.lt.s32.totalorder %v5102_v9, 0  ;;  %v2039_v63 = vclz %v5097_v47  ;;  %v10874_v31 = vld [vmem:[#allocation25_spill] sm:$0xff]  ;;  %10881 = vst [vmem:[#allocation11_spill] sm:$0xff] %v7755_v7 }
 0x1c7   : > { %5200 = vmatprep.subr.bf16.mxu0 %v2207_v11  ;;  %v2208_v20 = vpack.c.bf16 %v2198_v14, %v2197_v61  ;;  %vm10667_vm7 = vcmp.lt.s32.totalorder %v10873_v1, 0  ;;  %v1639_v13 = vxor.u32 2147483648, %v1638_v3  ;;  %v1947_v5 = vand.u32 2147483647, %v1946_v19  ;;  %v10876_v14 = vld [vmem:[#allocation24_spill] sm:$0xff] }
 0x1c8   : > { %v2467_v60 = vmul.f32 %v7685_v6, %v7287_v38  ;;  %3135 = vperm.xlu0 %5461, %v5778_v15   ;;  %5201 = vmatpush3.bf16.msra.mxu0 %v2207_v11  ;;  %v7697_v34 = vsel %vm1141_vm0, %v1223_v45, %v1222_v22  ;;  %vm10669_vm8 = vcmp.lt.s32.totalorder %v10874_v31, 0  ;;  %v1837_v49 = vshrl.u32 %v1819_v35, %v1835_v37  ;;  %v10878_v11 = vld [vmem:[#allocation21_spill] sm:$0xff] }
 0x1c9   : > { %v1841_v10 = vshll.u32 %v1840_v44, 23  ;;  %5202 = vmatprep.subr.bf16.mxu0 %v2208_v20  ;;  %v7707_v38 = vsel %vm10670_vm3, %v1535_v27, %v1534_v40  ;;  %v7711_v47 = vsel %vm1349_vm5, %v1431_v46, %v1430_v52  ;;  %v1949_v22 = vcvt.s32.f32 %v1942_v33  ;;  %3131 = vperm.xlu1 %5462, %v5779_v43   ;;  %v10875_v40 = vld [vmem:[#allocation10_spill] sm:$0xff] }
 0x1ca   : > { %v7714_v26 = vsel %vm5103_vm6, 0, %v5102_v9  ;;  %v7718_v51 = vsel %vm10667_vm7, %v1743_v2, %v1742_v48  ;;  %v1836_v53 = vshll.u32 %v7524_v16, %v7632_v57  ;;  %v7722_v19 = vadd.s32 4294967294, %v2039_v63  ;;  %v5780_v16 = vld [vmem:[%s5984_s28 + $0x28] sm:$0xff]  ;;  %v10879_v46 = vld [vmem:[#allocation22_spill] sm:$0xff] }
 0x1cb   : > { %v10648_v61 = vand.u32 2147483647, %v10875_v40  ;;  %v7727_v52 = vsub.s32 32, %v10876_v14  ;;  %v7731_v9 = vsel %vm10669_vm8, %v1639_v13, %v1638_v3  ;;  %v7733_v45 = vmul.f32 %v1949_v22, %v1947_v5 }
 0x1cc   : > { %v7736_v48 = vadd.f32 %v7703_v17, %v2467_v60  ;;  %3143 = vperm.xlu0 %5461, %v5780_v16   ;;  %5203 = vmatpush3.bf16.msra.mxu0 %v2208_v20  ;;  %v7739_v57 = vor.u32 %v1837_v49, %v1836_v53  ;;  %v7741_v37 = vor.u32 4788187, %v1841_v10  ;;  %v2151_v44 = vsub.s32 4294967266, %v7714_v26  ;;  %v5781_v20 = vld [vmem:[%s5984_s28 + $0x20] sm:$0xff]  ;;  %v5782_v49 = vld [vmem:[%s5984_s28 + $0x38] sm:$0xff] }
 0x1cd   : > { %v522_v3 = vand.u32 8388607, %v10648_v61  ;;  %v532_v27 = vshll.u32 %v10814_v18, %v10878_v11  ;;  %v533_v2 = vshrl.u32 %v10810_v28, %v10879_v46  ;;  %v535_v33 = vshll.u32 %v10810_v28, %v10878_v11  ;;  %3139 = vperm.xlu1 %5462, %v5781_v20  }
 0x1ce   : > { %10877 = vst [vmem:[#allocation8_spill] sm:$0xff] %v7736_v48  ;;  %v10880_v35 = vmov 2131351028   ;;  %vm5099_vm9 = vcmp.lt.s32.totalorder %v7722_v19, 0  ;;  %v531_v13 = vshrl.u32 %v10814_v18, %v10879_v46  ;;  %v10882_v60 = vmov 2102212464  }
 0x1cf   : > { %v536_v63 = vshrl.u32 %v10880_v35, %v10879_v46  ;;  %v538_v5 = vshll.u32 %v10880_v35, %v10878_v11  ;;  %v539_v15 = vshrl.u32 %v10882_v60, %v10879_v46  ;;  %v534_v10 = vor.u32 %v533_v2, %v532_v27  ;;  %v10886_v27 = vld [vmem:[#allocation20_spill] sm:$0xff]  ;;  %v5783_v2 = vld [vmem:[%s5984_s28 + $0x30] sm:$0xff] }
 0x1d0   : > { %3151 = vperm.xlu0 %5461, %v5782_v49   ;;  %v541_v53 = vshll.u32 %v10882_v60, %v10878_v11  ;;  %v10883_v43 = vmov 920167782   ;;  %v523_v20 = vor.u32 8388608, %v522_v3  ;;  %v10884_v7 = vmov 1326507024  }
 0x1d1   : > { %v537_v22 = vor.u32 %v536_v63, %v535_v33  ;;  %v542_v16 = vshrl.u32 %v10883_v43, %v10879_v46  ;;  %v540_v24 = vor.u32 %v539_v15, %v538_v5  ;;  %v544_v61 = vshll.u32 %v10883_v43, %v10878_v11  ;;  %3147 = vperm.xlu1 %5462, %v5783_v2   ;;  %v5784_v11 = vld [vmem:[%s5984_s28 + $0x48] sm:$0xff] }
 0x1d2   : > { %v545_v62 = vshrl.u32 %v10884_v7, %v10879_v46  ;;  %vm547_vm10 = vcmp.lt.s32.totalorder %v10886_v27, 1  ;;  %vm548_vm11 = vcmp.lt.s32.totalorder %v10886_v27, 2  ;;  %vm550_vm12 = vcmp.lt.s32.totalorder %v10886_v27, 4 }
 0x1d3   : > { %v543_v49 = vor.u32 %v542_v16, %v541_v53  ;;  %vm549_vm15 = vcmp.lt.s32.totalorder %v10886_v27, 3  ;;  %v552_v3 = vsel %vm550_vm12, %v540_v24, 2102212464  ;;  %v555_v63 = vsel %vm547_vm10, %v534_v10, %v537_v22  ;;  %v7783_v16 = vpop.permute.xlu1 %2651 }
 0x1d4   : > { %v546_v33 = vor.u32 %v545_v62, %v544_v61  ;;  %3159 = vperm.xlu0 %5461, %v5784_v11   ;;  %v551_v5 = vsel %vm547_vm10, %v531_v13, %v534_v10  ;;  %v553_v46 = vsel %vm549_vm15, %v537_v22, %v552_v3  ;;  %v559_v53 = vsel %vm547_vm10, %v537_v22, %v540_v24  ;;  %v10888_v61 = vld [vmem:[#allocation14_spill] sm:$0xff]  ;;  %v7807_v3 = vpop.permute.xlu0 %2655 }
 0x1d5   : > { %v556_v15 = vsel %vm550_vm12, %v543_v49, 920167782  ;;  %10887 = vst [vmem:[#allocation31_spill] sm:$0xff] %v7783_v16  ;;  %v563_v62 = vshll.u32 %v523_v20, 8  ;;  %v10657_v50 = vand.u32 2147483647, %v10888_v61  ;;  %v640_v27 = vshrl.u32 %v10880_v35, %v7727_v52 }
 0x1d6   : > { %v557_v59 = vsel %vm549_vm15, %v540_v24, %v556_v15  ;;  %v560_v2 = vsel %vm550_vm12, %v546_v33, 1326507024  ;;  %v7789_v11 = vadd.s32 127, %v2151_v44  ;;  %v7798_v22 = vsel %vm5099_vm9, 0, %v7722_v19  ;;  %v5785_v44 = vld [vmem:[%s5984_s28 + $0x40] sm:$0xff]  ;;  %10889 = vst [vmem:[#allocation19_spill] sm:$0xff] %v7807_v3 }
 0x1d7   : > { %v558_v13 = vsel %vm548_vm11, %v555_v63, %v557_v59  ;;  %v561_v10 = vsel %vm549_vm15, %v543_v49, %v560_v2  ;;  %3155 = vperm.xlu1 %5462, %v5785_v44   ;;  %v554_v59 = vsel %vm548_vm11, %v551_v5, %v553_v46  ;;  %v626_v19 = vand.u32 8388607, %v10657_v50  ;;  %v5786_v15 = vld [vmem:[%s5984_s28 + $0x58] sm:$0xff]  ;;  %v7832_v44 = vpop.permute.xlu1 %2659 }
 0x1d8   : > { %v562_v24 = vsel %vm548_vm11, %v559_v53, %v561_v10  ;;  %v7802_v20 = vmul.u32.u64.low %v563_v62, %v558_v13  ;;  %v7803_v33 = vmul.u32.u64.high %v563_v62, %v558_v13, %v7802_v20  ;;  %3167 = vperm.xlu0 %5461, %v5786_v15   ;;  %v636_v53 = vshll.u32 %v10814_v18, %v10876_v14  ;;  %10890 = vst [vmem:[#allocation25_spill] sm:$0xff] %v7832_v44 }
 0x1d9   : > { %v7811_v49 = vmul.u32.u64.low %v563_v62, %v562_v24  ;;  %v7812_v63 = vmul.u32.u64.high %v563_v62, %v562_v24, %v7811_v49  ;;  %v637_v2 = vshrl.u32 %v10810_v28, %v7727_v52  ;;  %v639_v13 = vshll.u32 %v10810_v28, %v10876_v14 }
 0x1da   : > { %v2047_v5 = vsub.s32 4294967266, %v7798_v22  ;;  %v642_v46 = vshll.u32 %v10880_v35, %v10876_v14  ;;  %v643_v10 = vshrl.u32 %v10882_v60, %v7727_v52  ;;  %v645_v24 = vshll.u32 %v10882_v60, %v10876_v14 }
 0x1db   : > { %v573_v49 = vadd.s32 1, %v7803_v33  ;;  %v638_v15 = vor.u32 %v637_v2, %v636_v53  ;;  %v641_v28 = vor.u32 %v640_v27, %v639_v13  ;;  %v646_v50 = vshrl.u32 %v10883_v43, %v7727_v52  ;;  %3163 = vperm.xlu1 %5462, %v5787_v54   ;;  %v7845_v2 = vpop.permute.xlu0 %2663 }
 0x1dc   : > { %v570_v3 = vmul.u32 %v563_v62, %v554_v59  ;;  %vm572_vm6 = vc.u32 %v7812_v63, %v7802_v20  ;;  %v627_v35 = vor.u32 8388608, %v626_v19  ;;  %v644_v16 = vor.u32 %v643_v10, %v642_v46  ;;  %10891 = vst [vmem:[#allocation10_spill] sm:$0xff] %v7845_v2  ;;  %v10892_v62 = vld [vmem:[#allocation23_spill] sm:$0xff] }
 0x1dd   : > { %v574_v48 = vsel %vm572_vm6, %v573_v49, %v7803_v33  ;;  %v647_v60 = vor.u32 %v646_v50, %v645_v24  ;;  %v648_v44 = vshll.u32 %v10883_v43, %v10876_v14  ;;  %v649_v53 = vshrl.u32 %v10884_v7, %v7727_v52  ;;  %v7853_v43 = vpop.permute.xlu1 %2667 }
 0x1de   : > { %v575_v13 = vadd.s32 %v574_v48, %v570_v3  ;;  %v635_v54 = vshrl.u32 %v10814_v18, %v7727_v52  ;;  %vm651_vm9 = vcmp.lt.s32.totalorder %v10892_v62, 1  ;;  %vm654_vm10 = vcmp.lt.s32.totalorder %v10892_v62, 4  ;;  %10893 = vst [vmem:[#allocation24_spill] sm:$0xff] %v7853_v43 }
 0x1df   : > { %v650_v59 = vor.u32 %v649_v53, %v648_v44  ;;  %vm652_vm11 = vcmp.lt.s32.totalorder %v10892_v62, 2  ;;  %v656_v50 = vsel %vm654_vm10, %v644_v16, 2102212464  ;;  %v659_v33 = vsel %vm651_vm9, %v638_v15, %v641_v28 }
 0x1e0   : > { %v576_v19 = vadd.s32 536870912, %v575_v13  ;;  %vm653_vm12 = vcmp.lt.s32.totalorder %v10892_v62, 3  ;;  %v660_v14 = vsel %vm654_vm10, %v647_v60, 920167782  ;;  %v663_v7 = vsel %vm651_vm9, %v641_v28, %v644_v16 }
 0x1e1   : > { %v655_v48 = vsel %vm651_vm9, %v635_v54, %v638_v15  ;;  %v661_v3 = vsel %vm653_vm12, %v644_v16, %v660_v14  ;;  %v664_v27 = vsel %vm654_vm10, %v650_v59, 1326507024  ;;  %v667_v18 = vshll.u32 %v627_v35, 8  ;;  %v7864_v15 = vpop.permute.xlu0 %2671  ;;  %v10894_v59 = vld [vmem:[#allocation38_spill] sm:$0xff] }
 0x1e2   : > { %v577_v52 = vshrl.u32 %v576_v19, 30  ;;  %v657_v46 = vsel %vm653_vm12, %v641_v28, %v656_v50  ;;  %v662_v10 = vsel %vm652_vm11, %v659_v33, %v661_v3  ;;  %v665_v24 = vsel %vm653_vm12, %v647_v60, %v664_v27  ;;  %v7888_v3 = vpop.permute.xlu1 %2675 }
 0x1e3   : > { %v2043_v44 = vsub.s32 32, %v7798_v22  ;;  %v666_v49 = vsel %vm652_vm11, %v663_v7, %v665_v24  ;;  %v7860_v53 = vmul.u32.u64.low %v667_v18, %v662_v10  ;;  %v7861_v2 = vmul.u32.u64.high %v667_v18, %v662_v10, %v7860_v53  ;;  %10896 = vst [vmem:[#allocation21_spill] sm:$0xff] %v7888_v3 }
 0x1e4   : > { %v2048_v43 = vadd.s32 127, %v2047_v5  ;;  %v578_v16 = vshll.u32 %v577_v52, 30  ;;  %v7866_v35 = vmul.u32.u64.low %v667_v18, %v666_v49  ;;  %v7867_v54 = vmul.u32.u64.high %v667_v18, %v666_v49, %v7866_v35  ;;  %v10903_v49 = vld [vmem:[#allocation26_spill] sm:$0xff] }
 0x1e5   : > { %v2131_v28 = vadd.s32 %v7376_v39, %v7387_v21  ;;  %v2027_v60 = vadd.s32 %v7457_v55, %v7470_v25  ;;  %v7875_v50 = vmul.f32 %v7685_v6, %v10894_v59  ;;  %v658_v33 = vsel %vm652_vm11, %v655_v48, %v657_v46  ;;  %v10901_v46 = vld [vmem:[#allocation9_spill] sm:$0xff] }
 0x1e6   : > { %v1843_v5 = vand.u32 2147483647, %v7741_v37  ;;  %v1845_v19 = vcvt.s32.f32 %v7739_v57  ;;  %v2148_v14 = vshll.u32 %v7591_v36, %v7714_v26  ;;  %v7883_v7 = vsub.s32 %v575_v13, %v578_v16  ;;  %v10897_v57 = vld [vmem:[#allocation5_spill] sm:$0xff] }
 0x1e7   : > { %v10895_v39 = vsub.s32 32, %v7714_v26  ;;  %v2153_v55 = vshll.u32 %v7789_v11, 23  ;;  %v2045_v25 = vshrl.u32 %v2027_v60, %v2043_v44  ;;  %v677_v62 = vadd.s32 1, %v7861_v2 }
 0x1e8   : > { %v2049_v48 = vshll.u32 %v2048_v43, 23  ;;  %v581_v37 = vsub.s32 0, %v7883_v7  ;;  %v674_v27 = vmul.u32 %v667_v18, %v658_v33  ;;  %vm676_vm15 = vc.u32 %v7867_v54, %v7860_v53  ;;  %v7906_v18 = vpop.permute.xlu0 %2679 }
 0x1e9   : > { %v2149_v21 = vshrl.u32 %v2131_v28, %v10895_v39  ;;  %v2044_v36 = vshll.u32 %v7622_v30, %v7798_v22  ;;  %v678_v26 = vsel %vm676_vm15, %v677_v62, %v7861_v2  ;;  %v10898_v13 = vand.u32 2147483647, %v10897_v57  ;;  %10902 = vst [vmem:[#allocation22_spill] sm:$0xff] %v7906_v18  ;;  %v7925_v39 = vpop.permute.xlu1 %2683 }
 0x1ea   : > { %v809_v10 = vsub.s32 4, %v10901_v46  ;;  %v2762_v43 = vmul.f32 %v7394_v58, %v7888_v3  ;;  %v5041_v24 = vmin.u32 %v581_v37, %v7883_v7  ;;  %v679_v44 = vadd.s32 %v678_v26, %v674_v27  ;;  %10904 = vst [vmem:[#allocation20_spill] sm:$0xff] %v7925_v39 }
 0x1eb   : > { %vm7899_vm6 = vcmp.le.f32.partialorder %v10898_v13, 0.7853982  ;;  %v7913_v22 = vmul.f32 %v1845_v19, %v1843_v5  ;;  %v7915_v2 = vor.u32 %v2149_v21, %v2148_v14  ;;  %v2763_v16 = vmul.f32 %v7394_v58, %v7906_v18 }
 0x1ec   : > { %v811_v30 = vsel %vm7899_vm6, %v10897_v57, %v10903_v49  ;;  %v601_v35 = vsub.s32 4, %v577_v52  ;;  %v7919_v28 = vor.u32 4788187, %v2153_v55  ;;  %v7921_v60 = vor.u32 %v2045_v25, %v2044_v36  ;;  %v7942_v26 = vpop.permute.xlu0 %2687 }
 0x1ed   : > { %v7923_v59 = vor.u32 4788187, %v2049_v48  ;;  %v583_v33 = vclz %v5041_v24  ;;  %v512_v62 = vlaneseq  ;;  %v680_v37 = vadd.s32 536870912, %v679_v44  ;;  %v10905_v48 = vld [vmem:[#allocation12_spill] sm:$0xff]  ;;  %10906 = vst [vmem:[#allocation14_spill] sm:$0xff] %v7942_v26 }
 0x1ee   : > { %v810_v5 = vsel %vm725_vm1, %v809_v10, %v10901_v46  ;;  %5644 = vcosq.f32 %v811_v30  ;;  %v7931_v19 = vadd.f32 %v7430_v12, %v2762_v43  ;;  %vm517_vm9 = vcmp.lt.s32.totalorder %v10875_v40, 0  ;;  %v10907_v46 = vld [vmem:[#allocation6_spill] sm:$0xff] }
 0x1ef   : > { %v5042_v14 = vadd.s32 4294967294, %v583_v33  ;;  %5646 = vsinq.f32 %v811_v30  ;;  %v7935_v21 = vadd.f32 %v7430_v12, %v2763_v16  ;;  %v602_v55 = vsel %vm517_vm9, %v601_v35, %v577_v52  ;;  %v10914_v16 = vld [vmem:[#allocation27_spill] sm:$0xff] }
 0x1f0   : > { %v681_v25 = vshrl.u32 %v680_v37, 30  ;;  %v913_v27 = vsub.s32 4, %v10905_v48  ;;  %v2764_v36 = vmul.f32 %v7394_v58, %v7925_v39  ;;  %v812_v13 = vsel %vm7899_vm6, 0, %v810_v5 }
 0x1f1   : > { %vm5043_vm1 = vcmp.lt.s32.totalorder %v5042_v14, 0  ;;  %v10908_v10 = vand.u32 2147483647, %v10907_v46  ;;  %v10911_v52 = vand.u32 2147483647, %v10875_v40  ;;  %v571_v35 = vadd.s32 %v7802_v20, %v7812_v63 }
 0x1f2   : > { %v586_v49 = vsel %vm5043_vm1, 0, %v5042_v14  ;;  %v682_v30 = vshll.u32 %v681_v25, 30  ;;  %v816_v14 = vadd.s32 3, %v812_v13  ;;  %v914_v18 = vsel %vm829_vm2, %v913_v27, %v10905_v48 }
 0x1f3   : > { %vm7948_vm10 = vcmp.le.f32.partialorder %v10908_v10, 0.7853982  ;;  %vm7954_vm11 = vcmp.le.f32.partialorder %v10911_v52, 0.7853982  ;;  %v587_v33 = vsub.s32 32, %v586_v49  ;;  %v591_v37 = vsub.s32 4294967266, %v586_v49 }
 0x1f4   : > { %v915_v11 = vsel %vm7948_vm10, %v10907_v46, %v10914_v16  ;;  %v604_v5 = vsel %vm7954_vm11, 0, %v602_v55  ;;  %v2765_v10 = vmul.f32 %v7394_v58, %v7942_v26  ;;  %v7968_v52 = vsub.s32 %v679_v44, %v682_v30 }
 0x1f5   : > { %v588_v16 = vshll.u32 %v7883_v7, %v586_v49  ;;  %v589_v39 = vshrl.u32 %v571_v35, %v587_v33  ;;  %v592_v3 = vadd.s32 127, %v591_v37  ;;  %5648 = vcosq.f32 %v915_v11 }
 0x1f6   : > { %v7974_v20 = vand.u32 127, %v512_v62  ;;  %v608_v63 = vadd.s32 3, %v604_v5  ;;  %v685_v55 = vsub.s32 0, %v7968_v52  ;;  %5650 = vsinq.f32 %v915_v11 }
 0x1f7   : > { %v7978_v58 = vadd.f32 %v7430_v12, %v2764_v36  ;;  %v590_v44 = vor.u32 %v589_v39, %v588_v16  ;;  %v593_v13 = vshll.u32 %v592_v3, 23  ;;  %v916_v30 = vsel %vm7948_vm10, 0, %v914_v18  ;;  %v10918_v39 = vld [vmem:[#allocation15_spill] sm:$0xff] }
 0x1f8   : > { %v5645_v48 = vpop.eup %5644  ;;  %v7983_v7 = vadd.f32 %v7430_v12, %v2765_v10  ;;  %vm621_vm2 = vcmp.lt.s32.totalorder %v10888_v61, 0  ;;  %v5045_v62 = vmin.u32 %v685_v55, %v7968_v52  ;;  %v705_v27 = vsub.s32 4, %v681_v25 }
 0x1f9   : > { %v5647_v49 = vpop.eup %5646  ;;  %v594_v35 = vor.u32 4788187, %v593_v13  ;;  %v10915_v11 = vand.u32 2147483647, %v10888_v61  ;;  %v817_v3 = vand.u32 3, %v816_v14  ;;  %v1017_v18 = vsub.s32 4, %v10918_v39 }
 0x1fa   : > { %v7994_v43 = vand.u32 3, %v608_v63  ;;  %v675_v12 = vadd.s32 %v7860_v53, %v7867_v54  ;;  %v687_v33 = vclz %v5045_v62  ;;  %v920_v37 = vadd.s32 3, %v916_v30 }
 0x1fb   : > { %vm7989_vm12 = vcmp.le.f32.partialorder %v10915_v11, 0.7853982  ;;  %v595_v5 = vand.u32 2147483647, %v594_v35  ;;  %v597_v10 = vcvt.s32.f32 %v590_v44  ;;  %v823_v16 = vxor.u32 2147483648, %v5645_v48 }
 0x1fc   : > { %v10919_v55 = vand.u32 2147483647, %v6071_v42  ;;  %v5046_v11 = vadd.s32 4294967294, %v687_v33  ;;  %v706_v14 = vsel %vm621_vm2, %v705_v27, %v681_v25  ;;  %v820_v63 = vxor.u32 2147483648, %v5647_v49 }
 0x1fd   : > { %v598_v54 = vmul.f32 %v597_v10, %v595_v5  ;;  %vm819_vm6 = vcmp.eq.s32.totalorder %v817_v3, 0  ;;  %v1018_v44 = vsel %vm933_vm13, %v1017_v18, %v10918_v39  ;;  %vm818_vm10 = vcmp.lt.s32.totalorder %v817_v3, 2 }
 0x1fe   : > { %vm8000_vm15 = vcmp.le.f32.partialorder %v10919_v55, 0.7853982  ;;  %vm5047_vm1 = vcmp.lt.s32.totalorder %v5046_v11, 0  ;;  %vm822_vm7 = vcmp.eq.s32.totalorder %v817_v3, 2  ;;  %v921_v30 = vand.u32 3, %v920_v37 }
 0x1ff   : > { %v1019_v53 = vsel %vm8000_vm15, %v6071_v42, %v7660_v29  ;;  %v5649_v62 = vpop.eup %5648  ;;  %v599_v25 = vxor.u32 2147483648, %v598_v54  ;;  %v690_v27 = vsel %vm5047_vm1, 0, %v5046_v11  ;;  %v708_v35 = vsel %vm7989_vm12, 0, %v706_v14  ;;  %v10922_v11 = vld [vmem:[#allocation7_spill] sm:$0xff] }
 0x200   : > { %5652 = vcosq.f32 %v1019_v53  ;;  %v824_v33 = vsel %vm822_vm7, %v823_v16, %v5647_v49  ;;  %v5651_v29 = vpop.eup %5650  ;;  %v691_v5 = vsub.s32 32, %v690_v27  ;;  %v695_v10 = vsub.s32 4294967266, %v690_v27  ;;  %v10926_v49 = vld [vmem:[#allocation13_spill] sm:$0xff] }
 0x201   : > { %5654 = vsinq.f32 %v1019_v53  ;;  %v821_v55 = vsel %vm819_vm6, %v5645_v48, %v820_v63  ;;  %v1020_v39 = vsel %vm8000_vm15, 0, %v1018_v44  ;;  %v600_v18 = vsel %vm517_vm9, %v599_v25, %v598_v54  ;;  %v10927_v54 = vld [vmem:[#allocation30_spill] sm:$0xff] }
 0x202   : > { %v692_v37 = vshll.u32 %v7968_v52, %v690_v27  ;;  %vm815_vm13 = vweird.f32 %v10897_v57  ;;  %v10923_v53 = vand.u32 2147483647, %v10922_v11  ;;  %v1121_v16 = vsub.s32 4, %v10926_v49 }
 0x203   : > { %v603_v48 = vsel %vm7954_vm11, %v10875_v40, %v600_v18  ;;  %v693_v13 = vshrl.u32 %v675_v12, %v691_v5  ;;  %v696_v63 = vadd.s32 127, %v695_v10  ;;  %vm922_vm7 = vcmp.lt.s32.totalorder %v921_v30, 2 }
 0x204   : > { %vm8024_vm1 = vcmp.le.f32.partialorder %v10923_v53, 0.7853982  ;;  %5656 = vcosq.f32 %v603_v48  ;;  %v924_v44 = vxor.u32 2147483648, %v5651_v29  ;;  %v927_v25 = vxor.u32 2147483648, %v5649_v62 }
 0x205   : > { %v1123_v52 = vsel %vm8024_vm1, %v10922_v11, %v10927_v54  ;;  %v1024_v27 = vadd.s32 3, %v1020_v39  ;;  %5658 = vsinq.f32 %v603_v48  ;;  %v694_v53 = vor.u32 %v693_v13, %v692_v37 }
 0x206   : > { %v697_v26 = vshll.u32 %v696_v63, 23  ;;  %v1122_v24 = vsel %vm1037_vm4, %v1121_v16, %v10926_v49  ;;  %v712_v18 = vadd.s32 3, %v708_v35  ;;  %vm923_vm9 = vcmp.eq.s32.totalorder %v921_v30, 0 }
 0x207   : > { %v1124_v12 = vsel %vm8024_vm1, 0, %v1122_v24  ;;  %5660 = vcosq.f32 %v1123_v52  ;;  %vm926_vm11 = vcmp.eq.s32.totalorder %v921_v30, 2  ;;  %v825_v39 = vsel %vm818_vm10, %v821_v55, %v824_v33 }
 0x208   : > { %v698_v5 = vor.u32 4788187, %v697_v26  ;;  %5662 = vsinq.f32 %v1123_v52  ;;  %v1128_v10 = vadd.s32 3, %v1124_v12  ;;  %v8042_v48 = vand.u32 3, %v1024_v27 }
 0x209   : > { %v2796_v37 = vmax.f32 %v7978_v58, 0.0  ;;  %v2797_v13 = vmax.f32 %v7983_v7, 0.0  ;;  %vm611_vm4 = vcmp.eq.s32.totalorder %v7994_v43, 0  ;;  %vm614_vm15 = vcmp.eq.s32.totalorder %v7994_v43, 2 }
 0x20a   : > { %v5653_v54 = vpop.eup %5652  ;;  %v699_v35 = vand.u32 2147483647, %v698_v5  ;;  %v701_v14 = vcvt.s32.f32 %v694_v53  ;;  %v925_v26 = vsel %vm923_vm9, %v5649_v62, %v924_v44  ;;  %v928_v16 = vsel %vm926_vm11, %v927_v25, %v5651_v29  ;;  %v10931_v29 = vld [vmem:[#allocation18_spill] sm:$0xff] }
 0x20b   : > { %v5655_v49 = vpop.eup %5654  ;;  %v8049_v63 = vand.u32 3, %v712_v18  ;;  %v1031_v33 = vxor.u32 2147483648, %v5653_v54  ;;  %v5468_v55 = vpack.i.bf16 %v2797_v13, %v2796_v37  ;;  %v8053_v58 = vsel %vm815_vm13, nan, %v825_v39 }
 0x20c   : > { %v1028_v3 = vxor.u32 2147483648, %v5655_v49  ;;  %v702_v52 = vmul.f32 %v701_v14, %v699_v35  ;;  %vm919_vm6 = vweird.f32 %v10907_v46  ;;  %v1129_v7 = vand.u32 3, %v1128_v10 }
 0x20d   : > { %v10928_v27 = vand.u32 2147483647, %v10868_v8  ;;  %vm610_vm1 = vcmp.lt.s32.totalorder %v7994_v43, 2  ;;  %v929_v62 = vsel %vm922_vm7, %v925_v26, %v928_v16  ;;  %vm1026_vm9 = vcmp.lt.s32.totalorder %v8042_v48, 2  ;;  %5469 = vrot.lane.b32.xlu0 %v5468_v55, %s5869_s16  ;;  %v10935_v26 = vld [vmem:[#allocation16_spill] sm:$0xff] }
 0x20e   : > { %v1225_v44 = vsub.s32 4, %v10931_v29  ;;  %v703_v24 = vxor.u32 2147483648, %v702_v52  ;;  %vm1027_vm13 = vcmp.eq.s32.totalorder %v8042_v48, 0  ;;  %vm1030_vm11 = vcmp.eq.s32.totalorder %v8042_v48, 2  ;;  %v5657_v18 = vpop.eup %5656 }
 0x20f   : > { %vm8058_vm10 = vcmp.le.f32.partialorder %v10928_v27, 0.7853982  ;;  %vm514_vm7 = vcmp.eq.s32.totalorder %v7974_v20, 0  ;;  %v1029_v30 = vsel %vm1027_vm13, %v5653_v54, %v1028_v3  ;;  %v1032_v12 = vsel %vm1030_vm11, %v1031_v33, %v5655_v49  ;;  %v5659_v10 = vpop.eup %5658  ;;  %v5788_v3 = vld [vmem:[%s5984_s28 + $0x68] sm:$0xff] }
 0x210   : > { %v1227_v25 = vsel %vm8058_vm10, %v10868_v8, %v7697_v34  ;;  %v1226_v5 = vsel %vm1141_vm0, %v1225_v44, %v10931_v29  ;;  %vm607_vm8 = vweird.f32 %v10875_v40  ;;  %v615_v34 = vxor.u32 2147483648, %v5657_v18  ;;  %v8101_v44 = vpop.permute.xlu1 %2691 }
 0x211   : > { %5664 = vcosq.f32 %v1227_v25  ;;  %v704_v39 = vsel %vm621_vm2, %v703_v24, %v702_v52  ;;  %vm1134_vm3 = vcmp.eq.s32.totalorder %v1129_v7, 2  ;;  %v1228_v37 = vsel %vm8058_vm10, 0, %v1226_v5  ;;  %v5661_v13 = vpop.eup %5660  ;;  %3175 = vperm.xlu0 %5461, %v5788_v3  }
 0x212   : > { %5666 = vsinq.f32 %v1227_v25  ;;  %v612_v35 = vxor.u32 2147483648, %v5659_v10  ;;  %v707_v54 = vsel %vm7989_vm12, %v10888_v61, %v704_v39  ;;  %v10932_v49 = vand.u32 2147483647, %v10867_v0  ;;  %v5663_v33 = vpop.eup %5662 }
 0x213   : > { %v1329_v16 = vsub.s32 4, %v10935_v26  ;;  %5668 = vcosq.f32 %v707_v54  ;;  %v1135_v55 = vxor.u32 2147483648, %v5661_v13  ;;  %v1232_v52 = vadd.s32 3, %v1228_v37 }
 0x214   : > { %vm8087_vm0 = vcmp.le.f32.partialorder %v10932_v49, 0.7853982  ;;  %v613_v27 = vsel %vm611_vm4, %v5657_v18, %v612_v35  ;;  %v616_v53 = vsel %vm614_vm15, %v615_v34, %v5659_v10  ;;  %5670 = vsinq.f32 %v707_v54 }
 0x215   : > { %v1331_v36 = vsel %vm8087_vm0, %v10867_v0, %v7670_v56  ;;  %v1132_v29 = vxor.u32 2147483648, %v5663_v33  ;;  %vm1131_vm2 = vcmp.eq.s32.totalorder %v1129_v7, 0  ;;  %v1136_v25 = vsel %vm1134_vm3, %v1135_v55, %v5663_v33  ;;  %3183 = vperm.xlu0 %5461, %v7646_v4  }
 0x216   : > { %v1330_v24 = vsel %vm1245_vm14, %v1329_v16, %v10935_v26  ;;  %5672 = vcosq.f32 %v1331_v36  ;;  %v930_v56 = vsel %vm919_vm6, nan, %v929_v62  ;;  %v1033_v18 = vsel %vm1026_vm9, %v1029_v30, %v1032_v12 }
 0x217   : > { %vm1130_vm12 = vcmp.lt.s32.totalorder %v1129_v7, 2  ;;  %v1133_v5 = vsel %vm1131_vm2, %v5661_v13, %v1132_v29  ;;  %v617_v10 = vsel %vm610_vm1, %v613_v27, %v616_v53  ;;  %vm1023_vm3 = vweird.f32 %v6071_v42  ;;  %v10937_v29 = vld [vmem:[#allocation33_spill] sm:$0xff] }
 0x218   : > { %v1137_v34 = vsel %vm1130_vm12, %v1133_v5, %v1136_v25  ;;  %v1332_v39 = vsel %vm8087_vm0, 0, %v1330_v24  ;;  %vm1127_vm14 = vweird.f32 %v10922_v11  ;;  %v1233_v37 = vand.u32 3, %v1232_v52 }
 0x219   : > { %5674 = vsinq.f32 %v1331_v36  ;;  %v1336_v62 = vadd.s32 3, %v1332_v39  ;;  %vm714_vm4 = vcmp.lt.s32.totalorder %v8049_v63, 2  ;;  %v8122_v4 = vsel %vm514_vm7, %v10907_v46, %v930_v56  ;;  %v8138_v46 = vpop.permute.xlu1 %2699 }
 0x21a   : > { %v1034_v43 = vsel %vm1023_vm3, nan, %v1033_v18  ;;  %v1138_v7 = vsel %vm1127_vm14, nan, %v1137_v34  ;;  %v2794_v30 = vmax.f32 %v7931_v19, 0.0  ;;  %v618_v13 = vsel %vm607_vm8, nan, %v617_v10 }
 0x21b   : > { %v5665_v48 = vpop.eup %5664  ;;  %vm711_vm15 = vweird.f32 %v10888_v61  ;;  %vm715_vm6 = vcmp.eq.s32.totalorder %v8049_v63, 0  ;;  %v2795_v54 = vmax.f32 %v7935_v21, 0.0  ;;  %v10936_v49 = vmov 0  }
 0x21c   : > { %v5667_v12 = vpop.eup %5666  ;;  %v1239_v35 = vxor.u32 2147483648, %v5665_v48  ;;  %5587 = vset.pattern.permute.xlu0 %v10936_v49  ;;  %vm718_vm10 = vcmp.eq.s32.totalorder %v8049_v63, 2  ;;  %v8136_v19 = vsel %vm514_vm7, %v10897_v57, %v8053_v58  ;;  %v1337_v26 = vand.u32 3, %v1336_v62 }
 0x21d   : > { %v1236_v14 = vxor.u32 2147483648, %v5667_v12  ;;  %vm2216_vm8 = vcmask 261120   ;;  %v2200_v16 = vpack.c.bf16 %v8122_v4, %v8136_v19  ;;  %v8145_v21 = vsel %vm514_vm7, %v6071_v42, %v1034_v43  ;;  %v5669_v57 = vpop.eup %5668  ;;  %v8174_v39 = vpop.permute.xlu1 %2883  ;;  %v10960_v19 = vld [vmem:[#allocation8_spill] sm:$0xff] }
 0x21e   : > { %v8150_v3 = vsel %vm514_vm7, %v10922_v11, %v1138_v7  ;;  %vm1234_vm1 = vcmp.lt.s32.totalorder %v1233_v37, 2  ;;  %v2179_v58 = vsel %vm514_vm7, %v10875_v40, %v618_v13  ;;  %vm1231_vm9 = vweird.f32 %v10868_v8  ;;  %v5671_v55 = vpop.eup %5670  ;;  %v8160_v40 = vpop.permute.xlu0 %2695 }
 0x21f   : > { %vm1235_vm13 = vcmp.eq.s32.totalorder %v1233_v37, 0  ;;  %vm1238_vm11 = vcmp.eq.s32.totalorder %v1233_v37, 2  ;;  %v5463_v33 = vpack.i.bf16 %v2795_v54, %v2794_v30  ;;  %v719_v52 = vxor.u32 2147483648, %v5669_v57 }
 0x220   : > { %v1237_v42 = vsel %vm1235_vm13, %v5665_v48, %v1236_v14  ;;  %v1240_v36 = vsel %vm1238_vm11, %v1239_v35, %v5667_v12  ;;  %vm1335_vm0 = vweird.f32 %v10867_v0  ;;  %v5673_v27 = vpop.eup %5672  ;;  %v716_v11 = vxor.u32 2147483648, %v5671_v55  ;;  %v10944_v14 = vld [vmem:[#allocation28_spill] sm:$0xff] }
 0x221   : > { %v2201_v53 = vpack.c.bf16 %v8150_v3, %v8145_v21  ;;  %vm1338_vm2 = vcmp.lt.s32.totalorder %v1337_v26, 2  ;;  %5464 = vrot.lane.b32.xlu1 %v5463_v33, %s5869_s16  ;;  %v1433_v25 = vsub.s32 4, %v10937_v29  ;;  %v720_v24 = vsel %vm718_vm10, %v719_v52, %v5671_v55  ;;  %v10954_v12 = vld [vmem:[#allocation32_spill] sm:$0xff] }
 0x222   : > { %vm1342_vm12 = vcmp.eq.s32.totalorder %v1337_v26, 2  ;;  %v1343_v56 = vxor.u32 2147483648, %v5673_v27  ;;  %v10938_v18 = vand.u32 2147483647, %v10870_v41  ;;  %v717_v10 = vsel %vm715_vm6, %v5669_v57, %v716_v11  ;;  %v8204_v52 = vpop.permute.xlu0 %2703 }
 0x223   : > { %v1241_v34 = vsel %vm1234_vm1, %v1237_v42, %v1240_v36  ;;  %v1434_v62 = vsel %vm1349_vm5, %v1433_v25, %v10937_v29  ;;  %v5675_v43 = vpop.eup %5674  ;;  %v721_v7 = vsel %vm714_vm4, %v717_v10, %v720_v24  ;;  %v10941_v37 = vand.u32 2147483647, %v6402_v32  ;;  %v10946_v29 = vld [vmem:[#allocation40_spill] sm:$0xff] }
 0x224   : > { %vm8167_vm3 = vcmp.le.f32.partialorder %v10938_v18, 0.7853982  ;;  %v722_v13 = vsel %vm711_vm15, nan, %v721_v7  ;;  %v1340_v35 = vxor.u32 2147483648, %v5675_v43  ;;  %v1344_v54 = vsel %vm1342_vm12, %v1343_v56, %v5675_v43  ;;  %v10952_v43 = vld [vmem:[#allocation29_spill] sm:$0xff] }
 0x225   : > { %v1435_v48 = vsel %vm8167_vm3, %v10870_v41, %v7711_v47  ;;  %v1436_v30 = vsel %vm8167_vm3, 0, %v1434_v62  ;;  %vm8189_vm14 = vcmp.le.f32.partialorder %v10941_v37, 0.7853982  ;;  %v5789_v47 = vld [vmem:[%s5984_s28 + $0x60] sm:$0xff]  ;;  %v2180_v63 = vsel %vm514_vm7, %v10888_v61, %v722_v13  ;;  %s10491_s28 = scalar_lea.hbm %s10540_s9, %s5151_s17 }
 0x226   : > { %5676 = vcosq.f32 %v1435_v48  ;;  %3171 = vperm.xlu1 %5462, %v5789_v47   ;;  %vm1339_vm5 = vcmp.eq.s32.totalorder %v1337_v26, 0  ;;  %v1537_v21 = vsub.s32 4, %v10944_v14  ;;  %v1539_v3 = vsel %vm8189_vm14, %v6402_v32, %v7707_v38  ;;  %v8220_v26 = vpop.permute.xlu1 %2891  ;;  %v8263_v62 = vpop.permute.xlu0 %2887 }
 0x227   : > { %5678 = vsinq.f32 %v1435_v48  ;;  %v2199_v57 = vpack.c.bf16 %v2180_v63, %v2179_v58  ;;  %v1341_v33 = vsel %vm1339_vm5, %v5673_v27, %v1340_v35  ;;  %v1440_v55 = vadd.s32 3, %v1436_v30 }
 0x228   : > { %5680 = vcosq.f32 %v1539_v3  ;;  %v1242_v42 = vsel %vm1231_vm9, nan, %v1241_v34  ;;  %v1345_v36 = vsel %vm1338_vm2, %v1341_v33, %v1344_v54  ;;  %vm10945_vm4 = vcmp.lt.s32.totalorder %v6402_v32, 0 }
 0x229   : > { %v1538_v61 = vsel %vm10945_vm4, %v1537_v21, %v10944_v14  ;;  %5682 = vsinq.f32 %v1539_v3  ;;  %v2155_v11 = vand.u32 2147483647, %v7919_v28  ;;  %v2469_v38 = vmul.f32 %v7685_v6, %v10946_v29  ;;  %5204 = vmatprep.mubr.msk.bf16.mxu0 %vm2216_vm8, %v2199_v57  ;;  %v10958_v57 = vld [vmem:[#allocation35_spill] sm:$0xff] }
 0x22a   : > { %v1346_v58 = vsel %vm1335_vm0, nan, %v1345_v36  ;;  %v1540_v27 = vsel %vm8189_vm14, 0, %v1538_v61  ;;  %3179 = vperm.xlu1 %5462, %v7637_v23   ;;  %v1951_v25 = vxor.u32 2147483648, %v7733_v45  ;;  %v2157_v24 = vcvt.s32.f32 %v7915_v2  ;;  %5205 = vmatmul.mubr.msk.bf16.vlgmr.msra.gmra.mrb[0].mxu0 %vm2216_vm8, %v2200_v16  ;;  %v10950_v16 = vld [vmem:[#allocation37_spill] sm:$0xff]  ;;  %v8274_v35 = vpop.permute.xlu1 %2895 }
 0x22b   : > { %v2051_v28 = vand.u32 2147483647, %v7923_v59  ;;  %v8228_v56 = vadd.f32 %v7703_v17, %v7875_v50  ;;  %5208 = vmatprep.mubr.msk.bf16.mxu0 %vm2216_vm8, %v2201_v53  ;;  %v2185_v23 = vsel %vm514_vm7, %v10868_v8, %v1242_v42  ;;  %v2186_v2 = vsel %vm514_vm7, %v10867_v0, %v1346_v58  ;;  %v10951_v0 = vld [vmem:[#allocation41_spill] sm:$0xff] }
 0x22c   : > { %v1441_v59 = vand.u32 3, %v1440_v55  ;;  %v1544_v18 = vadd.s32 3, %v1540_v27  ;;  %v1847_v50 = vxor.u32 2147483648, %v7913_v22  ;;  %v2053_v5 = vcvt.s32.f32 %v7921_v60  ;;  %v8294_v27 = vpop.permute.xlu0 %2899 }
 0x22d   : > { %v10947_v4 = vand.u32 2147483647, %v10874_v31  ;;  %v1641_v53 = vsub.s32 4, %v10950_v16  ;;  %v8250_v10 = vmul.f32 %v2157_v24, %v2155_v11  ;;  %v8253_v8 = vadd.f32 %v7703_v17, %v2469_v38 }
 0x22e   : > { %v8257_v34 = vmul.f32 %v7685_v6, %v10951_v0  ;;  %5583 = vset.pattern.permute.xlu1 %v10936_v49  ;;  %vm1869_vm6 = vcmp.lt.s32.totalorder %v10952_v43, 0  ;;  %v8267_v7 = vmul.f32 %v2053_v5, %v2051_v28  ;;  %v2202_v30 = vpack.c.bf16 %v2186_v2, %v2185_v23  ;;  %v8301_v2 = vpop.permute.xlu1 %2903 }
 0x22f   : > { %vm8245_vm15 = vcmp.le.f32.partialorder %v10947_v4, 0.7853982  ;;  %vm10953_vm10 = vcmp.lt.s32.totalorder %v10874_v31, 0  ;;  %vm1765_vm1 = vcmp.lt.s32.totalorder %v10954_v12, 0  ;;  %vm1439_vm9 = vweird.f32 %v10870_v41 }
 0x230   : > { %v1643_v60 = vsel %vm8245_vm15, %v10874_v31, %v7731_v9  ;;  %v5677_v48 = vpop.eup %5676  ;;  %v1642_v6 = vsel %vm10953_vm10, %v1641_v53, %v10950_v16  ;;  %vm1442_vm13 = vcmp.lt.s32.totalorder %v1441_v59, 2  ;;  %v1545_v13 = vand.u32 3, %v1544_v18 }
 0x231   : > { %5684 = vcosq.f32 %v1643_v60  ;;  %v5679_v37 = vpop.eup %5678  ;;  %v1447_v9 = vxor.u32 2147483648, %v5677_v48  ;;  %vm1446_vm11 = vcmp.eq.s32.totalorder %v1441_v59, 2  ;;  %v1644_v47 = vsel %vm8245_vm15, 0, %v1642_v6 }
 0x232   : > { %v1444_v54 = vxor.u32 2147483648, %v5679_v37  ;;  %5686 = vsinq.f32 %v1643_v60  ;;  %v5681_v63 = vpop.eup %5680  ;;  %vm1443_vm0 = vcmp.eq.s32.totalorder %v1441_v59, 0  ;;  %v10955_v21 = vand.u32 2147483647, %v10873_v1  ;;  %5209 = vmatmul.mubr.msk.bf16.gmra.mrb[4].mxu0 %vm2216_vm8, %v2202_v30  ;;  %v10961_v30 = vld [vmem:[#allocation42_spill] sm:$0xff] }
 0x233   : > { %v1448_v14 = vsel %vm1446_vm11, %v1447_v9, %v5679_v37  ;;  %v1745_v33 = vsub.s32 4, %v10958_v57  ;;  %v5683_v55 = vpop.eup %5682  ;;  %v1551_v36 = vxor.u32 2147483648, %v5681_v63  ;;  %v1648_v61 = vadd.s32 3, %v1644_v47  ;;  %v10962_v37 = vld [vmem:[#allocation34_spill] sm:$0xff]  ;;  %v10963_v9 = vld [vmem:[#allocation36_spill] sm:$0xff]  ;;  %v8335_v47 = vpop.permute.xlu0 %2907 }
 0x234   : > { %vm8280_vm2 = vcmp.le.f32.partialorder %v10955_v21, 0.7853982  ;;  %v1445_v42 = vsel %vm1443_vm0, %v5677_v48, %v1444_v54  ;;  %v1548_v38 = vxor.u32 2147483648, %v5683_v55  ;;  %vm1550_vm12 = vcmp.eq.s32.totalorder %v1545_v13, 2  ;;  %10964 = vst [vmem:[#allocation23_spill] sm:$0xff] %v8335_v47  ;;  %v10965_v21 = vld [vmem:[#allocation43_spill] sm:$0xff] }
 0x235   : > { %v1747_v11 = vsel %vm8280_vm2, %v10873_v1, %v7718_v51  ;;  %v1449_v29 = vsel %vm1442_vm13, %v1445_v42, %v1448_v14  ;;  %vm10959_vm3 = vcmp.lt.s32.totalorder %v10873_v1, 0  ;;  %vm1547_vm14 = vcmp.eq.s32.totalorder %v1545_v13, 0 }
 0x236   : > { %v1746_v58 = vsel %vm10959_vm3, %v1745_v33, %v10958_v57  ;;  %v1450_v24 = vsel %vm1439_vm9, nan, %v1449_v29  ;;  %v1552_v28 = vsel %vm1550_vm12, %v1551_v36, %v5683_v55  ;;  %5688 = vcosq.f32 %v1747_v11  ;;  %v8350_v55 = vpop.permute.xlu1 %2911  ;;  %v10970_v36 = vld [vmem:[#allocation46_spill] sm:$0xff] }
 0x237   : > { %vm1543_vm5 = vweird.f32 %v6402_v32  ;;  %vm1546_vm4 = vcmp.lt.s32.totalorder %v1545_v13, 2  ;;  %v1549_v51 = vsel %vm1547_vm14, %v5681_v63, %v1548_v38  ;;  %v1748_v23 = vsel %vm8280_vm2, 0, %v1746_v58  ;;  %10969 = vst [vmem:[#allocation38_spill] sm:$0xff] %v8350_v55 }
 0x238   : > { %v1553_v59 = vsel %vm1546_vm4, %v1549_v51, %v1552_v28  ;;  %v2187_v18 = vsel %vm514_vm7, %v10870_v41, %v1450_v24  ;;  %v1649_v5 = vand.u32 3, %v1648_v61  ;;  %5690 = vsinq.f32 %v1747_v11  ;;  %v8319_v41 = vld [vmem:[%s10533_s2] ss:$0 sm:$0xff]  ;;  %v10974_v24 = vld [vmem:[#allocation39_spill] sm:$0xff] }
 0x239   : > { %v1952_v4 = vsel %vm1869_vm6, %v1951_v25, %v7733_v45  ;;  %v1554_v0 = vsel %vm1543_vm5, nan, %v1553_v59  ;;  %v1848_v48 = vsel %vm1765_vm1, %v1847_v50, %v7913_v22  ;;  %v8323_v6 = vmul.f32 %v8319_v41, %v10961_v30 }
 0x23a   : > { %v2188_v45 = vsel %vm514_vm7, %v6402_v32, %v1554_v0  ;;  %v1752_v25 = vadd.s32 3, %v1748_v23  ;;  %vm2077_vm15 = vcmp.lt.s32.totalorder %v10962_v37, 0  ;;  %vm1973_vm10 = vcmp.lt.s32.totalorder %v10963_v9, 0 }
 0x23b   : > { %v5685_v60 = vpop.eup %5684  ;;  %v8333_v50 = vadd.f32 %v7703_v17, %v8257_v34  ;;  %v2203_v13 = vpack.c.bf16 %v2188_v45, %v2187_v18  ;;  %v2159_v14 = vxor.u32 2147483648, %v8250_v10  ;;  %v2055_v32 = vxor.u32 2147483648, %v8267_v7 }
 0x23c   : > { %v1655_v54 = vxor.u32 2147483648, %v5685_v60  ;;  %v5687_v63 = vpop.eup %5686  ;;  %v8341_v3 = vmul.f32 %v8319_v41, %v10965_v21  ;;  %vm1654_vm9 = vcmp.eq.s32.totalorder %v1649_v5, 2  ;;  %vm1650_vm13 = vcmp.lt.s32.totalorder %v1649_v5, 2 }
 0x23d   : > { %5212 = vmatprep.mubr.msk.bf16.mxu0 %vm2216_vm8, %v2203_v13  ;;  %v1652_v57 = vxor.u32 2147483648, %v5687_v63  ;;  %v10966_v34 = vand.u32 2147483647, %v10954_v12  ;;  %vm1651_vm0 = vcmp.eq.s32.totalorder %v1649_v5, 0  ;;  %v1753_v42 = vand.u32 3, %v1752_v25 }
 0x23e   : > { %v1656_v17 = vsel %vm1654_vm9, %v1655_v54, %v5687_v63  ;;  %v1849_v61 = vsub.s32 4, %v10970_v36  ;;  %v10971_v38 = vand.u32 2147483647, %v10952_v43  ;;  %v1953_v28 = vsub.s32 4, %v10974_v24  ;;  %v8379_v63 = vpop.permute.xlu1 %2919 }
 0x23f   : > { %vm8346_vm11 = vcmp.le.f32.partialorder %v10966_v34, 0.7853982  ;;  %v1653_v29 = vsel %vm1651_vm0, %v5685_v60, %v1652_v57  ;;  %vm1647_vm12 = vweird.f32 %v10874_v31  ;;  %vm1758_vm3 = vcmp.eq.s32.totalorder %v1753_v42, 2  ;;  %10975 = vst [vmem:[#allocation5_spill] sm:$0xff] %v8379_v63  ;;  %v8390_v34 = vld [vmem:[%s10533_s2 + $0x2] ss:$0 sm:$0xff] }
 0x240   : > { %v1851_v11 = vsel %vm8346_vm11, %v10954_v12, %v1848_v48  ;;  %vm8358_vm2 = vcmp.le.f32.partialorder %v10971_v38, 0.7853982  ;;  %v5689_v51 = vpop.eup %5688  ;;  %v1657_v23 = vsel %vm1650_vm13, %v1653_v29, %v1656_v17  ;;  %v1850_v59 = vsel %vm1765_vm1, %v1849_v61, %v10970_v36  ;;  %v8375_v48 = vpop.permute.xlu0 %2915 }
 0x241   : > { %5692 = vcosq.f32 %v1851_v11  ;;  %v1955_v18 = vsel %vm8358_vm2, %v10952_v43, %v1952_v4  ;;  %v1759_v5 = vxor.u32 2147483648, %v5689_v51  ;;  %v1852_v0 = vsel %vm8346_vm11, 0, %v1850_v59 }
 0x242   : > { %5694 = vsinq.f32 %v1851_v11  ;;  %v1954_v60 = vsel %vm1869_vm6, %v1953_v28, %v10974_v24  ;;  %v5691_v30 = vpop.eup %5690  ;;  %v1856_v45 = vadd.s32 3, %v1852_v0  ;;  %v1658_v4 = vsel %vm1647_vm12, nan, %v1657_v23  ;;  %v10977_v28 = vld [vmem:[#allocation56_spill] sm:$0xff] }
 0x243   : > { %v1956_v25 = vsel %vm8358_vm2, 0, %v1954_v60  ;;  %5696 = vcosq.f32 %v1955_v18  ;;  %v1756_v13 = vxor.u32 2147483648, %v5691_v30  ;;  %v1760_v54 = vsel %vm1758_vm3, %v1759_v5, %v5691_v30  ;;  %v8437_v60 = vpop.permute.xlu1 %2927 }
 0x244   : > { %5698 = vsinq.f32 %v1955_v18  ;;  %v2160_v21 = vsel %vm2077_vm15, %v2159_v14, %v8250_v10  ;;  %v2056_v57 = vsel %vm1973_vm10, %v2055_v32, %v8267_v7  ;;  %vm1755_vm6 = vcmp.eq.s32.totalorder %v1753_v42, 0 }
 0x245   : > { %v1960_v17 = vadd.s32 3, %v1956_v25  ;;  %v8394_v33 = vmul.f32 %v8390_v34, %v8101_v44  ;;  %v8398_v36 = vmul.f32 %v8390_v34, %v8138_v46  ;;  %vm1754_vm1 = vcmp.lt.s32.totalorder %v1753_v42, 2  ;;  %v8412_v42 = vpop.permute.xlu0 %2923 }
 0x246   : > { %v1757_v10 = vsel %vm1755_vm6, %v5689_v51, %v1756_v13  ;;  %vm1751_vm14 = vweird.f32 %v10873_v1  ;;  %v2189_v14 = vsel %vm514_vm7, %v10874_v31, %v1658_v4  ;;  %v1857_v32 = vand.u32 3, %v1856_v45  ;;  %10976 = vst [vmem:[#allocation9_spill] sm:$0xff] %v8412_v42 }
 0x247   : > { %v1761_v7 = vsel %vm1754_vm1, %v1757_v10, %v1760_v54  ;;  %v8406_v61 = vmul.f32 %v8390_v34, %v8174_v39  ;;  %v8410_v11 = vmul.f32 %v8390_v34, %v8160_v40  ;;  %v1961_v38 = vand.u32 3, %v1960_v17 }
 0x248   : > { %v1762_v29 = vsel %vm1751_vm14, nan, %v1761_v7  ;;  %v8416_v58 = vmul.f32 %v8390_v34, %v8220_v26  ;;  %v8420_v31 = vmul.f32 %v8390_v34, %v8204_v52  ;;  %v2057_v51 = vsub.s32 4, %v10977_v28 }
 0x249   : > { %v2190_v24 = vsel %vm514_vm7, %v10873_v1, %v1762_v29  ;;  %v8428_v18 = vmul.f32 %v8390_v34, %v8274_v35  ;;  %vm1855_vm5 = vweird.f32 %v10954_v12  ;;  %v10978_v5 = vand.u32 2147483647, %v10963_v9  ;;  %v8446_v13 = vpop.permute.xlu0 %2931 }
 0x24a   : > { %v2204_v59 = vpack.c.bf16 %v2190_v24, %v2189_v14  ;;  %vm1858_vm9 = vcmp.lt.s32.totalorder %v1857_v32, 2  ;;  %vm1859_vm13 = vcmp.eq.s32.totalorder %v1857_v32, 0  ;;  %v2058_v45 = vsel %vm1973_vm10, %v2057_v51, %v10977_v28  ;;  %10981 = vst [vmem:[#allocation26_spill] sm:$0xff] %v8446_v13  ;;  %v10985_v51 = vld [vmem:[#allocation51_spill] sm:$0xff] }
 0x24b   : > { %v5693_v23 = vpop.eup %5692  ;;  %vm8433_vm4 = vcmp.le.f32.partialorder %v10978_v5, 0.7853982  ;;  %vm1862_vm11 = vcmp.eq.s32.totalorder %v1857_v32, 2  ;;  %vm1963_vm0 = vcmp.eq.s32.totalorder %v1961_v38, 0  ;;  %v10982_v7 = vand.u32 2147483647, %v10962_v37 }
 0x24c   : > { %v5695_v30 = vpop.eup %5694  ;;  %v1863_v1 = vxor.u32 2147483648, %v5693_v23  ;;  %5213 = vmatmul.mubr.msk.bf16.gmra.mrb[8].mxu0 %vm2216_vm8, %v2204_v59  ;;  %v2059_v4 = vsel %vm8433_vm4, %v10963_v9, %v2056_v57  ;;  %v2060_v10 = vsel %vm8433_vm4, 0, %v2058_v45  ;;  %v2161_v57 = vsub.s32 4, %v10985_v51  ;;  %v8457_v59 = vpop.permute.xlu1 %2935 }
 0x24d   : > { %v1860_v25 = vxor.u32 2147483648, %v5695_v30  ;;  %v5697_v54 = vpop.eup %5696  ;;  %5700 = vcosq.f32 %v2059_v4  ;;  %vm8452_vm10 = vcmp.le.f32.partialorder %v10982_v7, 0.7853982  ;;  %vm1966_vm2 = vcmp.eq.s32.totalorder %v1961_v38, 2 }
 0x24e   : > { %v1864_v17 = vsel %vm1862_vm11, %v1863_v1, %v5695_v30  ;;  %v5699_v29 = vpop.eup %5698  ;;  %v1967_v28 = vxor.u32 2147483648, %v5697_v54  ;;  %5702 = vsinq.f32 %v2059_v4  ;;  %v2163_v0 = vsel %vm8452_vm10, %v10962_v37, %v2160_v21 }
 0x24f   : > { %v1861_v24 = vsel %vm1859_vm13, %v5693_v23, %v1860_v25  ;;  %v1964_v30 = vxor.u32 2147483648, %v5699_v29  ;;  %v2162_v23 = vsel %vm2077_vm15, %v2161_v57, %v10985_v51  ;;  %5704 = vcosq.f32 %v2163_v0  ;;  %v8468_v25 = vpop.permute.xlu0 %5422  ;;  %v10986_v51 = vld [vmem:[#allocation44_spill] sm:$0xff] }
 0x250   : > { %v1865_v5 = vsel %vm1858_vm9, %v1861_v24, %v1864_v17  ;;  %v1968_v45 = vsel %vm1966_vm2, %v1967_v28, %v5699_v29  ;;  %vm1959_vm12 = vweird.f32 %v10952_v43  ;;  %vm1962_vm3 = vcmp.lt.s32.totalorder %v1961_v38, 2  ;;  %v8477_v29 = vpop.permute.xlu1 %5427 }
 0x251   : > { %v1866_v1 = vsel %vm1855_vm5, nan, %v1865_v5  ;;  %v1965_v32 = vsel %vm1963_vm0, %v5697_v54, %v1964_v30  ;;  %v2064_v4 = vadd.s32 3, %v2060_v10  ;;  %v2164_v7 = vsel %vm8452_vm10, 0, %v2162_v23  ;;  %v8498_v30 = vld [vmem:[%s10533_s2 + $0x3] ss:$0 sm:$0xff] }
 0x252   : > { %v1969_v17 = vsel %vm1962_vm3, %v1965_v32, %v1968_v45  ;;  %v2191_v21 = vsel %vm514_vm7, %v10954_v12, %v1866_v1  ;;  %5706 = vsinq.f32 %v2163_v0  ;;  %v2995_v24 = vmul.f32 %v8390_v34, %v8263_v62 }
 0x253   : > { %v1970_v28 = vsel %vm1959_vm12, nan, %v1969_v17  ;;  %v2999_v38 = vmul.f32 %v8390_v34, %v8301_v2  ;;  %v2998_v54 = vmul.f32 %v8390_v34, %v8294_v27  ;;  %v8488_v12 = vmul.f32 %v8319_v41, %v10986_v51  ;;  %v8493_v5 = vpop.permute.xlu0 %5432 }
 0x254   : > { %v2192_v14 = vsel %vm514_vm7, %v10952_v43, %v1970_v28  ;;  %v2168_v57 = vadd.s32 3, %v2164_v7  ;;  %v8502_v0 = vadd.f32 %v8498_v30, %v8394_v33  ;;  %v2784_v1 = vadd.f32 %v8498_v30, %v8398_v36  ;;  %v8518_v7 = vpop.permute.xlu1 %5437 }
 0x255   : > { %v2205_v45 = vpack.c.bf16 %v2192_v14, %v2191_v21  ;;  %v2065_v23 = vand.u32 3, %v2064_v4  ;;  %v8508_v43 = vadd.f32 %v8498_v30, %v8406_v61  ;;  %v2783_v32 = vadd.f32 %v8498_v30, %v8410_v11 }
 0x256   : > { %v8514_v17 = vadd.f32 %v8498_v30, %v8416_v58  ;;  %v2785_v33 = vadd.f32 %v8498_v30, %v8420_v31  ;;  %v3013_v36 = vadd.f32 %v8498_v30, %v8428_v18  ;;  %v8523_v4 = vadd.f32 %v8498_v30, %v2995_v24 }
 0x257   : > { %v5701_v28 = vpop.eup %5700  ;;  %5216 = vmatprep.mubr.msk.bf16.mxu0 %vm2216_vm8, %v2205_v45  ;;  %v8527_v61 = vadd.f32 %v8498_v30, %v2999_v38  ;;  %v8530_v11 = vadd.f32 %v8498_v30, %v2998_v54  ;;  %vm2063_vm15 = vweird.f32 %v10963_v9  ;;  %v2169_v21 = vand.u32 3, %v2168_v57  ;;  %v8535_v18 = vpop.permute.xlu0 %5442 }
 0x258   : > { %v5703_v58 = vpop.eup %5702  ;;  %v2071_v31 = vxor.u32 2147483648, %v5701_v28  ;;  %v3001_v51 = vmul.f32 %v8390_v34, %v8350_v55  ;;  %vm2067_vm6 = vcmp.eq.s32.totalorder %v2065_v23, 0  ;;  %vm2070_vm1 = vcmp.eq.s32.totalorder %v2065_v23, 2  ;;  %v8541_v53 = vpop.permute.xlu1 %5447 }
 0x259   : > { %v2068_v24 = vxor.u32 2147483648, %v5703_v58  ;;  %v2800_v14 = vmax.f32 %v2784_v1, 0.0  ;;  %v5705_v45 = vpop.eup %5704  ;;  %v3000_v54 = vmul.f32 %v8390_v34, %v8335_v47  ;;  %v3003_v10 = vmul.f32 %v8390_v34, %v8379_v63 }
 0x25a   : > { %v2072_v38 = vsel %vm2070_vm1, %v2071_v31, %v5703_v58  ;;  %v2801_v22 = vmax.f32 %v2785_v33, 0.0  ;;  %vm2066_vm14 = vcmp.lt.s32.totalorder %v2065_v23, 2  ;;  %vm2167_vm5 = vweird.f32 %v10962_v37 }
 0x25b   : > { %v2069_v57 = vsel %vm2067_vm6, %v5701_v28, %v2068_v24  ;;  %v2175_v16 = vxor.u32 2147483648, %v5705_v45  ;;  %vm2174_vm4 = vcmp.eq.s32.totalorder %v2169_v21, 2  ;;  %v3017_v1 = vadd.f32 %v8498_v30, %v3001_v51  ;;  %v8545_v31 = vpop.permute.xlu0 %5452 }
 0x25c   : > { %v5707_v49 = vpop.eup %5706  ;;  %v2073_v55 = vsel %vm2066_vm14, %v2069_v57, %v2072_v38  ;;  %v5478_v58 = vpack.i.bf16 %v2801_v22, %v2800_v14  ;;  %v3002_v23 = vmul.f32 %v8390_v34, %v8375_v48  ;;  %vm2170_vm9 = vcmp.lt.s32.totalorder %v2169_v21, 2  ;;  %v8556_v22 = vpop.permute.xlu1 %5457 }
 0x25d   : > { %v2074_v47 = vsel %vm2063_vm15, nan, %v2073_v55  ;;  %v2172_v63 = vxor.u32 2147483648, %v5707_v49  ;;  %v2176_v33 = vsel %vm2174_vm4, %v2175_v16, %v5707_v49  ;;  %vm2171_vm13 = vcmp.eq.s32.totalorder %v2169_v21, 0 }
 0x25e   : > { %v3016_v28 = vadd.f32 %v8498_v30, %v3000_v54  ;;  %v8553_v24 = vadd.f32 %v8498_v30, %v3003_v10  ;;  %5479 = vrot.lane.b32.xlu0 %v5478_v58, %s5869_s16  ;;  %v3005_v55 = vmul.f32 %v8390_v34, %v8437_v60  ;;  %v3004_v49 = vmul.f32 %v8390_v34, %v8412_v42 }
 0x25f   : > { %v2173_v51 = vsel %vm2171_vm13, %v5705_v45, %v2172_v63  ;;  %v2798_v16 = vmax.f32 %v8502_v0, 0.0  ;;  %v2193_v21 = vsel %vm514_vm7, %v10963_v9, %v2074_v47  ;;  %v2799_v10 = vmax.f32 %v2783_v32, 0.0  ;;  %v8567_v54 = vpop.permute.xlu0 %2939 }
 0x260   : > { %v2177_v14 = vsel %vm2170_vm9, %v2173_v51, %v2176_v33  ;;  %v3028_v38 = vmax.f32 %v8514_v17, 0.0  ;;  %v3018_v45 = vadd.f32 %v8498_v30, %v3002_v23  ;;  %v3020_v57 = vadd.f32 %v8498_v30, %v3004_v49  ;;  %v8578_v32 = vpop.permute.xlu1 %2943  ;;  %v10987_v23 = vld [vmem:[#allocation45_spill] sm:$0xff] }
 0x261   : > { %v2178_v63 = vsel %vm2167_vm5, nan, %v2177_v14  ;;  %v3029_v58 = vmax.f32 %v3013_v36, 0.0  ;;  %v5473_v33 = vpack.i.bf16 %v2799_v10, %v2798_v16  ;;  %v3026_v9 = vmax.f32 %v8508_v43, 0.0  ;;  %v8589_v43 = vld [vmem:[%s10533_s2 + $0x1] ss:$0 sm:$0xff] }
 0x262   : > { %v2194_v0 = vsel %vm514_vm7, %v10962_v37, %v2178_v63  ;;  %v3027_v47 = vmax.f32 %v8523_v4, 0.0  ;;  %v3021_v51 = vadd.f32 %v8498_v30, %v3005_v55  ;;  %v3032_v42 = vmax.f32 %v3016_v28, 0.0  ;;  %v3362_v16 = vld [vmem:[%s10534_s3] sm:$0xff] }
 0x263   : > { %v2206_v17 = vpack.c.bf16 %v2194_v0, %v2193_v21  ;;  %v5488_v14 = vpack.i.bf16 %v3029_v58, %v3028_v38  ;;  %v2472_v49 = vmul.f32 %v8319_v41, %v10987_v23  ;;  %5474 = vrot.lane.b32.xlu1 %v5473_v33, %s5869_s16  ;;  %v3033_v20 = vmax.f32 %v3017_v1, 0.0  ;;  %v8618_v58 = vpop.permute.xlu0 %3123  ;;  %v10990_v23 = vld [vmem:[#allocation48_spill] sm:$0xff] }
 0x264   : > { %v5483_v36 = vpack.i.bf16 %v3027_v47, %v3026_v9  ;;  %v3007_v37 = vmul.f32 %v8390_v34, %v8457_v59  ;;  %v8593_v4 = vadd.f32 %v8589_v43, %v8323_v6  ;;  %v3006_v28 = vmul.f32 %v8390_v34, %v8446_v13  ;;  %v3363_v6 = vld [vmem:[%s10534_s3 + $0x8] sm:$0xff] }
 0x265   : > { %5217 = vmatmul.mubr.msk.bf16.gmra.mrb[12].mxu0 %vm2216_vm8, %v2206_v17  ;;  %5489 = vrot.lane.b32.xlu0 %v5488_v14, %s5869_s16  ;;  %v3030_v1 = vmax.f32 %v8530_v11, 0.0  ;;  %v3031_v55 = vmax.f32 %v8527_v61, 0.0  ;;  %v8609_v21 = vadd.f32 %v8589_v43, %v8341_v3  ;;  %v3035_v10 = vmax.f32 %v8553_v24, 0.0  ;;  %v3364_v61 = vld [vmem:[%s10534_s3 + $0x10] sm:$0xff]  ;;  %v3365_v11 = vld [vmem:[%s10534_s3 + $0x18] sm:$0xff]  ;;  %v8630_v17 = vpop.permute.xlu1 %3127 }
 0x266   : > { %v5498_v38 = vpack.i.bf16 %v3033_v20, %v3032_v42  ;;  %v3036_v63 = vmax.f32 %v3020_v57, 0.0  ;;  %v3034_v0 = vmax.f32 %v3018_v45, 0.0  ;;  %v3023_v33 = vadd.f32 %v8498_v30, %v3007_v37  ;;  %10988 = vst [vmem:[#allocation12_spill] sm:$0xff] %v8630_v17  ;;  %v10989_v14 = vld [vmem:[#allocation47_spill] sm:$0xff]  ;;  %v10991_v37 = vld [vmem:[#allocation49_spill] sm:$0xff] }
 0x267   : > { %v3022_v3 = vadd.f32 %v8498_v30, %v3006_v28  ;;  %v3037_v9 = vmax.f32 %v3021_v51, 0.0  ;;  %v8624_v42 = vadd.f32 %v8589_v43, %v8488_v12  ;;  %v8627_v24 = vadd.f32 %v8589_v43, %v2472_v49  ;;  %5484 = vrot.lane.b32.xlu1 %v5483_v36, %s5869_s16  ;;  %v3366_v49 = vld [vmem:[%s10534_s3 + $0x20] sm:$0xff]  ;;  %v3367_v36 = vld [vmem:[%s10534_s3 + $0x28] sm:$0xff]  ;;  %v8658_v13 = vpop.permute.xlu0 %3135 }
 0x268   : > { %v5493_v57 = vpack.i.bf16 %v3031_v55, %v3030_v1  ;;  %v3402_v47 = vpack.c.bf16 %v3363_v6, %v3362_v16  ;;  %v2475_v45 = vmul.f32 %v8319_v41, %v10989_v14  ;;  %v2474_v20 = vmul.f32 %v8319_v41, %v10990_v23  ;;  %v10992_v1 = vld [vmem:[#allocation50_spill] sm:$0xff]  ;;  %10996 = vst [vmem:[#allocation6_spill] sm:$0xff] %v8658_v13 }
 0x269   : > { %5499 = vrot.lane.b32.xlu0 %v5498_v38, %s5869_s16  ;;  %v5508_v51 = vpack.i.bf16 %v3037_v9, %v3036_v63  ;;  %v3403_v12 = vpack.c.bf16 %v3365_v11, %v3364_v61  ;;  %v2477_v28 = vmul.f32 %v8319_v41, %v10991_v37  ;;  %v2476_v55 = vmul.f32 %v8319_v41, %v10992_v1  ;;  %v10993_v38 = vld [vmem:[#allocation52_spill] sm:$0xff] }
 0x26a   : > { %5220 = vmatprep.subr.bf16.mxu0 %v3402_v47  ;;  %v5425_v16 = vunpack.i.h.bf16 %v8468_v25  ;;  %v5424_v6 = vunpack.i.l.bf16 %v8468_v25  ;;  %5292 = vmatprep.subr.bf16.mxu1 %v3402_v47  ;;  %v2479_v63 = vmul.f32 %v8319_v41, %v10993_v38  ;;  %v3039_v61 = vmax.f32 %v3023_v33, 0.0 }
 0x26b   : > { %v3038_v11 = vmax.f32 %v3022_v3, 0.0  ;;  %v5503_v9 = vpack.i.bf16 %v3035_v10, %v3034_v0  ;;  %5221 = vmatpush3.bf16.msra.mxu0 %v3402_v47  ;;  %5296 = vmatpush3.bf16.msra.mxu1 %v3402_v47  ;;  %v10994_v14 = vmax.f32 %v10960_v19, 0.0  ;;  %v10995_v37 = vmax.f32 %v8228_v56, 0.0  ;;  %v10997_v10 = vld [vmem:[#allocation53_spill] sm:$0xff]  ;;  %v10998_v3 = vld [vmem:[#allocation54_spill] sm:$0xff]  ;;  %v3369_v19 = vld [vmem:[%s10534_s3 + $0x38] sm:$0xff] }
 0x26c   : > { %5494 = vrot.lane.b32.xlu1 %v5493_v57, %s5869_s16  ;;  %5222 = vmatprep.subr.bf16.mxu0 %v3403_v12  ;;  %v3404_v1 = vpack.c.bf16 %v3367_v36, %v3366_v49  ;;  %vm3413_vm7 = vcmask 523264   ;;  %v2503_v33 = vmax.f32 %v8593_v4, 0.0  ;;  %v2478_v0 = vmul.f32 %v8319_v41, %v10997_v10  ;;  %v3368_v56 = vld [vmem:[%s10534_s3 + $0x30] sm:$0xff] }
 0x26d   : > { %v2627_v23 = vsel %vm2216_vm8, %v10994_v14, %v5425_v16  ;;  %v2626_v25 = vsel %vm2216_vm8, %v10995_v37, %v5424_v6  ;;  %v2481_v57 = vmul.f32 %v8319_v41, %v10998_v3  ;;  %5509 = vrot.lane.b32.xlu0 %v5508_v51, %s5869_s16  ;;  %5293 = vmatprep.subr.bf16.mxu1 %v3403_v12  ;;  %v10999_v51 = vld [vmem:[#allocation55_spill] sm:$0xff]  ;;  %v8683_v6 = vpop.permute.xlu1 %3131  ;;  %v5435_v37 = vunpack.i.h.bf16 %v8493_v5 }
 0x26e   : > { %v3370_v47 = vpack.c.bf16 %v2627_v23, %v2626_v25  ;;  %v8673_v4 = vadd.f32 %v8589_v43, %v2475_v45  ;;  %v8676_v49 = vadd.f32 %v8589_v43, %v2474_v20  ;;  %v8679_v36 = vadd.f32 %v8589_v43, %v2477_v28  ;;  %11000 = vst [vmem:[#allocation27_spill] sm:$0xff] %v8683_v6 }
 0x26f   : > { %v2480_v16 = vmul.f32 %v8319_v41, %v10999_v51  ;;  %v8686_v38 = vadd.f32 %v8589_v43, %v2476_v55  ;;  %v8689_v14 = vadd.f32 %v8589_v43, %v2479_v63  ;;  %5223 = vmatpush3.bf16.msra.mxu0 %v3403_v12  ;;  %v5430_v45 = vunpack.i.h.bf16 %v8477_v29  ;;  %5297 = vmatpush3.bf16.msra.mxu1 %v3403_v12 }
 0x270   : > { %v5429_v20 = vunpack.i.l.bf16 %v8477_v29  ;;  %5228 = vmatprep.mubr.msk.bf16.mxu0 %vm3413_vm7, %v3370_v47  ;;  %5504 = vrot.lane.b32.xlu1 %v5503_v9, %s5869_s16  ;;  %v5513_v28 = vpack.i.bf16 %v3039_v61, %v3038_v11  ;;  %v3405_v23 = vpack.c.bf16 %v3369_v19, %v3368_v56  ;;  %v5434_v55 = vunpack.i.l.bf16 %v8493_v5  ;;  %v11001_v29 = vld [vmem:[#allocation11_spill] sm:$0xff] }
 0x271   : > { %5224 = vmatprep.subr.bf16.mxu0 %v3404_v1  ;;  %v2502_v25 = vmax.f32 %v8609_v21, 0.0  ;;  %v8699_v63 = vadd.f32 %v8589_v43, %v2478_v0  ;;  %v8702_v10 = vadd.f32 %v8589_v43, %v2481_v57  ;;  %v2755_v3 = vmul.f32 %v8390_v34, %v11001_v29  ;;  %v8712_v21 = vpop.permute.xlu0 %3143  ;;  %5294 = vmatprep.subr.bf16.mxu1 %v3404_v1  ;;  %v8727_v51 = vpop.permute.xlu1 %3139  ;;  %v11006_v57 = vld [vmem:[#allocation19_spill] sm:$0xff] }
 0x272   : > { %v2505_v61 = vmax.f32 %v8624_v42, 0.0  ;;  %v2504_v11 = vmax.f32 %v8627_v24, 0.0  ;;  %v2507_v9 = vmax.f32 %v8673_v4, 0.0  ;;  %v8710_v5 = vadd.f32 %v8589_v43, %v2480_v16 }
 0x273   : > { %v2506_v0 = vmax.f32 %v8676_v49, 0.0  ;;  %5225 = vmatpush3.bf16.msra.mxu0 %v3404_v1  ;;  %v11002_v56 = vmax.f32 %v8253_v8, 0.0  ;;  %v11003_v42 = vmax.f32 %v8333_v50, 0.0  ;;  %v2631_v4 = vsel %vm2216_vm8, %v2503_v33, %v5435_v37  ;;  %5298 = vmatpush3.bf16.msra.mxu1 %v3404_v1  ;;  %v11005_v1 = vld [vmem:[#allocation31_spill] sm:$0xff] }
 0x274   : > { %5514 = vrot.lane.b32.xlu1 %v5513_v28, %s5869_s16  ;;  %5226 = vmatprep.subr.bf16.mxu0 %v3405_v23  ;;  %v2630_v49 = vsel %vm2216_vm8, %v2502_v25, %v5434_v55  ;;  %v8732_v50 = vadd.f32 %v8498_v30, %v2755_v3  ;;  %v11004_v28 = vld [vmem:[#allocation17_spill] sm:$0xff]  ;;  %v3009_v55 = vmul.f32 %v8390_v34, %v8578_v32  ;;  %v5440_v25 = vunpack.i.h.bf16 %v8518_v7 }
 0x275   : > { %v2629_v12 = vsel %vm2216_vm8, %v11002_v56, %v5430_v45  ;;  %v2628_v24 = vsel %vm2216_vm8, %v11003_v42, %v5429_v20  ;;  %v3008_v45 = vmul.f32 %v8390_v34, %v8567_v54  ;;  %v2754_v33 = vmul.f32 %v8390_v34, %v11004_v28  ;;  %5295 = vmatprep.subr.bf16.mxu1 %v3405_v23  ;;  %v8751_v8 = vpop.permute.xlu0 %3151  ;;  %v8766_v28 = vpop.permute.xlu1 %3147 }
 0x276   : > { %v3371_v37 = vpack.c.bf16 %v2629_v12, %v2628_v24  ;;  %v5439_v3 = vunpack.i.l.bf16 %v8518_v7  ;;  %v3372_v56 = vpack.c.bf16 %v2631_v4, %v2630_v49  ;;  %v3234_v42 = vmul.f32 %v8390_v34, %v8618_v58 }
 0x277   : > { %5227 = vmatpush3.bf16.msra.mxu0 %v3405_v23  ;;  %v2756_v20 = vmul.f32 %v8390_v34, %v11005_v1  ;;  %v5445_v16 = vunpack.i.h.bf16 %v8535_v18  ;;  %v5444_v12 = vunpack.i.l.bf16 %v8535_v18  ;;  %v3235_v24 = vmul.f32 %v8390_v34, %v8630_v17  ;;  %5299 = vmatpush3.bf16.msra.mxu1 %v3405_v23 }
 0x278   : > { %v3024_v7 = vadd.f32 %v8498_v30, %v3008_v45  ;;  %v3025_v4 = vadd.f32 %v8498_v30, %v3009_v55  ;;  %v3250_v49 = vadd.f32 %v8498_v30, %v3234_v42  ;;  %v8758_v19 = vadd.f32 %v8498_v30, %v2754_v33 }
 0x279   : > { %v2757_v18 = vmul.f32 %v8390_v34, %v11006_v57  ;;  %v3251_v1 = vadd.f32 %v8498_v30, %v3235_v24  ;;  %v3237_v47 = vmul.f32 %v8390_v34, %v8658_v13  ;;  %v2633_v45 = vsel %vm2216_vm8, %v2505_v61, %v5440_v25 }
 0x27a   : > { %5229 = vmatmul.mubr.msk.bf16.vlgmr.msra.gmra.mrb[16].mxu0 %vm3413_vm7, %v3371_v37  ;;  %v2632_v55 = vsel %vm2216_vm8, %v2504_v11, %v5439_v3  ;;  %v5450_v23 = vunpack.i.h.bf16 %v8541_v53  ;;  %v3236_v33 = vmul.f32 %v8390_v34, %v8683_v6  ;;  %v2635_v37 = vsel %vm2216_vm8, %v2507_v9, %v5445_v16  ;;  %v8783_v9 = vpop.permute.xlu0 %3159 }
 0x27b   : > { %5232 = vmatprep.mubr.msk.bf16.mxu0 %vm3413_vm7, %v3372_v56  ;;  %v2634_v42 = vsel %vm2216_vm8, %v2506_v0, %v5444_v12  ;;  %v5449_v24 = vunpack.i.l.bf16 %v8541_v53  ;;  %v3266_v57 = vmax.f32 %v3250_v49, 0.0  ;;  %v3267_v13 = vmax.f32 %v3251_v1, 0.0  ;;  %v8792_v49 = vpop.permute.xlu1 %3155 }
 0x27c   : > { %v3252_v17 = vadd.f32 %v8498_v30, %v3236_v33  ;;  %v3040_v61 = vmax.f32 %v3024_v7, 0.0  ;;  %v3041_v25 = vmax.f32 %v3025_v4, 0.0  ;;  %v3373_v11 = vpack.c.bf16 %v2633_v45, %v2632_v55  ;;  %v11007_v45 = vld [vmem:[#allocation25_spill] sm:$0xff] }
 0x27d   : > { %v3253_v3 = vadd.f32 %v8498_v30, %v3237_v47  ;;  %v3239_v56 = vmul.f32 %v8390_v34, %v8712_v21  ;;  %v3238_v6 = vmul.f32 %v8390_v34, %v8727_v51  ;;  %v3374_v0 = vpack.c.bf16 %v2635_v37, %v2634_v42 }
 0x27e   : > { %v5455_v53 = vunpack.i.h.bf16 %v8545_v31  ;;  %v5454_v16 = vunpack.i.l.bf16 %v8545_v31  ;;  %v5518_v1 = vpack.i.bf16 %v3041_v25, %v3040_v61  ;;  %v2786_v12 = vmax.f32 %v8758_v19, 0.0 }
 0x27f   : > { %v8789_v7 = vadd.f32 %v8498_v30, %v2756_v20  ;;  %v3268_v47 = vmax.f32 %v3252_v17, 0.0  ;;  %v3254_v4 = vadd.f32 %v8498_v30, %v3238_v6  ;;  %v2758_v55 = vmul.f32 %v8390_v34, %v11007_v45 }
 0x280   : > { %5519 = vrot.lane.b32.xlu0 %v5518_v1, %s5869_s16  ;;  %v3255_v33 = vadd.f32 %v8498_v30, %v3239_v56  ;;  %v3241_v31 = vmul.f32 %v8390_v34, %v8751_v8  ;;  %v5523_v37 = vpack.i.bf16 %v3267_v13, %v3266_v57  ;;  %v8801_v19 = vadd.f32 %v8498_v30, %v2757_v18  ;;  %v8825_v56 = vpop.permute.xlu0 %3167 }
 0x281   : > { %v11008_v17 = vmax.f32 %v8679_v36, 0.0  ;;  %v11009_v20 = vmax.f32 %v8686_v38, 0.0  ;;  %v3269_v61 = vmax.f32 %v3253_v3, 0.0  ;;  %v11010_v25 = vmax.f32 %v8689_v14, 0.0  ;;  %v11012_v38 = vld [vmem:[#allocation10_spill] sm:$0xff] }
 0x282   : > { %5233 = vmatmul.mubr.msk.bf16.gmra.mrb[20].mxu0 %vm3413_vm7, %v3373_v11  ;;  %v11011_v57 = vmax.f32 %v8699_v63, 0.0  ;;  %v3270_v11 = vmax.f32 %v3254_v4, 0.0  ;;  %5524 = vrot.lane.b32.xlu1 %v5523_v37, %s5869_s16  ;;  %v3240_v36 = vmul.f32 %v8390_v34, %v8766_v28  ;;  %v3243_v14 = vmul.f32 %v8390_v34, %v8783_v9 }
 0x283   : > { %v2637_v6 = vsel %vm2216_vm8, %v11008_v17, %v5450_v23  ;;  %v2636_v42 = vsel %vm2216_vm8, %v11009_v20, %v5449_v24  ;;  %5236 = vmatprep.mubr.msk.bf16.mxu0 %vm3413_vm7, %v3374_v0  ;;  %v2639_v13 = vsel %vm2216_vm8, %v11010_v25, %v5455_v53  ;;  %v2759_v23 = vmul.f32 %v8390_v34, %v11012_v38  ;;  %v8834_v20 = vpop.permute.xlu1 %3163 }
 0x284   : > { %v2638_v18 = vsel %vm2216_vm8, %v11011_v57, %v5454_v16  ;;  %v5460_v24 = vunpack.i.h.bf16 %v8556_v22  ;;  %v5528_v3 = vpack.i.bf16 %v3269_v61, %v3268_v47  ;;  %v3271_v63 = vmax.f32 %v3255_v33, 0.0 }
 0x285   : > { %v3257_v0 = vadd.f32 %v8498_v30, %v3241_v31  ;;  %v3256_v53 = vadd.f32 %v8498_v30, %v3240_v36  ;;  %v3242_v16 = vmul.f32 %v8390_v34, %v8792_v49  ;;  %v3375_v1 = vpack.c.bf16 %v2637_v6, %v2636_v42  ;;  %v11013_v42 = vld [vmem:[#allocation24_spill] sm:$0xff] }
 0x286   : > { %v5459_v4 = vunpack.i.l.bf16 %v8556_v22  ;;  %v3376_v37 = vpack.c.bf16 %v2639_v13, %v2638_v18  ;;  %v3259_v17 = vadd.f32 %v8498_v30, %v3243_v14  ;;  %5529 = vrot.lane.b32.xlu0 %v5528_v3, %s5869_s16  ;;  %v3245_v31 = vmul.f32 %v8390_v34, %v8825_v56 }
 0x287   : > { %v3272_v47 = vmax.f32 %v3256_v53, 0.0  ;;  %v3258_v33 = vadd.f32 %v8498_v30, %v3242_v16  ;;  %v5533_v61 = vpack.i.bf16 %v3271_v63, %v3270_v11  ;;  %v2788_v25 = vmax.f32 %v8789_v7, 0.0 }
 0x288   : > { %v2789_v6 = vmax.f32 %v8801_v19, 0.0  ;;  %v2774_v22 = vadd.f32 %v8498_v30, %v2758_v55  ;;  %v2760_v13 = vmul.f32 %v8390_v34, %v11013_v42  ;;  %v2775_v57 = vadd.f32 %v8498_v30, %v2759_v23 }
 0x289   : > { %v3273_v18 = vmax.f32 %v3257_v0, 0.0  ;;  %v3274_v36 = vmax.f32 %v3258_v33, 0.0  ;;  %5534 = vrot.lane.b32.xlu1 %v5533_v61, %s5869_s16  ;;  %v3244_v14 = vmul.f32 %v8390_v34, %v8834_v20  ;;  %v2761_v11 = vmul.f32 %v8390_v34, %v7864_v15 }
 0x28a   : > { %5237 = vmatmul.mubr.msk.bf16.gmra.mrb[24].mxu0 %vm3413_vm7, %v3375_v1  ;;  %v11014_v7 = vmax.f32 %v8702_v10, 0.0  ;;  %v11015_v19 = vmax.f32 %v8710_v5, 0.0  ;;  %v3275_v3 = vmax.f32 %v3259_v17, 0.0  ;;  %v3261_v63 = vadd.f32 %v8498_v30, %v3245_v31  ;;  %v11018_v17 = vld [vmem:[#allocation20_spill] sm:$0xff] }
 0x28b   : > { %5240 = vmatprep.mubr.msk.bf16.mxu0 %vm3413_vm7, %v3376_v37  ;;  %v3260_v0 = vadd.f32 %v8498_v30, %v3244_v14  ;;  %v11016_v53 = vmax.f32 %v8732_v50, 0.0  ;;  %v5538_v33 = vpack.i.bf16 %v3273_v18, %v3272_v47  ;;  %v2790_v1 = vmax.f32 %v2774_v22, 0.0  ;;  %v11019_v14 = vld [vmem:[#allocation14_spill] sm:$0xff] }
 0x28c   : > { %v2641_v55 = vsel %vm2216_vm8, %v11014_v7, %v5460_v24  ;;  %v2640_v23 = vsel %vm2216_vm8, %v11015_v19, %v5459_v4  ;;  %v2791_v61 = vmax.f32 %v2775_v57, 0.0  ;;  %v2776_v10 = vadd.f32 %v8498_v30, %v2760_v13  ;;  %v11017_v4 = vld [vmem:[#allocation21_spill] sm:$0xff]  ;;  %v11020_v22 = vld [vmem:[#allocation22_spill] sm:$0xff]  ;;  %v5470_v7 = vpop.permute.xlu0 %5469 }
 0x28d   : > { %v5543_v16 = vpack.i.bf16 %v11016_v53, %v2786_v12  ;;  %v3276_v24 = vmax.f32 %v3260_v0, 0.0  ;;  %5539 = vrot.lane.b32.xlu0 %v5538_v33, %s5869_s16  ;;  %v5553_v5 = vpack.i.bf16 %v3275_v3, %v3274_v36  ;;  %v2714_v37 = vmul.f32 %v8319_v41, %v11017_v4 }
 0x28e   : > { %v2716_v31 = vmul.f32 %v8319_v41, %v11018_v17  ;;  %v2717_v50 = vmul.f32 %v8319_v41, %v11019_v14  ;;  %v3377_v12 = vpack.c.bf16 %v2641_v55, %v2640_v23  ;;  %v2777_v47 = vadd.f32 %v8498_v30, %v2761_v11 }
 0x28f   : > { %5544 = vrot.lane.b32.xlu1 %v5543_v16, %s5869_s16  ;;  %v2715_v13 = vmul.f32 %v8319_v41, %v11020_v22  ;;  %v3277_v57 = vmax.f32 %v3261_v63, 0.0  ;;  %v5548_v18 = vpack.i.bf16 %v2789_v6, %v2788_v25  ;;  %v2730_v19 = vadd.f32 %v8589_v43, %v2714_v37 }
 0x290   : > { %v2732_v3 = vadd.f32 %v8589_v43, %v2716_v31  ;;  %v2733_v0 = vadd.f32 %v8589_v43, %v2717_v50  ;;  %v2792_v11 = vmax.f32 %v2776_v10, 0.0  ;;  %v2793_v55 = vmax.f32 %v2777_v47, 0.0 }
 0x291   : > { %5549 = vrot.lane.b32.xlu0 %v5548_v18, %s5869_s16  ;;  %v5558_v36 = vpack.i.bf16 %v3277_v57, %v3276_v24  ;;  %v2731_v23 = vadd.f32 %v8589_v43, %v2715_v13  ;;  %v5563_v63 = vpack.i.bf16 %v2791_v61, %v2790_v1  ;;  %v5472_v25 = vunpack.i.h.bf16 %v5470_v7 }
 0x292   : > { %5241 = vmatmul.mubr.msk.bf16.gmra.mrb[28].mxu0 %vm3413_vm7, %v3377_v12  ;;  %v5471_v6 = vunpack.i.l.bf16 %v5470_v7  ;;  %v2746_v53 = vmax.f32 %v2730_v19, 0.0  ;;  %v2748_v16 = vmax.f32 %v2732_v3, 0.0  ;;  %v2749_v33 = vmax.f32 %v2733_v0, 0.0  ;;  %v8890_v12 = vpop.permute.xlu0 %3175 }
 0x293   : > { %5554 = vrot.lane.b32.xlu1 %v5553_v5, %s5869_s16  ;;  %v5465_v24 = vpop.permute.xlu1 %5464  ;;  %v2747_v5 = vmax.f32 %v2731_v23, 0.0  ;;  %v5568_v17 = vpack.i.bf16 %v2793_v55, %v2792_v11  ;;  %v3247_v47 = vmul.f32 %v8390_v34, %v8890_v12  ;;  %vm4183_vm11 = vcmask 7168  }
 0x294   : > { %v5467_v4 = vunpack.i.h.bf16 %v5465_v24  ;;  %v5466_v37 = vunpack.i.l.bf16 %v5465_v24  ;;  %v2877_v10 = vsel %vm2216_vm8, %v2749_v33, %v5472_v25  ;;  %v2876_v31 = vsel %vm2216_vm8, %v2748_v16, %v5471_v6 }
 0x295   : > { %5559 = vrot.lane.b32.xlu0 %v5558_v36, %s5869_s16  ;;  %v3383_v50 = vpack.c.bf16 %v2877_v10, %v2876_v31  ;;  %v3263_v57 = vadd.f32 %v8498_v30, %v3247_v47  ;;  %v2718_v16 = vmul.f32 %v8319_v41, %v8101_v44  ;;  %v2720_v33 = vmul.f32 %v8319_v41, %v8138_v46 }
 0x296   : > { %v2874_v1 = vsel %vm2216_vm8, %v2746_v53, %v5466_v37  ;;  %v2875_v61 = vsel %vm2216_vm8, %v2747_v5, %v5467_v4  ;;  %v8894_v22 = vpop.permute.xlu0 %3183  ;;  %v2721_v24 = vmul.f32 %v8319_v41, %v8204_v52  ;;  %v2946_v37 = vmul.f32 %v8319_v41, %v8174_v39 }
 0x297   : > { %5564 = vrot.lane.b32.xlu1 %v5563_v63, %s5869_s16  ;;  %v3382_v14 = vpack.c.bf16 %v2875_v61, %v2874_v1  ;;  %v3249_v7 = vmul.f32 %v8390_v34, %v8894_v22  ;;  %v3279_v3 = vmax.f32 %v3263_v57, 0.0  ;;  %v2736_v4 = vadd.f32 %v8589_v43, %v2720_v33 }
 0x298   : > { %v2947_v46 = vmul.f32 %v8319_v41, %v8263_v62  ;;  %v2948_v52 = vmul.f32 %v8319_v41, %v8220_v26  ;;  %v2949_v1 = vmul.f32 %v8319_v41, %v8274_v35  ;;  %v2951_v61 = vmul.f32 %v8319_v41, %v8301_v2 }
 0x299   : > { %5569 = vrot.lane.b32.xlu0 %v5568_v17, %s5869_s16  ;;  %5252 = vmatprep.mubr.msk.bf16.mxu1 %vm3413_vm7, %v3382_v14  ;;  %v3265_v11 = vadd.f32 %v8498_v30, %v3249_v7  ;;  %v2737_v17 = vadd.f32 %v8589_v43, %v2721_v24  ;;  %v2752_v39 = vmax.f32 %v2736_v4, 0.0  ;;  %v2962_v14 = vadd.f32 %v8589_v43, %v2946_v37 }
 0x29a   : > { %5253 = vmatmul.mubr.msk.bf16.vlgmr.msra.gmra.mrb[0].mxu1 %vm3413_vm7, %v3383_v50  ;;  %v2950_v47 = vmul.f32 %v8319_v41, %v8294_v27  ;;  %v2963_v26 = vadd.f32 %v8589_v43, %v2947_v46  ;;  %v2965_v2 = vadd.f32 %v8589_v43, %v2949_v1  ;;  %v8953_v46 = vld [vmem:[%s10533_s2] ss:$0 sm:$0xff]  ;;  %vm4200_vm0 = vcmask 15360  }
 0x29b   : > { %v3281_v25 = vmax.f32 %v3265_v11, 0.0  ;;  %v2753_v50 = vmax.f32 %v2737_v17, 0.0  ;;  %vm4217_vm10 = vcmask 23552   ;;  %vm4234_vm2 = vcmask 31744  }
 0x2a5   : > { %v8896_v13 = vpop.permute.xlu1 %3171 }
 0x2a6   : > { %v3246_v18 = vmul.f32 %v8390_v34, %v8896_v13 }
 0x2a8   : > { %v3262_v36 = vadd.f32 %v8498_v30, %v3246_v18 }
 0x2a9   : > { %v8904_v19 = vpop.permute.xlu1 %3179 }
 0x2aa   : > { %v3278_v0 = vmax.f32 %v3262_v36, 0.0  ;;  %v3248_v55 = vmul.f32 %v8390_v34, %v8904_v19  ;;  %v2719_v34 = vmul.f32 %v8319_v41, %v8160_v40  ;;  %v2964_v36 = vadd.f32 %v8589_v43, %v2948_v52  ;;  %v11021_v52 = vld [vmem:[#allocation38_spill] sm:$0xff] }
 0x2ac   : > { %v3264_v23 = vadd.f32 %v8498_v30, %v3248_v55  ;;  %v5573_v63 = vpack.i.bf16 %v3279_v3, %v3278_v0  ;;  %v2734_v30 = vadd.f32 %v8589_v43, %v2718_v16  ;;  %v2735_v44 = vadd.f32 %v8589_v43, %v2719_v34 }
 0x2ad   : > { %v2967_v0 = vadd.f32 %v8589_v43, %v2951_v61  ;;  %v2978_v55 = vmax.f32 %v2962_v14, 0.0  ;;  %v2980_v24 = vmax.f32 %v2964_v36, 0.0 }
 0x2ae   : > { %v3280_v6 = vmax.f32 %v3264_v23, 0.0  ;;  %5574 = vrot.lane.b32.xlu1 %v5573_v63, %s5869_s16  ;;  %v2750_v31 = vmax.f32 %v2734_v30, 0.0  ;;  %v2751_v57 = vmax.f32 %v2735_v44, 0.0  ;;  %v2966_v23 = vadd.f32 %v8589_v43, %v2950_v47 }
 0x2af   : > { %v2983_v4 = vmax.f32 %v2967_v0, 0.0 }
 0x2b0   : > { %v5578_v53 = vpack.i.bf16 %v3281_v25, %v3280_v6  ;;  %v2979_v6 = vmax.f32 %v2963_v26, 0.0  ;;  %v2982_v44 = vmax.f32 %v2966_v23, 0.0 }
 0x2b2   : > { %5579 = vrot.lane.b32.xlu0 %v5578_v53, %s5869_s16  ;;  %s10385_s16 = scalar_lea.vmem %s10539_s8, %s5974_s22  ;;  %s348_s22 = sand.u32 1, %s5850_s10  }
 0x2b3   : > { %s5031_s27 = sshll.u32 %s348_s22, 2 }
 0x2b4   : > { %s350_s29 = scalar_lea.vmem [#allocation2], %s5031_s27 }
 0x2b5   : > { %s4931_s14 = sshll.u32 %s350_s29, 4  ;;  %s10486_s14 = int_to_ptr.vmem [resolvable:$true] %s4931_s14 }
 0x2b6   : > { %s5796_s25 = scalar_lea.vmem %s10486_s14, 64  ;;  %p5803_p0 = scmp.lt.s32.totalorder %s10486_s14, %s5801_s13 }
 0x2b7   : > { %p5797_p11 = scmp.ne.s32.totalorder %s10486_s14, %s5796_s25 }
 0x2b9   : > { %p5798_p12 = pnand %p5797_p11, %p5961_p5 }
 0x2bb   : > { %p5799_p13 = pneg %p5798_p12 }
 0x2d0   : > { %v5480_v5 = vpop.permute.xlu0 %5479 }
 0x2d1   : > { %v5482_v10 = vunpack.i.h.bf16 %v5480_v5  ;;  %v5481_v40 = vunpack.i.l.bf16 %v5480_v5  ;;  %v2981_v5 = vmax.f32 %v2965_v2, 0.0 }
 0x2d3   : > { %v2881_v35 = vsel %vm2216_vm8, %v2753_v50, %v5482_v10  ;;  %v2880_v3 = vsel %vm2216_vm8, %v2752_v39, %v5481_v40  ;;  %v2953_v10 = vmul.f32 %v8953_v46, %v11021_v52  ;;  %v11022_v40 = vld [vmem:[#allocation23_spill] sm:$0xff]  ;;  %v11023_v39 = vld [vmem:[#allocation5_spill] sm:$0xff]  ;;  %v2954_v50 = vmul.f32 %v8953_v46, %v8375_v48 }
 0x2d4   : > { %v3385_v33 = vpack.c.bf16 %v2881_v35, %v2880_v3  ;;  %v2955_v14 = vmul.f32 %v8953_v46, %v11023_v39  ;;  %v2961_v39 = vmul.f32 %v8953_v46, %v8578_v32 }
 0x2d5   : > { %v5475_v62 = vpop.permute.xlu1 %5474  ;;  %v2969_v35 = vadd.f32 %v8589_v43, %v2953_v10  ;;  %v2970_v0 = vadd.f32 %v8589_v43, %v2954_v50  ;;  %v3186_v50 = vmul.f32 %v8953_v46, %v8618_v58 }
 0x2d6   : > { %v5477_v18 = vunpack.i.h.bf16 %v5475_v62  ;;  %v5476_v7 = vunpack.i.l.bf16 %v5475_v62  ;;  %v2971_v48 = vadd.f32 %v8589_v43, %v2955_v14 }
 0x2d7   : > { %v5490_v41 = vpop.permute.xlu0 %5489 }
 0x2d8   : > { %v2878_v11 = vsel %vm2216_vm8, %v2750_v31, %v5476_v7  ;;  %v2879_v27 = vsel %vm2216_vm8, %v2751_v57, %v5477_v18  ;;  %v5492_v34 = vunpack.i.h.bf16 %v5490_v41  ;;  %v5491_v30 = vunpack.i.l.bf16 %v5490_v41 }
 0x2d9   : > { %v5485_v63 = vpop.permute.xlu1 %5484  ;;  %v3384_v25 = vpack.c.bf16 %v2879_v27, %v2878_v11  ;;  %v2952_v31 = vmul.f32 %v8953_v46, %v11022_v40 }
 0x2da   : > { %v5487_v53 = vunpack.i.h.bf16 %v5485_v63  ;;  %v5486_v16 = vunpack.i.l.bf16 %v5485_v63  ;;  %v3109_v57 = vsel %vm2216_vm8, %v2981_v5, %v5492_v34  ;;  %v3108_v26 = vsel %vm2216_vm8, %v2980_v24, %v5491_v30  ;;  %v11025_v5 = vld [vmem:[#allocation26_spill] sm:$0xff] }
 0x2db   : > { %5256 = vmatprep.mubr.msk.bf16.mxu1 %vm3413_vm7, %v3384_v25  ;;  %v5500_v18 = vpop.permute.xlu0 %5499  ;;  %v2968_v3 = vadd.f32 %v8589_v43, %v2952_v31  ;;  %v3387_v11 = vpack.c.bf16 %v3109_v57, %v3108_v26  ;;  %v2985_v25 = vmax.f32 %v2969_v35, 0.0  ;;  %v2987_v24 = vmax.f32 %v2971_v48, 0.0  ;;  %v11027_v35 = vld [vmem:[#allocation17_spill] sm:$0xff] }
 0x2dc   : > { %v3106_v37 = vsel %vm2216_vm8, %v2978_v55, %v5486_v16  ;;  %v3107_v17 = vsel %vm2216_vm8, %v2979_v6, %v5487_v53  ;;  %5257 = vmatmul.mubr.msk.bf16.gmra.mrb[4].mxu1 %vm3413_vm7, %v3385_v33  ;;  %v5502_v27 = vunpack.i.h.bf16 %v5500_v18  ;;  %v5501_v41 = vunpack.i.l.bf16 %v5500_v18  ;;  %v11024_v16 = vld [vmem:[#allocation9_spill] sm:$0xff]  ;;  %v11026_v18 = vld [vmem:[#allocation12_spill] sm:$0xff] }
 0x2dd   : > { %v3386_v61 = vpack.c.bf16 %v3107_v17, %v3106_v37  ;;  %v2984_v6 = vmax.f32 %v2968_v3, 0.0  ;;  %v2957_v53 = vmul.f32 %v8953_v46, %v8437_v60  ;;  %v2956_v33 = vmul.f32 %v8953_v46, %v11024_v16 }
 0x2de   : > { %v5495_v1 = vpop.permute.xlu1 %5494  ;;  %v2986_v34 = vmax.f32 %v2970_v0, 0.0  ;;  %v2959_v30 = vmul.f32 %v8953_v46, %v8457_v59  ;;  %v3113_v37 = vsel %vm2216_vm8, %v2985_v25, %v5502_v27  ;;  %v2960_v31 = vmul.f32 %v8953_v46, %v8567_v54 }
 0x2df   : > { %v5497_v47 = vunpack.i.h.bf16 %v5495_v1  ;;  %v5496_v62 = vunpack.i.l.bf16 %v5495_v1  ;;  %5260 = vmatprep.mubr.msk.bf16.mxu1 %vm3413_vm7, %v3386_v61  ;;  %v3112_v17 = vsel %vm2216_vm8, %v2984_v6, %v5501_v41  ;;  %v2973_v10 = vadd.f32 %v8589_v43, %v2957_v53 }
 0x2e0   : > { %v2972_v40 = vadd.f32 %v8589_v43, %v2956_v33  ;;  %v2975_v1 = vadd.f32 %v8589_v43, %v2959_v30  ;;  %v3389_v14 = vpack.c.bf16 %v3113_v37, %v3112_v17  ;;  %v2707_v26 = vmul.f32 %v8953_v46, %v11001_v29  ;;  %v11029_v33 = vld [vmem:[#allocation31_spill] sm:$0xff] }
 0x2e1   : > { %v3111_v7 = vsel %vm2216_vm8, %v2983_v4, %v5497_v47  ;;  %v3110_v36 = vsel %vm2216_vm8, %v2982_v44, %v5496_v62  ;;  %v2958_v4 = vmul.f32 %v8953_v46, %v11025_v5  ;;  %v5510_v44 = vpop.permute.xlu0 %5509  ;;  %v3187_v54 = vmul.f32 %v8953_v46, %v11026_v18  ;;  %v11030_v5 = vld [vmem:[#allocation27_spill] sm:$0xff] }
 0x2e2   : > { %v5505_v2 = vpop.permute.xlu1 %5504  ;;  %v3388_v55 = vpack.c.bf16 %v3111_v7, %v3110_v36  ;;  %v5512_v47 = vunpack.i.h.bf16 %v5510_v44  ;;  %v5511_v62 = vunpack.i.l.bf16 %v5510_v44  ;;  %v2706_v32 = vmul.f32 %v8953_v46, %v11027_v35 }
 0x2e3   : > { %v5507_v23 = vunpack.i.h.bf16 %v5505_v2  ;;  %v5506_v63 = vunpack.i.l.bf16 %v5505_v2  ;;  %v2974_v61 = vadd.f32 %v8589_v43, %v2958_v4  ;;  %v2989_v3 = vmax.f32 %v2973_v10, 0.0 }
 0x2e4   : > { %5261 = vmatmul.mubr.msk.bf16.gmra.mrb[8].mxu1 %vm3413_vm7, %v3387_v11  ;;  %v2988_v2 = vmax.f32 %v2972_v40, 0.0  ;;  %v2976_v58 = vadd.f32 %v8589_v43, %v2960_v31  ;;  %v2991_v48 = vmax.f32 %v2975_v1, 0.0  ;;  %v2977_v29 = vadd.f32 %v8589_v43, %v2961_v39  ;;  %v11031_v31 = vld [vmem:[#allocation19_spill] sm:$0xff] }
 0x2e5   : > { %5264 = vmatprep.mubr.msk.bf16.mxu1 %vm3413_vm7, %v3388_v55  ;;  %v3115_v60 = vsel %vm2216_vm8, %v2987_v24, %v5507_v23  ;;  %v3114_v52 = vsel %vm2216_vm8, %v2986_v34, %v5506_v63  ;;  %v2990_v0 = vmax.f32 %v2974_v61, 0.0  ;;  %v3202_v11 = vadd.f32 %v8589_v43, %v3186_v50  ;;  %v11028_v23 = vld [vmem:[#allocation6_spill] sm:$0xff] }
 0x2e6   : > { %v5515_v59 = vpop.permute.xlu1 %5514  ;;  %v3390_v57 = vpack.c.bf16 %v3115_v60, %v3114_v52  ;;  %v3117_v27 = vsel %vm2216_vm8, %v2989_v3, %v5512_v47  ;;  %v3116_v41 = vsel %vm2216_vm8, %v2988_v2, %v5511_v62  ;;  %v3203_v55 = vadd.f32 %v8589_v43, %v3187_v54 }
 0x2e7   : > { %v5517_v7 = vunpack.i.h.bf16 %v5515_v59  ;;  %v5516_v36 = vunpack.i.l.bf16 %v5515_v59  ;;  %v3189_v63 = vmul.f32 %v8953_v46, %v11028_v23  ;;  %v9015_v53 = vadd.f32 %v8589_v43, %v2707_v26 }
 0x2e8   : > { %v9018_v16 = vadd.f32 %v8589_v43, %v2706_v32  ;;  %v2708_v24 = vmul.f32 %v8953_v46, %v11029_v33  ;;  %v2992_v34 = vmax.f32 %v2976_v58, 0.0  ;;  %v2993_v30 = vmax.f32 %v2977_v29, 0.0 }
 0x2e9   : > { %v3119_v25 = vsel %vm2216_vm8, %v2991_v48, %v5517_v7  ;;  %v3118_v6 = vsel %vm2216_vm8, %v2990_v0, %v5516_v36  ;;  %v3188_v4 = vmul.f32 %v8953_v46, %v11030_v5  ;;  %v3191_v37 = vmul.f32 %v8953_v46, %v8712_v21 }
 0x2ea   : > { %v3391_v17 = vpack.c.bf16 %v3117_v27, %v3116_v41  ;;  %v3190_v60 = vmul.f32 %v8953_v46, %v8727_v51  ;;  %v3392_v52 = vpack.c.bf16 %v3119_v25, %v3118_v6  ;;  %v2709_v59 = vmul.f32 %v8953_v46, %v11031_v31 }
 0x2eb   : > { %v3218_v1 = vmax.f32 %v3202_v11, 0.0  ;;  %v3219_v61 = vmax.f32 %v3203_v55, 0.0  ;;  %v3205_v39 = vadd.f32 %v8589_v43, %v3189_v63  ;;  %v2739_v62 = vmax.f32 %v9015_v53, 0.0 }
 0x2ec   : > { %5265 = vmatmul.mubr.msk.bf16.gmra.mrb[12].mxu1 %vm3413_vm7, %v3389_v14  ;;  %v3204_v26 = vadd.f32 %v8589_v43, %v3188_v4  ;;  %v3207_v18 = vadd.f32 %v8589_v43, %v3191_v37  ;;  %v2710_v54 = vmul.f32 %v8953_v46, %v11007_v45  ;;  %v3206_v7 = vadd.f32 %v8589_v43, %v3190_v60 }
 0x2ed   : > { %5268 = vmatprep.mubr.msk.bf16.mxu1 %vm3413_vm7, %v3390_v57  ;;  %v9037_v57 = vadd.f32 %v8589_v43, %v2708_v24  ;;  %v9047_v3 = vadd.f32 %v8589_v43, %v2709_v59  ;;  %v2711_v2 = vmul.f32 %v8953_v46, %v11012_v38  ;;  %v3193_v58 = vmul.f32 %v8953_v46, %v8751_v8 }
 0x2ee   : > { %v3221_v0 = vmax.f32 %v3205_v39, 0.0  ;;  %v3220_v27 = vmax.f32 %v3204_v26, 0.0  ;;  %v3223_v41 = vmax.f32 %v3207_v18, 0.0  ;;  %v3192_v55 = vmul.f32 %v8953_v46, %v8766_v28 }
 0x2ef   : > { %v3195_v23 = vmul.f32 %v8953_v46, %v8783_v9  ;;  %v3222_v25 = vmax.f32 %v3206_v7, 0.0  ;;  %v3194_v38 = vmul.f32 %v8953_v46, %v8792_v49  ;;  %v2738_v53 = vmax.f32 %v9018_v16, 0.0 }
 0x2f0   : > { %v2740_v33 = vmax.f32 %v9037_v57, 0.0  ;;  %v9062_v24 = vadd.f32 %v8589_v43, %v2710_v54  ;;  %v2741_v16 = vmax.f32 %v9047_v3, 0.0  ;;  %v2712_v5 = vmul.f32 %v8953_v46, %v11013_v42 }
 0x2f1   : > { %v3208_v4 = vadd.f32 %v8589_v43, %v3192_v55  ;;  %v3211_v37 = vadd.f32 %v8589_v43, %v3195_v23  ;;  %v2727_v60 = vadd.f32 %v8589_v43, %v2711_v2  ;;  %v3197_v18 = vmul.f32 %v8953_v46, %v8825_v56 }
 0x2f2   : > { %v5520_v44 = vpop.permute.xlu0 %5519  ;;  %v2742_v59 = vmax.f32 %v9062_v24, 0.0  ;;  %v5795_v24 = vld [vmem:[%s10533_s2 + $0x1] ss:$0 sm:$0xff] }
 0x2f3   : > { %v5522_v10 = vunpack.i.h.bf16 %v5520_v44  ;;  %v5521_v40 = vunpack.i.l.bf16 %v5520_v44  ;;  %v3224_v57 = vmax.f32 %v3208_v4, 0.0  ;;  %v3227_v26 = vmax.f32 %v3211_v37, 0.0 }
 0x2f4   : > { %5269 = vmatmul.mubr.msk.bf16.gmra.mrb[16].mxu1 %vm3413_vm7, %v3391_v17  ;;  %v5525_v14 = vpop.permute.xlu1 %5524 }
 0x2f5   : > { %5272 = vmatprep.mubr.msk.bf16.mxu1 %vm3413_vm7, %v3392_v52  ;;  %v3121_v21 = vsel %vm2216_vm8, %v2993_v30, %v5522_v10  ;;  %v3120_v50 = vsel %vm2216_vm8, %v2992_v34, %v5521_v40  ;;  %v5527_v51 = vunpack.i.h.bf16 %v5525_v14  ;;  %v5526_v47 = vunpack.i.l.bf16 %v5525_v14 }
 0x2f6   : > { %v3393_v48 = vpack.c.bf16 %v3121_v21, %v3120_v50  ;;  %v3209_v34 = vadd.f32 %v8589_v43, %v3193_v58  ;;  %v3210_v52 = vadd.f32 %v8589_v43, %v3194_v38  ;;  %v2728_v58 = vadd.f32 %v8589_v43, %v2712_v5 }
 0x2f7   : > { %v3347_v36 = vsel %vm2216_vm8, %v3219_v61, %v5527_v51  ;;  %v3346_v35 = vsel %vm2216_vm8, %v3218_v1, %v5526_v47 }
 0x2f8   : > { %v5530_v32 = vpop.permute.xlu0 %5529  ;;  %v3394_v11 = vpack.c.bf16 %v3347_v36, %v3346_v35  ;;  %v3225_v1 = vmax.f32 %v3209_v34, 0.0  ;;  %v3226_v35 = vmax.f32 %v3210_v52, 0.0 }
 0x2f9   : > { %v5532_v29 = vunpack.i.h.bf16 %v5530_v32  ;;  %v5531_v45 = vunpack.i.l.bf16 %v5530_v32  ;;  %v3196_v32 = vmul.f32 %v8953_v46, %v8834_v20 }
 0x2fb   : > { %v5535_v63 = vpop.permute.xlu1 %5534  ;;  %v3349_v28 = vsel %vm2216_vm8, %v3221_v0, %v5532_v29  ;;  %v3348_v9 = vsel %vm2216_vm8, %v3220_v27, %v5531_v45  ;;  %v2743_v27 = vmax.f32 %v2727_v60, 0.0 }
 0x2fc   : > { %v5537_v6 = vunpack.i.h.bf16 %v5535_v63  ;;  %v5536_v8 = vunpack.i.l.bf16 %v5535_v63  ;;  %5273 = vmatmul.mubr.msk.bf16.gmra.mrb[20].mxu1 %vm3413_vm7, %v3393_v48  ;;  %v3395_v42 = vpack.c.bf16 %v3349_v28, %v3348_v9  ;;  %v2713_v48 = vmul.f32 %v8953_v46, %v7864_v15  ;;  %v9115_v28 = vld [vmem:[%s10538_s7] ss:$0 sm:$0xff] }
 0x2fd   : > { %5276 = vmatprep.mubr.msk.bf16.mxu1 %vm3413_vm7, %v3394_v11  ;;  %v9078_v10 = vpop.f32.mrb[0].mxu0  ;;  %v3212_v63 = vadd.f32 %v8589_v43, %v3196_v32 }
 0x2fe   : > { %v3350_v49 = vsel %vm2216_vm8, %v3222_v25, %v5536_v8  ;;  %v3351_v30 = vsel %vm2216_vm8, %v3223_v41, %v5537_v6  ;;  %v9081_v61 = vpop.f32.mrb[1].mxu0  ;;  %v3213_v41 = vadd.f32 %v8589_v43, %v3197_v18  ;;  %v2729_v34 = vadd.f32 %v5795_v24, %v2713_v48 }
 0x2ff   : > { %v5540_v44 = vpop.permute.xlu0 %5539  ;;  %v3396_v39 = vpack.c.bf16 %v3351_v30, %v3350_v49  ;;  %v9083_v14 = vpop.f32.mrb[2].mxu0  ;;  %v3228_v60 = vmax.f32 %v3212_v63, 0.0  ;;  %v3199_v18 = vmul.f32 %v8953_v46, %v8890_v12 }
 0x300   : > { %v5542_v51 = vunpack.i.h.bf16 %v5540_v44  ;;  %v5541_v47 = vunpack.i.l.bf16 %v5540_v44  ;;  %v9089_v54 = vpop.f32.mrb[3].mxu0  ;;  %v3229_v44 = vmax.f32 %v3213_v41, 0.0 }
 0x301   : > { %v5545_v17 = vpop.permute.xlu1 %5544 }
 0x302   : > { %v5547_v40 = vunpack.i.h.bf16 %v5545_v17  ;;  %v5546_v31 = vunpack.i.l.bf16 %v5545_v17  ;;  %v3353_v29 = vsel %vm2216_vm8, %v3225_v1, %v5542_v51  ;;  %v3352_v45 = vsel %vm2216_vm8, %v3224_v57, %v5541_v47 }
 0x303   : > { %v3397_v9 = vpack.c.bf16 %v3353_v29, %v3352_v45  ;;  %v2744_v1 = vmax.f32 %v2728_v58, 0.0 }
 0x304   : > { %v2867_v21 = vsel %vm2216_vm8, %v2739_v62, %v5547_v40  ;;  %v2866_v50 = vsel %vm2216_vm8, %v2738_v53, %v5546_v31  ;;  %v5550_v62 = vpop.permute.xlu0 %5549  ;;  %5277 = vmatmul.mubr.msk.bf16.gmra.mrb[24].mxu1 %vm3413_vm7, %v3395_v42  ;;  %v2745_v42 = vmax.f32 %v2729_v34, 0.0 }
 0x305   : > { %v5555_v7 = vpop.permute.xlu1 %5554  ;;  %v3378_v36 = vpack.c.bf16 %v2867_v21, %v2866_v50  ;;  %v5552_v0 = vunpack.i.h.bf16 %v5550_v62  ;;  %v5551_v56 = vunpack.i.l.bf16 %v5550_v62  ;;  %5280 = vmatprep.mubr.msk.bf16.mxu1 %vm3413_vm7, %v3396_v39  ;;  %v9107_v25 = vpop.f32.mrb[4].mxu0 }
 0x306   : > { %v5557_v3 = vunpack.i.h.bf16 %v5555_v7  ;;  %v5556_v2 = vunpack.i.l.bf16 %v5555_v7  ;;  %v3198_v7 = vmul.f32 %v8953_v46, %v8896_v13 }
 0x307   : > { %5244 = vmatprep.mubr.msk.bf16.mxu0 %vm3413_vm7, %v3378_v36  ;;  %v2869_v15 = vsel %vm2216_vm8, %v2741_v16, %v5552_v0  ;;  %v2868_v55 = vsel %vm2216_vm8, %v2740_v33, %v5551_v56  ;;  %v2291_v33 = vpop.f32.mrb[5].mxu0  ;;  %v3215_v36 = vadd.f32 %v5795_v24, %v3199_v18 }
 0x308   : > { %v3354_v20 = vsel %vm2216_vm8, %v3226_v35, %v5556_v2  ;;  %v3355_v11 = vsel %vm2216_vm8, %v3227_v26, %v5557_v3  ;;  %v5560_v8 = vpop.permute.xlu0 %5559  ;;  %v3379_v53 = vpack.c.bf16 %v2869_v15, %v2868_v55  ;;  %v9118_v30 = vadd.f32 %v9115_v28, %v2291_v33  ;;  %v9120_v16 = vpop.f32.mrb[6].mxu0 }
 0x309   : > { %v5565_v23 = vpop.permute.xlu1 %5564  ;;  %v5562_v49 = vunpack.i.h.bf16 %v5560_v8  ;;  %v3398_v43 = vpack.c.bf16 %v3355_v11, %v3354_v20  ;;  %v5561_v37 = vunpack.i.l.bf16 %v5560_v8  ;;  %v2294_v17 = vpop.f32.mrb[7].mxu0  ;;  %v3201_v35 = vmul.f32 %v8953_v46, %v8894_v22 }
 0x30a   : > { %v5567_v38 = vunpack.i.h.bf16 %v5565_v23  ;;  %v5566_v6 = vunpack.i.l.bf16 %v5565_v23  ;;  %5245 = vmatmul.mubr.msk.bf16.gmra.mrb[32].mxu0 %vm3413_vm7, %v3379_v53  ;;  %v9126_v52 = vadd.f32 %v9115_v28, %v2294_v17  ;;  %v3214_v32 = vadd.f32 %v5795_v24, %v3198_v7 }
 0x30b   : > { %v3357_v50 = vsel %vm2216_vm8, %v3229_v44, %v5562_v49  ;;  %v3200_v3 = vmul.f32 %v8953_v46, %v8904_v19  ;;  %v3231_v48 = vmax.f32 %v3215_v36, 0.0  ;;  %v3217_v0 = vadd.f32 %v5795_v24, %v3201_v35 }
 0x30c   : > { %v2871_v5 = vsel %vm2216_vm8, %v2743_v27, %v5567_v38  ;;  %v2870_v4 = vsel %vm2216_vm8, %v2742_v59, %v5566_v6  ;;  %v5570_v40 = vpop.permute.xlu0 %5569  ;;  %5281 = vmatmul.mubr.msk.bf16.gmra.mrb[28].mxu1 %vm3413_vm7, %v3397_v9  ;;  %v3356_v59 = vsel %vm2216_vm8, %v3228_v60, %v5561_v37  ;;  %v3230_v13 = vmax.f32 %v3214_v32, 0.0 }
 0x30d   : > { %v3380_v31 = vpack.c.bf16 %v2871_v5, %v2870_v4  ;;  %v5572_v39 = vunpack.i.h.bf16 %v5570_v40  ;;  %v5571_v21 = vunpack.i.l.bf16 %v5570_v40  ;;  %5284 = vmatprep.mubr.msk.bf16.mxu1 %vm3413_vm7, %v3398_v43  ;;  %v3399_v26 = vpack.c.bf16 %v3357_v50, %v3356_v59  ;;  %v9174_v43 = vld [vmem:[%s10535_s4] ss:$0 sm:$0xff] }
 0x30e   : > { %v3216_v29 = vadd.f32 %v5795_v24, %v3200_v3  ;;  %v3233_v27 = vmax.f32 %v3217_v0, 0.0  ;;  %v2284_v5 = vadd.f32 %v9078_v10, %v9115_v28  ;;  %v2276_v4 = vadd.f32 %v9115_v28, %v9081_v61 }
 0x30f   : > { %5248 = vmatprep.mubr.msk.bf16.mxu0 %vm3413_vm7, %v3380_v31  ;;  %v2873_v51 = vsel %vm2216_vm8, %v2745_v42, %v5572_v39  ;;  %v2872_v47 = vsel %vm2216_vm8, %v2744_v1, %v5571_v21  ;;  %v2287_v60 = vadd.f32 %v9083_v14, %v9115_v28 }
 0x310   : > { %v3381_v57 = vpack.c.bf16 %v2873_v51, %v2872_v47  ;;  %v3232_v41 = vmax.f32 %v3216_v29, 0.0  ;;  %v9188_v1 = vmax.f32 %v2284_v5, 0.0  ;;  %v9194_v39 = vmax.f32 %v2276_v4, 0.0 }
 0x311   : > { %v9201_v59 = vmax.f32 %v2287_v60, 0.0 }
 0x312   : > { %5249 = vmatmul.mubr.msk.bf16.gmra.mrb[36].mxu0 %vm3413_vm7, %v3381_v57 }
 0x314   : > { %5285 = vmatmul.mubr.msk.bf16.gmra.mrb[32].mxu1 %vm3413_vm7, %v3399_v26 }
 0x31f   : > { %v9145_v2 = vpop.f32.mrb[8].mxu0 }
 0x320   : > { %v9147_v62 = vpop.f32.mrb[9].mxu0  ;;  %v5575_v56 = vpop.permute.xlu1 %5574 }
 0x321   : > { %v9149_v58 = vpop.f32.mrb[10].mxu0  ;;  %v5577_v45 = vunpack.i.h.bf16 %v5575_v56  ;;  %v5576_v20 = vunpack.i.l.bf16 %v5575_v56 }
 0x322   : > { %v9151_v12 = vpop.f32.mrb[11].mxu0 }
 0x323   : > { %v3358_v22 = vsel %vm2216_vm8, %v3230_v13, %v5576_v20  ;;  %v3359_v11 = vsel %vm2216_vm8, %v3231_v48, %v5577_v45 }
 0x324   : > { %v5580_v19 = vpop.permute.xlu0 %5579  ;;  %v3400_v46 = vpack.c.bf16 %v3359_v11, %v3358_v22  ;;  %v2316_v22 = vadd.f32 %v9145_v2, %v9115_v28  ;;  %v2308_v11 = vadd.f32 %v9115_v28, %v9147_v62 }
 0x325   : > { %v5582_v15 = vunpack.i.h.bf16 %v5580_v19  ;;  %v5581_v55 = vunpack.i.l.bf16 %v5580_v19 }
 0x326   : > { %5288 = vmatprep.mubr.msk.bf16.mxu1 %vm3413_vm7, %v3400_v46  ;;  %v2319_v46 = vadd.f32 %v9149_v58, %v9115_v28 }
 0x327   : > { %v3361_v23 = vsel %vm2216_vm8, %v3233_v27, %v5582_v15  ;;  %v3360_v63 = vsel %vm2216_vm8, %v3232_v41, %v5581_v55  ;;  %v2311_v15 = vadd.f32 %v9115_v28, %v9151_v12 }
 0x328   : > { %v3401_v38 = vpack.c.bf16 %v3361_v23, %v3360_v63  ;;  %v9249_v63 = vmax.f32 %v2316_v22, 0.0 }
 0x32a   : > { %5289 = vmatmul.mubr.msk.bf16.gmra.mrb[36].mxu1 %vm3413_vm7, %v3401_v38 }
 0x338   : > { %v5218_v6 = vpop.f32.mrb[12].mxu0 }
 0x339   : > { %v9160_v8 = vadd.f32 %v5218_v6, %v9115_v28  ;;  %v2323_v53 = vpop.f32.mrb[13].mxu0  ;;  %v2279_v6 = vadd.f32 %v9115_v28, %v9089_v54  ;;  %v2303_v54 = vadd.f32 %v9120_v16, %v9115_v28 }
 0x33a   : > { %v9163_v24 = vadd.f32 %v9115_v28, %v2323_v53  ;;  %v5219_v34 = vpop.f32.mrb[14].mxu0  ;;  %v9257_v53 = vmax.f32 %v2308_v11, 0.0 }
 0x33b   : > { %v9166_v33 = vadd.f32 %v5219_v34, %v9115_v28  ;;  %v2326_v9 = vpop.f32.mrb[15].mxu0  ;;  %v9288_v16 = vmax.f32 %v2279_v6, 0.0 }
 0x33c   : > { %v9169_v49 = vadd.f32 %v9115_v28, %v2326_v9  ;;  %v9263_v9 = vmax.f32 %v2319_v46, 0.0 }
 0x34d   : > { %v5230_v37 = vpop.f32.mrb[16].mxu0 }
 0x34e   : > { %v9181_v17 = vadd.f32 %v5230_v37, %v9174_v43  ;;  %v3544_v44 = vpop.f32.mrb[17].mxu0 }
 0x34f   : > { %v9186_v40 = vadd.f32 %v9174_v43, %v3544_v44  ;;  %v5231_v31 = vpop.f32.mrb[18].mxu0  ;;  %v9274_v44 = vmax.f32 %v2311_v15, 0.0 }
 0x350   : > { %11032 = vst [vmem:[#allocation15_spill] sm:$0xff] %v9181_v17  ;;  %v10701_v42 = vmax.f32 %v9181_v17, 0.0  ;;  %v9192_v10 = vadd.f32 %v5231_v31, %v9174_v43  ;;  %v3547_v61 = vpop.f32.mrb[19].mxu0 }
 0x351   : > { %11033 = vst [vmem:[#allocation7_spill] sm:$0xff] %v9186_v40  ;;  %v10696_v21 = vmax.f32 %v9186_v40, 0.0  ;;  %v9244_v55 = vadd.f32 %v9174_v43, %v3547_v61 }
 0x352   : > { %11034 = vst [vmem:[#allocation13_spill] sm:$0xff] %v9192_v10  ;;  %v3865_v14 = vmul.f32 %v10701_v42, %v9188_v1  ;;  %v10695_v50 = vmax.f32 %v9192_v10, 0.0 }
 0x353   : > { %v3863_v51 = vmul.f32 %v10696_v21, %v9194_v39  ;;  %11036 = vst [vmem:[#allocation18_spill] sm:$0xff] %v9244_v55  ;;  %v10694_v60 = vmax.f32 %v9244_v55, 0.0 }
 0x354   : > { %v3885_v47 = vsel %vm2216_vm8, %v3865_v14, 0.0  ;;  %v3866_v57 = vmul.f32 %v10695_v50, %v9201_v59 }
 0x355   : > { %3886 = vadd.xlane.f32.xlu0 %v3885_v47  ;;  %v5234_v26 = vpop.f32.mrb[20].mxu0  ;;  %v3879_v18 = vsel %vm2216_vm8, %v3863_v51, 0.0  ;;  %v3864_v22 = vmul.f32 %v10694_v60, %v9288_v16 }
 0x356   : > { %v9211_v7 = vpop.f32.mrb[21].mxu0  ;;  %3880 = vadd.xlane.f32.xlu1 %v3879_v18  ;;  %v3888_v32 = vsel %vm2216_vm8, %v3866_v57, 0.0  ;;  %v9279_v61 = vadd.f32 %v5234_v26, %v9174_v43  ;;  %v2300_v57 = vadd.f32 %v9107_v25, %v9115_v28 }
 0x357   : > { %v5235_v36 = vpop.f32.mrb[22].mxu0  ;;  %v3882_v15 = vsel %vm2216_vm8, %v3864_v22, 0.0  ;;  %v9318_v6 = vadd.f32 %v9174_v43, %v9211_v7 }
 0x358   : > { %v9213_v35 = vpop.f32.mrb[23].mxu0  ;;  %v9266_v5 = vadd.f32 %v5235_v36, %v9174_v43  ;;  %11041 = vst [vmem:[#allocation37_spill] sm:$0xff] %v9279_v61  ;;  %v10693_v11 = vmax.f32 %v9279_v61, 0.0  ;;  %v9304_v25 = vmax.f32 %v2300_v57, 0.0 }
 0x359   : > { %11042 = vst [vmem:[#allocation41_spill] sm:$0xff] %v9318_v6 }
 0x35a   : > { %3889 = vadd.xlane.f32.xlu1 %v3888_v32  ;;  %11040 = vst [vmem:[#allocation40_spill] sm:$0xff] %v9266_v5  ;;  %v10688_v18 = vmax.f32 %v9266_v5, 0.0  ;;  %v9297_v32 = vmax.f32 %v2303_v54, 0.0  ;;  %v9322_v54 = vadd.f32 %v9174_v43, %v9213_v35 }
 0x35c   : > { %v3870_v28 = vmul.f32 %v10688_v18, %v9297_v32  ;;  %11043 = vst [vmem:[#allocation29_spill] sm:$0xff] %v9322_v54 }
 0x35d   : > { %v9216_v3 = vpop.f32.mrb[24].mxu0 }
 0x35e   : > { %v9218_v48 = vpop.f32.mrb[25].mxu0 }
 0x35f   : > { %v9220_v0 = vpop.f32.mrb[26].mxu0 }
 0x360   : > { %v9222_v56 = vpop.f32.mrb[27].mxu0 }
 0x365   : > { %v9224_v13 = vpop.f32.mrb[28].mxu0 }
 0x366   : > { %v9226_v29 = vpop.f32.mrb[29].mxu0 }
 0x367   : > { %v9228_v45 = vpop.f32.mrb[30].mxu0 }
 0x368   : > { %v9230_v20 = vpop.f32.mrb[31].mxu0 }
 0x36d   : > { %v5254_v19 = vpop.f32.mrb[0].mxu1 }
 0x36e   : > { %v9239_v27 = vadd.f32 %v5254_v19, %v9174_v43  ;;  %v3640_v41 = vpop.f32.mrb[1].mxu1 }
 0x36f   : > { %v9247_v23 = vadd.f32 %v9174_v43, %v3640_v41  ;;  %v5255_v2 = vpop.f32.mrb[2].mxu1  ;;  %v3869_v41 = vmul.f32 %v10693_v11, %v9304_v25 }
 0x370   : > { %11035 = vst [vmem:[#allocation30_spill] sm:$0xff] %v9239_v27  ;;  %v10685_v62 = vmax.f32 %v9239_v27, 0.0  ;;  %v9253_v58 = vadd.f32 %v5255_v2, %v9174_v43  ;;  %v3643_v38 = vpop.f32.mrb[3].mxu1  ;;  %v3900_v2 = vsel %vm2216_vm8, %v3870_v28, 0.0  ;;  %v9342_v28 = vmax.f32 %v9166_v33, 0.0 }
 0x371   : > { %11037 = vst [vmem:[#allocation16_spill] sm:$0xff] %v9247_v23  ;;  %v10684_v12 = vmax.f32 %v9247_v23, 0.0  ;;  %v9261_v34 = vadd.f32 %v9174_v43, %v3643_v38  ;;  %v3897_v38 = vsel %vm2216_vm8, %v3869_v41, 0.0  ;;  %v9360_v33 = vadd.f32 %v9216_v3, %v9174_v43 }
 0x372   : > { %11038 = vst [vmem:[#allocation33_spill] sm:$0xff] %v9253_v58  ;;  %v3953_v4 = vmul.f32 %v10685_v62, %v9249_v63  ;;  %v10683_v37 = vmax.f32 %v9253_v58, 0.0  ;;  %v9375_v3 = vadd.f32 %v9220_v0, %v9174_v43 }
 0x373   : > { %11039 = vst [vmem:[#allocation28_spill] sm:$0xff] %v9261_v34  ;;  %v10681_v31 = vmax.f32 %v9261_v34, 0.0  ;;  %v3951_v14 = vmul.f32 %v10684_v12, %v9257_v53  ;;  %11048 = vst [vmem:[#allocation34_spill] sm:$0xff] %v9360_v33 }
 0x374   : > { %v3954_v51 = vmul.f32 %v10683_v37, %v9263_v9  ;;  %v3989_v47 = vsel %vm2216_vm8, %v3953_v4, 0.0  ;;  %11049 = vst [vmem:[#allocation36_spill] sm:$0xff] %v9375_v3 }
 0x375   : > { %3990 = vadd.xlane.f32.xlu0 %v3989_v47  ;;  %v3952_v26 = vmul.f32 %v10681_v31, %v9274_v44  ;;  %v3983_v19 = vsel %vm2216_vm8, %v3951_v14, 0.0  ;;  %v10691_v47 = vmax.f32 %v9318_v6, 0.0 }
 0x376   : > { %v3992_v36 = vsel %vm2216_vm8, %v3954_v51, 0.0 }
 0x377   : > { %3993 = vadd.xlane.f32.xlu1 %v3992_v36  ;;  %v3986_v46 = vsel %vm2216_vm8, %v3952_v26, 0.0  ;;  %v9329_v26 = vmax.f32 %v9160_v8, 0.0 }
 0x379   : > { %3984 = vadd.xlane.f32.xlu0 %v3983_v19  ;;  %v9339_v19 = vmax.f32 %v9118_v30, 0.0 }
 0x37b   : > { %3987 = vadd.xlane.f32.xlu1 %v3986_v46  ;;  %v10686_v46 = vmax.f32 %v9322_v54, 0.0  ;;  %v3867_v30 = vmul.f32 %v10691_v47, %v9339_v19 }
 0x37d   : > { %3883 = vadd.xlane.f32.xlu0 %v3882_v15  ;;  %v3891_v62 = vsel %vm2216_vm8, %v3867_v30, 0.0  ;;  %v9403_v30 = vadd.f32 %v9174_v43, %v9218_v48 }
 0x37f   : > { %3901 = vadd.xlane.f32.xlu1 %v3900_v2  ;;  %v9353_v2 = vmax.f32 %v9126_v52, 0.0  ;;  %11052 = vst [vmem:[#allocation39_spill] sm:$0xff] %v9403_v30  ;;  %v10697_v47 = vmax.f32 %v9403_v30, 0.0 }
 0x381   : > { %3898 = vadd.xlane.f32.xlu0 %v3897_v38 }
 0x3af   : > { %v5258_v4 = vpop.f32.mrb[4].mxu1 }
 0x3b0   : > { %v9325_v14 = vadd.f32 %v5258_v4, %v9174_v43  ;;  %v3656_v51 = vpop.f32.mrb[5].mxu1 }
 0x3b1   : > { %v5259_v57 = vpop.f32.mrb[6].mxu1  ;;  %v9333_v7 = vadd.f32 %v9174_v43, %v3656_v51 }
 0x3b2   : > { %11044 = vst [vmem:[#allocation32_spill] sm:$0xff] %v9325_v14  ;;  %v10680_v36 = vmax.f32 %v9325_v14, 0.0  ;;  %v9336_v22 = vadd.f32 %v5259_v57, %v9174_v43  ;;  %v3659_v35 = vpop.f32.mrb[7].mxu1  ;;  %v9368_v57 = vmax.f32 %v9163_v24, 0.0 }
 0x3b3   : > { %11045 = vst [vmem:[#allocation35_spill] sm:$0xff] %v9333_v7  ;;  %v9350_v15 = vadd.f32 %v9174_v43, %v3659_v35  ;;  %v10687_v38 = vmax.f32 %v9333_v7, 0.0  ;;  %v3868_v35 = vmul.f32 %v10686_v46, %v9353_v2 }
 0x3b4   : > { %11046 = vst [vmem:[#allocation8_spill] sm:$0xff] %v9336_v22  ;;  %v3957_v8 = vmul.f32 %v10680_v36, %v9329_v26  ;;  %v10682_v41 = vmax.f32 %v9336_v22, 0.0 }
 0x3b5   : > { %11047 = vst [vmem:[#allocation42_spill] sm:$0xff] %v9350_v15  ;;  %v10689_v36 = vmax.f32 %v9350_v15, 0.0  ;;  %v3955_v37 = vmul.f32 %v10687_v38, %v9368_v57  ;;  %v3894_v46 = vsel %vm2216_vm8, %v3868_v35, 0.0 }
 0x3b6   : > { %v3958_v4 = vmul.f32 %v10682_v41, %v9342_v28  ;;  %v4001_v51 = vsel %vm2216_vm8, %v3957_v8, 0.0  ;;  %v9380_v8 = vmax.f32 %v9169_v49, 0.0 }
 0x3b7   : > { %v5262_v52 = vpop.f32.mrb[8].mxu1  ;;  %4002 = vadd.xlane.f32.xlu0 %v4001_v51  ;;  %v10690_v51 = vmax.f32 %v9360_v33, 0.0  ;;  %v3995_v38 = vsel %vm2216_vm8, %v3955_v37, 0.0 }
 0x3b8   : > { %v3672_v31 = vpop.f32.mrb[9].mxu1  ;;  %v4004_v41 = vsel %vm2216_vm8, %v3958_v4, 0.0  ;;  %v9387_v12 = vadd.f32 %v5262_v52, %v9174_v43  ;;  %v10692_v4 = vmax.f32 %v9375_v3, 0.0  ;;  %v3956_v49 = vmul.f32 %v10689_v36, %v9380_v8 }
 0x3b9   : > { %v5263_v24 = vpop.f32.mrb[10].mxu1  ;;  %4005 = vadd.xlane.f32.xlu1 %v4004_v41  ;;  %v3873_v52 = vmul.f32 %v10690_v51, %v9249_v63 }
 0x3ba   : > { %11050 = vst [vmem:[#allocation43_spill] sm:$0xff] %v9387_v12  ;;  %v3675_v0 = vpop.f32.mrb[11].mxu1  ;;  %v9395_v41 = vadd.f32 %v5263_v24, %v9174_v43  ;;  %v3874_v24 = vmul.f32 %v10692_v4, %v9263_v9  ;;  %v3998_v48 = vsel %vm2216_vm8, %v3956_v49, 0.0 }
 0x3bb   : > { %3892 = vadd.xlane.f32.xlu0 %v3891_v62  ;;  %v10700_v62 = vmax.f32 %v9387_v12, 0.0 }
 0x3bc   : > { %11051 = vst [vmem:[#allocation46_spill] sm:$0xff] %v9395_v41  ;;  %v10698_v35 = vmax.f32 %v9395_v41, 0.0  ;;  %v3912_v60 = vsel %vm2216_vm8, %v3874_v24, 0.0 }
 0x3bd   : > { %3895 = vadd.xlane.f32.xlu1 %v3894_v46  ;;  %v9412_v46 = vadd.f32 %v9174_v43, %v9222_v56  ;;  %v4025_v37 = vmul.f32 %v10700_v62, %v9188_v1  ;;  %v3909_v56 = vsel %vm2216_vm8, %v3873_v52, 0.0  ;;  %v9437_v52 = vadd.f32 %v9224_v13, %v9174_v43 }
 0x3be   : > { %v4026_v49 = vmul.f32 %v10698_v35, %v9201_v59 }
 0x3bf   : > { %v5266_v18 = vpop.f32.mrb[12].mxu1  ;;  %3996 = vadd.xlane.f32.xlu0 %v3995_v38  ;;  %11053 = vst [vmem:[#allocation56_spill] sm:$0xff] %v9412_v46  ;;  %v9421_v38 = vadd.f32 %v9174_v43, %v3672_v31  ;;  %v10699_v11 = vmax.f32 %v9412_v46, 0.0  ;;  %v3871_v31 = vmul.f32 %v10697_v47, %v9257_v53  ;;  %11056 = vst [vmem:[#allocation45_spill] sm:$0xff] %v9437_v52  ;;  %v4045_v50 = vsel %vm2216_vm8, %v4025_v37, 0.0 }
 0x3c0   : > { %v3688_v36 = vpop.f32.mrb[13].mxu1  ;;  %v4048_v13 = vsel %vm2216_vm8, %v4026_v49, 0.0 }
 0x3c1   : > { %v5267_v51 = vpop.f32.mrb[14].mxu1  ;;  %3999 = vadd.xlane.f32.xlu1 %v3998_v48  ;;  %11054 = vst [vmem:[#allocation51_spill] sm:$0xff] %v9421_v38  ;;  %v9429_v48 = vadd.f32 %v9174_v43, %v3675_v0  ;;  %v3872_v0 = vmul.f32 %v10699_v11, %v9274_v44  ;;  %v9457_v11 = vadd.f32 %v5266_v18, %v9174_v43  ;;  %v11060_v18 = vmax.f32 %v9437_v52, 0.0 }
 0x3c2   : > { %v3691_v4 = vpop.f32.mrb[15].mxu1 }
 0x3c3   : > { %3910 = vadd.xlane.f32.xlu0 %v3909_v56  ;;  %11055 = vst [vmem:[#allocation44_spill] sm:$0xff] %v9429_v48  ;;  %v10702_v56 = vmax.f32 %v9421_v38, 0.0  ;;  %v10703_v24 = vmax.f32 %v9429_v48, 0.0  ;;  %11058 = vst [vmem:[#allocation48_spill] sm:$0xff] %v9457_v11  ;;  %v3906_v37 = vsel %vm2216_vm8, %v3872_v0, 0.0 }
 0x3c5   : > { %3913 = vadd.xlane.f32.xlu1 %v3912_v60  ;;  %v9446_v60 = vadd.f32 %v9228_v45, %v9174_v43  ;;  %v3903_v45 = vsel %vm2216_vm8, %v3871_v31, 0.0  ;;  %v4024_v49 = vmul.f32 %v10703_v24, %v9288_v16  ;;  %v9475_v31 = vadd.f32 %v9174_v43, %v9226_v29 }
 0x3c7   : > { %v5270_v21 = vpop.f32.mrb[16].mxu1  ;;  %4046 = vadd.xlane.f32.xlu0 %v4045_v50  ;;  %11057 = vst [vmem:[#allocation47_spill] sm:$0xff] %v9446_v60  ;;  %v4023_v50 = vmul.f32 %v10702_v56, %v9194_v39  ;;  %v3877_v56 = vmul.f32 %v11060_v18, %v9329_v26  ;;  %11061 = vst [vmem:[#allocation50_spill] sm:$0xff] %v9475_v31  ;;  %v4042_v29 = vsel %vm2216_vm8, %v4024_v49, 0.0 }
 0x3c8   : > { %v9449_v47 = vpop.f32.mrb[17].mxu1 }
 0x3c9   : > { %v5271_v35 = vpop.f32.mrb[18].mxu1  ;;  %4049 = vadd.xlane.f32.xlu1 %v4048_v13  ;;  %v9467_v13 = vadd.f32 %v5267_v51, %v9174_v43  ;;  %v4039_v42 = vsel %vm2216_vm8, %v4023_v50, 0.0  ;;  %v11062_v51 = vmax.f32 %v9446_v60, 0.0  ;;  %v11064_v50 = vmax.f32 %v9457_v11, 0.0 }
 0x3ca   : > { %v9459_v62 = vpop.f32.mrb[19].mxu1  ;;  %v9542_v52 = vadd.f32 %v5271_v35, %v9174_v43  ;;  %v9581_v23 = vadd.f32 %v9174_v43, %v9449_v47 }
 0x3cb   : > { %3904 = vadd.xlane.f32.xlu0 %v3903_v45  ;;  %11059 = vst [vmem:[#allocation49_spill] sm:$0xff] %v9467_v13  ;;  %v3878_v0 = vmul.f32 %v11062_v51, %v9342_v28  ;;  %v10708_v18 = vmax.f32 %v9467_v13, 0.0  ;;  %v4029_v60 = vmul.f32 %v11064_v50, %v9304_v25  ;;  %v9499_v51 = vadd.f32 %v9174_v43, %v3688_v36 }
 0x3cc   : > { %v11067_v36 = vmax.f32 %v9475_v31, 0.0  ;;  %11070 = vst [vmem:[#allocation11_spill] sm:$0xff] %v9542_v52  ;;  %11075 = vst [vmem:[#allocation21_spill] sm:$0xff] %v9581_v23  ;;  %v11076_v27 = vmax.f32 %v9542_v52, 0.0 }
 0x3cd   : > { %3907 = vadd.xlane.f32.xlu1 %v3906_v37  ;;  %v9486_v37 = vadd.f32 %v9174_v43, %v9230_v20  ;;  %11065 = vst [vmem:[#allocation53_spill] sm:$0xff] %v9499_v51  ;;  %v3921_v20 = vsel %vm2216_vm8, %v3877_v56, 0.0  ;;  %v3924_v7 = vsel %vm2216_vm8, %v3878_v0, 0.0  ;;  %v10713_v56 = vmax.f32 %v9499_v51, 0.0 }
 0x3ce   : > { %v3875_v50 = vmul.f32 %v11067_v36, %v9368_v57  ;;  %v4034_v33 = vmul.f32 %v11076_v27, %v9263_v9 }
 0x3cf   : > { %4040 = vadd.xlane.f32.xlu0 %v4039_v42  ;;  %v9479_v24 = vpop.f32.mrb[20].mxu1  ;;  %11063 = vst [vmem:[#allocation52_spill] sm:$0xff] %v9486_v37  ;;  %v9509_v42 = vadd.f32 %v9174_v43, %v3691_v4 }
 0x3d0   : > { %v9490_v22 = vpop.f32.mrb[21].mxu1  ;;  %v3915_v36 = vsel %vm2216_vm8, %v3875_v50, 0.0 }
 0x3d1   : > { %4043 = vadd.xlane.f32.xlu1 %v4042_v29  ;;  %v9492_v45 = vpop.f32.mrb[22].mxu1  ;;  %v4030_v29 = vmul.f32 %v10708_v18, %v9297_v32  ;;  %11066 = vst [vmem:[#allocation54_spill] sm:$0xff] %v9509_v42  ;;  %v11068_v18 = vmax.f32 %v9486_v37, 0.0  ;;  %v10716_v4 = vmax.f32 %v9509_v42, 0.0 }
 0x3d2   : > { %v9502_v15 = vpop.f32.mrb[23].mxu1 }
 0x3d3   : > { %3922 = vadd.xlane.f32.xlu0 %v3921_v20  ;;  %v4057_v20 = vsel %vm2216_vm8, %v4029_v60, 0.0  ;;  %v3876_v14 = vmul.f32 %v11068_v18, %v9380_v8  ;;  %v4060_v0 = vsel %vm2216_vm8, %v4030_v29, 0.0  ;;  %v4027_v60 = vmul.f32 %v10713_v56, %v9339_v19 }
 0x3d4   : > { %v4028_v18 = vmul.f32 %v10716_v4, %v9353_v2  ;;  %v9538_v29 = vadd.f32 %v5270_v21, %v9174_v43 }
 0x3d5   : > { %3925 = vadd.xlane.f32.xlu1 %v3924_v7 }
 0x3d6   : > { %11069 = vst [vmem:[#allocation55_spill] sm:$0xff] %v9538_v29 }
 0x3d7   : > { %4058 = vadd.xlane.f32.xlu0 %v4057_v20  ;;  %v9517_v49 = vpop.f32.mrb[24].mxu1 }
 0x3d8   : > { %v9524_v7 = vpop.f32.mrb[25].mxu1 }
 0x3d9   : > { %4061 = vadd.xlane.f32.xlu1 %v4060_v0  ;;  %v9526_v31 = vpop.f32.mrb[26].mxu1  ;;  %v3918_v0 = vsel %vm2216_vm8, %v3876_v14, 0.0 }
 0x3da   : > { %v9532_v20 = vpop.f32.mrb[27].mxu1 }
 0x3db   : > { %3916 = vadd.xlane.f32.xlu0 %v3915_v36  ;;  %v4051_v36 = vsel %vm2216_vm8, %v4027_v60, 0.0 }
 0x3dd   : > { %v5246_v37 = vpop.f32.mrb[32].mxu0  ;;  %3919 = vadd.xlane.f32.xlu1 %v3918_v0  ;;  %v4054_v0 = vsel %vm2216_vm8, %v4028_v18, 0.0 }
 0x3de   : > { %v9545_v56 = vadd.f32 %v5246_v37, %v9174_v43  ;;  %v3608_v50 = vpop.f32.mrb[33].mxu0 }
 0x3df   : > { %v5247_v34 = vpop.f32.mrb[34].mxu0  ;;  %4052 = vadd.xlane.f32.xlu0 %v4051_v36  ;;  %v9548_v46 = vpop.f32.mrb[28].mxu1  ;;  %v9559_v37 = vadd.f32 %v9174_v43, %v3608_v50 }
 0x3e0   : > { %v10720_v21 = vmax.f32 %v9545_v56, 0.0  ;;  %v9552_v4 = vadd.f32 %v5247_v34, %v9174_v43  ;;  %v3611_v14 = vpop.f32.mrb[35].mxu0  ;;  %v9556_v58 = vpop.f32.mrb[29].mxu1 }
 0x3e1   : > { %11072 = vst [vmem:[#allocation10_spill] sm:$0xff] %v9559_v37  ;;  %4055 = vadd.xlane.f32.xlu1 %v4054_v0  ;;  %v9562_v36 = vpop.f32.mrb[30].mxu1  ;;  %v9569_v35 = vadd.f32 %v9174_v43, %v3611_v14  ;;  %v11074_v0 = vmax.f32 %v9538_v29, 0.0  ;;  %v11078_v27 = vmax.f32 %v9559_v37, 0.0 }
 0x3e2   : > { %11071 = vst [vmem:[#allocation25_spill] sm:$0xff] %v9552_v4  ;;  %v3945_v34 = vmul.f32 %v10720_v21, %v9188_v1  ;;  %v10724_v3 = vmax.f32 %v9552_v4, 0.0  ;;  %v9571_v18 = vpop.f32.mrb[31].mxu1 }
 0x3e3   : > { %11073 = vst [vmem:[#allocation24_spill] sm:$0xff] %v9569_v35  ;;  %v4033_v60 = vmul.f32 %v11074_v0, %v9249_v63  ;;  %v10732_v29 = vmax.f32 %v9569_v35, 0.0  ;;  %v3943_v52 = vmul.f32 %v11078_v27, %v9194_v39  ;;  %v4072_v27 = vsel %vm2216_vm8, %v4034_v33, 0.0 }
 0x3e4   : > { %v3946_v50 = vmul.f32 %v10724_v3, %v9201_v59  ;;  %v3965_v14 = vsel %vm2216_vm8, %v3945_v34, 0.0  ;;  %v9590_v3 = vadd.f32 %v9174_v43, %v9459_v62  ;;  %v9632_v33 = vadd.f32 %v9492_v45, %v9174_v43 }
 0x3e5   : > { %v5250_v30 = vpop.f32.mrb[36].mxu0  ;;  %3966 = vadd.xlane.f32.xlu0 %v3965_v14  ;;  %v4069_v14 = vsel %vm2216_vm8, %v4033_v60, 0.0  ;;  %v3959_v6 = vsel %vm2216_vm8, %v3943_v52, 0.0 }
 0x3e6   : > { %11077 = vst [vmem:[#allocation20_spill] sm:$0xff] %v9590_v3  ;;  %v3624_v0 = vpop.f32.mrb[37].mxu0  ;;  %v3968_v47 = vsel %vm2216_vm8, %v3946_v50, 0.0  ;;  %v9603_v62 = vadd.f32 %v5250_v30, %v9174_v43  ;;  %v11081_v30 = vmax.f32 %v9581_v23, 0.0  ;;  %v9623_v50 = vadd.f32 %v9479_v24, %v9174_v43  ;;  %11084 = vst [vmem:[#allocation23_spill] sm:$0xff] %v9632_v33 }
 0x3e7   : > { %v5251_v42 = vpop.f32.mrb[38].mxu0  ;;  %3969 = vadd.xlane.f32.xlu1 %v3968_v47  ;;  %v9594_v21 = vpop.f32.mrb[32].mxu1  ;;  %v3944_v47 = vmul.f32 %v10732_v29, %v9288_v16  ;;  %v9641_v23 = vadd.f32 %v9174_v43, %v3624_v0 }
 0x3e8   : > { %v3627_v54 = vpop.f32.mrb[39].mxu0  ;;  %v9600_v13 = vpop.f32.mrb[33].mxu1  ;;  %11079 = vst [vmem:[#allocation14_spill] sm:$0xff] %v9603_v62  ;;  %v9613_v34 = vadd.f32 %v5251_v42, %v9174_v43  ;;  %v4031_v60 = vmul.f32 %v11081_v30, %v9257_v53  ;;  %11082 = vst [vmem:[#allocation38_spill] sm:$0xff] %v9623_v50  ;;  %v10735_v29 = vmax.f32 %v9603_v62, 0.0  ;;  %v11083_v42 = vmax.f32 %v9590_v3, 0.0 }
 0x3e9   : > { %v9610_v5 = vpop.f32.mrb[34].mxu1  ;;  %4070 = vadd.xlane.f32.xlu0 %v4069_v14  ;;  %v3962_v30 = vsel %vm2216_vm8, %v3944_v47, 0.0  ;;  %v10737_v24 = vmax.f32 %v9623_v50, 0.0  ;;  %11085 = vst [vmem:[#allocation5_spill] sm:$0xff] %v9641_v23  ;;  %v9649_v47 = vadd.f32 %v9174_v43, %v3627_v54  ;;  %v11088_v54 = vmax.f32 %v9632_v33, 0.0 }
 0x3ea   : > { %11080 = vst [vmem:[#allocation22_spill] sm:$0xff] %v9613_v34  ;;  %v9616_v51 = vpop.f32.mrb[35].mxu1  ;;  %v4032_v14 = vmul.f32 %v11083_v42, %v9274_v44  ;;  %v3949_v52 = vmul.f32 %v10735_v29, %v9304_v25  ;;  %v4063_v42 = vsel %vm2216_vm8, %v4031_v60, 0.0  ;;  %v9657_v60 = vadd.f32 %v9174_v43, %v9490_v22 }
 0x3eb   : > { %4073 = vadd.xlane.f32.xlu1 %v4072_v27  ;;  %v10736_v27 = vmax.f32 %v9613_v34, 0.0  ;;  %11086 = vst [vmem:[#allocation9_spill] sm:$0xff] %v9649_v47  ;;  %v4037_v0 = vmul.f32 %v10737_v24, %v9329_v26  ;;  %v10738_v29 = vmax.f32 %v9641_v23, 0.0  ;;  %v9673_v24 = vadd.f32 %v9517_v49, %v9174_v43 }
 0x3ec   : > { %11087 = vst [vmem:[#allocation26_spill] sm:$0xff] %v9657_v60  ;;  %v3977_v45 = vsel %vm2216_vm8, %v3949_v52, 0.0  ;;  %v10740_v22 = vmax.f32 %v9657_v60, 0.0 }
 0x3ed   : > { %3960 = vadd.xlane.f32.xlu0 %v3959_v6  ;;  %v3950_v6 = vmul.f32 %v10736_v27, %v9297_v32  ;;  %v4038_v27 = vmul.f32 %v11088_v54, %v9342_v28  ;;  %11090 = vst [vmem:[#allocation17_spill] sm:$0xff] %v9673_v24  ;;  %v3947_v52 = vmul.f32 %v10738_v29, %v9339_v19  ;;  %v4081_v54 = vsel %vm2216_vm8, %v4037_v0, 0.0 }
 0x3ee   : > { %v9694_v29 = vadd.f32 %v9174_v43, %v9524_v7  ;;  %v11094_v7 = vmax.f32 %v9673_v24, 0.0 }
 0x3ef   : > { %3963 = vadd.xlane.f32.xlu1 %v3962_v30  ;;  %v4066_v30 = vsel %vm2216_vm8, %v4032_v14, 0.0  ;;  %v9666_v14 = vadd.f32 %v9174_v43, %v9502_v15  ;;  %v4084_v49 = vsel %vm2216_vm8, %v4038_v27, 0.0  ;;  %v9703_v27 = vadd.f32 %v9174_v43, %v9532_v20 }
 0x3f0   : > { %11092 = vst [vmem:[#allocation31_spill] sm:$0xff] %v9694_v29  ;;  %v10757_v33 = vmax.f32 %v9694_v29, 0.0 }
 0x3f1   : > { %4064 = vadd.xlane.f32.xlu0 %v4063_v42  ;;  %11089 = vst [vmem:[#allocation12_spill] sm:$0xff] %v9666_v14  ;;  %v10739_v42 = vmax.f32 %v9649_v47, 0.0  ;;  %v10742_v15 = vmax.f32 %v9666_v14, 0.0  ;;  %11093 = vst [vmem:[#allocation27_spill] sm:$0xff] %v9703_v27  ;;  %v9721_v14 = vadd.f32 %v9562_v36, %v9174_v43 }
 0x3f3   : > { %4067 = vadd.xlane.f32.xlu1 %v4066_v30  ;;  %v3980_v30 = vsel %vm2216_vm8, %v3950_v6, 0.0  ;;  %v3948_v6 = vmul.f32 %v10739_v42, %v9353_v2  ;;  %v4036_v42 = vmul.f32 %v10742_v15, %v9380_v8  ;;  %v9712_v15 = vadd.f32 %v9548_v46, %v9174_v43  ;;  %11097 = vst [vmem:[#allocation57_spill] sm:$0xff] %v9721_v14 }
 0x3f4   : > { %v4103_v46 = vmul.f32 %v10757_v33, %v9194_v39 }
 0x3f5   : > { %3978 = vadd.xlane.f32.xlu0 %v3977_v45  ;;  %v9682_v45 = vadd.f32 %v9526_v31, %v9174_v43  ;;  %v3971_v31 = vsel %vm2216_vm8, %v3947_v52, 0.0  ;;  %v4105_v52 = vmul.f32 %v11094_v7, %v9188_v1  ;;  %11095 = vst [vmem:[#allocation19_spill] sm:$0xff] %v9712_v15  ;;  %v4078_v7 = vsel %vm2216_vm8, %v4036_v42, 0.0 }
 0x3f6   : > { %v9739_v42 = vadd.f32 %v9174_v43, %v9571_v18 }
 0x3f7   : > { %3981 = vadd.xlane.f32.xlu1 %v3980_v30  ;;  %11091 = vst [vmem:[#allocation6_spill] sm:$0xff] %v9682_v45  ;;  %v4035_v30 = vmul.f32 %v10740_v22, %v9368_v57 }
 0x3f8   : > { %11099 = vst [vmem:[#allocation59_spill] sm:$0xff] %v9739_v42 }
 0x3f9   : > { %4082 = vadd.xlane.f32.xlu0 %v4081_v54  ;;  %v4075_v20 = vsel %vm2216_vm8, %v4035_v30, 0.0  ;;  %v10755_v30 = vmax.f32 %v9712_v15, 0.0 }
 0x3fb   : > { %4085 = vadd.xlane.f32.xlu1 %v4084_v49  ;;  %v3974_v49 = vsel %vm2216_vm8, %v3948_v6, 0.0 }
 0x3fd   : > { %3972 = vadd.xlane.f32.xlu0 %v3971_v31  ;;  %v5290_v22 = vpop.f32.mrb[36].mxu1  ;;  %v11096_v31 = vmax.f32 %v9682_v45, 0.0 }
 0x3fe   : > { %v3784_v0 = vpop.f32.mrb[37].mxu1 }
 0x3ff   : > { %3975 = vadd.xlane.f32.xlu1 %v3974_v49  ;;  %v5291_v54 = vpop.f32.mrb[38].mxu1  ;;  %v4106_v6 = vmul.f32 %v11096_v31, %v9201_v59  ;;  %v10756_v49 = vmax.f32 %v9703_v27, 0.0  ;;  %v9730_v59 = vadd.f32 %v9174_v43, %v9556_v58  ;;  %v4125_v31 = vsel %vm2216_vm8, %v4105_v52, 0.0 }
 0x400   : > { %v3787_v1 = vpop.f32.mrb[39].mxu1  ;;  %v4109_v58 = vmul.f32 %v10755_v30, %v9304_v25 }
 0x401   : > { %4076 = vadd.xlane.f32.xlu0 %v4075_v20  ;;  %11098 = vst [vmem:[#allocation58_spill] sm:$0xff] %v9730_v59  ;;  %v4104_v36 = vmul.f32 %v10756_v49, %v9288_v16  ;;  %v10753_v20 = vmax.f32 %v9721_v14, 0.0  ;;  %v4128_v39 = vsel %vm2216_vm8, %v4106_v6, 0.0  ;;  %v10754_v52 = vmax.f32 %v9730_v59, 0.0 }
 0x402   : > { %v4119_v16 = vsel %vm2216_vm8, %v4103_v46, 0.0  ;;  %v9757_v6 = vadd.f32 %v9610_v5, %v9174_v43 }
 0x403   : > { %4079 = vadd.xlane.f32.xlu1 %v4078_v7  ;;  %v9748_v7 = vadd.f32 %v9594_v21, %v9174_v43  ;;  %v4110_v18 = vmul.f32 %v10753_v20, %v9297_v32  ;;  %v4122_v25 = vsel %vm2216_vm8, %v4104_v36, 0.0  ;;  %v4107_v21 = vmul.f32 %v10754_v52, %v9339_v19 }
 0x404   : > { %11101 = vst [vmem:[#allocation61_spill] sm:$0xff] %v9757_v6  ;;  %v4137_v32 = vsel %vm2216_vm8, %v4109_v58, 0.0  ;;  %v9775_v36 = vadd.f32 %v9174_v43, %v9616_v51 }
 0x405   : > { %4126 = vadd.xlane.f32.xlu0 %v4125_v31  ;;  %11100 = vst [vmem:[#allocation60_spill] sm:$0xff] %v9748_v7  ;;  %v10752_v31 = vmax.f32 %v9739_v42, 0.0  ;;  %v10751_v46 = vmax.f32 %v9748_v7, 0.0  ;;  %v4140_v19 = vsel %vm2216_vm8, %v4110_v18, 0.0  ;;  %v9791_v18 = vadd.f32 %v9174_v43, %v3787_v1 }
 0x406   : > { %11103 = vst [vmem:[#allocation63_spill] sm:$0xff] %v9775_v36 }
 0x407   : > { %4129 = vadd.xlane.f32.xlu1 %v4128_v39  ;;  %v9766_v39 = vadd.f32 %v9174_v43, %v9600_v13  ;;  %v4108_v5 = vmul.f32 %v10752_v31, %v9353_v2  ;;  %v4113_v13 = vmul.f32 %v10751_v46, %v9249_v63  ;;  %v4131_v2 = vsel %vm2216_vm8, %v4107_v21, 0.0  ;;  %11105 = vst [vmem:[#allocation65_spill] sm:$0xff] %v9791_v18 }
 0x408   : > { %v9799_v21 = vadd.f32 %v9174_v43, %v3784_v0 }
 0x409   : > { %4120 = vadd.xlane.f32.xlu0 %v4119_v16  ;;  %11102 = vst [vmem:[#allocation62_spill] sm:$0xff] %v9766_v39  ;;  %v10744_v16 = vmax.f32 %v9757_v6, 0.0  ;;  %v10750_v58 = vmax.f32 %v9766_v39, 0.0 }
 0x40a   : > { %11106 = vst [vmem:[#allocation66_spill] sm:$0xff] %v9799_v21  ;;  %v10747_v0 = vmax.f32 %v9799_v21, 0.0 }
 0x40b   : > { %4123 = vadd.xlane.f32.xlu1 %v4122_v25  ;;  %v9783_v25 = vadd.f32 %v5290_v22, %v9174_v43  ;;  %v4114_v51 = vmul.f32 %v10744_v16, %v9263_v9  ;;  %v4111_v63 = vmul.f32 %v10750_v58, %v9257_v53  ;;  %v4149_v9 = vsel %vm2216_vm8, %v4113_v13, 0.0 }
 0x40d   : > { %4138 = vadd.xlane.f32.xlu0 %v4137_v32  ;;  %11104 = vst [vmem:[#allocation64_spill] sm:$0xff] %v9783_v25  ;;  %v10749_v32 = vmax.f32 %v9775_v36, 0.0  ;;  %v10748_v22 = vmax.f32 %v9783_v25, 0.0  ;;  %v4143_v13 = vsel %vm2216_vm8, %v4111_v63, 0.0 }
 0x40f   : > { %4141 = vadd.xlane.f32.xlu1 %v4140_v19  ;;  %v4134_v19 = vsel %vm2216_vm8, %v4108_v5, 0.0  ;;  %v4112_v1 = vmul.f32 %v10749_v32, %v9274_v44  ;;  %v10746_v5 = vmax.f32 %v9791_v18, 0.0  ;;  %v4117_v53 = vmul.f32 %v10748_v22, %v9329_v26 }
 0x411   : > { %4132 = vadd.xlane.f32.xlu0 %v4131_v2  ;;  %v9806_v2 = vadd.f32 %v5291_v54, %v9174_v43  ;;  %v4116_v43 = vmul.f32 %v10746_v5, %v9380_v8  ;;  %v4146_v44 = vsel %vm2216_vm8, %v4112_v1, 0.0  ;;  %v4115_v54 = vmul.f32 %v10747_v0, %v9368_v57  ;;  %v3887_v1 = vpop.xlane.xlu0 %3886 }
 0x412   : > { %v4161_v26 = vsel %vm2216_vm8, %v4117_v53, 0.0  ;;  %v3929_v48 = vmul.f32 0.17677669, %v3887_v1 }
 0x413   : > { %4135 = vadd.xlane.f32.xlu1 %v4134_v19  ;;  %11107 = vst [vmem:[#allocation67_spill] sm:$0xff] %v9806_v2  ;;  %v4152_v19 = vsel %vm2216_vm8, %v4114_v51, 0.0  ;;  %v10745_v16 = vmax.f32 %v9806_v2, 0.0  ;;  %v4158_v63 = vsel %vm2216_vm8, %v4116_v43, 0.0  ;;  %v4155_v8 = vsel %vm2216_vm8, %v4115_v54, 0.0 }
 0x415   : > { %4150 = vadd.xlane.f32.xlu0 %v4149_v9  ;;  %v4118_v51 = vmul.f32 %v10745_v16, %v9342_v28 }
 0x417   : > { %4153 = vadd.xlane.f32.xlu1 %v4152_v19  ;;  %v4164_v9 = vsel %vm2216_vm8, %v4118_v51, 0.0  ;;  %v3881_v19 = vpop.xlane.xlu1 %3880 }
 0x418   : > { %v3927_v35 = vmul.f32 0.17677669, %v3881_v19 }
 0x419   : > { %4144 = vadd.xlane.f32.xlu0 %v4143_v13  ;;  %v9830_v13 = vpop.xlane.xlu0 %3990 }
 0x41b   : > { %4147 = vadd.xlane.f32.xlu1 %v4146_v44  ;;  %v3890_v57 = vpop.xlane.xlu1 %3889 }
 0x41c   : > { %v3930_v55 = vmul.f32 0.17677669, %v3890_v57 }
 0x41d   : > { %4162 = vadd.xlane.f32.xlu0 %v4161_v26  ;;  %v9832_v53 = vpop.xlane.xlu0 %3984 }
 0x41f   : > { %4159 = vadd.xlane.f32.xlu1 %v4158_v63  ;;  %v9834_v44 = vpop.xlane.xlu1 %3993 }
 0x421   : > { %4156 = vadd.xlane.f32.xlu0 %v4155_v8  ;;  %v3884_v28 = vpop.xlane.xlu0 %3883 }
 0x422   : > { %v3928_v41 = vmul.f32 0.17677669, %v3884_v28 }
 0x423   : > { %4165 = vadd.xlane.f32.xlu1 %v4164_v9  ;;  %v9836_v26 = vpop.xlane.xlu1 %3987 }
 0x425   : > { %v3899_v43 = vpop.xlane.xlu0 %3898 }
 0x426   : > { %v3933_v12 = vmul.f32 0.17677669, %v3899_v43 }
 0x427   : > { %v3902_v63 = vpop.xlane.xlu1 %3901 }
 0x428   : > { %v3934_v10 = vmul.f32 0.17677669, %v3902_v63 }
 0x444   : > { %v9838_v16 = vpop.xlane.xlu0 %4002 }
 0x446   : > { %v9840_v54 = vpop.xlane.xlu1 %4005 }
 0x448   : > { %v9842_v51 = vpop.xlane.xlu0 %3892 }
 0x44a   : > { %v9844_v8 = vpop.xlane.xlu1 %3895 }
 0x44c   : > { %v9846_v9 = vpop.xlane.xlu0 %3996 }
 0x44e   : > { %v9848_v5 = vpop.xlane.xlu1 %3999 }
 0x450   : > { %v9850_v0 = vpop.xlane.xlu0 %3910 }
 0x452   : > { %v9852_v22 = vpop.xlane.xlu1 %3913 }
 0x454   : > { %v4047_v32 = vpop.xlane.xlu0 %4046 }
 0x455   : > { %v4089_v38 = vmul.f32 0.17677669, %v4047_v32 }
 0x456   : > { %v4050_v58 = vpop.xlane.xlu1 %4049 }
 0x458   : > { %v9854_v46 = vpop.xlane.xlu0 %3904 }
 0x45a   : > { %v9856_v31 = vpop.xlane.xlu1 %3907 }
 0x45c   : > { %v4041_v20 = vpop.xlane.xlu0 %4040 }
 0x45d   : > { %v4087_v17 = vmul.f32 0.17677669, %v4041_v20 }
 0x45e   : > { %v4044_v52 = vpop.xlane.xlu1 %4043 }
 0x45f   : > { %v4088_v32 = vmul.f32 0.17677669, %v4044_v52 }
 0x460   : > { %v9858_v30 = vpop.xlane.xlu0 %3922 }
 0x462   : > { %v9860_v49 = vpop.xlane.xlu1 %3925 }
 0x464   : > { %v4059_v33 = vpop.xlane.xlu0 %4058 }
 0x466   : > { %v9862_v2 = vpop.xlane.xlu1 %4061 }
 0x468   : > { %v9864_v18 = vpop.xlane.xlu0 %3916 }
 0x46a   : > { %v9866_v21 = vpop.xlane.xlu1 %3919 }
 0x46c   : > { %v9868_v60 = vpop.xlane.xlu0 %4052 }
 0x46e   : > { %v9870_v25 = vpop.xlane.xlu1 %4055 }
 0x472   : > { %v3967_v50 = vpop.xlane.xlu0 %3966 }
 0x473   : > { %v4009_v62 = vmul.f32 0.17677669, %v3967_v50 }
 0x474   : > { %v3970_v36 = vpop.xlane.xlu1 %3969 }
 0x475   : > { %v4010_v61 = vmul.f32 0.17677669, %v3970_v36  ;;  %v4186_v4 = vsel %vm4183_vm11, %v3929_v48, %v4009_v62  ;;  %v4090_v36 = vmul.f32 0.17677669, %v4050_v58 }
 0x476   : > { %v9872_v3 = vpop.xlane.xlu0 %4070  ;;  %v4203_v57 = vsel %vm4200_vm0, %v4186_v4, %v4089_v38 }
 0x477   : > { %v4187_v37 = vsel %vm4183_vm11, %v3930_v55, %v4010_v61 }
 0x478   : > { %v9874_v6 = vpop.xlane.xlu1 %4073  ;;  %v4204_v55 = vsel %vm4200_vm0, %v4187_v37, %v4090_v36  ;;  %v4093_v37 = vmul.f32 0.17677669, %v4059_v33 }
 0x47a   : > { %v3961_v39 = vpop.xlane.xlu0 %3960 }
 0x47b   : > { %v4007_v29 = vmul.f32 0.17677669, %v3961_v39 }
 0x47c   : > { %v3964_v7 = vpop.xlane.xlu1 %3963 }
 0x47d   : > { %v4008_v40 = vmul.f32 0.17677669, %v3964_v7  ;;  %v4184_v28 = vsel %vm4183_vm11, %v3927_v35, %v4007_v29  ;;  %v3931_v35 = vmul.f32 0.17677669, %v9842_v51 }
 0x47e   : > { %v9876_v42 = vpop.xlane.xlu0 %4064 }
 0x47f   : > { %v4185_v61 = vsel %vm4183_vm11, %v3928_v41, %v4008_v40  ;;  %v4201_v40 = vsel %vm4200_vm0, %v4184_v28, %v4087_v17  ;;  %v4094_v17 = vmul.f32 0.17677669, %v9862_v2 }
 0x480   : > { %v9878_v47 = vpop.xlane.xlu1 %4067  ;;  %v4202_v52 = vsel %vm4200_vm0, %v4185_v61, %v4088_v32 }
 0x482   : > { %v3979_v14 = vpop.xlane.xlu0 %3978 }
 0x483   : > { %v4013_v48 = vmul.f32 0.17677669, %v3979_v14 }
 0x484   : > { %v3982_v34 = vpop.xlane.xlu1 %3981 }
 0x485   : > { %v4014_v7 = vmul.f32 0.17677669, %v3982_v34  ;;  %v4190_v41 = vsel %vm4183_vm11, %v3933_v12, %v4013_v48 }
 0x486   : > { %v9880_v59 = vpop.xlane.xlu0 %4082 }
 0x487   : > { %v4191_v43 = vsel %vm4183_vm11, %v3934_v10, %v4014_v7  ;;  %v3937_v10 = vmul.f32 0.17677669, %v9850_v0 }
 0x488   : > { %v9882_v23 = vpop.xlane.xlu1 %4085  ;;  %v4208_v48 = vsel %vm4200_vm0, %v4191_v43, %v4094_v17 }
 0x48a   : > { %v3973_v15 = vpop.xlane.xlu0 %3972 }
 0x48b   : > { %v4011_v34 = vmul.f32 0.17677669, %v3973_v15 }
 0x48c   : > { %v3976_v11 = vpop.xlane.xlu1 %3975 }
 0x48d   : > { %v4012_v63 = vmul.f32 0.17677669, %v3976_v11  ;;  %v4188_v28 = vsel %vm4183_vm11, %v3931_v35, %v4011_v34  ;;  %v4018_v35 = vmul.f32 0.17677669, %v9834_v44  ;;  %v3935_v44 = vmul.f32 0.17677669, %v9854_v46 }
 0x48e   : > { %v9884_v27 = vpop.xlane.xlu0 %4076 }
 0x490   : > { %v9886_v45 = vpop.xlane.xlu1 %4079 }
 0x492   : > { %v4127_v50 = vpop.xlane.xlu0 %4126 }
 0x493   : > { %v4169_v24 = vmul.f32 0.17677669, %v4127_v50 }
 0x494   : > { %v4130_v1 = vpop.xlane.xlu1 %4129 }
 0x495   : > { %v4170_v19 = vmul.f32 0.17677669, %v4130_v1  ;;  %v9893_v62 = vsel %vm4217_vm10, %v4203_v57, %v4169_v24  ;;  %v3932_v1 = vmul.f32 0.17677669, %v9844_v8  ;;  %v3938_v57 = vmul.f32 0.17677669, %v9852_v22 }
 0x496   : > { %v4121_v39 = vpop.xlane.xlu0 %4120  ;;  %v4241_v58 = vsel %vm4234_vm2, %v9893_v62, -inf  ;;  %v4092_v22 = vmul.f32 0.17677669, %v9870_v25 }
 0x497   : > { %v9900_v20 = vsel %vm4217_vm10, %v4204_v55, %v4170_v19  ;;  %v4167_v38 = vmul.f32 0.17677669, %v4121_v39  ;;  %4242 = vmax.xlane.f32.xlu0 %v4241_v58  ;;  %v4207_v19 = vsel %vm4200_vm0, %v4190_v41, %v4093_v37  ;;  %v4091_v55 = vmul.f32 0.17677669, %v9868_v60 }
 0x498   : > { %v4124_v4 = vpop.xlane.xlu1 %4123  ;;  %v4244_v29 = vsel %vm4234_vm2, %v9900_v20, -inf  ;;  %v4189_v61 = vsel %vm4183_vm11, %v3932_v1, %v4012_v63  ;;  %v4097_v60 = vmul.f32 0.17677669, %v9872_v3  ;;  %v4098_v37 = vmul.f32 0.17677669, %v9874_v6 }
 0x499   : > { %v4168_v24 = vmul.f32 0.17677669, %v4124_v4  ;;  %4245 = vmax.xlane.f32.xlu1 %v4244_v29  ;;  %v9908_v14 = vsel %vm4217_vm10, %v4201_v40, %v4167_v38  ;;  %v4017_v38 = vmul.f32 0.17677669, %v9830_v13  ;;  %v4205_v29 = vsel %vm4200_vm0, %v4188_v28, %v4091_v55 }
 0x49a   : > { %v4139_v50 = vpop.xlane.xlu0 %4138  ;;  %v4235_v51 = vsel %vm4234_vm2, %v9908_v14, -inf  ;;  %v4195_v34 = vsel %vm4183_vm11, %v3938_v57, %v4018_v35  ;;  %v3936_v63 = vmul.f32 0.17677669, %v9856_v31  ;;  %v4016_v1 = vmul.f32 0.17677669, %v9836_v26 }
 0x49b   : > { %v9915_v33 = vsel %vm4217_vm10, %v4202_v52, %v4168_v24  ;;  %v4173_v36 = vmul.f32 0.17677669, %v4139_v50  ;;  %4236 = vmax.xlane.f32.xlu0 %v4235_v51  ;;  %v4206_v24 = vsel %vm4200_vm0, %v4189_v61, %v4092_v22  ;;  %v4194_v40 = vsel %vm4183_vm11, %v3937_v10, %v4017_v38 }
 0x49c   : > { %v4142_v12 = vpop.xlane.xlu1 %4141  ;;  %v4238_v15 = vsel %vm4234_vm2, %v9915_v33, -inf  ;;  %v4095_v50 = vmul.f32 0.17677669, %v9876_v42  ;;  %v4211_v17 = vsel %vm4200_vm0, %v4194_v40, %v4097_v60  ;;  %v4193_v28 = vsel %vm4183_vm11, %v3936_v63, %v4016_v1 }
 0x49d   : > { %v4174_v11 = vmul.f32 0.17677669, %v4142_v12  ;;  %4239 = vmax.xlane.f32.xlu1 %v4238_v15  ;;  %v9926_v2 = vsel %vm4217_vm10, %v4207_v19, %v4173_v36  ;;  %v4015_v36 = vmul.f32 0.17677669, %v9832_v53  ;;  %v4096_v12 = vmul.f32 0.17677669, %v9878_v47 }
 0x49e   : > { %v4133_v8 = vpop.xlane.xlu0 %4132  ;;  %v4253_v0 = vsel %vm4234_vm2, %v9926_v2, -inf  ;;  %v4212_v15 = vsel %vm4200_vm0, %v4195_v34, %v4098_v37  ;;  %v3941_v53 = vmul.f32 0.17677669, %v9858_v30  ;;  %v4101_v26 = vmul.f32 0.17677669, %v9880_v59 }
 0x49f   : > { %v9934_v7 = vsel %vm4217_vm10, %v4208_v48, %v4174_v11  ;;  %v4171_v39 = vmul.f32 0.17677669, %v4133_v8  ;;  %4254 = vmax.xlane.f32.xlu0 %v4253_v0  ;;  %v4192_v11 = vsel %vm4183_vm11, %v3935_v44, %v4015_v36  ;;  %v4021_v61 = vmul.f32 0.17677669, %v9838_v16 }
 0x4a0   : > { %v4136_v58 = vpop.xlane.xlu1 %4135  ;;  %v4256_v32 = vsel %vm4234_vm2, %v9934_v7, -inf  ;;  %v4209_v55 = vsel %vm4200_vm0, %v4192_v11, %v4095_v50  ;;  %v4210_v30 = vsel %vm4200_vm0, %v4193_v28, %v4096_v12  ;;  %v3942_v60 = vmul.f32 0.17677669, %v9860_v49 }
 0x4a1   : > { %v4172_v4 = vmul.f32 0.17677669, %v4136_v58  ;;  %4257 = vmax.xlane.f32.xlu1 %v4256_v32  ;;  %v9945_v25 = vsel %vm4217_vm10, %v4205_v29, %v4171_v39  ;;  %v4198_v59 = vsel %vm4183_vm11, %v3941_v53, %v4021_v61  ;;  %v3939_v58 = vmul.f32 0.17677669, %v9864_v18 }
 0x4a2   : > { %v4151_v41 = vpop.xlane.xlu0 %4150  ;;  %v4247_v13 = vsel %vm4234_vm2, %v9945_v25, -inf  ;;  %v4215_v29 = vsel %vm4200_vm0, %v4198_v59, %v4101_v26  ;;  %v4019_v35 = vmul.f32 0.17677669, %v9846_v9  ;;  %v4102_v37 = vmul.f32 0.17677669, %v9882_v23 }
 0x4a3   : > { %v9952_v3 = vsel %vm4217_vm10, %v4206_v24, %v4172_v4  ;;  %v4177_v52 = vmul.f32 0.17677669, %v4151_v41  ;;  %4248 = vmax.xlane.f32.xlu0 %v4247_v13  ;;  %v4099_v4 = vmul.f32 0.17677669, %v9884_v27  ;;  %v4022_v18 = vmul.f32 0.17677669, %v9840_v54 }
 0x4a4   : > { %v4154_v6 = vpop.xlane.xlu1 %4153  ;;  %v4250_v43 = vsel %vm4234_vm2, %v9952_v3, -inf  ;;  %v3940_v40 = vmul.f32 0.17677669, %v9866_v21  ;;  %v4020_v27 = vmul.f32 0.17677669, %v9848_v5  ;;  %v4196_v13 = vsel %vm4183_vm11, %v3939_v58, %v4019_v35 }
 0x4a5   : > { %v4178_v51 = vmul.f32 0.17677669, %v4154_v6  ;;  %4251 = vmax.xlane.f32.xlu1 %v4250_v43  ;;  %v9964_v46 = vsel %vm4217_vm10, %v4211_v17, %v4177_v52  ;;  %v4100_v34 = vmul.f32 0.17677669, %v9886_v45  ;;  %v4199_v44 = vsel %vm4183_vm11, %v3942_v60, %v4022_v18 }
 0x4a6   : > { %v4145_v10 = vpop.xlane.xlu0 %4144  ;;  %v4265_v31 = vsel %vm4234_vm2, %v9964_v46, -inf  ;;  %v4213_v54 = vsel %vm4200_vm0, %v4196_v13, %v4099_v4  ;;  %v4216_v43 = vsel %vm4200_vm0, %v4199_v44, %v4102_v37  ;;  %v4197_v5 = vsel %vm4183_vm11, %v3940_v40, %v4020_v27 }
 0x4a7   : > { %v9971_v42 = vsel %vm4217_vm10, %v4212_v15, %v4178_v51  ;;  %v4175_v19 = vmul.f32 0.17677669, %v4145_v10  ;;  %4266 = vmax.xlane.f32.xlu0 %v4265_v31  ;;  %v4214_v51 = vsel %vm4200_vm0, %v4197_v5, %v4100_v34 }
 0x4a8   : > { %v4148_v47 = vpop.xlane.xlu1 %4147  ;;  %v4268_v57 = vsel %vm4234_vm2, %v9971_v42, -inf }
 0x4a9   : > { %v4176_v48 = vmul.f32 0.17677669, %v4148_v47  ;;  %4269 = vmax.xlane.f32.xlu1 %v4268_v57  ;;  %v9982_v8 = vsel %vm4217_vm10, %v4209_v55, %v4175_v19 }
 0x4aa   : > { %v4163_v0 = vpop.xlane.xlu0 %4162  ;;  %v4259_v22 = vsel %vm4234_vm2, %v9982_v8, -inf }
 0x4ab   : > { %v9988_v39 = vsel %vm4217_vm10, %v4210_v30, %v4176_v48  ;;  %v4181_v32 = vmul.f32 0.17677669, %v4163_v0  ;;  %4260 = vmax.xlane.f32.xlu0 %v4259_v22 }
 0x4ac   : > { %v4160_v38 = vpop.xlane.xlu1 %4159  ;;  %v4262_v16 = vsel %vm4234_vm2, %v9988_v39, -inf }
 0x4ad   : > { %4263 = vmax.xlane.f32.xlu1 %v4262_v16  ;;  %v10000_v24 = vsel %vm4217_vm10, %v4215_v29, %v4181_v32  ;;  %v4180_v52 = vmul.f32 0.17677669, %v4160_v38 }
 0x4ae   : > { %v4157_v41 = vpop.xlane.xlu0 %4156  ;;  %v4277_v49 = vsel %vm4234_vm2, %v10000_v24, -inf }
 0x4af   : > { %v4179_v9 = vmul.f32 0.17677669, %v4157_v41  ;;  %4278 = vmax.xlane.f32.xlu0 %v4277_v49  ;;  %v10025_v17 = vsel %vm4217_vm10, %v4214_v51, %v4180_v52 }
 0x4b0   : > { %v4166_v23 = vpop.xlane.xlu1 %4165  ;;  %v4274_v36 = vsel %vm4234_vm2, %v10025_v17, -inf }
 0x4b1   : > { %v4182_v6 = vmul.f32 0.17677669, %v4166_v23  ;;  %v10012_v21 = vsel %vm4217_vm10, %v4213_v54, %v4179_v9 }
 0x4b2   : > { %v4271_v63 = vsel %vm4234_vm2, %v10012_v21, -inf }
 0x4b3   : > { %v10019_v45 = vsel %vm4217_vm10, %v4216_v43, %v4182_v6  ;;  %4272 = vmax.xlane.f32.xlu0 %v4271_v63 }
 0x4b4   : > { %v4280_v50 = vsel %vm4234_vm2, %v10019_v45, -inf }
 0x4b5   : > { %4281 = vmax.xlane.f32.xlu1 %v4280_v50 }
 0x4b9   : > { %4275 = vmax.xlane.f32.xlu1 %v4274_v36 }
 0x524   : > { %v4243_v12 = vpop.xlane.xlu0 %4242 }
 0x525   : > { %v4285_v15 = vsub.f32 %v9893_v62, %v4243_v12 }
 0x526   : > { %v4246_v1 = vpop.xlane.xlu1 %4245 }
 0x527   : > { %v4286_v10 = vsub.f32 %v9900_v20, %v4246_v1  ;;  %v4303_v31 = vmul.f32 1.442695, %v4285_v15 }
 0x528   : > { %v4237_v53 = vpop.xlane.xlu0 %4236 }
 0x529   : > { %v4305_v11 = vmul.f32 1.442695, %v4286_v10  ;;  %5708 = vpow2.f32 %v4303_v31  ;;  %v4283_v19 = vsub.f32 %v9908_v14, %v4237_v53 }
 0x52a   : > { %v4240_v47 = vpop.xlane.xlu1 %4239 }
 0x52b   : > { %5710 = vpow2.f32 %v4305_v11  ;;  %v4284_v57 = vsub.f32 %v9915_v33, %v4240_v47  ;;  %v4299_v28 = vmul.f32 1.442695, %v4283_v19 }
 0x52c   : > { %v4255_v48 = vpop.xlane.xlu0 %4254 }
 0x52d   : > { %v4301_v26 = vmul.f32 1.442695, %v4284_v57  ;;  %5712 = vpow2.f32 %v4299_v28  ;;  %v4289_v55 = vsub.f32 %v9926_v2, %v4255_v48 }
 0x52e   : > { %v4258_v62 = vpop.xlane.xlu1 %4257 }
 0x52f   : > { %5714 = vpow2.f32 %v4301_v26  ;;  %v4290_v20 = vsub.f32 %v9934_v7, %v4258_v62  ;;  %v4311_v61 = vmul.f32 1.442695, %v4289_v55 }
 0x530   : > { %v4249_v0 = vpop.xlane.xlu0 %4248 }
 0x531   : > { %v4313_v30 = vmul.f32 1.442695, %v4290_v20  ;;  %5716 = vpow2.f32 %v4311_v61  ;;  %v4287_v14 = vsub.f32 %v9945_v25, %v4249_v0 }
 0x532   : > { %v4252_v22 = vpop.xlane.xlu1 %4251 }
 0x533   : > { %5718 = vpow2.f32 %v4313_v30  ;;  %v4288_v33 = vsub.f32 %v9952_v3, %v4252_v22  ;;  %v10037_v59 = vpop.eup %5708  ;;  %v4307_v58 = vmul.f32 1.442695, %v4287_v14 }
 0x534   : > { %v4267_v38 = vpop.xlane.xlu0 %4266  ;;  %v4337_v7 = vsel %vm4234_vm2, %v10037_v59, 0.0 }
 0x535   : > { %v10039_v32 = vpop.eup %5710  ;;  %v4309_v2 = vmul.f32 1.442695, %v4288_v33  ;;  %5720 = vpow2.f32 %v4307_v58  ;;  %v4293_v16 = vsub.f32 %v9964_v46, %v4267_v38  ;;  %4338 = vadd.xlane.f32.xlu0 %v4337_v7  ;;  %v11108_v7 = vmov 1  }
 0x536   : > { %v4270_v60 = vpop.xlane.xlu1 %4269  ;;  %v4340_v25 = vsel %vm4234_vm2, %v10039_v32, 0.0 }
 0x537   : > { %5722 = vpow2.f32 %v4309_v2  ;;  %v4294_v3 = vsub.f32 %v9971_v42, %v4270_v60  ;;  %4341 = vadd.xlane.f32.xlu1 %v4340_v25  ;;  %v10047_v4 = vpop.eup %5712  ;;  %v4319_v29 = vmul.f32 1.442695, %v4293_v16  ;;  %v11109_v60 = vmov 2  }
 0x538   : > { %v4261_v18 = vpop.xlane.xlu0 %4260  ;;  %v4331_v40 = vsel %vm4234_vm2, %v10047_v4, 0.0 }
 0x539   : > { %v10049_v35 = vpop.eup %5714  ;;  %v4321_v37 = vmul.f32 1.442695, %v4294_v3  ;;  %5724 = vpow2.f32 %v4319_v29  ;;  %v4291_v46 = vsub.f32 %v9982_v8, %v4261_v18  ;;  %4332 = vadd.xlane.f32.xlu0 %v4331_v40  ;;  %v11111_v40 = vmov 0  }
 0x53a   : > { %v4264_v41 = vpop.xlane.xlu1 %4263  ;;  %v4334_v49 = vsel %vm4234_vm2, %v10049_v35, 0.0 }
 0x53b   : > { %5726 = vpow2.f32 %v4321_v37  ;;  %v4292_v42 = vsub.f32 %v9988_v39, %v4264_v41  ;;  %4335 = vadd.xlane.f32.xlu1 %v4334_v49  ;;  %v10057_v27 = vpop.eup %5716  ;;  %v4315_v13 = vmul.f32 1.442695, %v4291_v46 }
 0x53c   : > { %v4279_v23 = vpop.xlane.xlu0 %4278  ;;  %v4349_v44 = vsel %vm4234_vm2, %v10057_v27, 0.0 }
 0x53d   : > { %v10059_v34 = vpop.eup %5718  ;;  %v4317_v9 = vmul.f32 1.442695, %v4292_v42  ;;  %5728 = vpow2.f32 %v4315_v13  ;;  %v4297_v8 = vsub.f32 %v10000_v24, %v4279_v23  ;;  %4350 = vadd.xlane.f32.xlu0 %v4349_v44 }
 0x53e   : > { %v4352_v52 = vsel %vm4234_vm2, %v10059_v34, 0.0 }
 0x53f   : > { %5730 = vpow2.f32 %v4317_v9  ;;  %4353 = vadd.xlane.f32.xlu1 %v4352_v52  ;;  %v10066_v39 = vpop.eup %5720  ;;  %v4327_v6 = vmul.f32 1.442695, %v4297_v8 }
 0x540   : > { %v4273_v43 = vpop.xlane.xlu0 %4272  ;;  %v4343_v5 = vsel %vm4234_vm2, %v10066_v39, 0.0 }
 0x541   : > { %v10068_v54 = vpop.eup %5722  ;;  %5732 = vpow2.f32 %v4327_v6  ;;  %v4295_v63 = vsub.f32 %v10012_v21, %v4273_v43  ;;  %4344 = vadd.xlane.f32.xlu0 %v4343_v5 }
 0x542   : > { %v4282_v24 = vpop.xlane.xlu1 %4281  ;;  %v4346_v50 = vsel %vm4234_vm2, %v10068_v54, 0.0 }
 0x543   : > { %v4298_v51 = vsub.f32 %v10019_v45, %v4282_v24  ;;  %4347 = vadd.xlane.f32.xlu1 %v4346_v50  ;;  %v10076_v36 = vpop.eup %5724  ;;  %v4323_v12 = vmul.f32 1.442695, %v4295_v63 }
 0x544   : > { %v4361_v10 = vsel %vm4234_vm2, %v10076_v36, 0.0 }
 0x545   : > { %v10078_v15 = vpop.eup %5726  ;;  %v4329_v1 = vmul.f32 1.442695, %v4298_v51  ;;  %5734 = vpow2.f32 %v4323_v12  ;;  %4362 = vadd.xlane.f32.xlu0 %v4361_v10 }
 0x546   : > { %v4276_v21 = vpop.xlane.xlu1 %4275  ;;  %v4364_v31 = vsel %vm4234_vm2, %v10078_v15, 0.0 }
 0x547   : > { %5736 = vpow2.f32 %v4329_v1  ;;  %v4296_v11 = vsub.f32 %v10025_v17, %v4276_v21  ;;  %4365 = vadd.xlane.f32.xlu1 %v4364_v31  ;;  %v10085_v45 = vpop.eup %5728 }
 0x548   : > { %v4355_v47 = vsel %vm4234_vm2, %v10085_v45, 0.0 }
 0x549   : > { %v10087_v53 = vpop.eup %5730  ;;  %v4325_v19 = vmul.f32 1.442695, %v4296_v11  ;;  %4356 = vadd.xlane.f32.xlu0 %v4355_v47 }
 0x54a   : > { %v4358_v57 = vsel %vm4234_vm2, %v10087_v53, 0.0 }
 0x54b   : > { %5738 = vpow2.f32 %v4325_v19  ;;  %4359 = vadd.xlane.f32.xlu1 %v4358_v57  ;;  %v10093_v28 = vpop.eup %5732 }
 0x54c   : > { %v4373_v17 = vsel %vm4234_vm2, %v10093_v28, 0.0 }
 0x54d   : > { %4374 = vadd.xlane.f32.xlu0 %v4373_v17  ;;  %v11112_v17 = vmax.f32 %v9545_v56, 0.0 }
 0x54f   : > { %v10097_v26 = vpop.eup %5734 }
 0x550   : > { %v4367_v55 = vsel %vm4234_vm2, %v10097_v26, 0.0 }
 0x551   : > { %v10099_v48 = vpop.eup %5736  ;;  %4368 = vadd.xlane.f32.xlu0 %v4367_v55  ;;  %v11113_v55 = vld [vmem:[#allocation15_spill] sm:$0xff] }
 0x552   : > { %v4376_v62 = vsel %vm4234_vm2, %v10099_v48, 0.0 }
 0x553   : > { %4377 = vadd.xlane.f32.xlu1 %v4376_v62  ;;  %v11114_v62 = vmax.f32 %v11113_v55, 0.0 }
 0x555   : > { %v10105_v20 = vpop.eup %5738 }
 0x556   : > { %v4370_v61 = vsel %vm4234_vm2, %v10105_v20, 0.0 }
 0x557   : > { %4371 = vadd.xlane.f32.xlu1 %v4370_v61  ;;  %v11115_v61 = vld [vmem:[#allocation43_spill] sm:$0xff] }
 0x5c2   : > { %v4339_v30 = vpop.xlane.xlu0 %4338 }
 0x5c3   : > { %5740 = vrcp.f32 %v4339_v30  ;;  %v11116_v30 = vmax.f32 %v11115_v61, 0.0 }
 0x5c4   : > { %v4342_v14 = vpop.xlane.xlu1 %4341 }
 0x5c6   : > { %v4333_v0 = vpop.xlane.xlu0 %4332 }
 0x5c7   : > { %5742 = vrcp.f32 %v4333_v0 }
 0x5c8   : > { %5744 = vrcp.f32 %v4342_v14  ;;  %v4336_v58 = vpop.xlane.xlu1 %4335 }
 0x5c9   : > { %5746 = vrcp.f32 %v4336_v58 }
 0x5cc   : > { %v4354_v18 = vpop.xlane.xlu1 %4353 }
 0x5cd   : > { %v5741_v22 = vpop.eup %5740 }
 0x5ce   : > { %v10110_v33 = vmul.f32 %v5741_v22, %v10037_v59  ;;  %v4351_v59 = vpop.xlane.xlu0 %4350 }
 0x5cf   : > { %5748 = vrcp.f32 %v4351_v59 }
 0x5d0   : > { %4423 = vperm.xlu1 %5583, %v10110_v33   ;;  %v4348_v41 = vpop.xlane.xlu1 %4347 }
 0x5d1   : > { %v5743_v2 = vpop.eup %5742 }
 0x5d2   : > { %v10114_v38 = vmul.f32 %v5743_v2, %v10047_v4  ;;  %v5745_v16 = vpop.eup %5744  ;;  %v11110_v4 = vmov 3   ;;  %v4345_v37 = vpop.xlane.xlu0 %4344 }
 0x5d3   : > { %v10124_v25 = vmul.f32 %v5745_v16, %v10039_v32  ;;  %v5747_v3 = vpop.eup %5746  ;;  %5750 = vrcp.f32 %v4345_v37  ;;  %v11117_v16 = vld [vmem:[#allocation17_spill] sm:$0xff] }
 0x5d4   : > { %4413 = vperm.xlu0 %5587, %v10114_v38   ;;  %5584 = vset.pattern.permute.xlu1 %v11108_v7  ;;  %v10130_v29 = vmul.f32 %v5747_v3, %v10049_v35  ;;  %5752 = vrcp.f32 %v4354_v18  ;;  %v4366_v52 = vpop.xlane.xlu1 %4365  ;;  %v11118_v59 = vmax.f32 %v11117_v16, 0.0  ;;  %v11119_v18 = vld [vmem:[#allocation7_spill] sm:$0xff] }
 0x5d5   : > { %4516 = vperm.xlu1 %5584, %v10110_v33   ;;  %5754 = vrcp.f32 %v4348_v41 }
 0x5d6   : > { %v4363_v42 = vpop.xlane.xlu0 %4362 }
 0x5d7   : > { %5756 = vrcp.f32 %v4363_v42  ;;  %v11121_v42 = vld [vmem:[#allocation10_spill] sm:$0xff] }
 0x5d8   : > { %5589 = vset.pattern.permute.xlu0 %v11109_v60 }
 0x5d9   : > { %4604 = vperm.xlu0 %5589, %v10114_v38   ;;  %5585 = vset.pattern.permute.xlu1 %v11109_v60  ;;  %v5749_v32 = vpop.eup %5748 }
 0x5da   : > { %4612 = vperm.xlu1 %5585, %v10110_v33   ;;  %v10141_v35 = vmul.f32 %v5749_v32, %v10057_v27  ;;  %v4357_v23 = vpop.xlane.xlu0 %4356 }
 0x5db   : > { %5758 = vrcp.f32 %v4357_v23  ;;  %v11123_v23 = vld [vmem:[#allocation51_spill] sm:$0xff] }
 0x5dc   : > { %5760 = vrcp.f32 %v4366_v52 }
 0x5dd   : > { %4616 = vperm.xlu0 %5589, %v10124_v25   ;;  %v5751_v46 = vpop.eup %5750 }
 0x5de   : > { %5586 = vset.pattern.permute.xlu1 %v11110_v4  ;;  %v10152_v49 = vmul.f32 %v5751_v46, %v10066_v39  ;;  %v5753_v27 = vpop.eup %5752  ;;  %v4375_v63 = vpop.xlane.xlu0 %4374  ;;  %v11120_v46 = vmax.f32 %v11119_v18, 0.0 }
 0x5df   : > { %4708 = vperm.xlu1 %5586, %v10110_v33   ;;  %v10163_v13 = vmul.f32 %v5753_v27, %v10059_v34  ;;  %v5755_v9 = vpop.eup %5754  ;;  %v11122_v27 = vmax.f32 %v11121_v42, 0.0  ;;  %v11139_v42 = vld [vmem:[#allocation44_spill] sm:$0xff] }
 0x5e0   : > { %v10170_v44 = vmul.f32 %v5755_v9, %v10068_v54  ;;  %v4360_v54 = vpop.xlane.xlu1 %4359 }
 0x5e1   : > { %5595 = vset.pattern.permute.xlu0 %v11108_v7  ;;  %v5757_v8 = vpop.eup %5756  ;;  %5762 = vrcp.f32 %v4360_v54 }
 0x5e2   : > { %4512 = vperm.xlu0 %5595, %v10130_v29   ;;  %v10175_v34 = vmul.f32 %v5757_v8, %v10076_v36  ;;  %5764 = vrcp.f32 %v4375_v63  ;;  %v4369_v51 = vpop.xlane.xlu0 %4368  ;;  %v11124_v8 = vmax.f32 %v11123_v23, 0.0 }
 0x5e3   : > { %5588 = vset.pattern.permute.xlu1 %v11108_v7  ;;  %5766 = vrcp.f32 %v4369_v51 }
 0x5e4   : > { %4508 = vperm.xlu1 %5588, %v10114_v38  }
 0x5e5   : > { %v5759_v39 = vpop.eup %5758 }
 0x5e6   : > { %5597 = vset.pattern.permute.xlu0 %v11110_v4  ;;  %v10186_v6 = vmul.f32 %v5759_v39, %v10085_v45  ;;  %v5761_v43 = vpop.eup %5760 }
 0x5e7   : > { %4704 = vperm.xlu0 %5597, %v10130_v29   ;;  %v10197_v5 = vmul.f32 %v5761_v43, %v10078_v15  ;;  %v4378_v15 = vpop.xlane.xlu1 %4377 }
 0x5e8   : > { %5590 = vset.pattern.permute.xlu1 %v11110_v4  ;;  %5768 = vrcp.f32 %v4378_v15 }
 0x5e9   : > { %4700 = vperm.xlu1 %5590, %v10114_v38  }
 0x5eb   : > { %5599 = vset.pattern.permute.xlu0 %v11108_v7  ;;  %v5763_v24 = vpop.eup %5762  ;;  %v4372_v21 = vpop.xlane.xlu1 %4371 }
 0x5ec   : > { %4532 = vperm.xlu0 %5599, %v10141_v35   ;;  %v10208_v50 = vmul.f32 %v5763_v24, %v10087_v53  ;;  %v5765_v36 = vpop.eup %5764  ;;  %5770 = vrcp.f32 %v4372_v21  ;;  %v11125_v24 = vld [vmem:[#allocation31_spill] sm:$0xff] }
 0x5ed   : > { %5591 = vset.pattern.permute.xlu1 %v11111_v40  ;;  %v10219_v12 = vmul.f32 %v5765_v36, %v10093_v28  ;;  %v5767_v1 = vpop.eup %5766  ;;  %v11126_v51 = vmax.f32 %v11125_v24, 0.0  ;;  %v11143_v24 = vld [vmem:[#allocation37_spill] sm:$0xff] }
 0x5ee   : > { %4428 = vperm.xlu1 %5591, %v10124_v25   ;;  %v10230_v10 = vmul.f32 %v5767_v1, %v10097_v26 }
 0x5f0   : > { %5601 = vset.pattern.permute.xlu0 %v11110_v4 }
 0x5f1   : > { %4724 = vperm.xlu0 %5601, %v10141_v35  }
 0x5f2   : > { %5592 = vset.pattern.permute.xlu1 %v11108_v7  ;;  %v5769_v31 = vpop.eup %5768 }
 0x5f3   : > { %4520 = vperm.xlu1 %5592, %v10124_v25   ;;  %v10241_v11 = vmul.f32 %v5769_v31, %v10099_v48 }
 0x5f5   : > { %5603 = vset.pattern.permute.xlu0 %v11108_v7 }
 0x5f6   : > { %4524 = vperm.xlu0 %5603, %v10152_v49   ;;  %v5771_v45 = vpop.eup %5770 }
 0x5f7   : > { %5593 = vset.pattern.permute.xlu1 %v11110_v4  ;;  %v10252_v53 = vmul.f32 %v5771_v45, %v10105_v20 }
 0x5f8   : > { %4712 = vperm.xlu1 %5593, %v10124_v25  }
 0x5fa   : > { %5605 = vset.pattern.permute.xlu0 %v11110_v4 }
 0x5fb   : > { %4716 = vperm.xlu0 %5605, %v10152_v49  }
 0x5fc   : > { %5594 = vset.pattern.permute.xlu1 %v11111_v40 }
 0x5fd   : > { %4418 = vperm.xlu1 %5594, %v10130_v29  }
 0x5ff   : > { %5608 = vset.pattern.permute.xlu0 %v11109_v60 }
 0x600   : > { %4632 = vperm.xlu0 %5608, %v10163_v13  }
 0x601   : > { %5596 = vset.pattern.permute.xlu1 %v11109_v60 }
 0x602   : > { %4608 = vperm.xlu1 %5596, %v10130_v29  }
 0x604   : > { %4624 = vperm.xlu0 %5608, %v10170_v44  }
 0x606   : > { %5598 = vset.pattern.permute.xlu1 %v11111_v40 }
 0x607   : > { %4443 = vperm.xlu1 %5598, %v10141_v35  }
 0x608   : > { %5614 = vset.pattern.permute.xlu0 %v11108_v7 }
 0x609   : > { %4548 = vperm.xlu0 %5614, %v10175_v34  }
 0x60b   : > { %5600 = vset.pattern.permute.xlu1 %v11109_v60 }
 0x60c   : > { %4628 = vperm.xlu1 %5600, %v10141_v35  }
 0x60d   : > { %5616 = vset.pattern.permute.xlu0 %v11110_v4 }
 0x60e   : > { %4740 = vperm.xlu0 %5616, %v10175_v34  }
 0x610   : > { %5602 = vset.pattern.permute.xlu1 %v11111_v40 }
 0x611   : > { %4433 = vperm.xlu1 %5602, %v10152_v49  }
 0x612   : > { %5618 = vset.pattern.permute.xlu0 %v11108_v7 }
 0x613   : > { %4540 = vperm.xlu0 %5618, %v10186_v6  }
 0x615   : > { %5604 = vset.pattern.permute.xlu1 %v11109_v60 }
 0x616   : > { %4620 = vperm.xlu1 %5604, %v10152_v49  }
 0x617   : > { %5620 = vset.pattern.permute.xlu0 %v11110_v4 }
 0x618   : > { %4732 = vperm.xlu0 %5620, %v10186_v6  }
 0x61a   : > { %5606 = vset.pattern.permute.xlu1 %v11111_v40 }
 0x61b   : > { %4448 = vperm.xlu1 %5606, %v10163_v13  }
 0x61c   : > { %5621 = vset.pattern.permute.xlu0 %v11111_v40 }
 0x61d   : > { %4468 = vperm.xlu0 %5621, %v10197_v5  }
 0x61f   : > { %5607 = vset.pattern.permute.xlu1 %v11108_v7 }
 0x620   : > { %4536 = vperm.xlu1 %5607, %v10163_v13  }
 0x621   : > { %5623 = vset.pattern.permute.xlu0 %v11109_v60 }
 0x622   : > { %4648 = vperm.xlu0 %5623, %v10197_v5  }
 0x624   : > { %5609 = vset.pattern.permute.xlu1 %v11110_v4 }
 0x625   : > { %4728 = vperm.xlu1 %5609, %v10163_v13  }
 0x626   : > { %5625 = vset.pattern.permute.xlu0 %v11111_v40 }
 0x627   : > { %4458 = vperm.xlu0 %5625, %v10208_v50  }
 0x629   : > { %5610 = vset.pattern.permute.xlu1 %v11111_v40 }
 0x62a   : > { %4438 = vperm.xlu1 %5610, %v10170_v44  }
 0x62b   : > { %5627 = vset.pattern.permute.xlu0 %v11109_v60 }
 0x62c   : > { %4640 = vperm.xlu0 %5627, %v10208_v50  }
 0x62e   : > { %5611 = vset.pattern.permute.xlu1 %v11108_v7 }
 0x62f   : > { %4528 = vperm.xlu1 %5611, %v10170_v44  }
 0x630   : > { %5630 = vset.pattern.permute.xlu0 %v11108_v7 }
 0x631   : > { %4564 = vperm.xlu0 %5630, %v10219_v12  }
 0x633   : > { %5612 = vset.pattern.permute.xlu1 %v11110_v4 }
 0x634   : > { %4720 = vperm.xlu1 %5612, %v10170_v44  }
 0x635   : > { %5632 = vset.pattern.permute.xlu0 %v11110_v4 }
 0x636   : > { %4756 = vperm.xlu0 %5632, %v10219_v12  }
 0x638   : > { %5613 = vset.pattern.permute.xlu1 %v11111_v40 }
 0x639   : > { %4463 = vperm.xlu1 %5613, %v10175_v34  }
 0x63a   : > { %5634 = vset.pattern.permute.xlu0 %v11108_v7 }
 0x63b   : > { %4556 = vperm.xlu0 %5634, %v10230_v10  }
 0x63d   : > { %5615 = vset.pattern.permute.xlu1 %v11109_v60 }
 0x63e   : > { %4644 = vperm.xlu1 %5615, %v10175_v34  }
 0x63f   : > { %5636 = vset.pattern.permute.xlu0 %v11110_v4 }
 0x640   : > { %4748 = vperm.xlu0 %5636, %v10230_v10  }
 0x642   : > { %5617 = vset.pattern.permute.xlu1 %v11111_v40 }
 0x643   : > { %4453 = vperm.xlu1 %5617, %v10186_v6  }
 0x644   : > { %5637 = vset.pattern.permute.xlu0 %v11111_v40 }
 0x645   : > { %4488 = vperm.xlu0 %5637, %v10241_v11  }
 0x647   : > { %5619 = vset.pattern.permute.xlu1 %v11109_v60 }
 0x648   : > { %4636 = vperm.xlu1 %5619, %v10186_v6  }
 0x649   : > { %5639 = vset.pattern.permute.xlu0 %v11109_v60 }
 0x64a   : > { %4664 = vperm.xlu0 %5639, %v10241_v11  }
 0x64c   : > { %5622 = vset.pattern.permute.xlu1 %v11108_v7 }
 0x64d   : > { %4552 = vperm.xlu1 %5622, %v10197_v5  }
 0x64e   : > { %5640 = vset.pattern.permute.xlu0 %v11111_v40 }
 0x64f   : > { %4478 = vperm.xlu0 %5640, %v10252_v53   ;;  %v4424_v19 = vpop.permute.xlu1 %4423 }
 0x650   : > { %v4493_v20 = vmul.f32 %v4424_v19, %v11114_v62 }
 0x651   : > { %5624 = vset.pattern.permute.xlu1 %v11110_v4 }
 0x652   : > { %4744 = vperm.xlu1 %5624, %v10197_v5  }
 0x653   : > { %v4414_v47 = vpop.permute.xlu0 %4413  ;;  %5641 = vset.pattern.permute.xlu0 %v11109_v60 }
 0x654   : > { %4656 = vperm.xlu0 %5641, %v10252_v53   ;;  %v4517_v57 = vpop.permute.xlu1 %4516  ;;  %v4491_v41 = vmul.f32 %v4414_v47, %v11120_v46 }
 0x655   : > { %v4573_v26 = vmul.f32 %v4517_v57, %v11112_v17  ;;  %v11129_v17 = vld [vmem:[#allocation13_spill] sm:$0xff] }
 0x656   : > { %5626 = vset.pattern.permute.xlu1 %v11108_v7 }
 0x657   : > { %4544 = vperm.xlu1 %5626, %v10208_v50   ;;  %v4589_v22 = vadd.f32 %v4573_v26, %v4493_v20  ;;  %v11130_v26 = vmax.f32 %v11129_v17, 0.0  ;;  %v11131_v20 = vld [vmem:[#allocation46_spill] sm:$0xff] }
 0x658   : > { %v4605_v28 = vpop.permute.xlu0 %4604  ;;  %v11132_v61 = vmax.f32 %v11131_v20, 0.0 }
 0x659   : > { %v4613_v48 = vpop.permute.xlu1 %4612  ;;  %v4667_v52 = vmul.f32 %v4605_v28, %v11124_v8 }
 0x65a   : > { %v4669_v0 = vmul.f32 %v4613_v48, %v11116_v30  ;;  %v11133_v30 = vld [vmem:[#allocation18_spill] sm:$0xff] }
 0x65b   : > { %5628 = vset.pattern.permute.xlu1 %v11110_v4 }
 0x65c   : > { %v4617_v14 = vpop.permute.xlu0 %4616  ;;  %4736 = vperm.xlu1 %5628, %v10208_v50   ;;  %v4685_v2 = vadd.f32 %v4669_v0, %v4589_v22  ;;  %v11134_v0 = vmax.f32 %v11133_v30, 0.0  ;;  %v11151_v30 = vld [vmem:[#allocation41_spill] sm:$0xff] }
 0x65e   : > { %v4709_v58 = vpop.permute.xlu1 %4708 }
 0x65f   : > { %v4765_v3 = vmul.f32 %v4709_v58, %v11118_v59 }
 0x660   : > { %5629 = vset.pattern.permute.xlu1 %v11111_v40 }
 0x661   : > { %v4781_v56 = vadd.f32 %v4765_v3, %v4685_v2  ;;  %v4513_v37 = vpop.permute.xlu0 %4512  ;;  %4483 = vperm.xlu1 %5629, %v10219_v12   ;;  %v11135_v2 = vld [vmem:[#allocation24_spill] sm:$0xff] }
 0x662   : > { %v11136_v16 = vmax.f32 %v11135_v2, 0.0 }
 0x663   : > { %4815 = vrot.lane.b32.xlu0 %v4781_v56, %s5871_s24  ;;  %v4509_v32 = vpop.permute.xlu1 %4508  ;;  %v11137_v56 = vld [vmem:[#allocation6_spill] sm:$0xff] }
 0x664   : > { %v4571_v9 = vmul.f32 %v4509_v32, %v11122_v27  ;;  %v4572_v59 = vmul.f32 %v4513_v37, %v11136_v16  ;;  %v11138_v32 = vmax.f32 %v11137_v56, 0.0  ;;  %v11140_v27 = vmax.f32 %v11139_v42, 0.0  ;;  %v11157_v42 = vld [vmem:[#allocation58_spill] sm:$0xff] }
 0x665   : > { %5631 = vset.pattern.permute.xlu1 %v11109_v60 }
 0x666   : > { %v4587_v39 = vadd.f32 %v4571_v9, %v4491_v41  ;;  %v4705_v54 = vpop.permute.xlu0 %4704  ;;  %4660 = vperm.xlu1 %5631, %v10219_v12  }
 0x668   : > { %v4683_v43 = vadd.f32 %v4667_v52, %v4587_v39  ;;  %v4701_v63 = vpop.permute.xlu1 %4700  ;;  %v11141_v52 = vld [vmem:[#allocation27_spill] sm:$0xff] }
 0x669   : > { %v4763_v36 = vmul.f32 %v4701_v63, %v11126_v51  ;;  %v11142_v39 = vmax.f32 %v11141_v52, 0.0  ;;  %v11144_v51 = vmax.f32 %v11143_v24, 0.0 }
 0x66a   : > { %5633 = vset.pattern.permute.xlu1 %v11111_v40  ;;  %v11127_v40 = vld [vmem:[#allocation25_spill] sm:$0xff] }
 0x66b   : > { %v4779_v15 = vadd.f32 %v4763_v36, %v4683_v43  ;;  %v4533_v1 = vpop.permute.xlu0 %4532  ;;  %4473 = vperm.xlu1 %5633, %v10230_v10   ;;  %v11128_v57 = vmax.f32 %v11127_v40, 0.0  ;;  %v4764_v43 = vmul.f32 %v4705_v54, %v11142_v39  ;;  %v11149_v54 = vld [vmem:[#allocation19_spill] sm:$0xff] }
 0x66d   : > { %4811 = vrot.lane.b32.xlu0 %v4779_v15, %s5871_s24  ;;  %v4429_v21 = vpop.permute.xlu1 %4428 }
 0x66e   : > { %v4494_v48 = vmul.f32 %v4429_v21, %v11130_v26  ;;  %v11145_v21 = vld [vmem:[#allocation14_spill] sm:$0xff] }
 0x66f   : > { %5635 = vset.pattern.permute.xlu1 %v11109_v60 }
 0x670   : > { %v4725_v31 = vpop.permute.xlu0 %4724  ;;  %4652 = vperm.xlu1 %5635, %v10230_v10  }
 0x672   : > { %v4521_v45 = vpop.permute.xlu1 %4520 }
 0x673   : > { %v4574_v28 = vmul.f32 %v4521_v45, %v11128_v57  ;;  %v11146_v45 = vmax.f32 %v11145_v21, 0.0  ;;  %v11163_v21 = vld [vmem:[#allocation49_spill] sm:$0xff] }
 0x674   : > { %5638 = vset.pattern.permute.xlu1 %v11108_v7  ;;  %v4670_v7 = vmul.f32 %v4617_v14, %v11132_v61 }
 0x675   : > { %v4525_v19 = vpop.permute.xlu0 %4524  ;;  %4568 = vperm.xlu1 %5638, %v10241_v11   ;;  %v4590_v60 = vadd.f32 %v4574_v28, %v4494_v48  ;;  %v11147_v28 = vld [vmem:[#allocation48_spill] sm:$0xff] }
 0x676   : > { %v11148_v17 = vmax.f32 %v11147_v28, 0.0  ;;  %v11165_v28 = vld [vmem:[#allocation57_spill] sm:$0xff] }
 0x677   : > { %v4713_v47 = vpop.permute.xlu1 %4712  ;;  %v4686_v3 = vadd.f32 %v4670_v7, %v4590_v60  ;;  %v11150_v60 = vmax.f32 %v11149_v54, 0.0 }
 0x678   : > { %v4766_v18 = vmul.f32 %v4713_v47, %v11138_v32  ;;  %v4577_v47 = vmul.f32 %v4533_v1, %v11146_v45  ;;  %v11153_v1 = vld [vmem:[#allocation5_spill] sm:$0xff]  ;;  %v11164_v45 = vmax.f32 %v11163_v21, 0.0 }
 0x679   : > { %4560 = vperm.xlu1 %5638, %v10252_v53   ;;  %v11154_v16 = vmax.f32 %v11153_v1, 0.0  ;;  %v11155_v32 = vld [vmem:[#allocation53_spill] sm:$0xff] }
 0x67a   : > { %v4717_v55 = vpop.permute.xlu0 %4716  ;;  %v4782_v23 = vadd.f32 %v4766_v18, %v4686_v3  ;;  %v11156_v18 = vmax.f32 %v11155_v32, 0.0 }
 0x67c   : > { %v4419_v62 = vpop.permute.xlu1 %4418 }
 0x67d   : > { %5642 = vset.pattern.permute.xlu1 %v11110_v4  ;;  %v4492_v22 = vmul.f32 %v4419_v62, %v11134_v0  ;;  %v4769_v62 = vmul.f32 %v4725_v31, %v11150_v60  ;;  %v11152_v0 = vmax.f32 %v11151_v30, 0.0  ;;  %v11158_v31 = vmax.f32 %v11157_v42, 0.0  ;;  %v11173_v42 = vld [vmem:[#allocation59_spill] sm:$0xff] }
 0x67e   : > { %4752 = vperm.xlu1 %5642, %v10252_v53  }
 0x67f   : > { %v4633_v58 = vpop.permute.xlu0 %4632  ;;  %v4588_v41 = vadd.f32 %v4572_v59, %v4492_v22  ;;  %v4575_v59 = vmul.f32 %v4525_v19, %v11154_v16  ;;  %v11161_v19 = vld [vmem:[#allocation22_spill] sm:$0xff] }
 0x680   : > { %v11162_v24 = vmax.f32 %v11161_v19, 0.0  ;;  %v11177_v19 = vld [vmem:[#allocation30_spill] sm:$0xff] }
 0x681   : > { %v4609_v46 = vpop.permute.xlu1 %4608 }
 0x682   : > { %v4668_v9 = vmul.f32 %v4609_v46, %v11140_v27  ;;  %4760 = vperm.xlu1 %5642, %v10241_v11   ;;  %v4767_v27 = vmul.f32 %v4717_v55, %v11158_v31  ;;  %v11174_v31 = vmax.f32 %v11173_v42, 0.0 }
 0x683   : > { %v4625_v14 = vpop.permute.xlu0 %4624 }
 0x684   : > { %v4684_v8 = vadd.f32 %v4668_v9, %v4588_v41 }
 0x686   : > { %4817 = vrot.lane.b32.xlu1 %v4782_v23, %s5871_s24  ;;  %v4444_v37 = vpop.permute.xlu1 %4443  ;;  %v4780_v63 = vadd.f32 %v4764_v43, %v4684_v8  ;;  %v11159_v43 = vld [vmem:[#allocation40_spill] sm:$0xff] }
 0x687   : > { %v4497_v36 = vmul.f32 %v4444_v37, %v11144_v51  ;;  %v11160_v37 = vmax.f32 %v11159_v43, 0.0 }
 0x688   : > { %v4549_v15 = vpop.permute.xlu0 %4548 }
 0x689   : > { %v4593_v57 = vadd.f32 %v4577_v47, %v4497_v36  ;;  %v4674_v47 = vmul.f32 %v4633_v58, %v11164_v45  ;;  %v11179_v45 = vld [vmem:[#allocation55_spill] sm:$0xff] }
 0x68a   : > { %4813 = vrot.lane.b32.xlu1 %v4780_v63, %s5871_s24 }
 0x68b   : > { %v4629_v40 = vpop.permute.xlu1 %4628 }
 0x68c   : > { %v4673_v26 = vmul.f32 %v4629_v40, %v11148_v17  ;;  %v11166_v17 = vmax.f32 %v11165_v28, 0.0 }
 0x68d   : > { %v4741_v48 = vpop.permute.xlu0 %4740 }
 0x68e   : > { %v4689_v20 = vadd.f32 %v4673_v26, %v4593_v57 }
 0x690   : > { %v4785_v61 = vadd.f32 %v4769_v62, %v4689_v20  ;;  %v4434_v7 = vpop.permute.xlu1 %4433 }
 0x691   : > { %v4495_v22 = vmul.f32 %v4434_v7, %v11152_v0  ;;  %v11167_v7 = vld [vmem:[#allocation29_spill] sm:$0xff] }
 0x692   : > { %v4541_v2 = vpop.permute.xlu0 %4540  ;;  %4823 = vrot.lane.b32.xlu0 %v4785_v61, %s5871_s24  ;;  %v11168_v30 = vmax.f32 %v11167_v7, 0.0 }
 0x693   : > { %v4591_v56 = vadd.f32 %v4575_v59, %v4495_v22  ;;  %v11169_v22 = vld [vmem:[#allocation9_spill] sm:$0xff]  ;;  %v11171_v59 = vld [vmem:[#allocation54_spill] sm:$0xff] }
 0x694   : > { %v11170_v1 = vmax.f32 %v11169_v22, 0.0 }
 0x695   : > { %v4621_v3 = vpop.permute.xlu1 %4620 }
 0x696   : > { %v4671_v46 = vmul.f32 %v4621_v3, %v11156_v18  ;;  %v11172_v3 = vmax.f32 %v11171_v59, 0.0 }
 0x697   : > { %v4733_v41 = vpop.permute.xlu0 %4732 }
 0x698   : > { %v4687_v9 = vadd.f32 %v4671_v46, %v4591_v56  ;;  %v4672_v56 = vmul.f32 %v4625_v14, %v11172_v3  ;;  %v11187_v3 = vld [vmem:[#allocation21_spill] sm:$0xff] }
 0x69a   : > { %v4783_v23 = vadd.f32 %v4767_v27, %v4687_v9  ;;  %v4449_v8 = vpop.permute.xlu1 %4448 }
 0x69b   : > { %v4498_v63 = vmul.f32 %v4449_v8, %v11160_v37 }
 0x69c   : > { %v4469_v52 = vpop.permute.xlu0 %4468  ;;  %4819 = vrot.lane.b32.xlu0 %v4783_v23, %s5871_s24 }
 0x69f   : > { %v4537_v39 = vpop.permute.xlu1 %4536 }
 0x6a0   : > { %v4578_v51 = vmul.f32 %v4537_v39, %v11162_v24  ;;  %v11175_v39 = vld [vmem:[#allocation34_spill] sm:$0xff]  ;;  %v11178_v24 = vmax.f32 %v11177_v19, 0.0 }
 0x6a1   : > { %v4649_v36 = vpop.permute.xlu0 %4648  ;;  %v11176_v43 = vmax.f32 %v11175_v39, 0.0 }
 0x6a2   : > { %v4594_v40 = vadd.f32 %v4578_v51, %v4498_v63  ;;  %v4581_v51 = vmul.f32 %v4549_v15, %v11178_v24  ;;  %v11185_v15 = vld [vmem:[#allocation16_spill] sm:$0xff] }
 0x6a3   : > { %v11186_v22 = vmax.f32 %v11185_v15, 0.0 }
 0x6a4   : > { %v4690_v57 = vadd.f32 %v4674_v47, %v4594_v40  ;;  %v4729_v55 = vpop.permute.xlu1 %4728  ;;  %v11180_v47 = vmax.f32 %v11179_v45, 0.0 }
 0x6a5   : > { %v4770_v26 = vmul.f32 %v4729_v55, %v11166_v17  ;;  %v11181_v55 = vld [vmem:[#allocation60_spill] sm:$0xff] }
 0x6a6   : > { %v4459_v54 = vpop.permute.xlu0 %4458  ;;  %v11182_v28 = vmax.f32 %v11181_v55, 0.0  ;;  %v11197_v55 = vld [vmem:[#allocation61_spill] sm:$0xff] }
 0x6a7   : > { %v4786_v60 = vadd.f32 %v4770_v26, %v4690_v57 }
 0x6a8   : > { %v4773_v17 = vmul.f32 %v4741_v48, %v11182_v28  ;;  %v11189_v48 = vld [vmem:[#allocation62_spill] sm:$0xff] }
 0x6a9   : > { %4825 = vrot.lane.b32.xlu1 %v4786_v60, %s5871_s24  ;;  %v4439_v62 = vpop.permute.xlu1 %4438 }
 0x6aa   : > { %v4496_v0 = vmul.f32 %v4439_v62, %v11168_v30 }
 0x6ab   : > { %v4641_v20 = vpop.permute.xlu0 %4640 }
 0x6ae   : > { %v4529_v61 = vpop.permute.xlu1 %4528 }
 0x6af   : > { %v4576_v16 = vmul.f32 %v4529_v61, %v11170_v1  ;;  %v11183_v61 = vld [vmem:[#allocation39_spill] sm:$0xff]  ;;  %v4579_v1 = vmul.f32 %v4541_v2, %v11186_v22  ;;  %v11203_v22 = vld [vmem:[#allocation20_spill] sm:$0xff] }
 0x6b0   : > { %v4565_v58 = vpop.permute.xlu0 %4564  ;;  %v11184_v7 = vmax.f32 %v11183_v61, 0.0  ;;  %v11201_v61 = vld [vmem:[#allocation28_spill] sm:$0xff] }
 0x6b1   : > { %v4592_v32 = vadd.f32 %v4576_v16, %v4496_v0 }
 0x6b3   : > { %v4688_v18 = vadd.f32 %v4672_v56, %v4592_v32  ;;  %v4721_v46 = vpop.permute.xlu1 %4720  ;;  %v11188_v56 = vmax.f32 %v11187_v3, 0.0 }
 0x6b4   : > { %v4768_v27 = vmul.f32 %v4721_v46, %v11174_v31  ;;  %v11190_v46 = vmax.f32 %v11189_v48, 0.0 }
 0x6b5   : > { %v4757_v9 = vpop.permute.xlu0 %4756 }
 0x6b6   : > { %v4784_v23 = vadd.f32 %v4768_v27, %v4688_v18  ;;  %v4771_v42 = vmul.f32 %v4733_v41, %v11190_v46  ;;  %v11198_v41 = vmax.f32 %v11197_v55, 0.0 }
 0x6b8   : > { %4821 = vrot.lane.b32.xlu1 %v4784_v23, %s5871_s24  ;;  %v4464_v8 = vpop.permute.xlu1 %4463 }
 0x6b9   : > { %v4501_v37 = vmul.f32 %v4464_v8, %v11176_v43  ;;  %v11191_v8 = vld [vmem:[#allocation36_spill] sm:$0xff] }
 0x6ba   : > { %v4557_v63 = vpop.permute.xlu0 %4556  ;;  %v11192_v39 = vmax.f32 %v11191_v8, 0.0 }
 0x6bb   : > { %v4597_v14 = vadd.f32 %v4581_v51, %v4501_v37  ;;  %v11193_v37 = vld [vmem:[#allocation33_spill] sm:$0xff]  ;;  %v11195_v51 = vld [vmem:[#allocation11_spill] sm:$0xff] }
 0x6bc   : > { %v4502_v43 = vmul.f32 %v4469_v52, %v11192_v39  ;;  %v11194_v19 = vmax.f32 %v11193_v37, 0.0  ;;  %v11209_v39 = vld [vmem:[#allocation32_spill] sm:$0xff] }
 0x6bd   : > { %v4645_v21 = vpop.permute.xlu1 %4644 }
 0x6be   : > { %v4677_v40 = vmul.f32 %v4645_v21, %v11180_v47  ;;  %v11196_v21 = vmax.f32 %v11195_v51, 0.0 }
 0x6bf   : > { %v4749_v57 = vpop.permute.xlu0 %4748 }
 0x6c0   : > { %v4693_v26 = vadd.f32 %v4677_v40, %v4597_v14  ;;  %v4678_v14 = vmul.f32 %v4649_v36, %v11196_v21 }
 0x6c2   : > { %v4789_v60 = vadd.f32 %v4773_v17, %v4693_v26  ;;  %v4454_v62 = vpop.permute.xlu1 %4453 }
 0x6c3   : > { %v4499_v30 = vmul.f32 %v4454_v62, %v11184_v7  ;;  %v11202_v7 = vmax.f32 %v11201_v61, 0.0 }
 0x6c4   : > { %v10361_v0 = vpop.permute.xlu0 %4488  ;;  %4831 = vrot.lane.b32.xlu0 %v4789_v60, %s5871_s24  ;;  %v11199_v60 = vld [vmem:[#allocation56_spill] sm:$0xff] }
 0x6c5   : > { %v4595_v59 = vadd.f32 %v4579_v1, %v4499_v30  ;;  %v11200_v36 = vmax.f32 %v11199_v60, 0.0  ;;  %v11204_v1 = vmax.f32 %v11203_v22, 0.0  ;;  %v11217_v60 = vld [vmem:[#allocation35_spill] sm:$0xff]  ;;  %v11221_v22 = vld [vmem:[#allocation66_spill] sm:$0xff] }
 0x6c7   : > { %v4637_v16 = vpop.permute.xlu1 %4636  ;;  %v4500_v62 = vmul.f32 %v4459_v54, %v11200_v36  ;;  %v11218_v36 = vmax.f32 %v11217_v60, 0.0 }
 0x6c8   : > { %v4675_v32 = vmul.f32 %v4637_v16, %v11188_v56  ;;  %v4676_v16 = vmul.f32 %v4641_v20, %v11204_v1  ;;  %v11222_v1 = vmax.f32 %v11221_v22, 0.0 }
 0x6c9   : > { %v10368_v18 = vpop.permute.xlu0 %4664 }
 0x6ca   : > { %v4691_v31 = vadd.f32 %v4675_v32, %v4595_v59  ;;  %v11205_v32 = vld [vmem:[#allocation63_spill] sm:$0xff] }
 0x6cb   : > { %v11206_v48 = vmax.f32 %v11205_v32, 0.0  ;;  %v11223_v32 = vld [vmem:[#allocation52_spill] sm:$0xff] }
 0x6cc   : > { %v4787_v27 = vadd.f32 %v4771_v42, %v4691_v31  ;;  %v4553_v23 = vpop.permute.xlu1 %4552 }
 0x6cd   : > { %v4582_v2 = vmul.f32 %v4553_v23, %v11194_v19 }
 0x6ce   : > { %v4479_v24 = vpop.permute.xlu0 %4478  ;;  %4827 = vrot.lane.b32.xlu0 %v4787_v27, %s5871_s24  ;;  %v11207_v27 = vld [vmem:[#allocation45_spill] sm:$0xff] }
 0x6cf   : > { %v4598_v45 = vadd.f32 %v4582_v2, %v4502_v43  ;;  %v11208_v23 = vmax.f32 %v11207_v27, 0.0  ;;  %v11210_v43 = vmax.f32 %v11209_v39, 0.0  ;;  %v11211_v2 = vld [vmem:[#allocation38_spill] sm:$0xff] }
 0x6d0   : > { %v11212_v51 = vmax.f32 %v11211_v2, 0.0 }
 0x6d1   : > { %v4694_v47 = vadd.f32 %v4678_v14, %v4598_v45  ;;  %v4745_v40 = vpop.permute.xlu1 %4744  ;;  %v4585_v37 = vmul.f32 %v4565_v58, %v11210_v43  ;;  %v11213_v14 = vld [vmem:[#allocation64_spill] sm:$0xff] }
 0x6d2   : > { %v4774_v28 = vmul.f32 %v4745_v40, %v11198_v41  ;;  %v11214_v45 = vmax.f32 %v11213_v14, 0.0 }
 0x6d3   : > { %v4657_v17 = vpop.permute.xlu0 %4656 }
 0x6d4   : > { %v4790_v26 = vadd.f32 %v4774_v28, %v4694_v47  ;;  %v4777_v47 = vmul.f32 %v4757_v9, %v11214_v45  ;;  %v11215_v28 = vld [vmem:[#allocation50_spill] sm:$0xff] }
 0x6d6   : > { %4833 = vrot.lane.b32.xlu1 %v4790_v26, %s5871_s24  ;;  %v4545_v52 = vpop.permute.xlu1 %4544  ;;  %v11216_v26 = vmax.f32 %v11215_v28, 0.0 }
 0x6d7   : > { %v4580_v30 = vmul.f32 %v4545_v52, %v11202_v7  ;;  %v4816_v15 = vpop.permute.xlu0 %4815  ;;  %v11219_v7 = vld [vmem:[#allocation26_spill] sm:$0xff] }
 0x6d8   : > { %4861 = vst.msk [vmem:[%s10385_s16 + $0x10] sm:$0xff] %vm2216_vm8, %v4816_v15 }
 0x6d9   : > { %v4596_v59 = vadd.f32 %v4580_v30, %v4500_v62  ;;  %v4583_v62 = vmul.f32 %v4557_v63, %v11218_v36  ;;  %v11220_v30 = vmax.f32 %v11219_v7, 0.0 }
 0x6db   : > { %v4692_v3 = vadd.f32 %v4676_v16, %v4596_v59  ;;  %v4737_v56 = vpop.permute.xlu1 %4736  ;;  %v4775_v16 = vmul.f32 %v4749_v57, %v11222_v1 }
 0x6dc   : > { %v4772_v46 = vmul.f32 %v4737_v56, %v11206_v48  ;;  %v11224_v48 = vmax.f32 %v11223_v32, 0.0 }
 0x6de   : > { %v4788_v42 = vadd.f32 %v4772_v46, %v4692_v3  ;;  %v4504_v46 = vmul.f32 %v4479_v24, %v11224_v48 }
 0x6df   : > { %v4812_v31 = vpop.permute.xlu0 %4811 }
 0x6e0   : > { %4859 = vst.msk [vmem:[%s10385_s16] sm:$0xff] %vm2216_vm8, %v4812_v31  ;;  %4829 = vrot.lane.b32.xlu1 %v4788_v42, %s5871_s24  ;;  %v4484_v54 = vpop.permute.xlu1 %4483  ;;  %v11225_v42 = vld [vmem:[#allocation42_spill] sm:$0xff] }
 0x6e1   : > { %v4505_v8 = vmul.f32 %v4484_v54, %v11208_v23  ;;  %v11226_v31 = vmax.f32 %v11225_v42, 0.0  ;;  %v11227_v54 = vld [vmem:[#allocation8_spill] sm:$0xff] }
 0x6e2   : > { %v11228_v27 = vmax.f32 %v11227_v54, 0.0 }
 0x6e3   : > { %v4601_v19 = vadd.f32 %v4585_v37, %v4505_v8  ;;  %v11229_v8 = vld [vmem:[#allocation12_spill] sm:$0xff]  ;;  %v11231_v37 = vld [vmem:[#allocation47_spill] sm:$0xff] }
 0x6e4   : > { %v11230_v39 = vmax.f32 %v11229_v8, 0.0 }
 0x6e5   : > { %v4661_v20 = vpop.permute.xlu1 %4660 }
 0x6e6   : > { %v4681_v21 = vmul.f32 %v4661_v20, %v11212_v51  ;;  %v4680_v43 = vmul.f32 %v4657_v17, %v11230_v39  ;;  %v11232_v20 = vmax.f32 %v11231_v37, 0.0 }
 0x6e8   : > { %v4697_v40 = vadd.f32 %v4681_v21, %v4601_v19  ;;  %v4506_v19 = vmul.f32 %v10361_v0, %v11232_v20  ;;  %v11233_v21 = vld [vmem:[#allocation65_spill] sm:$0xff] }
 0x6e9   : > { %v11234_v14 = vmax.f32 %v11233_v21, 0.0 }
 0x6ea   : > { %v4793_v55 = vadd.f32 %v4777_v47, %v4697_v40  ;;  %v4474_v41 = vpop.permute.xlu1 %4473  ;;  %v11235_v47 = vld [vmem:[#allocation23_spill] sm:$0xff] }
 0x6eb   : > { %v4503_v52 = vmul.f32 %v4474_v41, %v11216_v26  ;;  %v11236_v40 = vmax.f32 %v11235_v47, 0.0  ;;  %v11237_v26 = vld [vmem:[#allocation67_spill] sm:$0xff] }
 0x6ec   : > { %4839 = vrot.lane.b32.xlu0 %v4793_v55, %s5871_s24 }
 0x6ed   : > { %v4599_v61 = vadd.f32 %v4583_v62, %v4503_v52  ;;  %v4682_v55 = vmul.f32 %v10368_v18, %v11236_v40  ;;  %v11238_v52 = vmax.f32 %v11237_v26, 0.0 }
 0x6ef   : > { %v4653_v58 = vpop.permute.xlu1 %4652 }
 0x6f0   : > { %v4679_v15 = vmul.f32 %v4653_v58, %v11220_v30 }
 0x6f2   : > { %v4695_v9 = vadd.f32 %v4679_v15, %v4599_v61 }
 0x6f4   : > { %v4791_v59 = vadd.f32 %v4775_v16, %v4695_v9  ;;  %v4569_v3 = vpop.permute.xlu1 %4568 }
 0x6f5   : > { %v4586_v23 = vmul.f32 %v4569_v3, %v11228_v27 }
 0x6f6   : > { %4835 = vrot.lane.b32.xlu0 %v4791_v59, %s5871_s24 }
 0x6f7   : > { %v4602_v24 = vadd.f32 %v4586_v23, %v4506_v19 }
 0x6f8   : > { %v4561_v56 = vpop.permute.xlu1 %4560 }
 0x6f9   : > { %v4584_v63 = vmul.f32 %v4561_v56, %v11226_v31  ;;  %v4698_v28 = vadd.f32 %v4682_v55, %v4602_v24 }
 0x6fb   : > { %v4600_v57 = vadd.f32 %v4584_v63, %v4504_v46 }
 0x6fd   : > { %v4696_v2 = vadd.f32 %v4680_v43, %v4600_v57  ;;  %v4753_v51 = vpop.permute.xlu1 %4752 }
 0x6fe   : > { %v4776_v45 = vmul.f32 %v4753_v51, %v11234_v14 }
 0x700   : > { %v4792_v41 = vadd.f32 %v4776_v45, %v4696_v2 }
 0x701   : > { %v4761_v17 = vpop.permute.xlu1 %4760 }
 0x702   : > { %v4778_v60 = vmul.f32 %v4761_v17, %v11238_v52  ;;  %4837 = vrot.lane.b32.xlu1 %v4792_v41, %s5871_s24 }
 0x704   : > { %v4794_v0 = vadd.f32 %v4778_v60, %v4698_v28  ;;  %v4824_v36 = vpop.permute.xlu0 %4823 }
 0x705   : > { %4865 = vst.msk [vmem:[%s10385_s16 + $0x30] sm:$0xff] %vm2216_vm8, %v4824_v36  ;;  %v4818_v62 = vpop.permute.xlu1 %4817 }
 0x706   : > { %4862 = vst.msk [vmem:[%s10385_s16 + $0x18] sm:$0xff] %vm2216_vm8, %v4818_v62  ;;  %4841 = vrot.lane.b32.xlu1 %v4794_v0, %s5871_s24  ;;  %s4914_s24 = scalar_lea.sflag [#allocation3], %s348_s22 }
 0x709   : > { %v4814_v18 = vpop.permute.xlu1 %4813 }
 0x70a   : > { %4860 = vst.msk [vmem:[%s10385_s16 + $0x8] sm:$0xff] %vm2216_vm8, %v4814_v18 }
 0x70e   : > { %v4820_v58 = vpop.permute.xlu0 %4819 }
 0x70f   : > { %4863 = vst.msk [vmem:[%s10385_s16 + $0x20] sm:$0xff] %vm2216_vm8, %v4820_v58 }
 0x714   : > { %4875 = vxpose.xlu0.b32.start [1/16] (narrow) %v10114_v38, 8 }
 0x718   : > { %4876 = vxpose.xlu0.b32.cont [2/16] (narrow) %v10130_v29, 8 }
 0x71b   : > { %v4826_v61 = vpop.permute.xlu1 %4825 }
 0x71c   : > { %4866 = vst.msk [vmem:[%s10385_s16 + $0x38] sm:$0xff] %vm2216_vm8, %v4826_v61  ;;  %4877 = vxpose.xlu0.b32.cont [3/16] (narrow) %v10110_v33, 8 }
 0x720   : > { %4878 = vxpose.xlu0.b32.cont [4/16] (narrow) %v10124_v25, 8 }
 0x724   : > { %4879 = vxpose.xlu0.b32.cont [5/16] (narrow) %v10152_v49, 8 }
 0x728   : > { %4880 = vxpose.xlu0.b32.cont [6/16] (narrow) %v10170_v44, 8 }
 0x72a   : > { %v4822_v7 = vpop.permute.xlu1 %4821 }
 0x72b   : > { %4864 = vst.msk [vmem:[%s10385_s16 + $0x28] sm:$0xff] %vm2216_vm8, %v4822_v7 }
 0x72c   : > { %4881 = vxpose.xlu0.b32.cont [7/16] (narrow) %v10141_v35, 8 }
 0x730   : > { %4882 = vxpose.xlu0.b32.cont [8/16] (narrow) %v10163_v13, 8 }
 0x734   : > { %4883 = vxpose.xlu0.b32.cont [9/16] (narrow) %v10186_v6, 8 }
 0x736   : > { %v4832_v38 = vpop.permute.xlu0 %4831 }
 0x737   : > { %4869 = vst.msk [vmem:[%s10385_s16 + $0x50] sm:$0xff] %vm2216_vm8, %v4832_v38 }
 0x738   : > { %4884 = vxpose.xlu0.b32.cont [10/16] (narrow) %v10208_v50, 8 }
 0x73c   : > { %4885 = vxpose.xlu0.b32.cont [11/16] (narrow) %v10175_v34, 8 }
 0x740   : > { %v4828_v33 = vpop.permute.xlu0 %4827  ;;  %4886 = vxpose.xlu0.b32.cont [12/16] (narrow) %v10197_v5, 8 }
 0x741   : > { %4867 = vst.msk [vmem:[%s10385_s16 + $0x40] sm:$0xff] %vm2216_vm8, %v4828_v33 }
 0x744   : > { %4887 = vxpose.xlu0.b32.cont [13/16] (narrow) %v10230_v10, 8 }
 0x748   : > { %4888 = vxpose.xlu0.b32.cont [14/16] (narrow) %v10252_v53, 8  ;;  %v4834_v25 = vpop.permute.xlu1 %4833 }
 0x749   : > { %4870 = vst.msk [vmem:[%s10385_s16 + $0x58] sm:$0xff] %vm2216_vm8, %v4834_v25 }
 0x74c   : > { %4889 = vxpose.xlu0.b32.cont [15/16] (narrow) %v10219_v12, 8 }
 0x750   : > { %4890 = vxpose.xlu0.b32.end [16/16] (narrow) %v10241_v11, 8 }
 0x752   : > { %v4830_v29 = vpop.permute.xlu1 %4829 }
 0x753   : > { %4868 = vst.msk [vmem:[%s10385_s16 + $0x48] sm:$0xff] %vm2216_vm8, %v4830_v29 }
 0x75e   : > { %v4840_v35 = vpop.permute.xlu0 %4839 }
 0x75f   : > { %4873 = vst.msk [vmem:[%s10385_s16 + $0x70] sm:$0xff] %vm2216_vm8, %v4840_v35 }
 0x768   : > { %v4836_v49 = vpop.permute.xlu0 %4835 }
 0x769   : > { %4871 = vst.msk [vmem:[%s10385_s16 + $0x60] sm:$0xff] %vm2216_vm8, %v4836_v49 }
 0x774   : > { %v4838_v13 = vpop.permute.xlu1 %4837 }
 0x775   : > { %4872 = vst.msk [vmem:[%s10385_s16 + $0x68] sm:$0xff] %vm2216_vm8, %v4838_v13 }
 0x778   : > { %v4842_v44 = vpop.permute.xlu1 %4841 }
 0x779   : > { %4874 = vst.msk [vmem:[%s10385_s16 + $0x78] sm:$0xff] %vm2216_vm8, %v4842_v44  ;;  %5643 = vset.pattern.permute.xlu0 %v11110_v4  ;;  %s5802_s16 = scalar_lea.vmem %s5801_s13, 128 }
 0x77a   : > { %p5804_p1 = scmp.lt.s32.totalorder %s5802_s16, %s5796_s25 }
 0x77c   : > { %p5805_p2 = por %p5804_p1, %p5803_p0 }
 0x77e   : > { %p5806_p3 = pnand %p5805_p2, %p5799_p13 }
 0x794   : > { %v4891_v34 = vpop.trf.xlu0 }
 0x795   : > { %4907 = vst [vmem:[%s350_s29] sm:$0xf] %v4891_v34 }
 0x796   : > { %5809 = shalt.err (!%p5806_p3)
}
 0x797   : > { %s5810_s22 = scalar_lea.hbm %s10491_s28, 64  ;;  %s5814_s17 = scalar_lea.hbm %s10540_s9, 128 }
 0x798   : > { %p5811_p4 = scmp.ne.s32.totalorder %s10491_s28, %s5810_s22  ;;  %p5815_p9 = scmp.lt.u32.totalorder %s10491_s28, %s10540_s9 }
 0x799   : > { %p5816_p10 = scmp.lt.u32.totalorder %s5814_s17, %s5810_s22  ;;  %p5818_p12 = scmp.lt.u32.totalorder %s5810_s22, %s10491_s28 }
 0x79a   : > { %p5812_p7 = pnand %p5811_p4, %p5961_p5 }
 0x79b   : > { %p5817_p11 = por %p5816_p10, %p5815_p9 }
 0x79c   : > { %p5813_p8 = pneg %p5812_p7 }
 0x79d   : > { %p5819_p13 = por %p5818_p12, %p5817_p11 }
 0x79f   : > { %p5820_p0 = pnand %p5819_p13, %p5813_p8 }
 0x7a1   : > { %5823 = shalt.err (!%p5820_p0)
}
 0x7a2   : > { %5364 = dma.vmem_to_hbm [thread:$0]  (%p5961_p5), %s10486_s14, 64, %s10491_s28, %s4914_s24  }
 0x7a3 PF: > { %p5370_p1 = scmp.ge.s32.totalorder %s5858_s12, 2  ;;  %s4951_s25 = sand.u32 1, %s5846_s30  }
 0x7a4   : > { %s4952_s26 = scalar_lea.sflag [#allocation3], %s4951_s25 }
 0x7a5   : > { %p5367_p2 = pnand %p5370_p1, %p5965_p6 }
 0x7a7   : > { %5841 = dma.done.wait (!%p5367_p2), %s4952_s26, 64  }
 0x7a8   : > { %5843 = vsyncadd (!%p5367_p2), %s4952_s26, 4294967232  ;;  %p20_p3 = scmp.ge.s32.totalorder %s5948_s15, 4   ;;  %s11239_s30 = smov %s5850_s10 }
 0x7a9   : > { %s11240_s10 = smov %s5854_s11  ;;  %s11241_s11 = smov %s5959_s18 }
 0x7aa   : > { %s11242_s12 = smov %s5948_s15  ;;  %22 = sbr.rel (!%p20_p3) target bundleno = 3 (0x3), region = 102 }
 0x7b1   :  { %4957 = vsyncpa [#allocation3], 1 }
 0x7b2   :  { %4959 = vsyncpa [#allocation3 + $0x1], 1 }

</bundles_post_ra>
